<compile_context>
chip_gen: v5e
topology: v5e:2x2
jax: 0.10.0
libtpu: 0.0.40
codegen_flags: <defaults>
</compile_context>

<pallas_src>
import functools

import jax
import jax.numpy as jnp
from jax import lax
from jax.experimental import pallas as pl
from jax.experimental.pallas import tpu as pltpu

F32 = jnp.float32
BF16 = jnp.bfloat16


# ------------------------------------ fused kernel ------------------------------------

def _decoder_kernel(x_ref, wslab_ref, bslab_ref,
                    fc4_ref, fc3_ref, fc2_ref, fc1_ref, fcb_ref,
                    out_ref, *, meta, out_lens, L0, C, W):
    """Whole decoder for one batch element.  Activations are (C, W=128) f32 values,
    zero beyond their logical length; weights are read from packed VMEM slabs."""
    col = lax.broadcasted_iota(jnp.int32, (C, W), 1)
    rr = lax.broadcasted_iota(jnp.int32, (W, W), 0)
    cc = lax.broadcasted_iota(jnp.int32, (W, W), 1)
    # Network-wide stride-2 gather / scatter matrices (built once, reused by every layer):
    #   (x @ G0)[:, o] = x[:, 2*o]          (x @ P0)[:, 2*i] = x[:, i]
    G0 = jnp.where(rr == 2 * cc, 1.0, 0.0)
    P0 = jnp.where(cc == 2 * rr, 1.0, 0.0)

    def mm(a, b):
        # bf16 x bf16 MXU matmul with f32 accumulation.
        return jnp.dot(a.astype(BF16), b.astype(BF16), preferred_element_type=F32)

    def lane_shift(v, s):
        # y[:, o] = v[:, o - s] for 0 <= o - s < W, else 0.   (XLU roll + VPU mask)
        if s == 0:
            return v
        r = pltpu.roll(v, s % W, axis=1)
        if s > 0:
            return jnp.where(col >= s, r, 0.0)
        return jnp.where(col < W + s, r, 0.0)

    def wmat(m):
        a = m["w_off"] * C
        return wslab_ref[:, a:a + m["K"] * C]          # (C, K*C) f32, taps stacked on lanes

    def bias(m):
        c = m["b_col"]
        return bslab_ref[:, c:c + 1]                    # (C, 1) f32

    def finish(acc, m, lout, relu):
        y = acc + bias(m)
        y = jnp.where(col < lout, y, 0.0)               # keep padded lanes exactly zero
        return (jnp.maximum(y, 0.0) if relu else y, lout)

    def conv(xL, m, relu=False):
        x, L = xL
        K, st, pad = m["K"], m["stride"], m["pad"]
        lout = (L + 2 * pad - K) // st + 1
        # stack all tap-shifted inputs -> one (C, K*C) @ (K*C, W) matmul
        xs = jnp.concatenate([lane_shift(x, -(k - pad)) for k in range(K)], axis=0)
        if st == 2:
            xs = mm(xs, G0)                             # single shared stride-2 gather push
        return finish(mm(wmat(m), xs), m, lout, relu)

    def convt(xL, m, relu=False, out_len=None):
        x, L = xL
        K, st, pad = m["K"], m["stride"], m["pad"]
        default = (L - 1) * st + K - 2 * pad
        lout = default if out_len is None else out_len
        assert 0 <= lout - default < max(st, 1), "invalid output_size for conv_transpose"
        base = mm(x, P0) if st == 2 else x              # single shared stride-2 scatter push
        xs = jnp.concatenate([lane_shift(base, k - pad) for k in range(K)], axis=0)
        return finish(mm(wmat(m), xs), m, lout, relu)

    def gdn(xL, m):
        # TODO(synk): GDN undefined in reference; non-inverse form y = x / sqrt(beta + gamma @ x^2),
        # kept fully in f32 (normalisation path).
        x, L = xL
        gamma = bslab_ref[:, m["g_col"]:m["g_col"] + C]
        beta = bslab_ref[:, m["b_col"]:m["b_col"] + 1]
        z = jnp.dot(gamma, x * x, preferred_element_type=F32) + beta
        return (x * lax.rsqrt(jnp.maximum(z, 1e-9)), L)

    def block(xL, m):
        # TODO(synk): `Block` undefined in reference; vanilla residual block x + conv3(relu(conv3(x))).
        h, _ = conv(conv(xL, m["c1"], relu=True), m["c2"], relu=False)
        return (xL[0] + h, xL[1])

    def rab(xL, m):
        # TODO(synk): RAB1D undefined in reference; x + trunk(x) * mask(x), no sigmoid; any
        # trunk/mask length mismatch is absorbed by the zero-padded 128-lane layout.
        h = block(block(xL, m["rb1"]), m["rb2"])
        d = conv(xL, m["down"][0], relu=True)
        d = conv(d, m["down"][1], relu=True)
        d = conv(d, m["down"][2], relu=False)
        d = block(d, m["rb3"])
        u = convt(d, m["up"][0], relu=True)
        u = convt(u, m["up"][1], relu=True)
        u = convt(u, m["up"][2], relu=False)
        u = conv(u, m["c1x1"], relu=False)
        return (xL[0] + h[0] * u[0], xL[1])

    xL = (x_ref[0], L0)                                 # (C, 128) lane-dense, zero-padded
    xL = convt(xL, meta["conv10"], out_len=out_lens["conv10"])
    xL = block(xL, meta["rb10a"])
    xL = block(xL, meta["rb10b"])
    xL = rab(xL, meta["rnab9"])
    xL = convt(xL, meta["conv8"], out_len=out_lens["conv8"])
    xL = gdn(xL, meta["gdn7"])
    xL = convt(xL, meta["conv6"], out_len=out_lens["conv6"])
    xL = rab(xL, meta["rnab5"])
    xL = gdn(xL, meta["gdn4"])
    xL = convt(xL, meta["conv3"], out_len=out_lens["conv3"])
    xL = gdn(xL, meta["gdn2"])
    xL = convt(xL, meta["conv1"], out_len=out_lens["conv1"])
    x, L = xL
    assert L == W, "conv1 output length must equal fc4 in_features (128)"

    # fc4..fc1 stack; weights pre-transposed to (in, out) and stored bf16.
    h = x[0:1, :]                                       # conv1 has one output channel (row 0)
    off = 0
    for w_ref in (fc4_ref, fc3_ref, fc2_ref, fc1_ref):
        nout = w_ref.shape[1]
        h = mm(h, w_ref[...]) + fcb_ref[:, off:off + nout]
        off += nout
    out_ref[0] = h.astype(out_ref.dtype)


# -------------------------------------- wrapper --------------------------------------

def tucodec_decode_forward(slabs, x, x1, x3, x6, x8, x10, *, meta):
    W = 128
    N, C, L0 = x.shape
    cluster = slabs["fc1w"].shape[1]
    out_lens = dict(conv10=x10.shape[-1], conv8=x8.shape[-1], conv6=x6.shape[-1],
                    conv3=x3.shape[-1], conv1=x1.shape[-1])
    assert out_lens["conv1"] == W, "conv1 output must have length 128 (fc4 in_features)"
    assert L0 <= W and max(out_lens.values()) <= W, "fixed 128-lane layout"

    # Zero-pad the input to the fixed 128-lane working width (lane-dense activations).
    xp = jnp.zeros((N, C, W), jnp.float32).at[:, :, :L0].set(x.astype(jnp.float32))

    kernel = functools.partial(_decoder_kernel, meta=meta, out_lens=out_lens,
                               L0=L0, C=C, W=W)

    def full_spec(a):
        nd = a.ndim
        return pl.BlockSpec(a.shape, lambda b, nd=nd: (0,) * nd)

    in_arrays = (xp, slabs["wslab"], slabs["bslab"], slabs["fc4w"], slabs["fc3w"],
                 slabs["fc2w"], slabs["fc1w"], slabs["fcb"])
    in_specs = [pl.BlockSpec((1, C, W), lambda b: (b, 0, 0))]
    in_specs += [full_spec(a) for a in in_arrays[1:]]
    out_spec = pl.BlockSpec((1, 1, cluster), lambda b: (b, 0, 0))

    weight_bytes = sum(int(a.size) * a.dtype.itemsize for a in in_arrays[1:])
    cost = pl.CostEstimate(flops=int(N * 16_000_000), transcendentals=int(N * 4_000),
                           bytes_accessed=int(4 * xp.size + 4 * N * cluster + weight_bytes))

    return pl.pallas_call(
        kernel,
        out_shape=jax.ShapeDtypeStruct((N, 1, cluster), jnp.float32),
        grid=(N,),
        in_specs=in_specs,
        out_specs=out_spec,
        compiler_params=pltpu.CompilerParams(
            dimension_semantics=("parallel",),            # splits the batch across TCs on v7x
            vmem_limit_bytes=32 * 1024 * 1024),
        cost_estimate=cost,
    )(*in_arrays)


# ----------------------------- packed parameter construction -----------------------------

def init_model(key, Cstd, cluster_input_size):
    """Random weights in PyTorch layouts, packed host-side into a few lane-dense slabs,
    plus a static metadata tree of slab offsets / conv hyper-parameters."""
    C = Cstd
    keys = iter(jax.random.split(key, 256))

    def nx(shape, scale=0.1):
        return scale * jax.random.normal(next(keys), shape, dtype=jnp.float32)

    wmats, bcols = [], []

    def _add_taps(taps):
        off = len(wmats)
        wmats.extend(taps)
        return off

    def _add_bcol(col):
        i = len(bcols)
        bcols.append(col)
        return i

    def conv_m(cout, cin, K, stride, pad):
        w = nx((cout, cin, K))                                  # PyTorch Conv1d layout
        taps = [jnp.zeros((C, C), jnp.float32).at[:cout, :cin].set(w[:, :, k])
                for k in range(K)]
        b = jnp.zeros((C,), jnp.float32).at[:cout].set(nx((cout,)))
        return dict(w_off=_add_taps(taps), K=K, stride=stride, pad=pad, b_col=_add_bcol(b))

    def convT_m(cin, cout, K, stride, pad):
        w = nx((cin, cout, K))                                  # PyTorch ConvTranspose1d layout
        taps = [jnp.zeros((C, C), jnp.float32).at[:cout, :cin].set(w[:, :, k].T)
                for k in range(K)]
        b = jnp.zeros((C,), jnp.float32).at[:cout].set(nx((cout,)))
        return dict(w_off=_add_taps(taps), K=K, stride=stride, pad=pad, b_col=_add_bcol(b))

    def gdn_m():
        gamma = 0.1 * jnp.eye(C, dtype=jnp.float32) + 0.01
        g_col = len(bcols)
        for j in range(C):
            bcols.append(gamma[:, j])
        return dict(g_col=g_col, b_col=_add_bcol(jnp.ones((C,), jnp.float32)))

    def block_m():
        return dict(c1=conv_m(C, C, 3, 1, 1), c2=conv_m(C, C, 3, 1, 1))

    meta = {}
    meta["conv10"] = convT_m(C, C, 2, 2, 0)
    meta["rb10a"] = block_m()
    meta["rb10b"] = block_m()
    meta["rnab9"] = dict(
        rb1=block_m(), rb2=block_m(), rb3=block_m(),
        down=[conv_m(C, C, 2, 1, 0), conv_m(C, C, 3, 2, 0), conv_m(C, C, 2, 1, 0)],
        up=[convT_m(C, C, 2, 1, 0), convT_m(C, C, 3, 2, 0), convT_m(C, C, 2, 1, 0)],
        c1x1=conv_m(C, C, 1, 1, 0))
    meta["conv8"] = convT_m(C, C, 3, 2, 1)
    meta["gdn7"] = gdn_m()
    meta["conv6"] = convT_m(C, C, 3, 2, 0)
    meta["rnab5"] = dict(
        rb1=block_m(), rb2=block_m(), rb3=block_m(),
        down=[conv_m(C, C, 3, 2, 0), conv_m(C, C, 3, 2, 0), conv_m(C, C, 3, 2, 0)],
        up=[convT_m(C, C, 3, 2, 0), convT_m(C, C, 3, 2, 0), convT_m(C, C, 3, 2, 0)],
        c1x1=conv_m(C, C, 1, 1, 0))
    meta["gdn4"] = gdn_m()
    meta["conv3"] = convT_m(C, C, 2, 2, 0)
    meta["gdn2"] = gdn_m()
    meta["conv1"] = convT_m(C, 1, 3, 2, 1)

    def fc(fin, fout):
        w = nx((fout, fin), 0.05).T.astype(BF16)               # pre-transposed (in, out), bf16
        return w, nx((fout,), 0.05)

    fc4w, fc4b = fc(128, 256)
    fc3w, fc3b = fc(256, 512)
    fc2w, fc2b = fc(512, 1024)
    fc1w, fc1b = fc(1024, cluster_input_size)

    slabs = dict(
        wslab=jnp.concatenate(wmats, axis=1),                  # (C, n_taps*C) f32 conv-tap slab
        bslab=jnp.stack(bcols, axis=1),                        # (C, n_cols) f32 biases + GDN
        fc4w=fc4w, fc3w=fc3w, fc2w=fc2w, fc1w=fc1w,
        fcb=jnp.concatenate([fc4b, fc3b, fc2b, fc1b])[None, :],  # (1, 1792+cluster) f32
    )
    return slabs, meta


# -------------------------------------- main --------------------------------------

if __name__ == "__main__":
    N, Cstd, cluster_input_size = 2, 8, 32
    key = jax.random.PRNGKey(0)
    kx, k1, k3, k6, k8, k10, kp = jax.random.split(key, 7)
    slabs, meta = init_model(kp, Cstd, cluster_input_size)

    # spatial sizes chosen so the transposed-conv chain reaches length 128 (fc4 in_features)
    x = jax.random.normal(kx, (N, Cstd, 4), jnp.float32)
    x10 = jax.random.normal(k10, (N, Cstd, 8), jnp.float32)
    x8 = jax.random.normal(k8, (N, Cstd, 15), jnp.float32)
    x6 = jax.random.normal(k6, (N, Cstd, 32), jnp.float32)
    x3 = jax.random.normal(k3, (N, Cstd, 64), jnp.float32)
    x1 = jax.random.normal(k1, (N, 1, 128), jnp.float32)

    fwd = jax.jit(functools.partial(tucodec_decode_forward, meta=meta))
    out = jax.block_until_ready(fwd(slabs, x, x1, x3, x6, x8, x10))
    assert out.shape == (N, 1, cluster_input_size), out.shape
    assert bool(jnp.all(jnp.isfinite(out)))
    print("KERNEL_OK")
</pallas_src>

<mosaic_0001>
module attributes {stable_mosaic.version = 11 : i64} {
  func.func @_decoder_kernel(%arg0: i32, %arg1: memref<1x8x128xf32, #tpu.memory_space<vmem>>, %arg2: memref<8x760xf32, #tpu.memory_space<vmem>>, %arg3: memref<8x62xf32, #tpu.memory_space<vmem>>, %arg4: memref<128x256xbf16, #tpu.memory_space<vmem>>, %arg5: memref<256x512xbf16, #tpu.memory_space<vmem>>, %arg6: memref<512x1024xbf16, #tpu.memory_space<vmem>>, %arg7: memref<1024x32xbf16, #tpu.memory_space<vmem>>, %arg8: memref<1x1824xf32, #tpu.memory_space<vmem>>, %arg9: memref<1x1x32xf32, #tpu.memory_space<vmem>>) attributes {dimension_semantics = [#tpu.dimension_semantics<parallel>], iteration_bounds = array<i64: 2>, scalar_prefetch = 0 : i64, scratch_operands = 0 : i64, tpu.core_type = #tpu.core_type<tc>, window_params = [{transform_indices = @transform_0, window_bounds = array<i64: 1, 8, 128>}, {pipeline_mode = #tpu.pipeline_mode<synchronous>, transform_indices = @transform_1, window_bounds = array<i64: 8, 760>}, {pipeline_mode = #tpu.pipeline_mode<synchronous>, transform_indices = @transform_2, window_bounds = array<i64: 8, 62>}, {pipeline_mode = #tpu.pipeline_mode<synchronous>, transform_indices = @transform_3, window_bounds = array<i64: 128, 256>}, {pipeline_mode = #tpu.pipeline_mode<synchronous>, transform_indices = @transform_4, window_bounds = array<i64: 256, 512>}, {pipeline_mode = #tpu.pipeline_mode<synchronous>, transform_indices = @transform_5, window_bounds = array<i64: 512, 1024>}, {pipeline_mode = #tpu.pipeline_mode<synchronous>, transform_indices = @transform_6, window_bounds = array<i64: 1024, 32>}, {pipeline_mode = #tpu.pipeline_mode<synchronous>, transform_indices = @transform_7, window_bounds = array<i64: 1, 1824>}, {transform_indices = @transform_8, window_bounds = array<i64: 1, 1, 32>}]} {
    %0 = tpu.iota {dimensions = array<i32: 1>} : vector<8x128xi32>
    %1 = tpu.iota {dimensions = array<i32: 0>} : vector<128x128xi32>
    %2 = tpu.iota {dimensions = array<i32: 1>} : vector<128x128xi32>
    %c2_i32 = arith.constant 2 : i32
    %3 = vector.broadcast %c2_i32 : i32 to vector<128x128xi32>
    %4 = arith.muli %3, %2 : vector<128x128xi32>
    %5 = arith.cmpi eq, %1, %4 : vector<128x128xi32>
    %cst = arith.constant 1.000000e+00 : f32
    %cst_0 = arith.constant 0.000000e+00 : f32
    %6 = vector.broadcast %cst : f32 to vector<128x128xf32>
    %7 = vector.broadcast %cst_0 : f32 to vector<128x128xf32>
    %8 = arith.select %5, %6, %7 : vector<128x128xi1>, vector<128x128xf32>
    %c2_i32_1 = arith.constant 2 : i32
    %9 = vector.broadcast %c2_i32_1 : i32 to vector<128x128xi32>
    %10 = arith.muli %9, %1 : vector<128x128xi32>
    %11 = arith.cmpi eq, %2, %10 : vector<128x128xi32>
    %cst_2 = arith.constant 1.000000e+00 : f32
    %cst_3 = arith.constant 0.000000e+00 : f32
    %12 = vector.broadcast %cst_2 : f32 to vector<128x128xf32>
    %13 = vector.broadcast %cst_3 : f32 to vector<128x128xf32>
    %14 = arith.select %11, %12, %13 : vector<128x128xi1>, vector<128x128xf32>
    %c0 = arith.constant 0 : index
    %c0_4 = arith.constant 0 : index
    %c0_5 = arith.constant 0 : index
    %15 = vector.load %arg1[%c0, %c0_4, %c0_5] : memref<1x8x128xf32, #tpu.memory_space<vmem>>, vector<1x8x128xf32>
    %16 = vector.shape_cast %15 : vector<1x8x128xf32> to vector<8x128xf32>
    %17 = arith.truncf %16 : vector<8x128xf32> to vector<8x128xbf16>
    %18 = arith.truncf %14 : vector<128x128xf32> to vector<128x128xbf16>
    %cst_6 = arith.constant dense<0.000000e+00> : vector<8x128xf32>
    %19 = tpu.matmul %17, %18, %cst_6 {dimension_numbers = #tpu.dot_dimension_numbers<[1], [0], [0], [1], [0, 0, 1, 1], [], []>} : vector<8x128xbf16>, vector<128x128xbf16>, vector<8x128xf32> -> vector<8x128xf32>
    %c1_i32 = arith.constant 1 : i32
    %20 = tpu.dynamic_rotate %19 by %c1_i32 dim 1 : vector<8x128xf32>, i32 -> vector<8x128xf32>
    %c1_i32_7 = arith.constant 1 : i32
    %21 = vector.broadcast %c1_i32_7 : i32 to vector<8x128xi32>
    %22 = arith.cmpi sge, %0, %21 : vector<8x128xi32>
    %cst_8 = arith.constant 0.000000e+00 : f32
    %23 = vector.broadcast %cst_8 : f32 to vector<8x128xf32>
    %24 = arith.select %22, %20, %23 : vector<8x128xi1>, vector<8x128xf32>
    %25 = tpu.concatenate %19, %24 in 0 : vector<8x128xf32>, vector<8x128xf32> -> vector<16x128xf32>
    %c0_9 = arith.constant 0 : index
    %c0_10 = arith.constant 0 : index
    %26 = vector.load %arg2[%c0_9, %c0_10] : memref<8x760xf32, #tpu.memory_space<vmem>>, vector<8x16xf32>
    %27 = arith.truncf %26 : vector<8x16xf32> to vector<8x16xbf16>
    %28 = arith.truncf %25 : vector<16x128xf32> to vector<16x128xbf16>
    %cst_11 = arith.constant dense<0.000000e+00> : vector<8x128xf32>
    %29 = tpu.matmul %27, %28, %cst_11 {dimension_numbers = #tpu.dot_dimension_numbers<[1], [0], [0], [1], [0, 0, 1, 1], [], []>} : vector<8x16xbf16>, vector<16x128xbf16>, vector<8x128xf32> -> vector<8x128xf32>
    %c0_12 = arith.constant 0 : index
    %c0_13 = arith.constant 0 : index
    %30 = vector.load %arg3[%c0_12, %c0_13] : memref<8x62xf32, #tpu.memory_space<vmem>>, vector<8x1xf32>
    %31 = vector.broadcast %30 : vector<8x1xf32> to vector<8x128xf32>
    %32 = arith.addf %29, %31 : vector<8x128xf32>
    %c8_i32 = arith.constant 8 : i32
    %33 = vector.broadcast %c8_i32 : i32 to vector<8x128xi32>
    %34 = arith.cmpi slt, %0, %33 : vector<8x128xi32>
    %cst_14 = arith.constant 0.000000e+00 : f32
    %35 = vector.broadcast %cst_14 : f32 to vector<8x128xf32>
    %36 = arith.select %34, %32, %35 : vector<8x128xi1>, vector<8x128xf32>
    %c1_i32_15 = arith.constant 1 : i32
    %37 = tpu.dynamic_rotate %36 by %c1_i32_15 dim 1 : vector<8x128xf32>, i32 -> vector<8x128xf32>
    %c1_i32_16 = arith.constant 1 : i32
    %38 = vector.broadcast %c1_i32_16 : i32 to vector<8x128xi32>
    %39 = arith.cmpi sge, %0, %38 : vector<8x128xi32>
    %cst_17 = arith.constant 0.000000e+00 : f32
    %40 = vector.broadcast %cst_17 : f32 to vector<8x128xf32>
    %41 = arith.select %39, %37, %40 : vector<8x128xi1>, vector<8x128xf32>
    %c127_i32 = arith.constant 127 : i32
    %42 = tpu.dynamic_rotate %36 by %c127_i32 dim 1 : vector<8x128xf32>, i32 -> vector<8x128xf32>
    %c127_i32_18 = arith.constant 127 : i32
    %43 = vector.broadcast %c127_i32_18 : i32 to vector<8x128xi32>
    %44 = arith.cmpi slt, %0, %43 : vector<8x128xi32>
    %cst_19 = arith.constant 0.000000e+00 : f32
    %45 = vector.broadcast %cst_19 : f32 to vector<8x128xf32>
    %46 = arith.select %44, %42, %45 : vector<8x128xi1>, vector<8x128xf32>
    %47 = tpu.concatenate %41, %36, %46 in 0 : vector<8x128xf32>, vector<8x128xf32>, vector<8x128xf32> -> vector<24x128xf32>
    %c0_20 = arith.constant 0 : index
    %c16 = arith.constant 16 : index
    %48 = vector.load %arg2[%c0_20, %c16] : memref<8x760xf32, #tpu.memory_space<vmem>>, vector<8x24xf32>
    %49 = arith.truncf %48 : vector<8x24xf32> to vector<8x24xbf16>
    %50 = arith.truncf %47 : vector<24x128xf32> to vector<24x128xbf16>
    %cst_21 = arith.constant dense<0.000000e+00> : vector<8x128xf32>
    %51 = tpu.matmul %49, %50, %cst_21 {dimension_numbers = #tpu.dot_dimension_numbers<[1], [0], [0], [1], [0, 0, 1, 1], [], []>} : vector<8x24xbf16>, vector<24x128xbf16>, vector<8x128xf32> -> vector<8x128xf32>
    %c0_22 = arith.constant 0 : index
    %c1 = arith.constant 1 : index
    %52 = vector.load %arg3[%c0_22, %c1] : memref<8x62xf32, #tpu.memory_space<vmem>>, vector<8x1xf32>
    %53 = vector.broadcast %52 : vector<8x1xf32> to vector<8x128xf32>
    %54 = arith.addf %51, %53 : vector<8x128xf32>
    %c8_i32_23 = arith.constant 8 : i32
    %55 = vector.broadcast %c8_i32_23 : i32 to vector<8x128xi32>
    %56 = arith.cmpi slt, %0, %55 : vector<8x128xi32>
    %cst_24 = arith.constant 0.000000e+00 : f32
    %57 = vector.broadcast %cst_24 : f32 to vector<8x128xf32>
    %58 = arith.select %56, %54, %57 : vector<8x128xi1>, vector<8x128xf32>
    %cst_25 = arith.constant 0.000000e+00 : f32
    %59 = vector.broadcast %cst_25 : f32 to vector<8x128xf32>
    %60 = arith.maximumf %58, %59 : vector<8x128xf32>
    %c1_i32_26 = arith.constant 1 : i32
    %61 = tpu.dynamic_rotate %60 by %c1_i32_26 dim 1 : vector<8x128xf32>, i32 -> vector<8x128xf32>
    %c1_i32_27 = arith.constant 1 : i32
    %62 = vector.broadcast %c1_i32_27 : i32 to vector<8x128xi32>
    %63 = arith.cmpi sge, %0, %62 : vector<8x128xi32>
    %cst_28 = arith.constant 0.000000e+00 : f32
    %64 = vector.broadcast %cst_28 : f32 to vector<8x128xf32>
    %65 = arith.select %63, %61, %64 : vector<8x128xi1>, vector<8x128xf32>
    %c127_i32_29 = arith.constant 127 : i32
    %66 = tpu.dynamic_rotate %60 by %c127_i32_29 dim 1 : vector<8x128xf32>, i32 -> vector<8x128xf32>
    %c127_i32_30 = arith.constant 127 : i32
    %67 = vector.broadcast %c127_i32_30 : i32 to vector<8x128xi32>
    %68 = arith.cmpi slt, %0, %67 : vector<8x128xi32>
    %cst_31 = arith.constant 0.000000e+00 : f32
    %69 = vector.broadcast %cst_31 : f32 to vector<8x128xf32>
    %70 = arith.select %68, %66, %69 : vector<8x128xi1>, vector<8x128xf32>
    %71 = tpu.concatenate %65, %60, %70 in 0 : vector<8x128xf32>, vector<8x128xf32>, vector<8x128xf32> -> vector<24x128xf32>
    %c0_32 = arith.constant 0 : index
    %c40 = arith.constant 40 : index
    %72 = vector.load %arg2[%c0_32, %c40] : memref<8x760xf32, #tpu.memory_space<vmem>>, vector<8x24xf32>
    %73 = arith.truncf %72 : vector<8x24xf32> to vector<8x24xbf16>
    %74 = arith.truncf %71 : vector<24x128xf32> to vector<24x128xbf16>
    %cst_33 = arith.constant dense<0.000000e+00> : vector<8x128xf32>
    %75 = tpu.matmul %73, %74, %cst_33 {dimension_numbers = #tpu.dot_dimension_numbers<[1], [0], [0], [1], [0, 0, 1, 1], [], []>} : vector<8x24xbf16>, vector<24x128xbf16>, vector<8x128xf32> -> vector<8x128xf32>
    %c0_34 = arith.constant 0 : index
    %c2 = arith.constant 2 : index
    %76 = vector.load %arg3[%c0_34, %c2] : memref<8x62xf32, #tpu.memory_space<vmem>>, vector<8x1xf32>
    %77 = vector.broadcast %76 : vector<8x1xf32> to vector<8x128xf32>
    %78 = arith.addf %75, %77 : vector<8x128xf32>
    %c8_i32_35 = arith.constant 8 : i32
    %79 = vector.broadcast %c8_i32_35 : i32 to vector<8x128xi32>
    %80 = arith.cmpi slt, %0, %79 : vector<8x128xi32>
    %cst_36 = arith.constant 0.000000e+00 : f32
    %81 = vector.broadcast %cst_36 : f32 to vector<8x128xf32>
    %82 = arith.select %80, %78, %81 : vector<8x128xi1>, vector<8x128xf32>
    %83 = arith.addf %36, %82 : vector<8x128xf32>
    %c1_i32_37 = arith.constant 1 : i32
    %84 = tpu.dynamic_rotate %83 by %c1_i32_37 dim 1 : vector<8x128xf32>, i32 -> vector<8x128xf32>
    %c1_i32_38 = arith.constant 1 : i32
    %85 = vector.broadcast %c1_i32_38 : i32 to vector<8x128xi32>
    %86 = arith.cmpi sge, %0, %85 : vector<8x128xi32>
    %cst_39 = arith.constant 0.000000e+00 : f32
    %87 = vector.broadcast %cst_39 : f32 to vector<8x128xf32>
    %88 = arith.select %86, %84, %87 : vector<8x128xi1>, vector<8x128xf32>
    %c127_i32_40 = arith.constant 127 : i32
    %89 = tpu.dynamic_rotate %83 by %c127_i32_40 dim 1 : vector<8x128xf32>, i32 -> vector<8x128xf32>
    %c127_i32_41 = arith.constant 127 : i32
    %90 = vector.broadcast %c127_i32_41 : i32 to vector<8x128xi32>
    %91 = arith.cmpi slt, %0, %90 : vector<8x128xi32>
    %cst_42 = arith.constant 0.000000e+00 : f32
    %92 = vector.broadcast %cst_42 : f32 to vector<8x128xf32>
    %93 = arith.select %91, %89, %92 : vector<8x128xi1>, vector<8x128xf32>
    %94 = tpu.concatenate %88, %83, %93 in 0 : vector<8x128xf32>, vector<8x128xf32>, vector<8x128xf32> -> vector<24x128xf32>
    %c0_43 = arith.constant 0 : index
    %c64 = arith.constant 64 : index
    %95 = vector.load %arg2[%c0_43, %c64] : memref<8x760xf32, #tpu.memory_space<vmem>>, vector<8x24xf32>
    %96 = arith.truncf %95 : vector<8x24xf32> to vector<8x24xbf16>
    %97 = arith.truncf %94 : vector<24x128xf32> to vector<24x128xbf16>
    %cst_44 = arith.constant dense<0.000000e+00> : vector<8x128xf32>
    %98 = tpu.matmul %96, %97, %cst_44 {dimension_numbers = #tpu.dot_dimension_numbers<[1], [0], [0], [1], [0, 0, 1, 1], [], []>} : vector<8x24xbf16>, vector<24x128xbf16>, vector<8x128xf32> -> vector<8x128xf32>
    %c0_45 = arith.constant 0 : index
    %c3 = arith.constant 3 : index
    %99 = vector.load %arg3[%c0_45, %c3] : memref<8x62xf32, #tpu.memory_space<vmem>>, vector<8x1xf32>
    %100 = vector.broadcast %99 : vector<8x1xf32> to vector<8x128xf32>
    %101 = arith.addf %98, %100 : vector<8x128xf32>
    %c8_i32_46 = arith.constant 8 : i32
    %102 = vector.broadcast %c8_i32_46 : i32 to vector<8x128xi32>
    %103 = arith.cmpi slt, %0, %102 : vector<8x128xi32>
    %cst_47 = arith.constant 0.000000e+00 : f32
    %104 = vector.broadcast %cst_47 : f32 to vector<8x128xf32>
    %105 = arith.select %103, %101, %104 : vector<8x128xi1>, vector<8x128xf32>
    %cst_48 = arith.constant 0.000000e+00 : f32
    %106 = vector.broadcast %cst_48 : f32 to vector<8x128xf32>
    %107 = arith.maximumf %105, %106 : vector<8x128xf32>
    %c1_i32_49 = arith.constant 1 : i32
    %108 = tpu.dynamic_rotate %107 by %c1_i32_49 dim 1 : vector<8x128xf32>, i32 -> vector<8x128xf32>
    %c1_i32_50 = arith.constant 1 : i32
    %109 = vector.broadcast %c1_i32_50 : i32 to vector<8x128xi32>
    %110 = arith.cmpi sge, %0, %109 : vector<8x128xi32>
    %cst_51 = arith.constant 0.000000e+00 : f32
    %111 = vector.broadcast %cst_51 : f32 to vector<8x128xf32>
    %112 = arith.select %110, %108, %111 : vector<8x128xi1>, vector<8x128xf32>
    %c127_i32_52 = arith.constant 127 : i32
    %113 = tpu.dynamic_rotate %107 by %c127_i32_52 dim 1 : vector<8x128xf32>, i32 -> vector<8x128xf32>
    %c127_i32_53 = arith.constant 127 : i32
    %114 = vector.broadcast %c127_i32_53 : i32 to vector<8x128xi32>
    %115 = arith.cmpi slt, %0, %114 : vector<8x128xi32>
    %cst_54 = arith.constant 0.000000e+00 : f32
    %116 = vector.broadcast %cst_54 : f32 to vector<8x128xf32>
    %117 = arith.select %115, %113, %116 : vector<8x128xi1>, vector<8x128xf32>
    %118 = tpu.concatenate %112, %107, %117 in 0 : vector<8x128xf32>, vector<8x128xf32>, vector<8x128xf32> -> vector<24x128xf32>
    %c0_55 = arith.constant 0 : index
    %c88 = arith.constant 88 : index
    %119 = vector.load %arg2[%c0_55, %c88] : memref<8x760xf32, #tpu.memory_space<vmem>>, vector<8x24xf32>
    %120 = arith.truncf %119 : vector<8x24xf32> to vector<8x24xbf16>
    %121 = arith.truncf %118 : vector<24x128xf32> to vector<24x128xbf16>
    %cst_56 = arith.constant dense<0.000000e+00> : vector<8x128xf32>
    %122 = tpu.matmul %120, %121, %cst_56 {dimension_numbers = #tpu.dot_dimension_numbers<[1], [0], [0], [1], [0, 0, 1, 1], [], []>} : vector<8x24xbf16>, vector<24x128xbf16>, vector<8x128xf32> -> vector<8x128xf32>
    %c0_57 = arith.constant 0 : index
    %c4 = arith.constant 4 : index
    %123 = vector.load %arg3[%c0_57, %c4] : memref<8x62xf32, #tpu.memory_space<vmem>>, vector<8x1xf32>
    %124 = vector.broadcast %123 : vector<8x1xf32> to vector<8x128xf32>
    %125 = arith.addf %122, %124 : vector<8x128xf32>
    %c8_i32_58 = arith.constant 8 : i32
    %126 = vector.broadcast %c8_i32_58 : i32 to vector<8x128xi32>
    %127 = arith.cmpi slt, %0, %126 : vector<8x128xi32>
    %cst_59 = arith.constant 0.000000e+00 : f32
    %128 = vector.broadcast %cst_59 : f32 to vector<8x128xf32>
    %129 = arith.select %127, %125, %128 : vector<8x128xi1>, vector<8x128xf32>
    %130 = arith.addf %83, %129 : vector<8x128xf32>
    %c1_i32_60 = arith.constant 1 : i32
    %131 = tpu.dynamic_rotate %130 by %c1_i32_60 dim 1 : vector<8x128xf32>, i32 -> vector<8x128xf32>
    %c1_i32_61 = arith.constant 1 : i32
    %132 = vector.broadcast %c1_i32_61 : i32 to vector<8x128xi32>
    %133 = arith.cmpi sge, %0, %132 : vector<8x128xi32>
    %cst_62 = arith.constant 0.000000e+00 : f32
    %134 = vector.broadcast %cst_62 : f32 to vector<8x128xf32>
    %135 = arith.select %133, %131, %134 : vector<8x128xi1>, vector<8x128xf32>
    %c127_i32_63 = arith.constant 127 : i32
    %136 = tpu.dynamic_rotate %130 by %c127_i32_63 dim 1 : vector<8x128xf32>, i32 -> vector<8x128xf32>
    %c127_i32_64 = arith.constant 127 : i32
    %137 = vector.broadcast %c127_i32_64 : i32 to vector<8x128xi32>
    %138 = arith.cmpi slt, %0, %137 : vector<8x128xi32>
    %cst_65 = arith.constant 0.000000e+00 : f32
    %139 = vector.broadcast %cst_65 : f32 to vector<8x128xf32>
    %140 = arith.select %138, %136, %139 : vector<8x128xi1>, vector<8x128xf32>
    %141 = tpu.concatenate %135, %130, %140 in 0 : vector<8x128xf32>, vector<8x128xf32>, vector<8x128xf32> -> vector<24x128xf32>
    %c0_66 = arith.constant 0 : index
    %c112 = arith.constant 112 : index
    %142 = vector.load %arg2[%c0_66, %c112] : memref<8x760xf32, #tpu.memory_space<vmem>>, vector<8x24xf32>
    %143 = arith.truncf %142 : vector<8x24xf32> to vector<8x24xbf16>
    %144 = arith.truncf %141 : vector<24x128xf32> to vector<24x128xbf16>
    %cst_67 = arith.constant dense<0.000000e+00> : vector<8x128xf32>
    %145 = tpu.matmul %143, %144, %cst_67 {dimension_numbers = #tpu.dot_dimension_numbers<[1], [0], [0], [1], [0, 0, 1, 1], [], []>} : vector<8x24xbf16>, vector<24x128xbf16>, vector<8x128xf32> -> vector<8x128xf32>
    %c0_68 = arith.constant 0 : index
    %c5 = arith.constant 5 : index
    %146 = vector.load %arg3[%c0_68, %c5] : memref<8x62xf32, #tpu.memory_space<vmem>>, vector<8x1xf32>
    %147 = vector.broadcast %146 : vector<8x1xf32> to vector<8x128xf32>
    %148 = arith.addf %145, %147 : vector<8x128xf32>
    %c8_i32_69 = arith.constant 8 : i32
    %149 = vector.broadcast %c8_i32_69 : i32 to vector<8x128xi32>
    %150 = arith.cmpi slt, %0, %149 : vector<8x128xi32>
    %cst_70 = arith.constant 0.000000e+00 : f32
    %151 = vector.broadcast %cst_70 : f32 to vector<8x128xf32>
    %152 = arith.select %150, %148, %151 : vector<8x128xi1>, vector<8x128xf32>
    %cst_71 = arith.constant 0.000000e+00 : f32
    %153 = vector.broadcast %cst_71 : f32 to vector<8x128xf32>
    %154 = arith.maximumf %152, %153 : vector<8x128xf32>
    %c1_i32_72 = arith.constant 1 : i32
    %155 = tpu.dynamic_rotate %154 by %c1_i32_72 dim 1 : vector<8x128xf32>, i32 -> vector<8x128xf32>
    %c1_i32_73 = arith.constant 1 : i32
    %156 = vector.broadcast %c1_i32_73 : i32 to vector<8x128xi32>
    %157 = arith.cmpi sge, %0, %156 : vector<8x128xi32>
    %cst_74 = arith.constant 0.000000e+00 : f32
    %158 = vector.broadcast %cst_74 : f32 to vector<8x128xf32>
    %159 = arith.select %157, %155, %158 : vector<8x128xi1>, vector<8x128xf32>
    %c127_i32_75 = arith.constant 127 : i32
    %160 = tpu.dynamic_rotate %154 by %c127_i32_75 dim 1 : vector<8x128xf32>, i32 -> vector<8x128xf32>
    %c127_i32_76 = arith.constant 127 : i32
    %161 = vector.broadcast %c127_i32_76 : i32 to vector<8x128xi32>
    %162 = arith.cmpi slt, %0, %161 : vector<8x128xi32>
    %cst_77 = arith.constant 0.000000e+00 : f32
    %163 = vector.broadcast %cst_77 : f32 to vector<8x128xf32>
    %164 = arith.select %162, %160, %163 : vector<8x128xi1>, vector<8x128xf32>
    %165 = tpu.concatenate %159, %154, %164 in 0 : vector<8x128xf32>, vector<8x128xf32>, vector<8x128xf32> -> vector<24x128xf32>
    %c0_78 = arith.constant 0 : index
    %c136 = arith.constant 136 : index
    %166 = vector.load %arg2[%c0_78, %c136] : memref<8x760xf32, #tpu.memory_space<vmem>>, vector<8x24xf32>
    %167 = arith.truncf %166 : vector<8x24xf32> to vector<8x24xbf16>
    %168 = arith.truncf %165 : vector<24x128xf32> to vector<24x128xbf16>
    %cst_79 = arith.constant dense<0.000000e+00> : vector<8x128xf32>
    %169 = tpu.matmul %167, %168, %cst_79 {dimension_numbers = #tpu.dot_dimension_numbers<[1], [0], [0], [1], [0, 0, 1, 1], [], []>} : vector<8x24xbf16>, vector<24x128xbf16>, vector<8x128xf32> -> vector<8x128xf32>
    %c0_80 = arith.constant 0 : index
    %c6 = arith.constant 6 : index
    %170 = vector.load %arg3[%c0_80, %c6] : memref<8x62xf32, #tpu.memory_space<vmem>>, vector<8x1xf32>
    %171 = vector.broadcast %170 : vector<8x1xf32> to vector<8x128xf32>
    %172 = arith.addf %169, %171 : vector<8x128xf32>
    %c8_i32_81 = arith.constant 8 : i32
    %173 = vector.broadcast %c8_i32_81 : i32 to vector<8x128xi32>
    %174 = arith.cmpi slt, %0, %173 : vector<8x128xi32>
    %cst_82 = arith.constant 0.000000e+00 : f32
    %175 = vector.broadcast %cst_82 : f32 to vector<8x128xf32>
    %176 = arith.select %174, %172, %175 : vector<8x128xi1>, vector<8x128xf32>
    %177 = arith.addf %130, %176 : vector<8x128xf32>
    %c1_i32_83 = arith.constant 1 : i32
    %178 = tpu.dynamic_rotate %177 by %c1_i32_83 dim 1 : vector<8x128xf32>, i32 -> vector<8x128xf32>
    %c1_i32_84 = arith.constant 1 : i32
    %179 = vector.broadcast %c1_i32_84 : i32 to vector<8x128xi32>
    %180 = arith.cmpi sge, %0, %179 : vector<8x128xi32>
    %cst_85 = arith.constant 0.000000e+00 : f32
    %181 = vector.broadcast %cst_85 : f32 to vector<8x128xf32>
    %182 = arith.select %180, %178, %181 : vector<8x128xi1>, vector<8x128xf32>
    %c127_i32_86 = arith.constant 127 : i32
    %183 = tpu.dynamic_rotate %177 by %c127_i32_86 dim 1 : vector<8x128xf32>, i32 -> vector<8x128xf32>
    %c127_i32_87 = arith.constant 127 : i32
    %184 = vector.broadcast %c127_i32_87 : i32 to vector<8x128xi32>
    %185 = arith.cmpi slt, %0, %184 : vector<8x128xi32>
    %cst_88 = arith.constant 0.000000e+00 : f32
    %186 = vector.broadcast %cst_88 : f32 to vector<8x128xf32>
    %187 = arith.select %185, %183, %186 : vector<8x128xi1>, vector<8x128xf32>
    %188 = tpu.concatenate %182, %177, %187 in 0 : vector<8x128xf32>, vector<8x128xf32>, vector<8x128xf32> -> vector<24x128xf32>
    %c0_89 = arith.constant 0 : index
    %c160 = arith.constant 160 : index
    %189 = vector.load %arg2[%c0_89, %c160] : memref<8x760xf32, #tpu.memory_space<vmem>>, vector<8x24xf32>
    %190 = arith.truncf %189 : vector<8x24xf32> to vector<8x24xbf16>
    %191 = arith.truncf %188 : vector<24x128xf32> to vector<24x128xbf16>
    %cst_90 = arith.constant dense<0.000000e+00> : vector<8x128xf32>
    %192 = tpu.matmul %190, %191, %cst_90 {dimension_numbers = #tpu.dot_dimension_numbers<[1], [0], [0], [1], [0, 0, 1, 1], [], []>} : vector<8x24xbf16>, vector<24x128xbf16>, vector<8x128xf32> -> vector<8x128xf32>
    %c0_91 = arith.constant 0 : index
    %c7 = arith.constant 7 : index
    %193 = vector.load %arg3[%c0_91, %c7] : memref<8x62xf32, #tpu.memory_space<vmem>>, vector<8x1xf32>
    %194 = vector.broadcast %193 : vector<8x1xf32> to vector<8x128xf32>
    %195 = arith.addf %192, %194 : vector<8x128xf32>
    %c8_i32_92 = arith.constant 8 : i32
    %196 = vector.broadcast %c8_i32_92 : i32 to vector<8x128xi32>
    %197 = arith.cmpi slt, %0, %196 : vector<8x128xi32>
    %cst_93 = arith.constant 0.000000e+00 : f32
    %198 = vector.broadcast %cst_93 : f32 to vector<8x128xf32>
    %199 = arith.select %197, %195, %198 : vector<8x128xi1>, vector<8x128xf32>
    %cst_94 = arith.constant 0.000000e+00 : f32
    %200 = vector.broadcast %cst_94 : f32 to vector<8x128xf32>
    %201 = arith.maximumf %199, %200 : vector<8x128xf32>
    %c1_i32_95 = arith.constant 1 : i32
    %202 = tpu.dynamic_rotate %201 by %c1_i32_95 dim 1 : vector<8x128xf32>, i32 -> vector<8x128xf32>
    %c1_i32_96 = arith.constant 1 : i32
    %203 = vector.broadcast %c1_i32_96 : i32 to vector<8x128xi32>
    %204 = arith.cmpi sge, %0, %203 : vector<8x128xi32>
    %cst_97 = arith.constant 0.000000e+00 : f32
    %205 = vector.broadcast %cst_97 : f32 to vector<8x128xf32>
    %206 = arith.select %204, %202, %205 : vector<8x128xi1>, vector<8x128xf32>
    %c127_i32_98 = arith.constant 127 : i32
    %207 = tpu.dynamic_rotate %201 by %c127_i32_98 dim 1 : vector<8x128xf32>, i32 -> vector<8x128xf32>
    %c127_i32_99 = arith.constant 127 : i32
    %208 = vector.broadcast %c127_i32_99 : i32 to vector<8x128xi32>
    %209 = arith.cmpi slt, %0, %208 : vector<8x128xi32>
    %cst_100 = arith.constant 0.000000e+00 : f32
    %210 = vector.broadcast %cst_100 : f32 to vector<8x128xf32>
    %211 = arith.select %209, %207, %210 : vector<8x128xi1>, vector<8x128xf32>
    %212 = tpu.concatenate %206, %201, %211 in 0 : vector<8x128xf32>, vector<8x128xf32>, vector<8x128xf32> -> vector<24x128xf32>
    %c0_101 = arith.constant 0 : index
    %c184 = arith.constant 184 : index
    %213 = vector.load %arg2[%c0_101, %c184] : memref<8x760xf32, #tpu.memory_space<vmem>>, vector<8x24xf32>
    %214 = arith.truncf %213 : vector<8x24xf32> to vector<8x24xbf16>
    %215 = arith.truncf %212 : vector<24x128xf32> to vector<24x128xbf16>
    %cst_102 = arith.constant dense<0.000000e+00> : vector<8x128xf32>
    %216 = tpu.matmul %214, %215, %cst_102 {dimension_numbers = #tpu.dot_dimension_numbers<[1], [0], [0], [1], [0, 0, 1, 1], [], []>} : vector<8x24xbf16>, vector<24x128xbf16>, vector<8x128xf32> -> vector<8x128xf32>
    %c0_103 = arith.constant 0 : index
    %c8 = arith.constant 8 : index
    %217 = vector.load %arg3[%c0_103, %c8] : memref<8x62xf32, #tpu.memory_space<vmem>>, vector<8x1xf32>
    %218 = vector.broadcast %217 : vector<8x1xf32> to vector<8x128xf32>
    %219 = arith.addf %216, %218 : vector<8x128xf32>
    %c8_i32_104 = arith.constant 8 : i32
    %220 = vector.broadcast %c8_i32_104 : i32 to vector<8x128xi32>
    %221 = arith.cmpi slt, %0, %220 : vector<8x128xi32>
    %cst_105 = arith.constant 0.000000e+00 : f32
    %222 = vector.broadcast %cst_105 : f32 to vector<8x128xf32>
    %223 = arith.select %221, %219, %222 : vector<8x128xi1>, vector<8x128xf32>
    %224 = arith.addf %177, %223 : vector<8x128xf32>
    %c127_i32_106 = arith.constant 127 : i32
    %225 = tpu.dynamic_rotate %130 by %c127_i32_106 dim 1 : vector<8x128xf32>, i32 -> vector<8x128xf32>
    %c127_i32_107 = arith.constant 127 : i32
    %226 = vector.broadcast %c127_i32_107 : i32 to vector<8x128xi32>
    %227 = arith.cmpi slt, %0, %226 : vector<8x128xi32>
    %cst_108 = arith.constant 0.000000e+00 : f32
    %228 = vector.broadcast %cst_108 : f32 to vector<8x128xf32>
    %229 = arith.select %227, %225, %228 : vector<8x128xi1>, vector<8x128xf32>
    %230 = tpu.concatenate %130, %229 in 0 : vector<8x128xf32>, vector<8x128xf32> -> vector<16x128xf32>
    %c0_109 = arith.constant 0 : index
    %c256 = arith.constant 256 : index
    %231 = vector.load %arg2[%c0_109, %c256] : memref<8x760xf32, #tpu.memory_space<vmem>>, vector<8x16xf32>
    %232 = arith.truncf %231 : vector<8x16xf32> to vector<8x16xbf16>
    %233 = arith.truncf %230 : vector<16x128xf32> to vector<16x128xbf16>
    %cst_110 = arith.constant dense<0.000000e+00> : vector<8x128xf32>
    %234 = tpu.matmul %232, %233, %cst_110 {dimension_numbers = #tpu.dot_dimension_numbers<[1], [0], [0], [1], [0, 0, 1, 1], [], []>} : vector<8x16xbf16>, vector<16x128xbf16>, vector<8x128xf32> -> vector<8x128xf32>
    %c0_111 = arith.constant 0 : index
    %c11 = arith.constant 11 : index
    %235 = vector.load %arg3[%c0_111, %c11] : memref<8x62xf32, #tpu.memory_space<vmem>>, vector<8x1xf32>
    %236 = vector.broadcast %235 : vector<8x1xf32> to vector<8x128xf32>
    %237 = arith.addf %234, %236 : vector<8x128xf32>
    %c7_i32 = arith.constant 7 : i32
    %238 = vector.broadcast %c7_i32 : i32 to vector<8x128xi32>
    %239 = arith.cmpi slt, %0, %238 : vector<8x128xi32>
    %cst_112 = arith.constant 0.000000e+00 : f32
    %240 = vector.broadcast %cst_112 : f32 to vector<8x128xf32>
    %241 = arith.select %239, %237, %240 : vector<8x128xi1>, vector<8x128xf32>
    %cst_113 = arith.constant 0.000000e+00 : f32
    %242 = vector.broadcast %cst_113 : f32 to vector<8x128xf32>
    %243 = arith.maximumf %241, %242 : vector<8x128xf32>
    %c127_i32_114 = arith.constant 127 : i32
    %244 = tpu.dynamic_rotate %243 by %c127_i32_114 dim 1 : vector<8x128xf32>, i32 -> vector<8x128xf32>
    %c127_i32_115 = arith.constant 127 : i32
    %245 = vector.broadcast %c127_i32_115 : i32 to vector<8x128xi32>
    %246 = arith.cmpi slt, %0, %245 : vector<8x128xi32>
    %cst_116 = arith.constant 0.000000e+00 : f32
    %247 = vector.broadcast %cst_116 : f32 to vector<8x128xf32>
    %248 = arith.select %246, %244, %247 : vector<8x128xi1>, vector<8x128xf32>
    %c126_i32 = arith.constant 126 : i32
    %249 = tpu.dynamic_rotate %243 by %c126_i32 dim 1 : vector<8x128xf32>, i32 -> vector<8x128xf32>
    %c126_i32_117 = arith.constant 126 : i32
    %250 = vector.broadcast %c126_i32_117 : i32 to vector<8x128xi32>
    %251 = arith.cmpi slt, %0, %250 : vector<8x128xi32>
    %cst_118 = arith.constant 0.000000e+00 : f32
    %252 = vector.broadcast %cst_118 : f32 to vector<8x128xf32>
    %253 = arith.select %251, %249, %252 : vector<8x128xi1>, vector<8x128xf32>
    %254 = tpu.concatenate %243, %248, %253 in 0 : vector<8x128xf32>, vector<8x128xf32>, vector<8x128xf32> -> vector<24x128xf32>
    %255 = arith.truncf %254 : vector<24x128xf32> to vector<24x128xbf16>
    %256 = arith.truncf %8 : vector<128x128xf32> to vector<128x128xbf16>
    %cst_119 = arith.constant dense<0.000000e+00> : vector<24x128xf32>
    %257 = tpu.matmul %255, %256, %cst_119 {dimension_numbers = #tpu.dot_dimension_numbers<[1], [0], [0], [1], [0, 0, 1, 1], [], []>} : vector<24x128xbf16>, vector<128x128xbf16>, vector<24x128xf32> -> vector<24x128xf32>
    %c0_120 = arith.constant 0 : index
    %c272 = arith.constant 272 : index
    %258 = vector.load %arg2[%c0_120, %c272] : memref<8x760xf32, #tpu.memory_space<vmem>>, vector<8x24xf32>
    %259 = arith.truncf %258 : vector<8x24xf32> to vector<8x24xbf16>
    %260 = arith.truncf %257 : vector<24x128xf32> to vector<24x128xbf16>
    %cst_121 = arith.constant dense<0.000000e+00> : vector<8x128xf32>
    %261 = tpu.matmul %259, %260, %cst_121 {dimension_numbers = #tpu.dot_dimension_numbers<[1], [0], [0], [1], [0, 0, 1, 1], [], []>} : vector<8x24xbf16>, vector<24x128xbf16>, vector<8x128xf32> -> vector<8x128xf32>
    %c0_122 = arith.constant 0 : index
    %c12 = arith.constant 12 : index
    %262 = vector.load %arg3[%c0_122, %c12] : memref<8x62xf32, #tpu.memory_space<vmem>>, vector<8x1xf32>
    %263 = vector.broadcast %262 : vector<8x1xf32> to vector<8x128xf32>
    %264 = arith.addf %261, %263 : vector<8x128xf32>
    %c3_i32 = arith.constant 3 : i32
    %265 = vector.broadcast %c3_i32 : i32 to vector<8x128xi32>
    %266 = arith.cmpi slt, %0, %265 : vector<8x128xi32>
    %cst_123 = arith.constant 0.000000e+00 : f32
    %267 = vector.broadcast %cst_123 : f32 to vector<8x128xf32>
    %268 = arith.select %266, %264, %267 : vector<8x128xi1>, vector<8x128xf32>
    %cst_124 = arith.constant 0.000000e+00 : f32
    %269 = vector.broadcast %cst_124 : f32 to vector<8x128xf32>
    %270 = arith.maximumf %268, %269 : vector<8x128xf32>
    %c127_i32_125 = arith.constant 127 : i32
    %271 = tpu.dynamic_rotate %270 by %c127_i32_125 dim 1 : vector<8x128xf32>, i32 -> vector<8x128xf32>
    %c127_i32_126 = arith.constant 127 : i32
    %272 = vector.broadcast %c127_i32_126 : i32 to vector<8x128xi32>
    %273 = arith.cmpi slt, %0, %272 : vector<8x128xi32>
    %cst_127 = arith.constant 0.000000e+00 : f32
    %274 = vector.broadcast %cst_127 : f32 to vector<8x128xf32>
    %275 = arith.select %273, %271, %274 : vector<8x128xi1>, vector<8x128xf32>
    %276 = tpu.concatenate %270, %275 in 0 : vector<8x128xf32>, vector<8x128xf32> -> vector<16x128xf32>
    %c0_128 = arith.constant 0 : index
    %c296 = arith.constant 296 : index
    %277 = vector.load %arg2[%c0_128, %c296] : memref<8x760xf32, #tpu.memory_space<vmem>>, vector<8x16xf32>
    %278 = arith.truncf %277 : vector<8x16xf32> to vector<8x16xbf16>
    %279 = arith.truncf %276 : vector<16x128xf32> to vector<16x128xbf16>
    %cst_129 = arith.constant dense<0.000000e+00> : vector<8x128xf32>
    %280 = tpu.matmul %278, %279, %cst_129 {dimension_numbers = #tpu.dot_dimension_numbers<[1], [0], [0], [1], [0, 0, 1, 1], [], []>} : vector<8x16xbf16>, vector<16x128xbf16>, vector<8x128xf32> -> vector<8x128xf32>
    %c0_130 = arith.constant 0 : index
    %c13 = arith.constant 13 : index
    %281 = vector.load %arg3[%c0_130, %c13] : memref<8x62xf32, #tpu.memory_space<vmem>>, vector<8x1xf32>
    %282 = vector.broadcast %281 : vector<8x1xf32> to vector<8x128xf32>
    %283 = arith.addf %280, %282 : vector<8x128xf32>
    %c2_i32_131 = arith.constant 2 : i32
    %284 = vector.broadcast %c2_i32_131 : i32 to vector<8x128xi32>
    %285 = arith.cmpi slt, %0, %284 : vector<8x128xi32>
    %cst_132 = arith.constant 0.000000e+00 : f32
    %286 = vector.broadcast %cst_132 : f32 to vector<8x128xf32>
    %287 = arith.select %285, %283, %286 : vector<8x128xi1>, vector<8x128xf32>
    %c1_i32_133 = arith.constant 1 : i32
    %288 = tpu.dynamic_rotate %287 by %c1_i32_133 dim 1 : vector<8x128xf32>, i32 -> vector<8x128xf32>
    %c1_i32_134 = arith.constant 1 : i32
    %289 = vector.broadcast %c1_i32_134 : i32 to vector<8x128xi32>
    %290 = arith.cmpi sge, %0, %289 : vector<8x128xi32>
    %cst_135 = arith.constant 0.000000e+00 : f32
    %291 = vector.broadcast %cst_135 : f32 to vector<8x128xf32>
    %292 = arith.select %290, %288, %291 : vector<8x128xi1>, vector<8x128xf32>
    %c127_i32_136 = arith.constant 127 : i32
    %293 = tpu.dynamic_rotate %287 by %c127_i32_136 dim 1 : vector<8x128xf32>, i32 -> vector<8x128xf32>
    %c127_i32_137 = arith.constant 127 : i32
    %294 = vector.broadcast %c127_i32_137 : i32 to vector<8x128xi32>
    %295 = arith.cmpi slt, %0, %294 : vector<8x128xi32>
    %cst_138 = arith.constant 0.000000e+00 : f32
    %296 = vector.broadcast %cst_138 : f32 to vector<8x128xf32>
    %297 = arith.select %295, %293, %296 : vector<8x128xi1>, vector<8x128xf32>
    %298 = tpu.concatenate %292, %287, %297 in 0 : vector<8x128xf32>, vector<8x128xf32>, vector<8x128xf32> -> vector<24x128xf32>
    %c0_139 = arith.constant 0 : index
    %c208 = arith.constant 208 : index
    %299 = vector.load %arg2[%c0_139, %c208] : memref<8x760xf32, #tpu.memory_space<vmem>>, vector<8x24xf32>
    %300 = arith.truncf %299 : vector<8x24xf32> to vector<8x24xbf16>
    %301 = arith.truncf %298 : vector<24x128xf32> to vector<24x128xbf16>
    %cst_140 = arith.constant dense<0.000000e+00> : vector<8x128xf32>
    %302 = tpu.matmul %300, %301, %cst_140 {dimension_numbers = #tpu.dot_dimension_numbers<[1], [0], [0], [1], [0, 0, 1, 1], [], []>} : vector<8x24xbf16>, vector<24x128xbf16>, vector<8x128xf32> -> vector<8x128xf32>
    %c0_141 = arith.constant 0 : index
    %c9 = arith.constant 9 : index
    %303 = vector.load %arg3[%c0_141, %c9] : memref<8x62xf32, #tpu.memory_space<vmem>>, vector<8x1xf32>
    %304 = vector.broadcast %303 : vector<8x1xf32> to vector<8x128xf32>
    %305 = arith.addf %302, %304 : vector<8x128xf32>
    %c2_i32_142 = arith.constant 2 : i32
    %306 = vector.broadcast %c2_i32_142 : i32 to vector<8x128xi32>
    %307 = arith.cmpi slt, %0, %306 : vector<8x128xi32>
    %cst_143 = arith.constant 0.000000e+00 : f32
    %308 = vector.broadcast %cst_143 : f32 to vector<8x128xf32>
    %309 = arith.select %307, %305, %308 : vector<8x128xi1>, vector<8x128xf32>
    %cst_144 = arith.constant 0.000000e+00 : f32
    %310 = vector.broadcast %cst_144 : f32 to vector<8x128xf32>
    %311 = arith.maximumf %309, %310 : vector<8x128xf32>
    %c1_i32_145 = arith.constant 1 : i32
    %312 = tpu.dynamic_rotate %311 by %c1_i32_145 dim 1 : vector<8x128xf32>, i32 -> vector<8x128xf32>
    %c1_i32_146 = arith.constant 1 : i32
    %313 = vector.broadcast %c1_i32_146 : i32 to vector<8x128xi32>
    %314 = arith.cmpi sge, %0, %313 : vector<8x128xi32>
    %cst_147 = arith.constant 0.000000e+00 : f32
    %315 = vector.broadcast %cst_147 : f32 to vector<8x128xf32>
    %316 = arith.select %314, %312, %315 : vector<8x128xi1>, vector<8x128xf32>
    %c127_i32_148 = arith.constant 127 : i32
    %317 = tpu.dynamic_rotate %311 by %c127_i32_148 dim 1 : vector<8x128xf32>, i32 -> vector<8x128xf32>
    %c127_i32_149 = arith.constant 127 : i32
    %318 = vector.broadcast %c127_i32_149 : i32 to vector<8x128xi32>
    %319 = arith.cmpi slt, %0, %318 : vector<8x128xi32>
    %cst_150 = arith.constant 0.000000e+00 : f32
    %320 = vector.broadcast %cst_150 : f32 to vector<8x128xf32>
    %321 = arith.select %319, %317, %320 : vector<8x128xi1>, vector<8x128xf32>
    %322 = tpu.concatenate %316, %311, %321 in 0 : vector<8x128xf32>, vector<8x128xf32>, vector<8x128xf32> -> vector<24x128xf32>
    %c0_151 = arith.constant 0 : index
    %c232 = arith.constant 232 : index
    %323 = vector.load %arg2[%c0_151, %c232] : memref<8x760xf32, #tpu.memory_space<vmem>>, vector<8x24xf32>
    %324 = arith.truncf %323 : vector<8x24xf32> to vector<8x24xbf16>
    %325 = arith.truncf %322 : vector<24x128xf32> to vector<24x128xbf16>
    %cst_152 = arith.constant dense<0.000000e+00> : vector<8x128xf32>
    %326 = tpu.matmul %324, %325, %cst_152 {dimension_numbers = #tpu.dot_dimension_numbers<[1], [0], [0], [1], [0, 0, 1, 1], [], []>} : vector<8x24xbf16>, vector<24x128xbf16>, vector<8x128xf32> -> vector<8x128xf32>
    %c0_153 = arith.constant 0 : index
    %c10 = arith.constant 10 : index
    %327 = vector.load %arg3[%c0_153, %c10] : memref<8x62xf32, #tpu.memory_space<vmem>>, vector<8x1xf32>
    %328 = vector.broadcast %327 : vector<8x1xf32> to vector<8x128xf32>
    %329 = arith.addf %326, %328 : vector<8x128xf32>
    %c2_i32_154 = arith.constant 2 : i32
    %330 = vector.broadcast %c2_i32_154 : i32 to vector<8x128xi32>
    %331 = arith.cmpi slt, %0, %330 : vector<8x128xi32>
    %cst_155 = arith.constant 0.000000e+00 : f32
    %332 = vector.broadcast %cst_155 : f32 to vector<8x128xf32>
    %333 = arith.select %331, %329, %332 : vector<8x128xi1>, vector<8x128xf32>
    %334 = arith.addf %287, %333 : vector<8x128xf32>
    %c1_i32_156 = arith.constant 1 : i32
    %335 = tpu.dynamic_rotate %334 by %c1_i32_156 dim 1 : vector<8x128xf32>, i32 -> vector<8x128xf32>
    %c1_i32_157 = arith.constant 1 : i32
    %336 = vector.broadcast %c1_i32_157 : i32 to vector<8x128xi32>
    %337 = arith.cmpi sge, %0, %336 : vector<8x128xi32>
    %cst_158 = arith.constant 0.000000e+00 : f32
    %338 = vector.broadcast %cst_158 : f32 to vector<8x128xf32>
    %339 = arith.select %337, %335, %338 : vector<8x128xi1>, vector<8x128xf32>
    %340 = tpu.concatenate %334, %339 in 0 : vector<8x128xf32>, vector<8x128xf32> -> vector<16x128xf32>
    %c0_159 = arith.constant 0 : index
    %c312 = arith.constant 312 : index
    %341 = vector.load %arg2[%c0_159, %c312] : memref<8x760xf32, #tpu.memory_space<vmem>>, vector<8x16xf32>
    %342 = arith.truncf %341 : vector<8x16xf32> to vector<8x16xbf16>
    %343 = arith.truncf %340 : vector<16x128xf32> to vector<16x128xbf16>
    %cst_160 = arith.constant dense<0.000000e+00> : vector<8x128xf32>
    %344 = tpu.matmul %342, %343, %cst_160 {dimension_numbers = #tpu.dot_dimension_numbers<[1], [0], [0], [1], [0, 0, 1, 1], [], []>} : vector<8x16xbf16>, vector<16x128xbf16>, vector<8x128xf32> -> vector<8x128xf32>
    %c0_161 = arith.constant 0 : index
    %c14 = arith.constant 14 : index
    %345 = vector.load %arg3[%c0_161, %c14] : memref<8x62xf32, #tpu.memory_space<vmem>>, vector<8x1xf32>
    %346 = vector.broadcast %345 : vector<8x1xf32> to vector<8x128xf32>
    %347 = arith.addf %344, %346 : vector<8x128xf32>
    %c3_i32_162 = arith.constant 3 : i32
    %348 = vector.broadcast %c3_i32_162 : i32 to vector<8x128xi32>
    %349 = arith.cmpi slt, %0, %348 : vector<8x128xi32>
    %cst_163 = arith.constant 0.000000e+00 : f32
    %350 = vector.broadcast %cst_163 : f32 to vector<8x128xf32>
    %351 = arith.select %349, %347, %350 : vector<8x128xi1>, vector<8x128xf32>
    %cst_164 = arith.constant 0.000000e+00 : f32
    %352 = vector.broadcast %cst_164 : f32 to vector<8x128xf32>
    %353 = arith.maximumf %351, %352 : vector<8x128xf32>
    %354 = arith.truncf %353 : vector<8x128xf32> to vector<8x128xbf16>
    %355 = arith.truncf %14 : vector<128x128xf32> to vector<128x128xbf16>
    %cst_165 = arith.constant dense<0.000000e+00> : vector<8x128xf32>
    %356 = tpu.matmul %354, %355, %cst_165 {dimension_numbers = #tpu.dot_dimension_numbers<[1], [0], [0], [1], [0, 0, 1, 1], [], []>} : vector<8x128xbf16>, vector<128x128xbf16>, vector<8x128xf32> -> vector<8x128xf32>
    %c1_i32_166 = arith.constant 1 : i32
    %357 = tpu.dynamic_rotate %356 by %c1_i32_166 dim 1 : vector<8x128xf32>, i32 -> vector<8x128xf32>
    %c1_i32_167 = arith.constant 1 : i32
    %358 = vector.broadcast %c1_i32_167 : i32 to vector<8x128xi32>
    %359 = arith.cmpi sge, %0, %358 : vector<8x128xi32>
    %cst_168 = arith.constant 0.000000e+00 : f32
    %360 = vector.broadcast %cst_168 : f32 to vector<8x128xf32>
    %361 = arith.select %359, %357, %360 : vector<8x128xi1>, vector<8x128xf32>
    %c2_i32_169 = arith.constant 2 : i32
    %362 = tpu.dynamic_rotate %356 by %c2_i32_169 dim 1 : vector<8x128xf32>, i32 -> vector<8x128xf32>
    %c2_i32_170 = arith.constant 2 : i32
    %363 = vector.broadcast %c2_i32_170 : i32 to vector<8x128xi32>
    %364 = arith.cmpi sge, %0, %363 : vector<8x128xi32>
    %cst_171 = arith.constant 0.000000e+00 : f32
    %365 = vector.broadcast %cst_171 : f32 to vector<8x128xf32>
    %366 = arith.select %364, %362, %365 : vector<8x128xi1>, vector<8x128xf32>
    %367 = tpu.concatenate %356, %361, %366 in 0 : vector<8x128xf32>, vector<8x128xf32>, vector<8x128xf32> -> vector<24x128xf32>
    %c0_172 = arith.constant 0 : index
    %c328 = arith.constant 328 : index
    %368 = vector.load %arg2[%c0_172, %c328] : memref<8x760xf32, #tpu.memory_space<vmem>>, vector<8x24xf32>
    %369 = arith.truncf %368 : vector<8x24xf32> to vector<8x24xbf16>
    %370 = arith.truncf %367 : vector<24x128xf32> to vector<24x128xbf16>
    %cst_173 = arith.constant dense<0.000000e+00> : vector<8x128xf32>
    %371 = tpu.matmul %369, %370, %cst_173 {dimension_numbers = #tpu.dot_dimension_numbers<[1], [0], [0], [1], [0, 0, 1, 1], [], []>} : vector<8x24xbf16>, vector<24x128xbf16>, vector<8x128xf32> -> vector<8x128xf32>
    %c0_174 = arith.constant 0 : index
    %c15 = arith.constant 15 : index
    %372 = vector.load %arg3[%c0_174, %c15] : memref<8x62xf32, #tpu.memory_space<vmem>>, vector<8x1xf32>
    %373 = vector.broadcast %372 : vector<8x1xf32> to vector<8x128xf32>
    %374 = arith.addf %371, %373 : vector<8x128xf32>
    %c7_i32_175 = arith.constant 7 : i32
    %375 = vector.broadcast %c7_i32_175 : i32 to vector<8x128xi32>
    %376 = arith.cmpi slt, %0, %375 : vector<8x128xi32>
    %cst_176 = arith.constant 0.000000e+00 : f32
    %377 = vector.broadcast %cst_176 : f32 to vector<8x128xf32>
    %378 = arith.select %376, %374, %377 : vector<8x128xi1>, vector<8x128xf32>
    %cst_177 = arith.constant 0.000000e+00 : f32
    %379 = vector.broadcast %cst_177 : f32 to vector<8x128xf32>
    %380 = arith.maximumf %378, %379 : vector<8x128xf32>
    %c1_i32_178 = arith.constant 1 : i32
    %381 = tpu.dynamic_rotate %380 by %c1_i32_178 dim 1 : vector<8x128xf32>, i32 -> vector<8x128xf32>
    %c1_i32_179 = arith.constant 1 : i32
    %382 = vector.broadcast %c1_i32_179 : i32 to vector<8x128xi32>
    %383 = arith.cmpi sge, %0, %382 : vector<8x128xi32>
    %cst_180 = arith.constant 0.000000e+00 : f32
    %384 = vector.broadcast %cst_180 : f32 to vector<8x128xf32>
    %385 = arith.select %383, %381, %384 : vector<8x128xi1>, vector<8x128xf32>
    %386 = tpu.concatenate %380, %385 in 0 : vector<8x128xf32>, vector<8x128xf32> -> vector<16x128xf32>
    %c0_181 = arith.constant 0 : index
    %c352 = arith.constant 352 : index
    %387 = vector.load %arg2[%c0_181, %c352] : memref<8x760xf32, #tpu.memory_space<vmem>>, vector<8x16xf32>
    %388 = arith.truncf %387 : vector<8x16xf32> to vector<8x16xbf16>
    %389 = arith.truncf %386 : vector<16x128xf32> to vector<16x128xbf16>
    %cst_182 = arith.constant dense<0.000000e+00> : vector<8x128xf32>
    %390 = tpu.matmul %388, %389, %cst_182 {dimension_numbers = #tpu.dot_dimension_numbers<[1], [0], [0], [1], [0, 0, 1, 1], [], []>} : vector<8x16xbf16>, vector<16x128xbf16>, vector<8x128xf32> -> vector<8x128xf32>
    %c0_183 = arith.constant 0 : index
    %c16_184 = arith.constant 16 : index
    %391 = vector.load %arg3[%c0_183, %c16_184] : memref<8x62xf32, #tpu.memory_space<vmem>>, vector<8x1xf32>
    %392 = vector.broadcast %391 : vector<8x1xf32> to vector<8x128xf32>
    %393 = arith.addf %390, %392 : vector<8x128xf32>
    %c8_i32_185 = arith.constant 8 : i32
    %394 = vector.broadcast %c8_i32_185 : i32 to vector<8x128xi32>
    %395 = arith.cmpi slt, %0, %394 : vector<8x128xi32>
    %cst_186 = arith.constant 0.000000e+00 : f32
    %396 = vector.broadcast %cst_186 : f32 to vector<8x128xf32>
    %397 = arith.select %395, %393, %396 : vector<8x128xi1>, vector<8x128xf32>
    %c0_187 = arith.constant 0 : index
    %c368 = arith.constant 368 : index
    %398 = vector.load %arg2[%c0_187, %c368] : memref<8x760xf32, #tpu.memory_space<vmem>>, vector<8x8xf32>
    %399 = arith.truncf %398 : vector<8x8xf32> to vector<8x8xbf16>
    %400 = arith.truncf %397 : vector<8x128xf32> to vector<8x128xbf16>
    %cst_188 = arith.constant dense<0.000000e+00> : vector<8x128xf32>
    %401 = tpu.matmul %399, %400, %cst_188 {dimension_numbers = #tpu.dot_dimension_numbers<[1], [0], [0], [1], [0, 0, 1, 1], [], []>} : vector<8x8xbf16>, vector<8x128xbf16>, vector<8x128xf32> -> vector<8x128xf32>
    %c0_189 = arith.constant 0 : index
    %c17 = arith.constant 17 : index
    %402 = vector.load %arg3[%c0_189, %c17] : memref<8x62xf32, #tpu.memory_space<vmem>>, vector<8x1xf32>
    %403 = vector.broadcast %402 : vector<8x1xf32> to vector<8x128xf32>
    %404 = arith.addf %401, %403 : vector<8x128xf32>
    %c8_i32_190 = arith.constant 8 : i32
    %405 = vector.broadcast %c8_i32_190 : i32 to vector<8x128xi32>
    %406 = arith.cmpi slt, %0, %405 : vector<8x128xi32>
    %cst_191 = arith.constant 0.000000e+00 : f32
    %407 = vector.broadcast %cst_191 : f32 to vector<8x128xf32>
    %408 = arith.select %406, %404, %407 : vector<8x128xi1>, vector<8x128xf32>
    %409 = arith.mulf %224, %408 : vector<8x128xf32>
    %410 = arith.addf %130, %409 : vector<8x128xf32>
    %411 = arith.truncf %410 : vector<8x128xf32> to vector<8x128xbf16>
    %412 = arith.truncf %14 : vector<128x128xf32> to vector<128x128xbf16>
    %cst_192 = arith.constant dense<0.000000e+00> : vector<8x128xf32>
    %413 = tpu.matmul %411, %412, %cst_192 {dimension_numbers = #tpu.dot_dimension_numbers<[1], [0], [0], [1], [0, 0, 1, 1], [], []>} : vector<8x128xbf16>, vector<128x128xbf16>, vector<8x128xf32> -> vector<8x128xf32>
    %c127_i32_193 = arith.constant 127 : i32
    %414 = tpu.dynamic_rotate %413 by %c127_i32_193 dim 1 : vector<8x128xf32>, i32 -> vector<8x128xf32>
    %c127_i32_194 = arith.constant 127 : i32
    %415 = vector.broadcast %c127_i32_194 : i32 to vector<8x128xi32>
    %416 = arith.cmpi slt, %0, %415 : vector<8x128xi32>
    %cst_195 = arith.constant 0.000000e+00 : f32
    %417 = vector.broadcast %cst_195 : f32 to vector<8x128xf32>
    %418 = arith.select %416, %414, %417 : vector<8x128xi1>, vector<8x128xf32>
    %c1_i32_196 = arith.constant 1 : i32
    %419 = tpu.dynamic_rotate %413 by %c1_i32_196 dim 1 : vector<8x128xf32>, i32 -> vector<8x128xf32>
    %c1_i32_197 = arith.constant 1 : i32
    %420 = vector.broadcast %c1_i32_197 : i32 to vector<8x128xi32>
    %421 = arith.cmpi sge, %0, %420 : vector<8x128xi32>
    %cst_198 = arith.constant 0.000000e+00 : f32
    %422 = vector.broadcast %cst_198 : f32 to vector<8x128xf32>
    %423 = arith.select %421, %419, %422 : vector<8x128xi1>, vector<8x128xf32>
    %424 = tpu.concatenate %418, %413, %423 in 0 : vector<8x128xf32>, vector<8x128xf32>, vector<8x128xf32> -> vector<24x128xf32>
    %c0_199 = arith.constant 0 : index
    %c376 = arith.constant 376 : index
    %425 = vector.load %arg2[%c0_199, %c376] : memref<8x760xf32, #tpu.memory_space<vmem>>, vector<8x24xf32>
    %426 = arith.truncf %425 : vector<8x24xf32> to vector<8x24xbf16>
    %427 = arith.truncf %424 : vector<24x128xf32> to vector<24x128xbf16>
    %cst_200 = arith.constant dense<0.000000e+00> : vector<8x128xf32>
    %428 = tpu.matmul %426, %427, %cst_200 {dimension_numbers = #tpu.dot_dimension_numbers<[1], [0], [0], [1], [0, 0, 1, 1], [], []>} : vector<8x24xbf16>, vector<24x128xbf16>, vector<8x128xf32> -> vector<8x128xf32>
    %c0_201 = arith.constant 0 : index
    %c18 = arith.constant 18 : index
    %429 = vector.load %arg3[%c0_201, %c18] : memref<8x62xf32, #tpu.memory_space<vmem>>, vector<8x1xf32>
    %430 = vector.broadcast %429 : vector<8x1xf32> to vector<8x128xf32>
    %431 = arith.addf %428, %430 : vector<8x128xf32>
    %c15_i32 = arith.constant 15 : i32
    %432 = vector.broadcast %c15_i32 : i32 to vector<8x128xi32>
    %433 = arith.cmpi slt, %0, %432 : vector<8x128xi32>
    %cst_202 = arith.constant 0.000000e+00 : f32
    %434 = vector.broadcast %cst_202 : f32 to vector<8x128xf32>
    %435 = arith.select %433, %431, %434 : vector<8x128xi1>, vector<8x128xf32>
    %c0_203 = arith.constant 0 : index
    %c19 = arith.constant 19 : index
    %436 = vector.load %arg3[%c0_203, %c19] : memref<8x62xf32, #tpu.memory_space<vmem>>, vector<8x8xf32>
    %c0_204 = arith.constant 0 : index
    %c27 = arith.constant 27 : index
    %437 = vector.load %arg3[%c0_204, %c27] : memref<8x62xf32, #tpu.memory_space<vmem>>, vector<8x1xf32>
    %438 = arith.mulf %435, %435 : vector<8x128xf32>
    %cst_205 = arith.constant dense<0.000000e+00> : vector<8x128xf32>
    %439 = tpu.matmul %436, %438, %cst_205 {dimension_numbers = #tpu.dot_dimension_numbers<[1], [0], [0], [1], [0, 0, 1, 1], [], []>} : vector<8x8xf32>, vector<8x128xf32>, vector<8x128xf32> -> vector<8x128xf32>
    %440 = vector.broadcast %437 : vector<8x1xf32> to vector<8x128xf32>
    %441 = arith.addf %439, %440 : vector<8x128xf32>
    %cst_206 = arith.constant 9.99999971E-10 : f32
    %442 = vector.broadcast %cst_206 : f32 to vector<8x128xf32>
    %443 = arith.maximumf %441, %442 : vector<8x128xf32>
    %444 = math.rsqrt %443 : vector<8x128xf32>
    %445 = arith.mulf %435, %444 : vector<8x128xf32>
    %446 = arith.truncf %445 : vector<8x128xf32> to vector<8x128xbf16>
    %447 = arith.truncf %14 : vector<128x128xf32> to vector<128x128xbf16>
    %cst_207 = arith.constant dense<0.000000e+00> : vector<8x128xf32>
    %448 = tpu.matmul %446, %447, %cst_207 {dimension_numbers = #tpu.dot_dimension_numbers<[1], [0], [0], [1], [0, 0, 1, 1], [], []>} : vector<8x128xbf16>, vector<128x128xbf16>, vector<8x128xf32> -> vector<8x128xf32>
    %c1_i32_208 = arith.constant 1 : i32
    %449 = tpu.dynamic_rotate %448 by %c1_i32_208 dim 1 : vector<8x128xf32>, i32 -> vector<8x128xf32>
    %c1_i32_209 = arith.constant 1 : i32
    %450 = vector.broadcast %c1_i32_209 : i32 to vector<8x128xi32>
    %451 = arith.cmpi sge, %0, %450 : vector<8x128xi32>
    %cst_210 = arith.constant 0.000000e+00 : f32
    %452 = vector.broadcast %cst_210 : f32 to vector<8x128xf32>
    %453 = arith.select %451, %449, %452 : vector<8x128xi1>, vector<8x128xf32>
    %c2_i32_211 = arith.constant 2 : i32
    %454 = tpu.dynamic_rotate %448 by %c2_i32_211 dim 1 : vector<8x128xf32>, i32 -> vector<8x128xf32>
    %c2_i32_212 = arith.constant 2 : i32
    %455 = vector.broadcast %c2_i32_212 : i32 to vector<8x128xi32>
    %456 = arith.cmpi sge, %0, %455 : vector<8x128xi32>
    %cst_213 = arith.constant 0.000000e+00 : f32
    %457 = vector.broadcast %cst_213 : f32 to vector<8x128xf32>
    %458 = arith.select %456, %454, %457 : vector<8x128xi1>, vector<8x128xf32>
    %459 = tpu.concatenate %448, %453, %458 in 0 : vector<8x128xf32>, vector<8x128xf32>, vector<8x128xf32> -> vector<24x128xf32>
    %c0_214 = arith.constant 0 : index
    %c400 = arith.constant 400 : index
    %460 = vector.load %arg2[%c0_214, %c400] : memref<8x760xf32, #tpu.memory_space<vmem>>, vector<8x24xf32>
    %461 = arith.truncf %460 : vector<8x24xf32> to vector<8x24xbf16>
    %462 = arith.truncf %459 : vector<24x128xf32> to vector<24x128xbf16>
    %cst_215 = arith.constant dense<0.000000e+00> : vector<8x128xf32>
    %463 = tpu.matmul %461, %462, %cst_215 {dimension_numbers = #tpu.dot_dimension_numbers<[1], [0], [0], [1], [0, 0, 1, 1], [], []>} : vector<8x24xbf16>, vector<24x128xbf16>, vector<8x128xf32> -> vector<8x128xf32>
    %c0_216 = arith.constant 0 : index
    %c28 = arith.constant 28 : index
    %464 = vector.load %arg3[%c0_216, %c28] : memref<8x62xf32, #tpu.memory_space<vmem>>, vector<8x1xf32>
    %465 = vector.broadcast %464 : vector<8x1xf32> to vector<8x128xf32>
    %466 = arith.addf %463, %465 : vector<8x128xf32>
    %c32_i32 = arith.constant 32 : i32
    %467 = vector.broadcast %c32_i32 : i32 to vector<8x128xi32>
    %468 = arith.cmpi slt, %0, %467 : vector<8x128xi32>
    %cst_217 = arith.constant 0.000000e+00 : f32
    %469 = vector.broadcast %cst_217 : f32 to vector<8x128xf32>
    %470 = arith.select %468, %466, %469 : vector<8x128xi1>, vector<8x128xf32>
    %c1_i32_218 = arith.constant 1 : i32
    %471 = tpu.dynamic_rotate %470 by %c1_i32_218 dim 1 : vector<8x128xf32>, i32 -> vector<8x128xf32>
    %c1_i32_219 = arith.constant 1 : i32
    %472 = vector.broadcast %c1_i32_219 : i32 to vector<8x128xi32>
    %473 = arith.cmpi sge, %0, %472 : vector<8x128xi32>
    %cst_220 = arith.constant 0.000000e+00 : f32
    %474 = vector.broadcast %cst_220 : f32 to vector<8x128xf32>
    %475 = arith.select %473, %471, %474 : vector<8x128xi1>, vector<8x128xf32>
    %c127_i32_221 = arith.constant 127 : i32
    %476 = tpu.dynamic_rotate %470 by %c127_i32_221 dim 1 : vector<8x128xf32>, i32 -> vector<8x128xf32>
    %c127_i32_222 = arith.constant 127 : i32
    %477 = vector.broadcast %c127_i32_222 : i32 to vector<8x128xi32>
    %478 = arith.cmpi slt, %0, %477 : vector<8x128xi32>
    %cst_223 = arith.constant 0.000000e+00 : f32
    %479 = vector.broadcast %cst_223 : f32 to vector<8x128xf32>
    %480 = arith.select %478, %476, %479 : vector<8x128xi1>, vector<8x128xf32>
    %481 = tpu.concatenate %475, %470, %480 in 0 : vector<8x128xf32>, vector<8x128xf32>, vector<8x128xf32> -> vector<24x128xf32>
    %c0_224 = arith.constant 0 : index
    %c424 = arith.constant 424 : index
    %482 = vector.load %arg2[%c0_224, %c424] : memref<8x760xf32, #tpu.memory_space<vmem>>, vector<8x24xf32>
    %483 = arith.truncf %482 : vector<8x24xf32> to vector<8x24xbf16>
    %484 = arith.truncf %481 : vector<24x128xf32> to vector<24x128xbf16>
    %cst_225 = arith.constant dense<0.000000e+00> : vector<8x128xf32>
    %485 = tpu.matmul %483, %484, %cst_225 {dimension_numbers = #tpu.dot_dimension_numbers<[1], [0], [0], [1], [0, 0, 1, 1], [], []>} : vector<8x24xbf16>, vector<24x128xbf16>, vector<8x128xf32> -> vector<8x128xf32>
    %c0_226 = arith.constant 0 : index
    %c29 = arith.constant 29 : index
    %486 = vector.load %arg3[%c0_226, %c29] : memref<8x62xf32, #tpu.memory_space<vmem>>, vector<8x1xf32>
    %487 = vector.broadcast %486 : vector<8x1xf32> to vector<8x128xf32>
    %488 = arith.addf %485, %487 : vector<8x128xf32>
    %c32_i32_227 = arith.constant 32 : i32
    %489 = vector.broadcast %c32_i32_227 : i32 to vector<8x128xi32>
    %490 = arith.cmpi slt, %0, %489 : vector<8x128xi32>
    %cst_228 = arith.constant 0.000000e+00 : f32
    %491 = vector.broadcast %cst_228 : f32 to vector<8x128xf32>
    %492 = arith.select %490, %488, %491 : vector<8x128xi1>, vector<8x128xf32>
    %cst_229 = arith.constant 0.000000e+00 : f32
    %493 = vector.broadcast %cst_229 : f32 to vector<8x128xf32>
    %494 = arith.maximumf %492, %493 : vector<8x128xf32>
    %c1_i32_230 = arith.constant 1 : i32
    %495 = tpu.dynamic_rotate %494 by %c1_i32_230 dim 1 : vector<8x128xf32>, i32 -> vector<8x128xf32>
    %c1_i32_231 = arith.constant 1 : i32
    %496 = vector.broadcast %c1_i32_231 : i32 to vector<8x128xi32>
    %497 = arith.cmpi sge, %0, %496 : vector<8x128xi32>
    %cst_232 = arith.constant 0.000000e+00 : f32
    %498 = vector.broadcast %cst_232 : f32 to vector<8x128xf32>
    %499 = arith.select %497, %495, %498 : vector<8x128xi1>, vector<8x128xf32>
    %c127_i32_233 = arith.constant 127 : i32
    %500 = tpu.dynamic_rotate %494 by %c127_i32_233 dim 1 : vector<8x128xf32>, i32 -> vector<8x128xf32>
    %c127_i32_234 = arith.constant 127 : i32
    %501 = vector.broadcast %c127_i32_234 : i32 to vector<8x128xi32>
    %502 = arith.cmpi slt, %0, %501 : vector<8x128xi32>
    %cst_235 = arith.constant 0.000000e+00 : f32
    %503 = vector.broadcast %cst_235 : f32 to vector<8x128xf32>
    %504 = arith.select %502, %500, %503 : vector<8x128xi1>, vector<8x128xf32>
    %505 = tpu.concatenate %499, %494, %504 in 0 : vector<8x128xf32>, vector<8x128xf32>, vector<8x128xf32> -> vector<24x128xf32>
    %c0_236 = arith.constant 0 : index
    %c448 = arith.constant 448 : index
    %506 = vector.load %arg2[%c0_236, %c448] : memref<8x760xf32, #tpu.memory_space<vmem>>, vector<8x24xf32>
    %507 = arith.truncf %506 : vector<8x24xf32> to vector<8x24xbf16>
    %508 = arith.truncf %505 : vector<24x128xf32> to vector<24x128xbf16>
    %cst_237 = arith.constant dense<0.000000e+00> : vector<8x128xf32>
    %509 = tpu.matmul %507, %508, %cst_237 {dimension_numbers = #tpu.dot_dimension_numbers<[1], [0], [0], [1], [0, 0, 1, 1], [], []>} : vector<8x24xbf16>, vector<24x128xbf16>, vector<8x128xf32> -> vector<8x128xf32>
    %c0_238 = arith.constant 0 : index
    %c30 = arith.constant 30 : index
    %510 = vector.load %arg3[%c0_238, %c30] : memref<8x62xf32, #tpu.memory_space<vmem>>, vector<8x1xf32>
    %511 = vector.broadcast %510 : vector<8x1xf32> to vector<8x128xf32>
    %512 = arith.addf %509, %511 : vector<8x128xf32>
    %c32_i32_239 = arith.constant 32 : i32
    %513 = vector.broadcast %c32_i32_239 : i32 to vector<8x128xi32>
    %514 = arith.cmpi slt, %0, %513 : vector<8x128xi32>
    %cst_240 = arith.constant 0.000000e+00 : f32
    %515 = vector.broadcast %cst_240 : f32 to vector<8x128xf32>
    %516 = arith.select %514, %512, %515 : vector<8x128xi1>, vector<8x128xf32>
    %517 = arith.addf %470, %516 : vector<8x128xf32>
    %c1_i32_241 = arith.constant 1 : i32
    %518 = tpu.dynamic_rotate %517 by %c1_i32_241 dim 1 : vector<8x128xf32>, i32 -> vector<8x128xf32>
    %c1_i32_242 = arith.constant 1 : i32
    %519 = vector.broadcast %c1_i32_242 : i32 to vector<8x128xi32>
    %520 = arith.cmpi sge, %0, %519 : vector<8x128xi32>
    %cst_243 = arith.constant 0.000000e+00 : f32
    %521 = vector.broadcast %cst_243 : f32 to vector<8x128xf32>
    %522 = arith.select %520, %518, %521 : vector<8x128xi1>, vector<8x128xf32>
    %c127_i32_244 = arith.constant 127 : i32
    %523 = tpu.dynamic_rotate %517 by %c127_i32_244 dim 1 : vector<8x128xf32>, i32 -> vector<8x128xf32>
    %c127_i32_245 = arith.constant 127 : i32
    %524 = vector.broadcast %c127_i32_245 : i32 to vector<8x128xi32>
    %525 = arith.cmpi slt, %0, %524 : vector<8x128xi32>
    %cst_246 = arith.constant 0.000000e+00 : f32
    %526 = vector.broadcast %cst_246 : f32 to vector<8x128xf32>
    %527 = arith.select %525, %523, %526 : vector<8x128xi1>, vector<8x128xf32>
    %528 = tpu.concatenate %522, %517, %527 in 0 : vector<8x128xf32>, vector<8x128xf32>, vector<8x128xf32> -> vector<24x128xf32>
    %c0_247 = arith.constant 0 : index
    %c472 = arith.constant 472 : index
    %529 = vector.load %arg2[%c0_247, %c472] : memref<8x760xf32, #tpu.memory_space<vmem>>, vector<8x24xf32>
    %530 = arith.truncf %529 : vector<8x24xf32> to vector<8x24xbf16>
    %531 = arith.truncf %528 : vector<24x128xf32> to vector<24x128xbf16>
    %cst_248 = arith.constant dense<0.000000e+00> : vector<8x128xf32>
    %532 = tpu.matmul %530, %531, %cst_248 {dimension_numbers = #tpu.dot_dimension_numbers<[1], [0], [0], [1], [0, 0, 1, 1], [], []>} : vector<8x24xbf16>, vector<24x128xbf16>, vector<8x128xf32> -> vector<8x128xf32>
    %c0_249 = arith.constant 0 : index
    %c31 = arith.constant 31 : index
    %533 = vector.load %arg3[%c0_249, %c31] : memref<8x62xf32, #tpu.memory_space<vmem>>, vector<8x1xf32>
    %534 = vector.broadcast %533 : vector<8x1xf32> to vector<8x128xf32>
    %535 = arith.addf %532, %534 : vector<8x128xf32>
    %c32_i32_250 = arith.constant 32 : i32
    %536 = vector.broadcast %c32_i32_250 : i32 to vector<8x128xi32>
    %537 = arith.cmpi slt, %0, %536 : vector<8x128xi32>
    %cst_251 = arith.constant 0.000000e+00 : f32
    %538 = vector.broadcast %cst_251 : f32 to vector<8x128xf32>
    %539 = arith.select %537, %535, %538 : vector<8x128xi1>, vector<8x128xf32>
    %cst_252 = arith.constant 0.000000e+00 : f32
    %540 = vector.broadcast %cst_252 : f32 to vector<8x128xf32>
    %541 = arith.maximumf %539, %540 : vector<8x128xf32>
    %c1_i32_253 = arith.constant 1 : i32
    %542 = tpu.dynamic_rotate %541 by %c1_i32_253 dim 1 : vector<8x128xf32>, i32 -> vector<8x128xf32>
    %c1_i32_254 = arith.constant 1 : i32
    %543 = vector.broadcast %c1_i32_254 : i32 to vector<8x128xi32>
    %544 = arith.cmpi sge, %0, %543 : vector<8x128xi32>
    %cst_255 = arith.constant 0.000000e+00 : f32
    %545 = vector.broadcast %cst_255 : f32 to vector<8x128xf32>
    %546 = arith.select %544, %542, %545 : vector<8x128xi1>, vector<8x128xf32>
    %c127_i32_256 = arith.constant 127 : i32
    %547 = tpu.dynamic_rotate %541 by %c127_i32_256 dim 1 : vector<8x128xf32>, i32 -> vector<8x128xf32>
    %c127_i32_257 = arith.constant 127 : i32
    %548 = vector.broadcast %c127_i32_257 : i32 to vector<8x128xi32>
    %549 = arith.cmpi slt, %0, %548 : vector<8x128xi32>
    %cst_258 = arith.constant 0.000000e+00 : f32
    %550 = vector.broadcast %cst_258 : f32 to vector<8x128xf32>
    %551 = arith.select %549, %547, %550 : vector<8x128xi1>, vector<8x128xf32>
    %552 = tpu.concatenate %546, %541, %551 in 0 : vector<8x128xf32>, vector<8x128xf32>, vector<8x128xf32> -> vector<24x128xf32>
    %c0_259 = arith.constant 0 : index
    %c496 = arith.constant 496 : index
    %553 = vector.load %arg2[%c0_259, %c496] : memref<8x760xf32, #tpu.memory_space<vmem>>, vector<8x24xf32>
    %554 = arith.truncf %553 : vector<8x24xf32> to vector<8x24xbf16>
    %555 = arith.truncf %552 : vector<24x128xf32> to vector<24x128xbf16>
    %cst_260 = arith.constant dense<0.000000e+00> : vector<8x128xf32>
    %556 = tpu.matmul %554, %555, %cst_260 {dimension_numbers = #tpu.dot_dimension_numbers<[1], [0], [0], [1], [0, 0, 1, 1], [], []>} : vector<8x24xbf16>, vector<24x128xbf16>, vector<8x128xf32> -> vector<8x128xf32>
    %c0_261 = arith.constant 0 : index
    %c32 = arith.constant 32 : index
    %557 = vector.load %arg3[%c0_261, %c32] : memref<8x62xf32, #tpu.memory_space<vmem>>, vector<8x1xf32>
    %558 = vector.broadcast %557 : vector<8x1xf32> to vector<8x128xf32>
    %559 = arith.addf %556, %558 : vector<8x128xf32>
    %c32_i32_262 = arith.constant 32 : i32
    %560 = vector.broadcast %c32_i32_262 : i32 to vector<8x128xi32>
    %561 = arith.cmpi slt, %0, %560 : vector<8x128xi32>
    %cst_263 = arith.constant 0.000000e+00 : f32
    %562 = vector.broadcast %cst_263 : f32 to vector<8x128xf32>
    %563 = arith.select %561, %559, %562 : vector<8x128xi1>, vector<8x128xf32>
    %564 = arith.addf %517, %563 : vector<8x128xf32>
    %c127_i32_264 = arith.constant 127 : i32
    %565 = tpu.dynamic_rotate %470 by %c127_i32_264 dim 1 : vector<8x128xf32>, i32 -> vector<8x128xf32>
    %c127_i32_265 = arith.constant 127 : i32
    %566 = vector.broadcast %c127_i32_265 : i32 to vector<8x128xi32>
    %567 = arith.cmpi slt, %0, %566 : vector<8x128xi32>
    %cst_266 = arith.constant 0.000000e+00 : f32
    %568 = vector.broadcast %cst_266 : f32 to vector<8x128xf32>
    %569 = arith.select %567, %565, %568 : vector<8x128xi1>, vector<8x128xf32>
    %c126_i32_267 = arith.constant 126 : i32
    %570 = tpu.dynamic_rotate %470 by %c126_i32_267 dim 1 : vector<8x128xf32>, i32 -> vector<8x128xf32>
    %c126_i32_268 = arith.constant 126 : i32
    %571 = vector.broadcast %c126_i32_268 : i32 to vector<8x128xi32>
    %572 = arith.cmpi slt, %0, %571 : vector<8x128xi32>
    %cst_269 = arith.constant 0.000000e+00 : f32
    %573 = vector.broadcast %cst_269 : f32 to vector<8x128xf32>
    %574 = arith.select %572, %570, %573 : vector<8x128xi1>, vector<8x128xf32>
    %575 = tpu.concatenate %470, %569, %574 in 0 : vector<8x128xf32>, vector<8x128xf32>, vector<8x128xf32> -> vector<24x128xf32>
    %576 = arith.truncf %575 : vector<24x128xf32> to vector<24x128xbf16>
    %577 = arith.truncf %8 : vector<128x128xf32> to vector<128x128xbf16>
    %cst_270 = arith.constant dense<0.000000e+00> : vector<24x128xf32>
    %578 = tpu.matmul %576, %577, %cst_270 {dimension_numbers = #tpu.dot_dimension_numbers<[1], [0], [0], [1], [0, 0, 1, 1], [], []>} : vector<24x128xbf16>, vector<128x128xbf16>, vector<24x128xf32> -> vector<24x128xf32>
    %c0_271 = arith.constant 0 : index
    %c568 = arith.constant 568 : index
    %579 = vector.load %arg2[%c0_271, %c568] : memref<8x760xf32, #tpu.memory_space<vmem>>, vector<8x24xf32>
    %580 = arith.truncf %579 : vector<8x24xf32> to vector<8x24xbf16>
    %581 = arith.truncf %578 : vector<24x128xf32> to vector<24x128xbf16>
    %cst_272 = arith.constant dense<0.000000e+00> : vector<8x128xf32>
    %582 = tpu.matmul %580, %581, %cst_272 {dimension_numbers = #tpu.dot_dimension_numbers<[1], [0], [0], [1], [0, 0, 1, 1], [], []>} : vector<8x24xbf16>, vector<24x128xbf16>, vector<8x128xf32> -> vector<8x128xf32>
    %c0_273 = arith.constant 0 : index
    %c35 = arith.constant 35 : index
    %583 = vector.load %arg3[%c0_273, %c35] : memref<8x62xf32, #tpu.memory_space<vmem>>, vector<8x1xf32>
    %584 = vector.broadcast %583 : vector<8x1xf32> to vector<8x128xf32>
    %585 = arith.addf %582, %584 : vector<8x128xf32>
    %c15_i32_274 = arith.constant 15 : i32
    %586 = vector.broadcast %c15_i32_274 : i32 to vector<8x128xi32>
    %587 = arith.cmpi slt, %0, %586 : vector<8x128xi32>
    %cst_275 = arith.constant 0.000000e+00 : f32
    %588 = vector.broadcast %cst_275 : f32 to vector<8x128xf32>
    %589 = arith.select %587, %585, %588 : vector<8x128xi1>, vector<8x128xf32>
    %cst_276 = arith.constant 0.000000e+00 : f32
    %590 = vector.broadcast %cst_276 : f32 to vector<8x128xf32>
    %591 = arith.maximumf %589, %590 : vector<8x128xf32>
    %c127_i32_277 = arith.constant 127 : i32
    %592 = tpu.dynamic_rotate %591 by %c127_i32_277 dim 1 : vector<8x128xf32>, i32 -> vector<8x128xf32>
    %c127_i32_278 = arith.constant 127 : i32
    %593 = vector.broadcast %c127_i32_278 : i32 to vector<8x128xi32>
    %594 = arith.cmpi slt, %0, %593 : vector<8x128xi32>
    %cst_279 = arith.constant 0.000000e+00 : f32
    %595 = vector.broadcast %cst_279 : f32 to vector<8x128xf32>
    %596 = arith.select %594, %592, %595 : vector<8x128xi1>, vector<8x128xf32>
    %c126_i32_280 = arith.constant 126 : i32
    %597 = tpu.dynamic_rotate %591 by %c126_i32_280 dim 1 : vector<8x128xf32>, i32 -> vector<8x128xf32>
    %c126_i32_281 = arith.constant 126 : i32
    %598 = vector.broadcast %c126_i32_281 : i32 to vector<8x128xi32>
    %599 = arith.cmpi slt, %0, %598 : vector<8x128xi32>
    %cst_282 = arith.constant 0.000000e+00 : f32
    %600 = vector.broadcast %cst_282 : f32 to vector<8x128xf32>
    %601 = arith.select %599, %597, %600 : vector<8x128xi1>, vector<8x128xf32>
    %602 = tpu.concatenate %591, %596, %601 in 0 : vector<8x128xf32>, vector<8x128xf32>, vector<8x128xf32> -> vector<24x128xf32>
    %603 = arith.truncf %602 : vector<24x128xf32> to vector<24x128xbf16>
    %604 = arith.truncf %8 : vector<128x128xf32> to vector<128x128xbf16>
    %cst_283 = arith.constant dense<0.000000e+00> : vector<24x128xf32>
    %605 = tpu.matmul %603, %604, %cst_283 {dimension_numbers = #tpu.dot_dimension_numbers<[1], [0], [0], [1], [0, 0, 1, 1], [], []>} : vector<24x128xbf16>, vector<128x128xbf16>, vector<24x128xf32> -> vector<24x128xf32>
    %c0_284 = arith.constant 0 : index
    %c592 = arith.constant 592 : index
    %606 = vector.load %arg2[%c0_284, %c592] : memref<8x760xf32, #tpu.memory_space<vmem>>, vector<8x24xf32>
    %607 = arith.truncf %606 : vector<8x24xf32> to vector<8x24xbf16>
    %608 = arith.truncf %605 : vector<24x128xf32> to vector<24x128xbf16>
    %cst_285 = arith.constant dense<0.000000e+00> : vector<8x128xf32>
    %609 = tpu.matmul %607, %608, %cst_285 {dimension_numbers = #tpu.dot_dimension_numbers<[1], [0], [0], [1], [0, 0, 1, 1], [], []>} : vector<8x24xbf16>, vector<24x128xbf16>, vector<8x128xf32> -> vector<8x128xf32>
    %c0_286 = arith.constant 0 : index
    %c36 = arith.constant 36 : index
    %610 = vector.load %arg3[%c0_286, %c36] : memref<8x62xf32, #tpu.memory_space<vmem>>, vector<8x1xf32>
    %611 = vector.broadcast %610 : vector<8x1xf32> to vector<8x128xf32>
    %612 = arith.addf %609, %611 : vector<8x128xf32>
    %c7_i32_287 = arith.constant 7 : i32
    %613 = vector.broadcast %c7_i32_287 : i32 to vector<8x128xi32>
    %614 = arith.cmpi slt, %0, %613 : vector<8x128xi32>
    %cst_288 = arith.constant 0.000000e+00 : f32
    %615 = vector.broadcast %cst_288 : f32 to vector<8x128xf32>
    %616 = arith.select %614, %612, %615 : vector<8x128xi1>, vector<8x128xf32>
    %cst_289 = arith.constant 0.000000e+00 : f32
    %617 = vector.broadcast %cst_289 : f32 to vector<8x128xf32>
    %618 = arith.maximumf %616, %617 : vector<8x128xf32>
    %c127_i32_290 = arith.constant 127 : i32
    %619 = tpu.dynamic_rotate %618 by %c127_i32_290 dim 1 : vector<8x128xf32>, i32 -> vector<8x128xf32>
    %c127_i32_291 = arith.constant 127 : i32
    %620 = vector.broadcast %c127_i32_291 : i32 to vector<8x128xi32>
    %621 = arith.cmpi slt, %0, %620 : vector<8x128xi32>
    %cst_292 = arith.constant 0.000000e+00 : f32
    %622 = vector.broadcast %cst_292 : f32 to vector<8x128xf32>
    %623 = arith.select %621, %619, %622 : vector<8x128xi1>, vector<8x128xf32>
    %c126_i32_293 = arith.constant 126 : i32
    %624 = tpu.dynamic_rotate %618 by %c126_i32_293 dim 1 : vector<8x128xf32>, i32 -> vector<8x128xf32>
    %c126_i32_294 = arith.constant 126 : i32
    %625 = vector.broadcast %c126_i32_294 : i32 to vector<8x128xi32>
    %626 = arith.cmpi slt, %0, %625 : vector<8x128xi32>
    %cst_295 = arith.constant 0.000000e+00 : f32
    %627 = vector.broadcast %cst_295 : f32 to vector<8x128xf32>
    %628 = arith.select %626, %624, %627 : vector<8x128xi1>, vector<8x128xf32>
    %629 = tpu.concatenate %618, %623, %628 in 0 : vector<8x128xf32>, vector<8x128xf32>, vector<8x128xf32> -> vector<24x128xf32>
    %630 = arith.truncf %629 : vector<24x128xf32> to vector<24x128xbf16>
    %631 = arith.truncf %8 : vector<128x128xf32> to vector<128x128xbf16>
    %cst_296 = arith.constant dense<0.000000e+00> : vector<24x128xf32>
    %632 = tpu.matmul %630, %631, %cst_296 {dimension_numbers = #tpu.dot_dimension_numbers<[1], [0], [0], [1], [0, 0, 1, 1], [], []>} : vector<24x128xbf16>, vector<128x128xbf16>, vector<24x128xf32> -> vector<24x128xf32>
    %c0_297 = arith.constant 0 : index
    %c616 = arith.constant 616 : index
    %633 = vector.load %arg2[%c0_297, %c616] : memref<8x760xf32, #tpu.memory_space<vmem>>, vector<8x24xf32>
    %634 = arith.truncf %633 : vector<8x24xf32> to vector<8x24xbf16>
    %635 = arith.truncf %632 : vector<24x128xf32> to vector<24x128xbf16>
    %cst_298 = arith.constant dense<0.000000e+00> : vector<8x128xf32>
    %636 = tpu.matmul %634, %635, %cst_298 {dimension_numbers = #tpu.dot_dimension_numbers<[1], [0], [0], [1], [0, 0, 1, 1], [], []>} : vector<8x24xbf16>, vector<24x128xbf16>, vector<8x128xf32> -> vector<8x128xf32>
    %c0_299 = arith.constant 0 : index
    %c37 = arith.constant 37 : index
    %637 = vector.load %arg3[%c0_299, %c37] : memref<8x62xf32, #tpu.memory_space<vmem>>, vector<8x1xf32>
    %638 = vector.broadcast %637 : vector<8x1xf32> to vector<8x128xf32>
    %639 = arith.addf %636, %638 : vector<8x128xf32>
    %c3_i32_300 = arith.constant 3 : i32
    %640 = vector.broadcast %c3_i32_300 : i32 to vector<8x128xi32>
    %641 = arith.cmpi slt, %0, %640 : vector<8x128xi32>
    %cst_301 = arith.constant 0.000000e+00 : f32
    %642 = vector.broadcast %cst_301 : f32 to vector<8x128xf32>
    %643 = arith.select %641, %639, %642 : vector<8x128xi1>, vector<8x128xf32>
    %c1_i32_302 = arith.constant 1 : i32
    %644 = tpu.dynamic_rotate %643 by %c1_i32_302 dim 1 : vector<8x128xf32>, i32 -> vector<8x128xf32>
    %c1_i32_303 = arith.constant 1 : i32
    %645 = vector.broadcast %c1_i32_303 : i32 to vector<8x128xi32>
    %646 = arith.cmpi sge, %0, %645 : vector<8x128xi32>
    %cst_304 = arith.constant 0.000000e+00 : f32
    %647 = vector.broadcast %cst_304 : f32 to vector<8x128xf32>
    %648 = arith.select %646, %644, %647 : vector<8x128xi1>, vector<8x128xf32>
    %c127_i32_305 = arith.constant 127 : i32
    %649 = tpu.dynamic_rotate %643 by %c127_i32_305 dim 1 : vector<8x128xf32>, i32 -> vector<8x128xf32>
    %c127_i32_306 = arith.constant 127 : i32
    %650 = vector.broadcast %c127_i32_306 : i32 to vector<8x128xi32>
    %651 = arith.cmpi slt, %0, %650 : vector<8x128xi32>
    %cst_307 = arith.constant 0.000000e+00 : f32
    %652 = vector.broadcast %cst_307 : f32 to vector<8x128xf32>
    %653 = arith.select %651, %649, %652 : vector<8x128xi1>, vector<8x128xf32>
    %654 = tpu.concatenate %648, %643, %653 in 0 : vector<8x128xf32>, vector<8x128xf32>, vector<8x128xf32> -> vector<24x128xf32>
    %c0_308 = arith.constant 0 : index
    %c520 = arith.constant 520 : index
    %655 = vector.load %arg2[%c0_308, %c520] : memref<8x760xf32, #tpu.memory_space<vmem>>, vector<8x24xf32>
    %656 = arith.truncf %655 : vector<8x24xf32> to vector<8x24xbf16>
    %657 = arith.truncf %654 : vector<24x128xf32> to vector<24x128xbf16>
    %cst_309 = arith.constant dense<0.000000e+00> : vector<8x128xf32>
    %658 = tpu.matmul %656, %657, %cst_309 {dimension_numbers = #tpu.dot_dimension_numbers<[1], [0], [0], [1], [0, 0, 1, 1], [], []>} : vector<8x24xbf16>, vector<24x128xbf16>, vector<8x128xf32> -> vector<8x128xf32>
    %c0_310 = arith.constant 0 : index
    %c33 = arith.constant 33 : index
    %659 = vector.load %arg3[%c0_310, %c33] : memref<8x62xf32, #tpu.memory_space<vmem>>, vector<8x1xf32>
    %660 = vector.broadcast %659 : vector<8x1xf32> to vector<8x128xf32>
    %661 = arith.addf %658, %660 : vector<8x128xf32>
    %c3_i32_311 = arith.constant 3 : i32
    %662 = vector.broadcast %c3_i32_311 : i32 to vector<8x128xi32>
    %663 = arith.cmpi slt, %0, %662 : vector<8x128xi32>
    %cst_312 = arith.constant 0.000000e+00 : f32
    %664 = vector.broadcast %cst_312 : f32 to vector<8x128xf32>
    %665 = arith.select %663, %661, %664 : vector<8x128xi1>, vector<8x128xf32>
    %cst_313 = arith.constant 0.000000e+00 : f32
    %666 = vector.broadcast %cst_313 : f32 to vector<8x128xf32>
    %667 = arith.maximumf %665, %666 : vector<8x128xf32>
    %c1_i32_314 = arith.constant 1 : i32
    %668 = tpu.dynamic_rotate %667 by %c1_i32_314 dim 1 : vector<8x128xf32>, i32 -> vector<8x128xf32>
    %c1_i32_315 = arith.constant 1 : i32
    %669 = vector.broadcast %c1_i32_315 : i32 to vector<8x128xi32>
    %670 = arith.cmpi sge, %0, %669 : vector<8x128xi32>
    %cst_316 = arith.constant 0.000000e+00 : f32
    %671 = vector.broadcast %cst_316 : f32 to vector<8x128xf32>
    %672 = arith.select %670, %668, %671 : vector<8x128xi1>, vector<8x128xf32>
    %c127_i32_317 = arith.constant 127 : i32
    %673 = tpu.dynamic_rotate %667 by %c127_i32_317 dim 1 : vector<8x128xf32>, i32 -> vector<8x128xf32>
    %c127_i32_318 = arith.constant 127 : i32
    %674 = vector.broadcast %c127_i32_318 : i32 to vector<8x128xi32>
    %675 = arith.cmpi slt, %0, %674 : vector<8x128xi32>
    %cst_319 = arith.constant 0.000000e+00 : f32
    %676 = vector.broadcast %cst_319 : f32 to vector<8x128xf32>
    %677 = arith.select %675, %673, %676 : vector<8x128xi1>, vector<8x128xf32>
    %678 = tpu.concatenate %672, %667, %677 in 0 : vector<8x128xf32>, vector<8x128xf32>, vector<8x128xf32> -> vector<24x128xf32>
    %c0_320 = arith.constant 0 : index
    %c544 = arith.constant 544 : index
    %679 = vector.load %arg2[%c0_320, %c544] : memref<8x760xf32, #tpu.memory_space<vmem>>, vector<8x24xf32>
    %680 = arith.truncf %679 : vector<8x24xf32> to vector<8x24xbf16>
    %681 = arith.truncf %678 : vector<24x128xf32> to vector<24x128xbf16>
    %cst_321 = arith.constant dense<0.000000e+00> : vector<8x128xf32>
    %682 = tpu.matmul %680, %681, %cst_321 {dimension_numbers = #tpu.dot_dimension_numbers<[1], [0], [0], [1], [0, 0, 1, 1], [], []>} : vector<8x24xbf16>, vector<24x128xbf16>, vector<8x128xf32> -> vector<8x128xf32>
    %c0_322 = arith.constant 0 : index
    %c34 = arith.constant 34 : index
    %683 = vector.load %arg3[%c0_322, %c34] : memref<8x62xf32, #tpu.memory_space<vmem>>, vector<8x1xf32>
    %684 = vector.broadcast %683 : vector<8x1xf32> to vector<8x128xf32>
    %685 = arith.addf %682, %684 : vector<8x128xf32>
    %c3_i32_323 = arith.constant 3 : i32
    %686 = vector.broadcast %c3_i32_323 : i32 to vector<8x128xi32>
    %687 = arith.cmpi slt, %0, %686 : vector<8x128xi32>
    %cst_324 = arith.constant 0.000000e+00 : f32
    %688 = vector.broadcast %cst_324 : f32 to vector<8x128xf32>
    %689 = arith.select %687, %685, %688 : vector<8x128xi1>, vector<8x128xf32>
    %690 = arith.addf %643, %689 : vector<8x128xf32>
    %691 = arith.truncf %690 : vector<8x128xf32> to vector<8x128xbf16>
    %692 = arith.truncf %14 : vector<128x128xf32> to vector<128x128xbf16>
    %cst_325 = arith.constant dense<0.000000e+00> : vector<8x128xf32>
    %693 = tpu.matmul %691, %692, %cst_325 {dimension_numbers = #tpu.dot_dimension_numbers<[1], [0], [0], [1], [0, 0, 1, 1], [], []>} : vector<8x128xbf16>, vector<128x128xbf16>, vector<8x128xf32> -> vector<8x128xf32>
    %c1_i32_326 = arith.constant 1 : i32
    %694 = tpu.dynamic_rotate %693 by %c1_i32_326 dim 1 : vector<8x128xf32>, i32 -> vector<8x128xf32>
    %c1_i32_327 = arith.constant 1 : i32
    %695 = vector.broadcast %c1_i32_327 : i32 to vector<8x128xi32>
    %696 = arith.cmpi sge, %0, %695 : vector<8x128xi32>
    %cst_328 = arith.constant 0.000000e+00 : f32
    %697 = vector.broadcast %cst_328 : f32 to vector<8x128xf32>
    %698 = arith.select %696, %694, %697 : vector<8x128xi1>, vector<8x128xf32>
    %c2_i32_329 = arith.constant 2 : i32
    %699 = tpu.dynamic_rotate %693 by %c2_i32_329 dim 1 : vector<8x128xf32>, i32 -> vector<8x128xf32>
    %c2_i32_330 = arith.constant 2 : i32
    %700 = vector.broadcast %c2_i32_330 : i32 to vector<8x128xi32>
    %701 = arith.cmpi sge, %0, %700 : vector<8x128xi32>
    %cst_331 = arith.constant 0.000000e+00 : f32
    %702 = vector.broadcast %cst_331 : f32 to vector<8x128xf32>
    %703 = arith.select %701, %699, %702 : vector<8x128xi1>, vector<8x128xf32>
    %704 = tpu.concatenate %693, %698, %703 in 0 : vector<8x128xf32>, vector<8x128xf32>, vector<8x128xf32> -> vector<24x128xf32>
    %c0_332 = arith.constant 0 : index
    %c640 = arith.constant 640 : index
    %705 = vector.load %arg2[%c0_332, %c640] : memref<8x760xf32, #tpu.memory_space<vmem>>, vector<8x24xf32>
    %706 = arith.truncf %705 : vector<8x24xf32> to vector<8x24xbf16>
    %707 = arith.truncf %704 : vector<24x128xf32> to vector<24x128xbf16>
    %cst_333 = arith.constant dense<0.000000e+00> : vector<8x128xf32>
    %708 = tpu.matmul %706, %707, %cst_333 {dimension_numbers = #tpu.dot_dimension_numbers<[1], [0], [0], [1], [0, 0, 1, 1], [], []>} : vector<8x24xbf16>, vector<24x128xbf16>, vector<8x128xf32> -> vector<8x128xf32>
    %c0_334 = arith.constant 0 : index
    %c38 = arith.constant 38 : index
    %709 = vector.load %arg3[%c0_334, %c38] : memref<8x62xf32, #tpu.memory_space<vmem>>, vector<8x1xf32>
    %710 = vector.broadcast %709 : vector<8x1xf32> to vector<8x128xf32>
    %711 = arith.addf %708, %710 : vector<8x128xf32>
    %c7_i32_335 = arith.constant 7 : i32
    %712 = vector.broadcast %c7_i32_335 : i32 to vector<8x128xi32>
    %713 = arith.cmpi slt, %0, %712 : vector<8x128xi32>
    %cst_336 = arith.constant 0.000000e+00 : f32
    %714 = vector.broadcast %cst_336 : f32 to vector<8x128xf32>
    %715 = arith.select %713, %711, %714 : vector<8x128xi1>, vector<8x128xf32>
    %cst_337 = arith.constant 0.000000e+00 : f32
    %716 = vector.broadcast %cst_337 : f32 to vector<8x128xf32>
    %717 = arith.maximumf %715, %716 : vector<8x128xf32>
    %718 = arith.truncf %717 : vector<8x128xf32> to vector<8x128xbf16>
    %719 = arith.truncf %14 : vector<128x128xf32> to vector<128x128xbf16>
    %cst_338 = arith.constant dense<0.000000e+00> : vector<8x128xf32>
    %720 = tpu.matmul %718, %719, %cst_338 {dimension_numbers = #tpu.dot_dimension_numbers<[1], [0], [0], [1], [0, 0, 1, 1], [], []>} : vector<8x128xbf16>, vector<128x128xbf16>, vector<8x128xf32> -> vector<8x128xf32>
    %c1_i32_339 = arith.constant 1 : i32
    %721 = tpu.dynamic_rotate %720 by %c1_i32_339 dim 1 : vector<8x128xf32>, i32 -> vector<8x128xf32>
    %c1_i32_340 = arith.constant 1 : i32
    %722 = vector.broadcast %c1_i32_340 : i32 to vector<8x128xi32>
    %723 = arith.cmpi sge, %0, %722 : vector<8x128xi32>
    %cst_341 = arith.constant 0.000000e+00 : f32
    %724 = vector.broadcast %cst_341 : f32 to vector<8x128xf32>
    %725 = arith.select %723, %721, %724 : vector<8x128xi1>, vector<8x128xf32>
    %c2_i32_342 = arith.constant 2 : i32
    %726 = tpu.dynamic_rotate %720 by %c2_i32_342 dim 1 : vector<8x128xf32>, i32 -> vector<8x128xf32>
    %c2_i32_343 = arith.constant 2 : i32
    %727 = vector.broadcast %c2_i32_343 : i32 to vector<8x128xi32>
    %728 = arith.cmpi sge, %0, %727 : vector<8x128xi32>
    %cst_344 = arith.constant 0.000000e+00 : f32
    %729 = vector.broadcast %cst_344 : f32 to vector<8x128xf32>
    %730 = arith.select %728, %726, %729 : vector<8x128xi1>, vector<8x128xf32>
    %731 = tpu.concatenate %720, %725, %730 in 0 : vector<8x128xf32>, vector<8x128xf32>, vector<8x128xf32> -> vector<24x128xf32>
    %c0_345 = arith.constant 0 : index
    %c664 = arith.constant 664 : index
    %732 = vector.load %arg2[%c0_345, %c664] : memref<8x760xf32, #tpu.memory_space<vmem>>, vector<8x24xf32>
    %733 = arith.truncf %732 : vector<8x24xf32> to vector<8x24xbf16>
    %734 = arith.truncf %731 : vector<24x128xf32> to vector<24x128xbf16>
    %cst_346 = arith.constant dense<0.000000e+00> : vector<8x128xf32>
    %735 = tpu.matmul %733, %734, %cst_346 {dimension_numbers = #tpu.dot_dimension_numbers<[1], [0], [0], [1], [0, 0, 1, 1], [], []>} : vector<8x24xbf16>, vector<24x128xbf16>, vector<8x128xf32> -> vector<8x128xf32>
    %c0_347 = arith.constant 0 : index
    %c39 = arith.constant 39 : index
    %736 = vector.load %arg3[%c0_347, %c39] : memref<8x62xf32, #tpu.memory_space<vmem>>, vector<8x1xf32>
    %737 = vector.broadcast %736 : vector<8x1xf32> to vector<8x128xf32>
    %738 = arith.addf %735, %737 : vector<8x128xf32>
    %c15_i32_348 = arith.constant 15 : i32
    %739 = vector.broadcast %c15_i32_348 : i32 to vector<8x128xi32>
    %740 = arith.cmpi slt, %0, %739 : vector<8x128xi32>
    %cst_349 = arith.constant 0.000000e+00 : f32
    %741 = vector.broadcast %cst_349 : f32 to vector<8x128xf32>
    %742 = arith.select %740, %738, %741 : vector<8x128xi1>, vector<8x128xf32>
    %cst_350 = arith.constant 0.000000e+00 : f32
    %743 = vector.broadcast %cst_350 : f32 to vector<8x128xf32>
    %744 = arith.maximumf %742, %743 : vector<8x128xf32>
    %745 = arith.truncf %744 : vector<8x128xf32> to vector<8x128xbf16>
    %746 = arith.truncf %14 : vector<128x128xf32> to vector<128x128xbf16>
    %cst_351 = arith.constant dense<0.000000e+00> : vector<8x128xf32>
    %747 = tpu.matmul %745, %746, %cst_351 {dimension_numbers = #tpu.dot_dimension_numbers<[1], [0], [0], [1], [0, 0, 1, 1], [], []>} : vector<8x128xbf16>, vector<128x128xbf16>, vector<8x128xf32> -> vector<8x128xf32>
    %c1_i32_352 = arith.constant 1 : i32
    %748 = tpu.dynamic_rotate %747 by %c1_i32_352 dim 1 : vector<8x128xf32>, i32 -> vector<8x128xf32>
    %c1_i32_353 = arith.constant 1 : i32
    %749 = vector.broadcast %c1_i32_353 : i32 to vector<8x128xi32>
    %750 = arith.cmpi sge, %0, %749 : vector<8x128xi32>
    %cst_354 = arith.constant 0.000000e+00 : f32
    %751 = vector.broadcast %cst_354 : f32 to vector<8x128xf32>
    %752 = arith.select %750, %748, %751 : vector<8x128xi1>, vector<8x128xf32>
    %c2_i32_355 = arith.constant 2 : i32
    %753 = tpu.dynamic_rotate %747 by %c2_i32_355 dim 1 : vector<8x128xf32>, i32 -> vector<8x128xf32>
    %c2_i32_356 = arith.constant 2 : i32
    %754 = vector.broadcast %c2_i32_356 : i32 to vector<8x128xi32>
    %755 = arith.cmpi sge, %0, %754 : vector<8x128xi32>
    %cst_357 = arith.constant 0.000000e+00 : f32
    %756 = vector.broadcast %cst_357 : f32 to vector<8x128xf32>
    %757 = arith.select %755, %753, %756 : vector<8x128xi1>, vector<8x128xf32>
    %758 = tpu.concatenate %747, %752, %757 in 0 : vector<8x128xf32>, vector<8x128xf32>, vector<8x128xf32> -> vector<24x128xf32>
    %c0_358 = arith.constant 0 : index
    %c688 = arith.constant 688 : index
    %759 = vector.load %arg2[%c0_358, %c688] : memref<8x760xf32, #tpu.memory_space<vmem>>, vector<8x24xf32>
    %760 = arith.truncf %759 : vector<8x24xf32> to vector<8x24xbf16>
    %761 = arith.truncf %758 : vector<24x128xf32> to vector<24x128xbf16>
    %cst_359 = arith.constant dense<0.000000e+00> : vector<8x128xf32>
    %762 = tpu.matmul %760, %761, %cst_359 {dimension_numbers = #tpu.dot_dimension_numbers<[1], [0], [0], [1], [0, 0, 1, 1], [], []>} : vector<8x24xbf16>, vector<24x128xbf16>, vector<8x128xf32> -> vector<8x128xf32>
    %c0_360 = arith.constant 0 : index
    %c40_361 = arith.constant 40 : index
    %763 = vector.load %arg3[%c0_360, %c40_361] : memref<8x62xf32, #tpu.memory_space<vmem>>, vector<8x1xf32>
    %764 = vector.broadcast %763 : vector<8x1xf32> to vector<8x128xf32>
    %765 = arith.addf %762, %764 : vector<8x128xf32>
    %c31_i32 = arith.constant 31 : i32
    %766 = vector.broadcast %c31_i32 : i32 to vector<8x128xi32>
    %767 = arith.cmpi slt, %0, %766 : vector<8x128xi32>
    %cst_362 = arith.constant 0.000000e+00 : f32
    %768 = vector.broadcast %cst_362 : f32 to vector<8x128xf32>
    %769 = arith.select %767, %765, %768 : vector<8x128xi1>, vector<8x128xf32>
    %c0_363 = arith.constant 0 : index
    %c712 = arith.constant 712 : index
    %770 = vector.load %arg2[%c0_363, %c712] : memref<8x760xf32, #tpu.memory_space<vmem>>, vector<8x8xf32>
    %771 = arith.truncf %770 : vector<8x8xf32> to vector<8x8xbf16>
    %772 = arith.truncf %769 : vector<8x128xf32> to vector<8x128xbf16>
    %cst_364 = arith.constant dense<0.000000e+00> : vector<8x128xf32>
    %773 = tpu.matmul %771, %772, %cst_364 {dimension_numbers = #tpu.dot_dimension_numbers<[1], [0], [0], [1], [0, 0, 1, 1], [], []>} : vector<8x8xbf16>, vector<8x128xbf16>, vector<8x128xf32> -> vector<8x128xf32>
    %c0_365 = arith.constant 0 : index
    %c41 = arith.constant 41 : index
    %774 = vector.load %arg3[%c0_365, %c41] : memref<8x62xf32, #tpu.memory_space<vmem>>, vector<8x1xf32>
    %775 = vector.broadcast %774 : vector<8x1xf32> to vector<8x128xf32>
    %776 = arith.addf %773, %775 : vector<8x128xf32>
    %c31_i32_366 = arith.constant 31 : i32
    %777 = vector.broadcast %c31_i32_366 : i32 to vector<8x128xi32>
    %778 = arith.cmpi slt, %0, %777 : vector<8x128xi32>
    %cst_367 = arith.constant 0.000000e+00 : f32
    %779 = vector.broadcast %cst_367 : f32 to vector<8x128xf32>
    %780 = arith.select %778, %776, %779 : vector<8x128xi1>, vector<8x128xf32>
    %781 = arith.mulf %564, %780 : vector<8x128xf32>
    %782 = arith.addf %470, %781 : vector<8x128xf32>
    %c0_368 = arith.constant 0 : index
    %c42 = arith.constant 42 : index
    %783 = vector.load %arg3[%c0_368, %c42] : memref<8x62xf32, #tpu.memory_space<vmem>>, vector<8x8xf32>
    %c0_369 = arith.constant 0 : index
    %c50 = arith.constant 50 : index
    %784 = vector.load %arg3[%c0_369, %c50] : memref<8x62xf32, #tpu.memory_space<vmem>>, vector<8x1xf32>
    %785 = arith.mulf %782, %782 : vector<8x128xf32>
    %cst_370 = arith.constant dense<0.000000e+00> : vector<8x128xf32>
    %786 = tpu.matmul %783, %785, %cst_370 {dimension_numbers = #tpu.dot_dimension_numbers<[1], [0], [0], [1], [0, 0, 1, 1], [], []>} : vector<8x8xf32>, vector<8x128xf32>, vector<8x128xf32> -> vector<8x128xf32>
    %787 = vector.broadcast %784 : vector<8x1xf32> to vector<8x128xf32>
    %788 = arith.addf %786, %787 : vector<8x128xf32>
    %cst_371 = arith.constant 9.99999971E-10 : f32
    %789 = vector.broadcast %cst_371 : f32 to vector<8x128xf32>
    %790 = arith.maximumf %788, %789 : vector<8x128xf32>
    %791 = math.rsqrt %790 : vector<8x128xf32>
    %792 = arith.mulf %782, %791 : vector<8x128xf32>
    %793 = arith.truncf %792 : vector<8x128xf32> to vector<8x128xbf16>
    %794 = arith.truncf %14 : vector<128x128xf32> to vector<128x128xbf16>
    %cst_372 = arith.constant dense<0.000000e+00> : vector<8x128xf32>
    %795 = tpu.matmul %793, %794, %cst_372 {dimension_numbers = #tpu.dot_dimension_numbers<[1], [0], [0], [1], [0, 0, 1, 1], [], []>} : vector<8x128xbf16>, vector<128x128xbf16>, vector<8x128xf32> -> vector<8x128xf32>
    %c1_i32_373 = arith.constant 1 : i32
    %796 = tpu.dynamic_rotate %795 by %c1_i32_373 dim 1 : vector<8x128xf32>, i32 -> vector<8x128xf32>
    %c1_i32_374 = arith.constant 1 : i32
    %797 = vector.broadcast %c1_i32_374 : i32 to vector<8x128xi32>
    %798 = arith.cmpi sge, %0, %797 : vector<8x128xi32>
    %cst_375 = arith.constant 0.000000e+00 : f32
    %799 = vector.broadcast %cst_375 : f32 to vector<8x128xf32>
    %800 = arith.select %798, %796, %799 : vector<8x128xi1>, vector<8x128xf32>
    %801 = tpu.concatenate %795, %800 in 0 : vector<8x128xf32>, vector<8x128xf32> -> vector<16x128xf32>
    %c0_376 = arith.constant 0 : index
    %c720 = arith.constant 720 : index
    %802 = vector.load %arg2[%c0_376, %c720] : memref<8x760xf32, #tpu.memory_space<vmem>>, vector<8x16xf32>
    %803 = arith.truncf %802 : vector<8x16xf32> to vector<8x16xbf16>
    %804 = arith.truncf %801 : vector<16x128xf32> to vector<16x128xbf16>
    %cst_377 = arith.constant dense<0.000000e+00> : vector<8x128xf32>
    %805 = tpu.matmul %803, %804, %cst_377 {dimension_numbers = #tpu.dot_dimension_numbers<[1], [0], [0], [1], [0, 0, 1, 1], [], []>} : vector<8x16xbf16>, vector<16x128xbf16>, vector<8x128xf32> -> vector<8x128xf32>
    %c0_378 = arith.constant 0 : index
    %c51 = arith.constant 51 : index
    %806 = vector.load %arg3[%c0_378, %c51] : memref<8x62xf32, #tpu.memory_space<vmem>>, vector<8x1xf32>
    %807 = vector.broadcast %806 : vector<8x1xf32> to vector<8x128xf32>
    %808 = arith.addf %805, %807 : vector<8x128xf32>
    %c64_i32 = arith.constant 64 : i32
    %809 = vector.broadcast %c64_i32 : i32 to vector<8x128xi32>
    %810 = arith.cmpi slt, %0, %809 : vector<8x128xi32>
    %cst_379 = arith.constant 0.000000e+00 : f32
    %811 = vector.broadcast %cst_379 : f32 to vector<8x128xf32>
    %812 = arith.select %810, %808, %811 : vector<8x128xi1>, vector<8x128xf32>
    %c0_380 = arith.constant 0 : index
    %c52 = arith.constant 52 : index
    %813 = vector.load %arg3[%c0_380, %c52] : memref<8x62xf32, #tpu.memory_space<vmem>>, vector<8x8xf32>
    %c0_381 = arith.constant 0 : index
    %c60 = arith.constant 60 : index
    %814 = vector.load %arg3[%c0_381, %c60] : memref<8x62xf32, #tpu.memory_space<vmem>>, vector<8x1xf32>
    %815 = arith.mulf %812, %812 : vector<8x128xf32>
    %cst_382 = arith.constant dense<0.000000e+00> : vector<8x128xf32>
    %816 = tpu.matmul %813, %815, %cst_382 {dimension_numbers = #tpu.dot_dimension_numbers<[1], [0], [0], [1], [0, 0, 1, 1], [], []>} : vector<8x8xf32>, vector<8x128xf32>, vector<8x128xf32> -> vector<8x128xf32>
    %817 = vector.broadcast %814 : vector<8x1xf32> to vector<8x128xf32>
    %818 = arith.addf %816, %817 : vector<8x128xf32>
    %cst_383 = arith.constant 9.99999971E-10 : f32
    %819 = vector.broadcast %cst_383 : f32 to vector<8x128xf32>
    %820 = arith.maximumf %818, %819 : vector<8x128xf32>
    %821 = math.rsqrt %820 : vector<8x128xf32>
    %822 = arith.mulf %812, %821 : vector<8x128xf32>
    %823 = arith.truncf %822 : vector<8x128xf32> to vector<8x128xbf16>
    %824 = arith.truncf %14 : vector<128x128xf32> to vector<128x128xbf16>
    %cst_384 = arith.constant dense<0.000000e+00> : vector<8x128xf32>
    %825 = tpu.matmul %823, %824, %cst_384 {dimension_numbers = #tpu.dot_dimension_numbers<[1], [0], [0], [1], [0, 0, 1, 1], [], []>} : vector<8x128xbf16>, vector<128x128xbf16>, vector<8x128xf32> -> vector<8x128xf32>
    %c127_i32_385 = arith.constant 127 : i32
    %826 = tpu.dynamic_rotate %825 by %c127_i32_385 dim 1 : vector<8x128xf32>, i32 -> vector<8x128xf32>
    %c127_i32_386 = arith.constant 127 : i32
    %827 = vector.broadcast %c127_i32_386 : i32 to vector<8x128xi32>
    %828 = arith.cmpi slt, %0, %827 : vector<8x128xi32>
    %cst_387 = arith.constant 0.000000e+00 : f32
    %829 = vector.broadcast %cst_387 : f32 to vector<8x128xf32>
    %830 = arith.select %828, %826, %829 : vector<8x128xi1>, vector<8x128xf32>
    %c1_i32_388 = arith.constant 1 : i32
    %831 = tpu.dynamic_rotate %825 by %c1_i32_388 dim 1 : vector<8x128xf32>, i32 -> vector<8x128xf32>
    %c1_i32_389 = arith.constant 1 : i32
    %832 = vector.broadcast %c1_i32_389 : i32 to vector<8x128xi32>
    %833 = arith.cmpi sge, %0, %832 : vector<8x128xi32>
    %cst_390 = arith.constant 0.000000e+00 : f32
    %834 = vector.broadcast %cst_390 : f32 to vector<8x128xf32>
    %835 = arith.select %833, %831, %834 : vector<8x128xi1>, vector<8x128xf32>
    %836 = tpu.concatenate %830, %825, %835 in 0 : vector<8x128xf32>, vector<8x128xf32>, vector<8x128xf32> -> vector<24x128xf32>
    %c0_391 = arith.constant 0 : index
    %c736 = arith.constant 736 : index
    %837 = vector.load %arg2[%c0_391, %c736] : memref<8x760xf32, #tpu.memory_space<vmem>>, vector<8x24xf32>
    %838 = arith.truncf %837 : vector<8x24xf32> to vector<8x24xbf16>
    %839 = arith.truncf %836 : vector<24x128xf32> to vector<24x128xbf16>
    %cst_392 = arith.constant dense<0.000000e+00> : vector<8x128xf32>
    %840 = tpu.matmul %838, %839, %cst_392 {dimension_numbers = #tpu.dot_dimension_numbers<[1], [0], [0], [1], [0, 0, 1, 1], [], []>} : vector<8x24xbf16>, vector<24x128xbf16>, vector<8x128xf32> -> vector<8x128xf32>
    %c0_393 = arith.constant 0 : index
    %c61 = arith.constant 61 : index
    %841 = vector.load %arg3[%c0_393, %c61] : memref<8x62xf32, #tpu.memory_space<vmem>>, vector<8x1xf32>
    %842 = vector.broadcast %841 : vector<8x1xf32> to vector<8x128xf32>
    %843 = arith.addf %840, %842 : vector<8x128xf32>
    %c128_i32 = arith.constant 128 : i32
    %844 = vector.broadcast %c128_i32 : i32 to vector<8x128xi32>
    %845 = arith.cmpi slt, %0, %844 : vector<8x128xi32>
    %cst_394 = arith.constant 0.000000e+00 : f32
    %846 = vector.broadcast %cst_394 : f32 to vector<8x128xf32>
    %847 = arith.select %845, %843, %846 : vector<8x128xi1>, vector<8x128xf32>
    %848 = vector.extract_strided_slice %847 {offsets = [0, 0], sizes = [1, 128], strides = [1, 1]} : vector<8x128xf32> to vector<1x128xf32>
    %c0_395 = arith.constant 0 : index
    %c0_396 = arith.constant 0 : index
    %849 = vector.load %arg4[%c0_395, %c0_396] : memref<128x256xbf16, #tpu.memory_space<vmem>>, vector<128x256xbf16>
    %850 = arith.truncf %848 : vector<1x128xf32> to vector<1x128xbf16>
    %cst_397 = arith.constant dense<0.000000e+00> : vector<1x256xf32>
    %851 = tpu.matmul %850, %849, %cst_397 {dimension_numbers = #tpu.dot_dimension_numbers<[1], [0], [0], [1], [0, 0, 1, 1], [], []>} : vector<1x128xbf16>, vector<128x256xbf16>, vector<1x256xf32> -> vector<1x256xf32>
    %c0_398 = arith.constant 0 : index
    %c0_399 = arith.constant 0 : index
    %852 = vector.load %arg8[%c0_398, %c0_399] : memref<1x1824xf32, #tpu.memory_space<vmem>>, vector<1x256xf32>
    %853 = arith.addf %851, %852 : vector<1x256xf32>
    %c0_400 = arith.constant 0 : index
    %c0_401 = arith.constant 0 : index
    %854 = vector.load %arg5[%c0_400, %c0_401] : memref<256x512xbf16, #tpu.memory_space<vmem>>, vector<256x512xbf16>
    %855 = arith.truncf %853 : vector<1x256xf32> to vector<1x256xbf16>
    %cst_402 = arith.constant dense<0.000000e+00> : vector<1x512xf32>
    %856 = tpu.matmul %855, %854, %cst_402 {dimension_numbers = #tpu.dot_dimension_numbers<[1], [0], [0], [1], [0, 0, 1, 1], [], []>} : vector<1x256xbf16>, vector<256x512xbf16>, vector<1x512xf32> -> vector<1x512xf32>
    %c0_403 = arith.constant 0 : index
    %c256_404 = arith.constant 256 : index
    %857 = vector.load %arg8[%c0_403, %c256_404] : memref<1x1824xf32, #tpu.memory_space<vmem>>, vector<1x512xf32>
    %858 = arith.addf %856, %857 : vector<1x512xf32>
    %c0_405 = arith.constant 0 : index
    %c0_406 = arith.constant 0 : index
    %859 = vector.load %arg6[%c0_405, %c0_406] : memref<512x1024xbf16, #tpu.memory_space<vmem>>, vector<512x1024xbf16>
    %860 = arith.truncf %858 : vector<1x512xf32> to vector<1x512xbf16>
    %cst_407 = arith.constant dense<0.000000e+00> : vector<1x1024xf32>
    %861 = tpu.matmul %860, %859, %cst_407 {dimension_numbers = #tpu.dot_dimension_numbers<[1], [0], [0], [1], [0, 0, 1, 1], [], []>} : vector<1x512xbf16>, vector<512x1024xbf16>, vector<1x1024xf32> -> vector<1x1024xf32>
    %c0_408 = arith.constant 0 : index
    %c768 = arith.constant 768 : index
    %862 = vector.load %arg8[%c0_408, %c768] : memref<1x1824xf32, #tpu.memory_space<vmem>>, vector<1x1024xf32>
    %863 = arith.addf %861, %862 : vector<1x1024xf32>
    %c0_409 = arith.constant 0 : index
    %c0_410 = arith.constant 0 : index
    %864 = vector.load %arg7[%c0_409, %c0_410] : memref<1024x32xbf16, #tpu.memory_space<vmem>>, vector<1024x32xbf16>
    %865 = arith.truncf %863 : vector<1x1024xf32> to vector<1x1024xbf16>
    %cst_411 = arith.constant dense<0.000000e+00> : vector<1x32xf32>
    %866 = tpu.matmul %865, %864, %cst_411 {dimension_numbers = #tpu.dot_dimension_numbers<[1], [0], [0], [1], [0, 0, 1, 1], [], []>} : vector<1x1024xbf16>, vector<1024x32xbf16>, vector<1x32xf32> -> vector<1x32xf32>
    %c0_412 = arith.constant 0 : index
    %c1792 = arith.constant 1792 : index
    %867 = vector.load %arg8[%c0_412, %c1792] : memref<1x1824xf32, #tpu.memory_space<vmem>>, vector<1x32xf32>
    %868 = arith.addf %866, %867 : vector<1x32xf32>
    %c0_413 = arith.constant 0 : index
    %c0_414 = arith.constant 0 : index
    %c0_415 = arith.constant 0 : index
    %869 = vector.load %arg9[%c0_413, %c0_414, %c0_415] : memref<1x1x32xf32, #tpu.memory_space<vmem>>, vector<1x1x32xf32>
    %870 = vector.shape_cast %869 : vector<1x1x32xf32> to vector<1x32xf32>
    %871 = vector.shape_cast %868 : vector<1x32xf32> to vector<1x1x32xf32>
    tpu.vector_store %arg9[%c0_413, %c0_414, %c0_415], %871 {strides = array<i32>} : memref<1x1x32xf32, #tpu.memory_space<vmem>>, vector<1x1x32xf32>,
    return
  }
  func.func @transform_0(%arg0: i32) -> (i32, i32, i32) {
    %c0_i32 = arith.constant 0 : i32
    %c0_i32_0 = arith.constant 0 : i32
    %c0_i32_1 = arith.constant 0 : i32
    return %arg0, %c0_i32, %c0_i32_0 : i32, i32, i32
  }
  func.func @transform_1(%arg0: i32) -> (i32, i32) {
    %c0_i32 = arith.constant 0 : i32
    %c0_i32_0 = arith.constant 0 : i32
    %c0_i32_1 = arith.constant 0 : i32
    return %c0_i32, %c0_i32_0 : i32, i32
  }
  func.func @transform_2(%arg0: i32) -> (i32, i32) {
    %c0_i32 = arith.constant 0 : i32
    %c0_i32_0 = arith.constant 0 : i32
    %c0_i32_1 = arith.constant 0 : i32
    return %c0_i32, %c0_i32_0 : i32, i32
  }
  func.func @transform_3(%arg0: i32) -> (i32, i32) {
    %c0_i32 = arith.constant 0 : i32
    %c0_i32_0 = arith.constant 0 : i32
    %c0_i32_1 = arith.constant 0 : i32
    return %c0_i32, %c0_i32_0 : i32, i32
  }
  func.func @transform_4(%arg0: i32) -> (i32, i32) {
    %c0_i32 = arith.constant 0 : i32
    %c0_i32_0 = arith.constant 0 : i32
    %c0_i32_1 = arith.constant 0 : i32
    return %c0_i32, %c0_i32_0 : i32, i32
  }
  func.func @transform_5(%arg0: i32) -> (i32, i32) {
    %c0_i32 = arith.constant 0 : i32
    %c0_i32_0 = arith.constant 0 : i32
    %c0_i32_1 = arith.constant 0 : i32
    return %c0_i32, %c0_i32_0 : i32, i32
  }
  func.func @transform_6(%arg0: i32) -> (i32, i32) {
    %c0_i32 = arith.constant 0 : i32
    %c0_i32_0 = arith.constant 0 : i32
    %c0_i32_1 = arith.constant 0 : i32
    return %c0_i32, %c0_i32_0 : i32, i32
  }
  func.func @transform_7(%arg0: i32) -> (i32, i32) {
    %c0_i32 = arith.constant 0 : i32
    %c0_i32_0 = arith.constant 0 : i32
    %c0_i32_1 = arith.constant 0 : i32
    return %c0_i32, %c0_i32_0 : i32, i32
  }
  func.func @transform_8(%arg0: i32) -> (i32, i32, i32) {
    %c0_i32 = arith.constant 0 : i32
    %c0_i32_0 = arith.constant 0 : i32
    %c0_i32_1 = arith.constant 0 : i32
    return %arg0, %c0_i32, %c0_i32_0 : i32, i32, i32
  }
}

</mosaic_0001>

<bundles_post_ra>
// kernel: tucodec_decode_forward.1
= control target key start
LH: loop header
LB: loop body
LE: loop exit
PB: predicated region body
PF: predicated region fallthrough
CT: control target
= control target key end

     0   :  { %13 = vsyncpa [#allocation3], 0  ;;  %s9997_s0 = inlined_call_operand.vmem [shape: f32[2,8,128], index: 0, kind: input, shape index: {}]   ;;  %s9998_s1 = inlined_call_operand.vmem [shape: f32[8,760], index: 1, kind: input, shape index: {}]   ;;  %s9999_s2 = inlined_call_operand.vmem [shape: f32[8,62], index: 2, kind: input, shape index: {}]   ;;  %s10000_s3 = inlined_call_operand.vmem [shape: bf16[128,256], index: 3, kind: input, shape index: {}]   ;;  %s10001_s4 = inlined_call_operand.vmem [shape: bf16[256,512], index: 4, kind: input, shape index: {}]   ;;  %s10002_s5 = inlined_call_operand.hbm [shape: bf16[512,1024], index: 5, kind: input, shape index: {}]   ;;  %s10003_s6 = inlined_call_operand.vmem [shape: bf16[1024,32], index: 6, kind: input, shape index: {}]   ;;  %s10004_s7 = inlined_call_operand.hbm [shape: f32[1,1824], index: 7, kind: input, shape index: {}]   ;;  %s10005_s8 = inlined_call_operand.hbm [shape: f32[2,1,32], index: 8, kind: output, shape index: {}]  }
   0x1   :  { %14 = vsyncpa [#allocation6], 0 }
   0x2   :  { %15 = vsyncpa [#allocation4], 0 }
   0x3   :  { %17 = vsyncpa [#allocation4 + $0x1], 0  ;;  %s8088_s27 = smov 0   ;;  %s8090_s28 = smov 0  }
   0x4   :  { %s8092_s29 = smov 0   ;;  %s8094_s30 = smov 0  }
   0x5 LB: > { %s8109_s9 = sadd.s32 4294967295, %s7975_s30   ;;  %s5306_s10 = sadd.s32 4294967294, %s7975_s30   ;;  %s7975_s30 = sphi %s8094_s30, %s10237_s30   ;;  %s7971_s29 = sphi %s8092_s29, %s10236_s29   ;;  %s7967_s28 = sphi %s8090_s28, %s10235_s28   ;;  %s7963_s27 = sphi %s8088_s27, %s10234_s27  }
   0x6   : > { %s8113_s11 = sadd.s32 1, %s7975_s30   ;;  %s203_s12 = sadd.s32 1, %s7971_s29 }
   0x7   : > { %s200_s13 = ssub.s32 %s7975_s30, %s8113_s11  ;;  %p213_p0 = scmp.ne.s32.totalorder %s7971_s29, %s7967_s28 }
   0x8   : > { %p201_p1 = scmp.eq.s32.totalorder %s200_s13, 0  ;;  %p214_p2 = scmp.eq.s32.totalorder %s8109_s9, 1 }
   0x9   : > { %p219_p3 = scmp.ne.s32.totalorder %s7967_s28, %s7963_s27  ;;  %p220_p4 = scmp.eq.s32.totalorder %s5306_s10, 1 }
   0xa   : > { %s8124_s14 = scalar_select %p201_p1, %s7971_s29, %s203_s12  }
   0xb   : > { %p8126_p5 = por %p214_p2, %p213_p0  ;;  %p8130_p6 = por %p220_p4, %p219_p3 }
   0xc   : > { %p5307_p7 = scmp.ge.s32.totalorder %s7975_s30, 1  ;;  %p227_p8 = scmp.lt.s32.totalorder %s7975_s30, 3 }
   0xd   : > { %p7695_p9 = scmp.eq.s32.totalorder %s8109_s9, 0  ;;  %s250_s20 = sshll.u32 %s10002_s5, 4  ;;  %s251_s20 = int_to_ptr.hbm [resolvable:$true] %s250_s20 }
   0xe   : > { %p8137_p10 = pnand %p5307_p7, %p227_p8  ;;  %s7977_s21 = smov [#allocation2]  }
   0xf   : > { %s252_s22 = sshll.u32 %s7977_s21, 4  ;;  %s268_s25 = sshll.u32 %s10004_s7, 4  ;;  %s253_s22 = int_to_ptr.vmem [resolvable:$true] %s252_s22  ;;  %s269_s25 = int_to_ptr.hbm [resolvable:$true] %s268_s25 }
  0x10   : > { %p7684_p11 = pneg %p8137_p10  ;;  %s7978_s26 = smov 512  }
  0x11   : > { %s7979_s10 = smov 32   ;;  %s7980_s12 = smov [#allocation5]  }
  0x12   : > { %p7685_p12 = pnand %p7695_p9, %p7684_p11  ;;  %s270_s13 = sshll.u32 %s7980_s12, 4  ;;  %s271_s13 = int_to_ptr.vmem [resolvable:$true] %s270_s13 }
  0x13   : > { %290 = sbr.rel (%p8137_p10) target bundleno = 10153 (0x27a9), region = 52 }
  0x14   : > { %7687 = dma.hbm_to_vmem [thread:$0]  (!%p7685_p12), %s251_s20, 32768, %s253_s22, [#allocation3], %s7978_s26, %s7978_s26, %s7979_s10  }
  0x15   : > { %7690 = dma.hbm_to_vmem [thread:$0]  (!%p7685_p12), %s269_s25, 240, %s271_s13, [#allocation6]  }
  0x18   : > { %7950 = dma.done.wait (%p7695_p9), [#allocation3], 32768  }
  0x19   : > { %7952 = vsyncadd (%p7695_p9), [#allocation3], 4294934528  ;;  %v333_v0 = vlaneseq }
  0x1a   : > { %7954 = dma.done.wait (%p7695_p9), [#allocation6], 240  }
  0x1b   : > { %7956 = vsyncadd (%p7695_p9), [#allocation6], 4294967056  ;;  %v8161_v1 = vshrl.u32 %v333_v0, 7  ;;  %v8163_v2 = vand.u32 127, %v333_v0  ;;  %v10069_v17 = vmov 0  ;;  %v10071_v19 = vmov 0 }
  0x1c   : > { %v7981_v18 = vmov 1.0|1.0   ;;  %v10073_v24 = vmov 0  ;;  %v10075_v29 = vmov 0  ;;  %p328_p13 = scmp.lt.s32.totalorder %s8109_s9, 1  ;;  %v10077_v34 = vmov 0 }
  0x1d   : > { %v8166_v3 = vadd.s32 112, %v8161_v1  ;;  %v8169_v4 = vadd.s32 120, %v8161_v1  ;;  %v8172_v5 = vadd.s32 96, %v8161_v1  ;;  %v8175_v6 = vadd.s32 104, %v8161_v1  ;;  %s7982_s22 = smov 1   ;;  %v8307_v47 = vld [vmem:[%s9999_s2] sm:$0xff] }
  0x1e   : > { %v8178_v7 = vadd.s32 80, %v8161_v1  ;;  %v8181_v8 = vadd.s32 88, %v8161_v1  ;;  %v8190_v15 = vadd.s32 64, %v8161_v1  ;;  %v8193_v16 = vadd.s32 72, %v8161_v1  ;;  %s329_s17 = scalar_select %p328_p13, %s8109_s9, 1  ;;  %v460_v49 = vld [vmem:[%s9998_s1] sm:$0xff] }
  0x1f   : > { %v399_v9 = vmul.u32 2, %v8166_v3  ;;  %v400_v10 = vmul.u32 2, %v8169_v4  ;;  %v397_v11 = vmul.u32 2, %v8172_v5  ;;  %v398_v12 = vmul.u32 2, %v8175_v6  ;;  %s7985_s10 = smov 112   ;;  %s7986_s12 = smov 127  }
  0x20   : > { %v395_v13 = vmul.u32 2, %v8178_v7  ;;  %v396_v14 = vmul.u32 2, %v8181_v8  ;;  %v393_v20 = vmul.u32 2, %v8190_v15  ;;  %v394_v21 = vmul.u32 2, %v8193_v16  ;;  %s5314_s18 = sshll.u32 %s329_s17, 3  ;;  %s7988_s13 = smov 88  }
  0x21   : > { %vm415_vm0 = vcmp.eq.s32.totalorder %v8163_v2, %v399_v9  ;;  %vm416_vm1 = vcmp.eq.s32.totalorder %v8163_v2, %v400_v10  ;;  %vm413_vm2 = vcmp.eq.s32.totalorder %v8163_v2, %v397_v11  ;;  %vm414_vm3 = vcmp.eq.s32.totalorder %v8163_v2, %v398_v12  ;;  %s331_s21 = scalar_lea.vmem %s9997_s0, %s5314_s18  ;;  %s7990_s17 = smov 64  }
  0x22   : > { %vm8199_vm4 = vmpackc.low %vm416_vm1, %vm415_vm0  ;;  %vm411_vm6 = vcmp.eq.s32.totalorder %v8163_v2, %v395_v13  ;;  %vm412_vm7 = vcmp.eq.s32.totalorder %v8163_v2, %v396_v14  ;;  %v8215_v22 = vadd.s32 48, %v8161_v1  ;;  %v8218_v23 = vadd.s32 56, %v8161_v1  ;;  %v433_v42 = vld [vmem:[%s331_s21] sm:$0xff]  ;;  %s7992_s18 = smov 40   ;;  %s10050_s21 = smov 16  }
  0x23   : > { %v10070_v17 = vsel %vm8199_vm4, 4294967295, %v10069_v17  ;;  %5316 = vmatpush.bf16.msk.msra.mxu0 %vm8199_vm4, %v7981_v18  ;;  %vm8206_vm5 = vmpackc.low %vm414_vm3, %vm413_vm2  ;;  %vm409_vm9 = vcmp.eq.s32.totalorder %v8163_v2, %v393_v20  ;;  %vm410_vm10 = vcmp.eq.s32.totalorder %v8163_v2, %v394_v21  ;;  %v8232_v27 = vadd.s32 32, %v8161_v1  ;;  %s10036_s25 = smov 120   ;;  %s7999_s26 = smov 126  }
  0x24   : > { %v10072_v19 = vsel %vm8206_vm5, 4294967295, %v10071_v19  ;;  %vm8223_vm8 = vmpackc.low %vm412_vm7, %vm411_vm6  ;;  %v391_v25 = vmul.u32 2, %v8215_v22  ;;  %v392_v26 = vmul.u32 2, %v8218_v23  ;;  %v8235_v28 = vadd.s32 40, %v8161_v1  ;;  %s10035_s19 = smov 96   ;;  %s8003_s20 = smov 72  }
  0x25   : > { %v10074_v24 = vsel %vm8223_vm8, 4294967295, %v10073_v24  ;;  %vm8240_vm11 = vmpackc.low %vm410_vm10, %vm409_vm9  ;;  %v8245_v30 = vadd.s32 16, %v8161_v1  ;;  %v8248_v31 = vadd.s32 24, %v8161_v1  ;;  %v389_v32 = vmul.u32 2, %v8232_v27  ;;  %s10048_s23 = smov 48   ;;  %s10047_s24 = smov 24  }
  0x26   : > { %v10076_v29 = vsel %vm8240_vm11, 4294967295, %v10075_v29  ;;  %vm407_vm12 = vcmp.eq.s32.totalorder %v8163_v2, %v391_v25  ;;  %vm408_vm13 = vcmp.eq.s32.totalorder %v8163_v2, %v392_v26  ;;  %v390_v33 = vmul.u32 2, %v8235_v28 }
  0x27   : > { %5318 = vmatpush.bf16.msk.msra.mxu0 %vm8206_vm5, %v7981_v18  ;;  %vm8258_vm14 = vmpackc.low %vm408_vm13, %vm407_vm12  ;;  %v8263_v35 = vadd.s32 8, %v8161_v1  ;;  %vm405_vm15 = vcmp.eq.s32.totalorder %v8163_v2, %v389_v32  ;;  %v387_v36 = vmul.u32 2, %v8245_v30  ;;  %v388_v37 = vmul.u32 2, %v8248_v31 }
  0x28   : > { %v10078_v34 = vsel %vm8258_vm14, 4294967295, %v10077_v34  ;;  %vm406_vm0 = vcmp.eq.s32.totalorder %v8163_v2, %v390_v33  ;;  %v10079_v38 = vmov 0  ;;  %v385_v39 = vmul.u32 2, %v8161_v1 }
  0x29   : > { %vm8273_vm1 = vmpackc.low %vm406_vm0, %vm405_vm15  ;;  %vm403_vm2 = vcmp.eq.s32.totalorder %v8163_v2, %v387_v36  ;;  %vm404_vm3 = vcmp.eq.s32.totalorder %v8163_v2, %v388_v37  ;;  %v386_v40 = vmul.u32 2, %v8263_v35  ;;  %v10081_v41 = vmov 0 }
  0x2a   : > { %v10080_v38 = vsel %vm8273_vm1, 4294967295, %v10079_v38  ;;  %vm8284_vm6 = vmpackc.low %vm404_vm3, %vm403_vm2  ;;  %vm401_vm7 = vcmp.eq.s32.totalorder %v8163_v2, %v385_v39  ;;  %v10083_v43 = vmov 0  ;;  %v434_v44 = vpack.c.bf16 %v433_v42, %v433_v42 }
  0x2b   : > { %5320 = vmatpush.bf16.msk.msra.mxu0 %vm8223_vm8, %v7981_v18  ;;  %v10082_v41 = vsel %vm8284_vm6, 4294967295, %v10081_v41  ;;  %vm402_vm9 = vcmp.eq.s32.totalorder %v8163_v2, %v386_v40  ;;  %v7983_v48 = vmov 0   ;;  %vm10007_vm12 = vcmp.ge.s32.totalorder %v8163_v2, 1 }
  0x2c   : > { %vm8296_vm10 = vmpackc.low %vm402_vm9, %vm401_vm7  ;;  %7798 = vset.pattern.permute.xlu0 %v7983_v48  ;;  %vm10008_vm13 = vmmov 1   ;;  %v10085_v51 = vmov 0  ;;  %v8321_v53 = vpack.c.bf16 %v460_v49, %v460_v49  ;;  %vm10006_vm0 = vcmask 130048  }
  0x2d   : > { %v10084_v43 = vsel %vm8296_vm10, 4294967295, %v10083_v43  ;;  %vm8317_vm15 = vmpackc.low %vm10007_vm12, %vm10008_vm13  ;;  %vm10010_vm2 = vcmp.lt.s32.totalorder %v8163_v2, 8  ;;  %v7987_v59 = vmov 1   ;;  %vm10009_vm3 = vcmp.lt.s32.totalorder %v8163_v2, 127 }
  0x2e   : > { %v10086_v51 = vsel %vm8317_vm15, 4294967295, %v10085_v51  ;;  %502 = vrot.lane.b32.xlu2 %v8321_v53, %s7985_s10  ;;  %vm10017_vm7 = vcmask 1043456   ;;  %vm5335_vm9 = vmpackc.low %vm10010_vm2, %vm10007_vm12  ;;  %v7989_v25 = vmov 2   ;;  %v10087_v39 = vmov 0 }
  0x2f   : > { %5322 = vmatpush.bf16.msk.msra.mxu0 %vm8240_vm11, %v7981_v18  ;;  %7799 = vset.pattern.permute.xlu2 %v7987_v59 }
  0x30   : > { %7800 = vset.pattern.permute.xlu1 %v7989_v25 }
  0x33   : > { %5324 = vmatpush.bf16.msk.msra.mxu0 %vm8258_vm14, %v7981_v18 }
  0x36   : > { %498 = vperm.xlu2 %7799, %v8307_v47  }
  0x37   : > { %5326 = vmatpush.bf16.msk.msra.mxu0 %vm8273_vm1, %v7981_v18 }
  0x3b   : > { %5328 = vmatpush.bf16.msk.msra.mxu0 %vm8284_vm6, %v7981_v18 }
  0x3f   : > { %5330 = vmatpush.bf16.msk.msra.mxu0 %vm8296_vm10, %v7981_v18 }
  0x42   : > { %451 = vmatmul.bf16.vlgmr.msra.gmra.mxu0 %v434_v44 }
  0x88   : > { %v503_v10 = vpop.permute.xlu2 %502 }
  0x90   : > { %v499_v11 = vpop.permute.xlu2 %498 }
  0xbf   : > { %v452_v45 = vpop.f32.mrf.mxu0 }
  0xc0   : > { %456 = vrot.lane.b32.xlu0 %v452_v45, %s7982_s22 }
  0xc7   : > { %v454_v46 = vpop.f32.mrf.mxu0 }
  0xc8   : > { %466 = vperm.xlu0 %7798, %v8307_v47  }
  0xd0   : > { %539 = vrot.lane.b32.xlu0 %v8321_v53, %s7988_s13 }
 0x132   : > { %v457_v50 = vpop.permute.xlu0 %456 }
 0x133   : > { %v5332_v52 = vpack.c.bf16 %v457_v50, %v452_v45 }
 0x135   : > { %5333 = vmatpush.bf16.msk.msra.mxu1 %vm8317_vm15, %v5332_v52  ;;  %v7991_v52 = vmov 3  }
 0x136   : > { %7801 = vset.pattern.permute.xlu2 %v7991_v52  ;;  %v10089_v52 = vmov 0 }
 0x138   : > { %5334 = vmatmul.msk.bf16.vlgmr.msra.gmra.mxu1 %vm10006_vm0, %v8321_v53  ;;  %vm10011_vm0 = vcmask 195584  }
 0x13a   : > { %v467_v54 = vpop.permute.xlu0 %466 }
 0x142   : > { %v540_v42 = vpop.permute.xlu0 %539 }
 0x1b5   : > { %v482_v55 = vpop.f32.mrf.mxu1 }
 0x1b6   : > { %v483_v56 = vadd.f32 %v482_v55, %v467_v54 }
 0x1b8   : > { %v487_v57 = vsel %vm10010_vm2, %v483_v56, 0.0 }
 0x1b9   : > { %491 = vrot.lane.b32.xlu1 %v487_v57, %s7986_s12 }
 0x1bd   : > { %v484_v58 = vpop.f32.mrf.mxu1 }
 0x1c1   : > { %488 = vrot.lane.b32.xlu1 %v487_v57, %s7982_s22 }
 0x22b   : > { %v492_v60 = vpop.permute.xlu1 %491 }
 0x22c   : > { %v494_v61 = vsel %vm10009_vm3, %v492_v60, 0.0 }
 0x22d   : > { %v496_v62 = vpack.c.bf16 %v494_v61, %v494_v61 }
 0x22f   : > { %v510_v63 = vsel %vm10017_vm7, %v496_v62, 0 }
 0x230   : > { %518 = vmatpush.bf16.msra.mxu2 %v510_v63 }
 0x233   : > { %v489_v0 = vpop.permute.xlu1 %488 }
 0x234   : > { %v5336_v9 = vpack.c.bf16 %v483_v56, %v489_v0 }
 0x236   : > { %5337 = vmatpush.bf16.msk.msra.mxu2 %vm5335_vm9, %v5336_v9  ;;  %vm8357_vm9 = vmpackc.low %vm10008_vm13, %vm10007_vm12 }
 0x237   : > { %v10088_v39 = vsel %vm8357_vm9, 4294967295, %v10087_v39  ;;  %vm8414_vm12 = vmpackc.low %vm10009_vm3, %vm10008_vm13  ;;  %vm10091_vm13 = vcmask 130048  }
 0x238   : > { %v10090_v52 = vsel %vm8414_vm12, 4294967295, %v10089_v52 }
 0x239   : > { %5338 = vmatmul.msk.bf16.vlgmr.msra.gmra.mxu2 %vm10011_vm0, %v503_v10 }
 0x2bc   : > { %v521_v12 = vpop.f32.mrf.mxu2 }
 0x2bd   : > { %v522_v13 = vadd.f32 %v521_v12, %v499_v11  ;;  %v7993_v11 = vmov 4  }
 0x2be   : > { %7802 = vset.pattern.permute.xlu0 %v7993_v11 }
 0x2bf   : > { %v525_v14 = vsel %vm10010_vm2, %v522_v13, 0.0 }
 0x2c0   : > { %v526_v20 = vmax.f32 %v525_v14, 0.0 }
 0x2c2   : > { %527 = vrot.lane.b32.xlu2 %v526_v20, %s7982_s22  ;;  %530 = vrot.lane.b32.xlu1 %v526_v20, %s7986_s12 }
 0x2c4   : > { %v523_v21 = vpop.f32.mrf.mxu2 }
 0x2ca   : > { %536 = vperm.xlu1 %7800, %v8307_v47  }
 0x2d2   : > { %574 = vrot.lane.b32.xlu1 %v8321_v53, %s7990_s17 }
 0x31c   : > { %v528_v36 = vpop.permute.xlu2 %527 }
 0x31d   : > { %v5340_v40 = vpack.c.bf16 %v526_v20, %v528_v36 }
 0x334   : > { %v531_v26 = vpop.permute.xlu1 %530 }
 0x335   : > { %v532_v32 = vsel %vm10009_vm3, %v531_v26, 0.0 }
 0x336   : > { %v534_v33 = vpack.c.bf16 %v532_v32, %v532_v32 }
 0x338   : > { %v545_v37 = vsel %vm10017_vm7, %v534_v33, 0 }
 0x339   : > { %553 = vmatpush.bf16.msrb.mxu1 %v545_v37 }
 0x33c   : > { %v537_v44 = vpop.permute.xlu1 %536 }
 0x33d   : > { %5341 = vmatpush.bf16.msk.msrb.mxu1 %vm8357_vm9, %v5340_v40 }
 0x340   : > { %5342 = vmatmul.msk.bf16.vlgmr.msrb.gmra.mxu1 %vm10011_vm0, %v540_v42  ;;  %v639_v42 = vld [vmem:[%s9998_s1 + $0x8] sm:$0xff] }
 0x3bd   : > { %v556_v45 = vpop.f32.mrf.mxu1 }
 0x3be   : > { %v557_v46 = vadd.f32 %v556_v45, %v537_v44  ;;  %v8401_v45 = vpack.c.bf16 %v639_v42, %v639_v42 }
 0x3c0   : > { %v560_v48 = vsel %vm10010_vm2, %v557_v46, 0.0  ;;  %v7995_v46 = vmov 5  }
 0x3c1   : > { %v561_v49 = vadd.f32 %v560_v48, %v487_v57  ;;  %v575_v57 = vpop.permute.xlu1 %574 }
 0x3c3   : > { %562 = vrot.lane.b32.xlu0 %v561_v49, %s7982_s22  ;;  %565 = vrot.lane.b32.xlu2 %v561_v49, %s7986_s12 }
 0x3c5   : > { %v558_v50 = vpop.f32.mrf.mxu1 }
 0x3cb   : > { %571 = vperm.xlu2 %7801, %v8307_v47  }
 0x3d3   : > { %609 = vrot.lane.b32.xlu2 %v8321_v53, %s7992_s18 }
 0x41d   : > { %v566_v54 = vpop.permute.xlu2 %565 }
 0x41e   : > { %v567_v55 = vsel %vm10009_vm3, %v566_v54, 0.0 }
 0x41f   : > { %v569_v56 = vpack.c.bf16 %v567_v55, %v567_v55 }
 0x421   : > { %v580_v58 = vsel %vm10017_vm7, %v569_v56, 0 }
 0x422   : > { %588 = vmatpush.bf16.msra.mxu1 %v580_v58 }
 0x425   : > { %v572_v61 = vpop.permute.xlu2 %571 }
 0x42d   : > { %v610_v26 = vpop.permute.xlu2 %609 }
 0x435   : > { %v563_v59 = vpop.permute.xlu0 %562 }
 0x436   : > { %v5344_v60 = vpack.c.bf16 %v561_v49, %v563_v59 }
 0x438   : > { %5345 = vmatpush.bf16.msk.msra.mxu1 %vm8357_vm9, %v5344_v60 }
 0x43b   : > { %5346 = vmatmul.msk.bf16.vlgmr.msra.gmra.mxu1 %vm10011_vm0, %v575_v57 }
 0x4b8   : > { %v591_v62 = vpop.f32.mrf.mxu1 }
 0x4b9   : > { %v592_v63 = vadd.f32 %v591_v62, %v572_v61  ;;  %v7996_v62 = vmov 11  }
 0x4ba   : > { %7804 = vset.pattern.permute.xlu2 %v7996_v62 }
 0x4bb   : > { %v595_v0 = vsel %vm10010_vm2, %v592_v63, 0.0 }
 0x4bc   : > { %v596_v9 = vmax.f32 %v595_v0, 0.0 }
 0x4be   : > { %597 = vrot.lane.b32.xlu1 %v596_v9, %s7982_s22  ;;  %600 = vrot.lane.b32.xlu0 %v596_v9, %s7986_s12 }
 0x4c0   : > { %v593_v10 = vpop.f32.mrf.mxu1 }
 0x4c6   : > { %606 = vperm.xlu0 %7802, %v8307_v47  }
 0x4ce   : > { %7803 = vset.pattern.permute.xlu0 %v7995_v46 }
 0x4cf   : > { %645 = vperm.xlu0 %7803, %v8307_v47  }
 0x530   : > { %v601_v12 = vpop.permute.xlu0 %600  ;;  %v598_v20 = vpop.permute.xlu1 %597 }
 0x531   : > { %v602_v13 = vsel %vm10009_vm3, %v601_v12, 0.0  ;;  %v5348_v25 = vpack.c.bf16 %v596_v9, %v598_v20 }
 0x532   : > { %v604_v14 = vpack.c.bf16 %v602_v13, %v602_v13 }
 0x534   : > { %v615_v21 = vsel %vm10017_vm7, %v604_v14, 0 }
 0x535   : > { %623 = vmatpush.bf16.msrb.mxu2 %v615_v21  ;;  %v7998_v21 = vmov 6  }
 0x538   : > { %v607_v32 = vpop.permute.xlu0 %606 }
 0x539   : > { %5349 = vmatpush.bf16.msk.msrb.mxu2 %vm8357_vm9, %v5348_v25 }
 0x53c   : > { %5350 = vmatmul.msk.bf16.vlgmr.msrb.gmra.mxu2 %vm10011_vm0, %v610_v26 }
 0x541   : > { %v646_v63 = vpop.permute.xlu0 %645 }
 0x5bf   : > { %v626_v33 = vpop.f32.mrf.mxu2 }
 0x5c0   : > { %v627_v36 = vadd.f32 %v626_v33, %v607_v32 }
 0x5c2   : > { %v630_v37 = vsel %vm10010_vm2, %v627_v36, 0.0 }
 0x5c3   : > { %v8392_v40 = vadd.f32 %v630_v37, %v561_v49  ;;  %v782_v49 = vld [vmem:[%s9998_s1 + $0x10] sm:$0xff]  ;;  %v352_v37 = vmul.u32 2, %v8163_v2 }
 0x5c4   : > { %v8421_v56 = vpack.c.bf16 %v782_v49, %v782_v49  ;;  %v10094_v49 = vmov 0 }
 0x5c5   : > { %632 = vrot.lane.b32.xlu2 %v8392_v40, %s7982_s22  ;;  %635 = vrot.lane.b32.xlu1 %v8392_v40, %s7986_s12  ;;  %vm365_vm15 = vcmp.eq.s32.totalorder %v8172_v5, %v352_v37  ;;  %vm366_vm10 = vcmp.eq.s32.totalorder %v8175_v6, %v352_v37  ;;  %v10101_v5 = vmov 0  ;;  %v10103_v6 = vmov 0 }
 0x5c7   : > { %v628_v44 = vpop.f32.mrf.mxu2 }
 0x5cd   : > { %650 = vrot.lane.b32.xlu1 %v8321_v53, %s10050_s21  ;;  %652 = vrot.lane.b32.xlu2 %v8401_v45, %s10050_s21 }
 0x61f   : > { %v633_v48 = vpop.permute.xlu2 %632 }
 0x620   : > { %v5352_v60 = vpack.c.bf16 %v8392_v40, %v633_v48 }
 0x627   : > { %v653_v59 = vpop.permute.xlu2 %652 }
 0x637   : > { %v636_v50 = vpop.permute.xlu1 %635 }
 0x638   : > { %v637_v53 = vsel %vm10009_vm3, %v636_v50, 0.0  ;;  %v5368_v54 = vpack.c.bf16 %v636_v50, %v8392_v40  ;;  %vm10092_vm3 = vmmov %vm10091_vm13 }
 0x639   : > { %v643_v55 = vpack.c.bf16 %v637_v53, %v637_v53 }
 0x63a   : > { %5369 = vmatpush.bf16.msk.msrb.mxu0 %vm8414_vm12, %v5368_v54 }
 0x63b   : > { %v660_v58 = vsel %vm10017_vm7, %v643_v55, 0 }
 0x63c   : > { %668 = vmatpush.bf16.msra.mxu3 %v660_v58 }
 0x63d   : > { %5370 = vmatmul.msk.bf16.vlgmr.msrb.gmra.mxu0 %vm10091_vm13, %v8421_v56  ;;  %vm10012_vm13 = vcmp.lt.s32.totalorder %v8163_v2, 7 }
 0x63f   : > { %v651_v57 = vpop.permute.xlu1 %650 }
 0x640   : > { %5353 = vmatpush.bf16.msk.msra.mxu3 %vm8357_vm9, %v5352_v60  ;;  %v655_v61 = vsel %vm10092_vm3, %v651_v57, %v653_v59  ;;  %vm10093_vm3 = vcmp.lt.s32.totalorder %v8163_v2, 127  ;;  %v8001_v59 = vmov 7   ;;  %v8002_v57 = vmov 12  }
 0x641   : > { %7806 = vset.pattern.permute.xlu1 %v8001_v59 }
 0x643   : > { %5354 = vmatmul.msk.bf16.vlgmr.msra.gmra.mxu3 %vm10011_vm0, %v655_v61  ;;  %vm368_vm0 = vcmp.eq.s32.totalorder %v8169_v4, %v352_v37  ;;  %v10099_v4 = vmov 0 }
 0x6ba   : > { %v801_v13 = vpop.f32.mrf.mxu0 }
 0x6c2   : > { %v803_v14 = vpop.f32.mrf.mxu0 }
 0x6c6   : > { %v671_v0 = vpop.f32.mrf.mxu3 }
 0x6c7   : > { %v672_v9 = vadd.f32 %v671_v0, %v646_v63 }
 0x6c9   : > { %v675_v10 = vsel %vm10010_vm2, %v672_v9, 0.0  ;;  %vm367_vm2 = vcmp.eq.s32.totalorder %v8166_v3, %v352_v37  ;;  %v10096_v3 = vmov 0 }
 0x6ca   : > { %v676_v11 = vmax.f32 %v675_v10, 0.0 }
 0x6cc   : > { %677 = vrot.lane.b32.xlu2 %v676_v11, %s7982_s22  ;;  %680 = vrot.lane.b32.xlu1 %v676_v11, %s7986_s12 }
 0x6ce   : > { %v673_v12 = vpop.f32.mrf.mxu3 }
 0x6d4   : > { %786 = vperm.xlu2 %7804, %v8307_v47   ;;  %689 = vrot.lane.b32.xlu1 %v8401_v45, %s10036_s25  ;;  %s8012_s25 = smov 2  }
 0x6dc   : > { %7805 = vset.pattern.permute.xlu2 %v7998_v21 }
 0x6dd   : > { %686 = vperm.xlu2 %7805, %v8307_v47  }
 0x6e5   : > { %724 = vrot.lane.b32.xlu2 %v8401_v45, %s10035_s19  ;;  %s10037_s19 = smov 56  }
 0x6e6   : > { %7807 = vset.pattern.permute.xlu2 %v8002_v57 }
 0x6ed   : > { %846 = vperm.xlu2 %7807, %v8307_v47  }
 0x6f5   : > { %759 = vrot.lane.b32.xlu2 %v8401_v45, %s8003_s20 }
 0x726   : > { %v678_v20 = vpop.permute.xlu2 %677 }
 0x727   : > { %v5356_v48 = vpack.c.bf16 %v676_v11, %v678_v20 }
 0x72e   : > { %v787_v25 = vpop.permute.xlu2 %786 }
 0x72f   : > { %v802_v26 = vadd.f32 %v801_v13, %v787_v25 }
 0x731   : > { %v806_v32 = vsel %vm10012_vm13, %v802_v26, 0.0  ;;  %vm8452_vm13 = vmpackc.low %vm368_vm0, %vm367_vm2  ;;  %vm10098_vm0 = vcmask 195584   ;;  %vm363_vm2 = vcmp.eq.s32.totalorder %v8178_v7, %v352_v37 }
 0x732   : > { %v807_v33 = vmax.f32 %v806_v32, 0.0  ;;  %v10095_v49 = vsel %vm8452_vm13, 4294967295, %v10094_v49 }
 0x734   : > { %808 = vrot.lane.b32.xlu0 %v807_v33, %s7986_s12  ;;  %811 = vrot.lane.b32.xlu1 %v807_v33, %s7999_s26 }
 0x73e   : > { %v681_v36 = vpop.permute.xlu1 %680 }
 0x73f   : > { %v682_v42 = vsel %vm10093_vm3, %v681_v36, 0.0  ;;  %vm8463_vm3 = vmpackc.low %vm366_vm10, %vm365_vm15  ;;  %vm362_vm10 = vcmp.eq.s32.totalorder %v8193_v16, %v352_v37 }
 0x740   : > { %v684_v44 = vpack.c.bf16 %v682_v42, %v682_v42  ;;  %v10097_v3 = vsel %vm8463_vm3, 4294967295, %v10096_v3 }
 0x742   : > { %v695_v46 = vsel %vm10017_vm7, %v684_v44, 0  ;;  %vm364_vm7 = vcmp.eq.s32.totalorder %v8181_v8, %v352_v37 }
 0x743   : > { %703 = vmatpush.bf16.msrb.mxu1 %v695_v46  ;;  %vm8473_vm6 = vmpackc.low %vm364_vm7, %vm363_vm2  ;;  %vm357_vm2 = vcmp.eq.s32.totalorder %v8232_v27, %v352_v37  ;;  %v10111_v27 = vmov 0 }
 0x744   : > { %v10100_v4 = vsel %vm8473_vm6, 4294967295, %v10099_v4 }
 0x746   : > { %v690_v50 = vpop.permute.xlu1 %689 }
 0x747   : > { %5357 = vmatpush.bf16.msk.msrb.mxu1 %vm8357_vm9, %v5356_v48 }
 0x74a   : > { %5358 = vmatmul.msk.bf16.vlgmr.msrb.gmra.mxu1 %vm10098_vm0, %v690_v50  ;;  %vm359_vm0 = vcmp.eq.s32.totalorder %v8215_v22, %v352_v37 }
 0x74b   : > { %5372 = vmatpush.bf16.msk.msra.mxu1 %vm8452_vm13, %v7981_v18  ;;  %vm361_vm13 = vcmp.eq.s32.totalorder %v8190_v15, %v352_v37 }
 0x74c   : > { %vm8482_vm15 = vmpackc.low %vm362_vm10, %vm361_vm13  ;;  %vm356_vm10 = vcmp.eq.s32.totalorder %v8248_v31, %v352_v37 }
 0x74d   : > { %v10102_v5 = vsel %vm8482_vm15, 4294967295, %v10101_v5 }
 0x74f   : > { %5374 = vmatpush.bf16.msk.msra.mxu1 %vm8463_vm3, %v7981_v18  ;;  %vm360_vm3 = vcmp.eq.s32.totalorder %v8218_v23, %v352_v37 }
 0x750   : > { %vm8491_vm7 = vmpackc.low %vm360_vm3, %vm359_vm0  ;;  %vm355_vm3 = vcmp.eq.s32.totalorder %v8245_v30, %v352_v37 }
 0x751   : > { %v10104_v6 = vsel %vm8491_vm7, 4294967295, %v10103_v6  ;;  %vm8511_vm0 = vmpackc.low %vm356_vm10, %vm355_vm3  ;;  %vm10115_vm10 = vcmask 1043456  }
 0x753   : > { %5376 = vmatpush.bf16.msk.msra.mxu1 %vm8473_vm6, %v7981_v18  ;;  %vm358_vm6 = vcmp.eq.s32.totalorder %v8235_v28, %v352_v37  ;;  %v687_v28 = vpop.permute.xlu2 %686 }
 0x754   : > { %vm8502_vm13 = vmpackc.low %vm358_vm6, %vm357_vm2  ;;  %vm813_vm2 = vcmp.lt.s32.totalorder %v8163_v2, 126 }
 0x755   : > { %vm8530_vm3 = vmpackc.low %vm813_vm2, %vm813_vm2 }
 0x756   : > { %v10112_v27 = vsel %vm8530_vm3, 4294967295, %v10111_v27  ;;  %vm10116_vm2 = vmmov %vm10115_vm10 }
 0x757   : > { %5378 = vmatpush.bf16.msk.msra.mxu1 %vm8482_vm15, %v7981_v18  ;;  %vm353_vm15 = vcmp.eq.s32.totalorder %v8161_v1, %v352_v37 }
 0x75b   : > { %5380 = vmatpush.bf16.msk.msra.mxu1 %vm8491_vm7, %v7981_v18  ;;  %vm354_vm7 = vcmp.eq.s32.totalorder %v8263_v35, %v352_v37  ;;  %v725_v14 = vpop.permute.xlu2 %724 }
 0x75c   : > { %vm8520_vm6 = vmpackc.low %vm354_vm7, %vm353_vm15  ;;  %vm10113_vm15 = vcmp.lt.s32.totalorder %v8163_v2, 8  ;;  %vm10114_vm7 = vcmp.lt.s32.totalorder %v8163_v2, 127 }
 0x75f   : > { %5382 = vmatpush.bf16.msk.msra.mxu1 %vm8502_vm13, %v7981_v18 }
 0x763   : > { %5384 = vmatpush.bf16.msk.msra.mxu1 %vm8511_vm0, %v7981_v18  ;;  %v847_v42 = vpop.permute.xlu2 %846 }
 0x767   : > { %5386 = vmatpush.bf16.msk.msra.mxu1 %vm8520_vm6, %v7981_v18 }
 0x7a6   : > { %v809_v16 = vpop.permute.xlu0 %808  ;;  %v812_v1 = vpop.permute.xlu1 %811 }
 0x7a7   : > { %v5388_v22 = vpack.c.bf16 %v809_v16, %v807_v33  ;;  %v5391_v23 = vpack.c.bf16 %v812_v1, %v812_v1 }
 0x7a9   : > { %5389 = vmatmul.msk.bf16.vlgmr.msra.gmra.mxu1 %vm8414_vm12, %v5388_v22  ;;  %v8004_v22 = vmov 13  }
 0x7aa   : > { %7808 = vset.pattern.permute.xlu2 %v8004_v22 }
 0x7ab   : > { %879 = vperm.xlu2 %7808, %v8307_v47  }
 0x7b3   : > { %914 = vrot.lane.b32.xlu2 %v8401_v45, %s10048_s23  ;;  %s8017_s23 = smov 8  }
 0x7b9   : > { %5392 = vmatmul.msk.bf16.gmra.mxu1 %vm8530_vm3, %v5391_v23  ;;  %vm10126_vm3 = vcmask 195584  }
 0x7c7   : > { %v706_v30 = vpop.f32.mrf.mxu1 }
 0x7c8   : > { %v707_v31 = vadd.f32 %v706_v30, %v687_v28 }
 0x7ca   : > { %v710_v35 = vsel %vm10113_vm15, %v707_v31, 0.0  ;;  %vm10117_vm15 = vcmask 195584  }
 0x7cb   : > { %v8539_v53 = vadd.f32 %v710_v35, %v8392_v40 }
 0x7cd   : > { %712 = vrot.lane.b32.xlu1 %v8539_v53, %s7982_s22  ;;  %715 = vrot.lane.b32.xlu0 %v8539_v53, %s7986_s12 }
 0x7cf   : > { %v708_v54 = vpop.f32.mrf.mxu1 }
 0x7d0   : > { %v760_v54 = vpop.permute.xlu2 %759 }
 0x7d5   : > { %850 = vrot.lane.b32.xlu0 %v8421_v56, %s7985_s10  ;;  %721 = vperm.xlu1 %7806, %v8307_v47  }
 0x826   : > { %v834_v55 = vpop.f32.mrf.mxu1 }
 0x82e   : > { %v836_v58 = vpop.f32.mrf.mxu1 }
 0x82f   : > { %v843_v20 = vpack.c.bf16 %v836_v58, %v834_v55 }
 0x836   : > { %v839_v60 = vpop.f32.mrf.mxu1 }
 0x837   : > { %v844_v9 = vpack.c.bf16 %v839_v60, %v839_v60 }
 0x839   : > { %v856_v13 = vsel %vm10116_vm2, %v844_v9, 0  ;;  %vm10030_vm2 = vcmp.lt.s32.totalorder %v8163_v2, 3 }
 0x83e   : > { %v841_v61 = vpop.f32.mrf.mxu1 }
 0x83f   : > { %v716_v62 = vpop.permute.xlu0 %715  ;;  %v713_v10 = vpop.permute.xlu1 %712 }
 0x840   : > { %v717_v63 = vsel %vm10114_vm7, %v716_v62, 0.0  ;;  %v5360_v12 = vpack.c.bf16 %v8539_v53, %v713_v10  ;;  %vm10118_vm7 = vmmov %vm10117_vm15  ;;  %v880_v61 = vpop.permute.xlu2 %879  ;;  %v8006_v10 = vmov 9  }
 0x841   : > { %v719_v0 = vpack.c.bf16 %v717_v63, %v717_v63  ;;  %7809 = vset.pattern.permute.xlu0 %v8006_v10 }
 0x843   : > { %v730_v11 = vsel %vm10115_vm10, %v719_v0, 0  ;;  %vm10119_vm10 = vcmp.lt.s32.totalorder %v8163_v2, 8 }
 0x844   : > { %738 = vmatpush.bf16.msra.mxu2 %v730_v11 }
 0x847   : > { %v851_v21 = vpop.permute.xlu0 %850  ;;  %v722_v25 = vpop.permute.xlu1 %721 }
 0x848   : > { %5361 = vmatpush.bf16.msk.msra.mxu2 %vm8357_vm9, %v5360_v12 }
 0x84b   : > { %5362 = vmatmul.msk.bf16.vlgmr.msra.gmra.mxu2 %vm10117_vm15, %v725_v14  ;;  %vm10120_vm15 = vcmp.lt.s32.totalorder %v8163_v2, 127 }
 0x84c   : > { %864 = vmatpush.bf16.msrb.mxu2 %v856_v13 }
 0x850   : > { %865 = vmatpush.bf16.msrb.mxu2 %v843_v20 }
 0x85b   : > { %5393 = vmatmul.msk.bf16.vlgmr.msrb.gmra.mxu2 %vm10118_vm7, %v851_v21  ;;  %vm10121_vm7 = vcmask 1043456  }
 0x8ce   : > { %v741_v26 = vpop.f32.mrf.mxu2 }
 0x8cf   : > { %v742_v32 = vadd.f32 %v741_v26, %v722_v25  ;;  %v915_v25 = vpop.permute.xlu2 %914 }
 0x8d1   : > { %v745_v33 = vsel %vm10119_vm10, %v742_v32, 0.0  ;;  %vm10122_vm10 = vcmask 195584  }
 0x8d2   : > { %v746_v36 = vmax.f32 %v745_v33, 0.0 }
 0x8d4   : > { %747 = vrot.lane.b32.xlu1 %v746_v36, %s7982_s22  ;;  %750 = vrot.lane.b32.xlu0 %v746_v36, %s7986_s12 }
 0x8d6   : > { %v743_v37 = vpop.f32.mrf.mxu2 }
 0x8dc   : > { %882 = vrot.lane.b32.xlu1 %v8421_v56, %s7988_s13 }
 0x8de   : > { %v867_v44 = vpop.f32.mrf.mxu2 }
 0x8df   : > { %v868_v46 = vadd.f32 %v867_v44, %v847_v42  ;;  %v8008_v44 = vmov 10  }
 0x8e0   : > { %7810 = vset.pattern.permute.xlu2 %v8008_v44 }
 0x8e1   : > { %v872_v48 = vsel %vm10030_vm2, %v868_v46, 0.0  ;;  %vm10123_vm2 = vcmask 130048  }
 0x8e2   : > { %v873_v50 = vmax.f32 %v872_v48, 0.0 }
 0x8e4   : > { %874 = vrot.lane.b32.xlu0 %v873_v50, %s7986_s12 }
 0x8e6   : > { %v869_v16 = vpop.f32.mrf.mxu2 }
 0x946   : > { %v751_v1 = vpop.permute.xlu0 %750  ;;  %v748_v30 = vpop.permute.xlu1 %747 }
 0x947   : > { %v752_v23 = vsel %vm10120_vm15, %v751_v1, 0.0  ;;  %v5364_v35 = vpack.c.bf16 %v746_v36, %v748_v30  ;;  %vm900_vm15 = vcmp.lt.s32.totalorder %v8163_v2, 2 }
 0x948   : > { %v754_v28 = vpack.c.bf16 %v752_v23, %v752_v23 }
 0x94a   : > { %v765_v31 = vsel %vm10121_vm7, %v754_v28, 0 }
 0x94b   : > { %773 = vmatpush.bf16.msrb.mxu3 %v765_v31 }
 0x94e   : > { %v883_v59 = vpop.permute.xlu1 %882 }
 0x94f   : > { %5365 = vmatpush.bf16.msk.msrb.mxu3 %vm8357_vm9, %v5364_v35 }
 0x952   : > { %5366 = vmatmul.msk.bf16.vlgmr.msrb.gmra.mxu3 %vm10122_vm10, %v760_v54  ;;  %vm10125_vm10 = vcmp.ge.s32.totalorder %v8163_v2, 1 }
 0x956   : > { %v875_v55 = vpop.permute.xlu0 %874 }
 0x957   : > { %v5395_v58 = vpack.c.bf16 %v875_v55, %v873_v50  ;;  %v8009_v55 = vmov 14  }
 0x959   : > { %5396 = vmatpush.bf16.msk.msra.mxu3 %vm8414_vm12, %v5395_v58  ;;  %vm5398_vm12 = vmpackc.low %vm900_vm15, %vm10125_vm10  ;;  %vm10129_vm10 = vcmask 195584  }
 0x962   : > { %5397 = vmatmul.msk.bf16.vlgmr.msra.gmra.mxu3 %vm10123_vm2, %v883_v59  ;;  %vm10124_vm2 = vcmp.lt.s32.totalorder %v8163_v2, 127 }
 0x9d5   : > { %v8582_v60 = vpop.f32.mrf.mxu3 }
 0x9dd   : > { %v778_v57 = vpop.f32.mrf.mxu3 }
 0x9e5   : > { %v896_v62 = vpop.f32.mrf.mxu3 }
 0x9e6   : > { %v897_v63 = vadd.f32 %v896_v62, %v880_v61 }
 0x9e8   : > { %v901_v0 = vsel %vm900_vm15, %v897_v63, 0.0 }
 0x9e9   : > { %902 = vrot.lane.b32.xlu1 %v901_v0, %s7982_s22  ;;  %905 = vrot.lane.b32.xlu0 %v901_v0, %s7986_s12 }
 0x9ed   : > { %v898_v9 = vpop.f32.mrf.mxu3 }
 0x9f1   : > { %911 = vperm.xlu0 %7809, %v8307_v47  }
 0xa5b   : > { %v906_v11 = vpop.permute.xlu0 %905  ;;  %v903_v14 = vpop.permute.xlu1 %902 }
 0xa5c   : > { %v907_v12 = vsel %vm10124_vm2, %v906_v11, 0.0  ;;  %v5399_v21 = vpack.c.bf16 %v897_v63, %v903_v14 }
 0xa5d   : > { %v909_v13 = vpack.c.bf16 %v907_v12, %v907_v12  ;;  %v8011_v12 = vmov 15  }
 0xa5e   : > { %7812 = vset.pattern.permute.xlu0 %v8011_v12 }
 0xa5f   : > { %v920_v20 = vsel %vm10121_vm7, %v909_v13, 0 }
 0xa60   : > { %928 = vmatpush.bf16.msra.mxu0 %v920_v20  ;;  %v8013_v20 = vmov 8  }
 0xa63   : > { %v912_v26 = vpop.permute.xlu0 %911 }
 0xa64   : > { %5400 = vmatpush.bf16.msk.msra.mxu0 %vm5398_vm12, %v5399_v21  ;;  %vm10127_vm12 = vnez %v10082_v41 }
 0xa67   : > { %5401 = vmatmul.msk.bf16.vlgmr.msra.gmra.mxu0 %vm10126_vm3, %v915_v25  ;;  %vm10128_vm3 = vnez %v10084_v43 }
 0xa68   : > { %5411 = vmatpush.bf16.msk.msrb.mxu0 %vm8199_vm4, %v7981_v18 }
 0xa6c   : > { %5413 = vmatpush.bf16.msk.msrb.mxu0 %vm8206_vm5, %v7981_v18 }
 0xa70   : > { %5415 = vmatpush.bf16.msk.msrb.mxu0 %vm8223_vm8, %v7981_v18 }
 0xa74   : > { %5417 = vmatpush.bf16.msk.msrb.mxu0 %vm8240_vm11, %v7981_v18 }
 0xa78   : > { %5419 = vmatpush.bf16.msk.msrb.mxu0 %vm8258_vm14, %v7981_v18 }
 0xa7c   : > { %5421 = vmatpush.bf16.msk.msrb.mxu0 %vm8273_vm1, %v7981_v18 }
 0xa80   : > { %5423 = vmatpush.bf16.msk.msrb.mxu0 %vm10127_vm12, %v7981_v18 }
 0xa84   : > { %5425 = vmatpush.bf16.msk.msrb.mxu0 %vm10128_vm3, %v7981_v18 }
 0xae4   : > { %v931_v32 = vpop.f32.mrf.mxu0 }
 0xae5   : > { %v932_v33 = vadd.f32 %v931_v32, %v912_v26 }
 0xae7   : > { %v935_v36 = vsel %vm900_vm15, %v932_v33, 0.0 }
 0xae8   : > { %v936_v37 = vmax.f32 %v935_v36, 0.0 }
 0xaea   : > { %937 = vrot.lane.b32.xlu2 %v936_v37, %s7982_s22  ;;  %940 = vrot.lane.b32.xlu1 %v936_v37, %s7986_s12 }
 0xaec   : > { %v933_v42 = vpop.f32.mrf.mxu0 }
 0xaf2   : > { %949 = vrot.lane.b32.xlu1 %v8401_v45, %s10047_s24  ;;  %946 = vperm.xlu2 %7810, %v8307_v47  }
 0xafa   : > { %980 = vrot.lane.b32.xlu1 %v8421_v56, %s8003_s20  ;;  %7811 = vset.pattern.permute.xlu2 %v8009_v55 }
 0xafb   : > { %977 = vperm.xlu2 %7811, %v8307_v47  }
 0xb03   : > { %1027 = vrot.lane.b32.xlu2 %v8421_v56, %s10037_s19  ;;  %s10046_s19 = smov 32  }
 0xb0b   : > { %1058 = vrot.lane.b32.xlu2 %v8421_v56, %s10046_s19  ;;  %s8031_s19 = smov 104  }
 0xb13   : > { %1082 = vrot.lane.b32.xlu2 %v8421_v56, %s10050_s21  ;;  %s8018_s21 = smov 109  }
 0xb44   : > { %v938_v16 = vpop.permute.xlu2 %937 }
 0xb45   : > { %v5403_v1 = vpack.c.bf16 %v936_v37, %v938_v16 }
 0xb4c   : > { %v947_v23 = vpop.permute.xlu2 %946 }
 0xb55   : > { %v978_v61 = vpop.permute.xlu2 %977 }
 0xb5c   : > { %v941_v46 = vpop.permute.xlu1 %940 }
 0xb5d   : > { %v942_v48 = vsel %vm10124_vm2, %v941_v46, 0.0  ;;  %vm10130_vm2 = vnez %v10086_v51  ;;  %v1028_v37 = vpop.permute.xlu2 %1027 }
 0xb5e   : > { %v944_v50 = vpack.c.bf16 %v942_v48, %v942_v48 }
 0xb60   : > { %v955_v22 = vsel %vm10121_vm7, %v944_v50, 0  ;;  %vm10131_vm7 = vcmask 130048  }
 0xb61   : > { %963 = vmatpush.bf16.msra.mxu2 %v955_v22  ;;  %v8015_v22 = vmov 16  }
 0xb62   : > { %7813 = vset.pattern.permute.xlu1 %v8015_v22 }
 0xb64   : > { %v950_v45 = vpop.permute.xlu1 %949 }
 0xb65   : > { %5404 = vmatpush.bf16.msk.msra.mxu2 %vm8357_vm9, %v5403_v1  ;;  %vm10041_vm9 = vcmask 64512  }
 0xb68   : > { %5405 = vmatmul.msk.bf16.vlgmr.msra.gmra.mxu2 %vm10129_vm10, %v950_v45  ;;  %vm10038_vm10 = vcmp.ge.s32.totalorder %v8163_v2, 2 }
 0xb6c   : > { %v981_v57 = vpop.permute.xlu1 %980 }
 0xbeb   : > { %v966_v28 = vpop.f32.mrf.mxu2 }
 0xbec   : > { %v967_v30 = vadd.f32 %v966_v28, %v947_v23  ;;  %v1059_v23 = vpop.permute.xlu2 %1058  ;;  %v8016_v28 = vmov 17  }
 0xbee   : > { %v970_v31 = vsel %vm900_vm15, %v967_v30, 0.0  ;;  %vm10132_vm15 = vcmp.lt.s32.totalorder %v8163_v2, 3 }
 0xbef   : > { %v971_v35 = vadd.f32 %v970_v31, %v901_v0 }
 0xbf1   : > { %972 = vrot.lane.b32.xlu0 %v971_v35, %s7982_s22 }
 0xbf3   : > { %v968_v54 = vpop.f32.mrf.mxu2 }
 0xc63   : > { %v973_v58 = vpop.permute.xlu0 %972 }
 0xc64   : > { %v5407_v59 = vpack.c.bf16 %v973_v58, %v971_v35 }
 0xc66   : > { %5408 = vmatpush.bf16.msk.msrb.mxu3 %vm10130_vm2, %v5407_v59  ;;  %v1083_v59 = vpop.permute.xlu2 %1082 }
 0xc69   : > { %5409 = vmatmul.msk.bf16.vlgmr.msrb.gmra.mxu3 %vm10131_vm7, %v981_v57  ;;  %vm10133_vm7 = vcmask 1043456  }
 0xcec   : > { %v994_v62 = vpop.f32.mrf.mxu3 }
 0xced   : > { %v995_v63 = vadd.f32 %v994_v62, %v978_v61 }
 0xcef   : > { %v998_v0 = vsel %vm10132_vm15, %v995_v63, 0.0  ;;  %vm10134_vm15 = vcmask 195584  }
 0xcf0   : > { %v999_v9 = vmax.f32 %v998_v0, 0.0 }
 0xcf2   : > { %v1000_v10 = vpack.c.bf16 %v999_v9, %v999_v9 }
 0xcf4   : > { %v996_v11 = vpop.f32.mrf.mxu3  ;;  %1009 = vmatmul.bf16.vlgmr.msrb.gmra.mxu0 %v1000_v10 }
 0xd71   : > { %v1010_v13 = vpop.f32.mrf.mxu0 }
 0xd72   : > { %1014 = vrot.lane.b32.xlu1 %v1010_v13, %s7982_s22  ;;  %1017 = vrot.lane.b32.xlu0 %v1010_v13, %s8012_s25 }
 0xd79   : > { %v1012_v14 = vpop.f32.mrf.mxu0 }
 0xd7a   : > { %1024 = vperm.xlu0 %7812, %v8307_v47  }
 0xd82   : > { %7814 = vset.pattern.permute.xlu0 %v8013_v20 }
 0xd83   : > { %756 = vperm.xlu0 %7814, %v8307_v47  }
 0xde4   : > { %v1018_v21 = vpop.permute.xlu0 %1017  ;;  %v1015_v32 = vpop.permute.xlu1 %1014 }
 0xde5   : > { %v1020_v25 = vsel %vm10038_vm10, %v1018_v21, 0.0  ;;  %v5427_v36 = vpack.c.bf16 %v1015_v32, %v1010_v13  ;;  %vm10138_vm10 = vcmask 1043456  }
 0xde6   : > { %v1022_v26 = vpack.c.bf16 %v1020_v25, %v1020_v25 }
 0xde8   : > { %v1033_v33 = vsel %vm10133_vm7, %v1022_v26, 0  ;;  %vm10135_vm7 = vcmp.lt.s32.totalorder %v8163_v2, 7 }
 0xde9   : > { %1041 = vmatpush.bf16.msrb.mxu2 %v1033_v33 }
 0xdec   : > { %v1025_v42 = vpop.permute.xlu0 %1024 }
 0xded   : > { %5428 = vmatpush.bf16.msk.msrb.mxu2 %vm10130_vm2, %v5427_v36 }
 0xdf0   : > { %5429 = vmatmul.msk.bf16.vlgmr.msrb.gmra.mxu2 %vm10134_vm15, %v1028_v37  ;;  %vm10136_vm15 = vcmask 130048  }
 0xdf1   : > { %5436 = vmatpush.bf16.msk.msra.mxu2 %vm8199_vm4, %v7981_v18 }
 0xdf5   : > { %5438 = vmatpush.bf16.msk.msra.mxu2 %vm8206_vm5, %v7981_v18  ;;  %v757_v61 = vpop.permute.xlu0 %756 }
 0xdf6   : > { %v777_v62 = vadd.f32 %v8582_v60, %v757_v61  ;;  %v1128_v60 = vld [vmem:[%s9998_s1 + $0x18] sm:$0xff] }
 0xdf7   : > { %v8757_v25 = vpack.c.bf16 %v1128_v60, %v1128_v60 }
 0xdf9   : > { %5440 = vmatpush.bf16.msk.msra.mxu2 %vm8223_vm8, %v7981_v18  ;;  %1141 = vrot.lane.b32.xlu0 %v8757_v25, %s8017_s23 }
 0xdfd   : > { %5442 = vmatpush.bf16.msk.msra.mxu2 %vm8240_vm11, %v7981_v18 }
 0xe01   : > { %5444 = vmatpush.bf16.msk.msra.mxu2 %vm8258_vm14, %v7981_v18 }
 0xe05   : > { %5446 = vmatpush.bf16.msk.msra.mxu2 %vm8273_vm1, %v7981_v18 }
 0xe09   : > { %5448 = vmatpush.bf16.msk.msra.mxu2 %vm10127_vm12, %v7981_v18 }
 0xe0d   : > { %5450 = vmatpush.bf16.msk.msra.mxu2 %vm10128_vm3, %v7981_v18 }
 0xe73   : > { %v1044_v44 = vpop.f32.mrf.mxu2 }
 0xe74   : > { %v1045_v46 = vadd.f32 %v1044_v44, %v1025_v42  ;;  %v1142_v42 = vpop.permute.xlu0 %1141 }
 0xe76   : > { %v1048_v48 = vsel %vm10135_vm7, %v1045_v46, 0.0  ;;  %vm10137_vm7 = vcmp.lt.s32.totalorder %v8163_v2, 8 }
 0xe77   : > { %v1049_v50 = vmax.f32 %v1048_v48, 0.0 }
 0xe79   : > { %1050 = vrot.lane.b32.xlu1 %v1049_v50, %s7982_s22 }
 0xe7b   : > { %v1046_v16 = vpop.f32.mrf.mxu2 }
 0xe7c   : > { %v8020_v16 = vmov 27  }
 0xe7d   : > { %7817 = vset.pattern.permute.xlu0 %v8020_v16 }
 0xe7e   : > { %1168 = vperm.xlu0 %7817, %v8307_v47  }
 0xe81   : > { %1055 = vperm.xlu1 %7813, %v8307_v47  }
 0xe89   : > { %7815 = vset.pattern.permute.xlu1 %v8016_v28 }
 0xe8a   : > { %1079 = vperm.xlu1 %7815, %v8307_v47  }
 0xeeb   : > { %v1051_v1 = vpop.permute.xlu1 %1050 }
 0xeec   : > { %v5431_v45 = vpack.c.bf16 %v1051_v1, %v1049_v50 }
 0xeee   : > { %5432 = vmatpush.bf16.msk.msra.mxu3 %vm10130_vm2, %v5431_v45 }
 0xef1   : > { %5433 = vmatmul.msk.bf16.vlgmr.msra.gmra.mxu3 %vm10136_vm15, %v1059_v23  ;;  %vm10140_vm15 = vnez %v10097_v3 }
 0xef3   : > { %v1056_v30 = vpop.permute.xlu1 %1055 }
 0xefc   : > { %v1080_v63 = vpop.permute.xlu1 %1079 }
 0xf74   : > { %v1072_v31 = vpop.f32.mrf.mxu3 }
 0xf75   : > { %v1073_v35 = vadd.f32 %v1072_v31, %v1056_v30 }
 0xf77   : > { %v1076_v54 = vsel %vm10137_vm7, %v1073_v35, 0.0  ;;  %vm10141_vm7 = vnez %v10100_v4  ;;  %v1169_v35 = vpop.permute.xlu0 %1168 }
 0xf78   : > { %v1077_v55 = vpack.c.bf16 %v1076_v54, %v1076_v54 }
 0xf7a   : > { %v1089_v58 = vsel %vm10138_vm10, %v1077_v55, 0  ;;  %vm10139_vm10 = vnez %v10095_v49 }
 0xf7b   : > { %1098 = vmatpush.bf16.msrb.mxu1 %v1089_v58 }
 0xf7c   : > { %v1074_v57 = vpop.f32.mrf.mxu3 }
 0xf7e   : > { %5434 = vmatmul.msk.bf16.vlgmr.msrb.gmra.mxu1 %vm10041_vm9, %v1083_v59  ;;  %vm10142_vm9 = vnez %v10102_v5 }
 0xf7f   : > { %5457 = vmatpush.bf16.msk.msra.mxu1 %vm8199_vm4, %v7981_v18  ;;  %vm10162_vm4 = vcmask 195584  }
 0xf83   : > { %5459 = vmatpush.bf16.msk.msra.mxu1 %vm8206_vm5, %v7981_v18  ;;  %vm10152_vm5 = vcmask 64512  }
 0xf87   : > { %5461 = vmatpush.bf16.msk.msra.mxu1 %vm8223_vm8, %v7981_v18 }
 0xf8b   : > { %5463 = vmatpush.bf16.msk.msra.mxu1 %vm8240_vm11, %v7981_v18  ;;  %vm10149_vm11 = vmmov 1  }
 0xf8f   : > { %5465 = vmatpush.bf16.msk.msra.mxu1 %vm8258_vm14, %v7981_v18  ;;  %vm10148_vm14 = vcmp.lt.s32.totalorder %v8163_v2, 127 }
 0xf90   : > { %vm8771_vm8 = vmpackc.low %vm10149_vm11, %vm10148_vm14  ;;  %vm10060_vm11 = vcmp.lt.s32.totalorder %v8163_v2, 15 }
 0xf91   : > { %vm10154_vm14 = vmmov %vm10152_vm5 }
 0xf93   : > { %5467 = vmatpush.bf16.msk.msra.mxu1 %vm8273_vm1, %v7981_v18 }
 0xf97   : > { %5469 = vmatpush.bf16.msk.msra.mxu1 %vm10127_vm12, %v7981_v18  ;;  %vm10143_vm12 = vnez %v10104_v6 }
 0xf9b   : > { %5471 = vmatpush.bf16.msk.msra.mxu1 %vm10128_vm3, %v7981_v18  ;;  %vm10144_vm3 = vcmp.lt.s32.totalorder %v8163_v2, 8 }
 0xf9c   : > { %v780_v0 = vsel %vm10144_vm3, %v777_v62, 0.0  ;;  %vm10145_vm1 = vmmov %vm10144_vm3  ;;  %vm10147_vm3 = vcmask 1043456  }
 0xf9d   : > { %v781_v11 = vadd.f32 %v780_v0, %v8539_v53 }
 0xf9f   : > { %5493 = vmatpush.bf16.msk.msrb.mxu1 %vm10139_vm10, %v7981_v18 }
 0xfa3   : > { %5495 = vmatpush.bf16.msk.msrb.mxu1 %vm10140_vm15, %v7981_v18 }
 0xfa7   : > { %5497 = vmatpush.bf16.msk.msrb.mxu1 %vm10141_vm7, %v7981_v18 }
 0xfab   : > { %5499 = vmatpush.bf16.msk.msrb.mxu1 %vm10142_vm9, %v7981_v18 }
 0xfaf   : > { %5501 = vmatpush.bf16.msk.msrb.mxu1 %vm10143_vm12, %v7981_v18 }
 0xfb3   : > { %5503 = vmatpush.bf16.msk.msrb.mxu1 %vm8502_vm13, %v7981_v18 }
 0xfb7   : > { %5505 = vmatpush.bf16.msk.msrb.mxu1 %vm8511_vm0, %v7981_v18 }
 0xfbb   : > { %5507 = vmatpush.bf16.msk.msrb.mxu1 %vm8520_vm6, %v7981_v18 }
 0xffb   : > { %v1100_v9 = vpop.f32.mrf.mxu1 }
 0xffc   : > { %v1101_v10 = vadd.f32 %v1100_v9, %v1080_v63 }
 0xffe   : > { %v1104_v12 = vsel %vm10145_vm1, %v1101_v10, 0.0  ;;  %vm10146_vm1 = vcmp.ge.s32.totalorder %v8163_v2, 1 }
 0xfff   : > { %v1105_v13 = vmul.f32 %v1104_v12, %v781_v11 }
0x1001   : > { %v1106_v14 = vadd.f32 %v1105_v13, %v8392_v40  ;;  %v8019_v40 = vmov 18   ;;  %v8021_v13 = vmov 28  }
0x1002   : > { %7816 = vset.pattern.permute.xlu1 %v8019_v40  ;;  %7818 = vset.pattern.permute.xlu2 %v8021_v13 }
0x1003   : > { %v1107_v20 = vpack.c.bf16 %v1106_v14, %v1106_v14  ;;  %v1102_v21 = vpop.f32.mrf.mxu1  ;;  %v8791_v14 = vld [vmem:[%s9999_s2] sm:$0xff] }
0x1005   : > { %1116 = vmatmul.bf16.vlgmr.msra.gmra.mxu2 %v1107_v20 }
0x1088   : > { %v1117_v26 = vpop.f32.mrf.mxu2 }
0x1089   : > { %1121 = vrot.lane.b32.xlu1 %v1117_v26, %s7986_s12  ;;  %1124 = vrot.lane.b32.xlu2 %v1117_v26, %s7982_s22 }
0x1090   : > { %v1119_v53 = vpop.f32.mrf.mxu2 }
0x1091   : > { %1139 = vrot.lane.b32.xlu2 %v8421_v56, %s8017_s23  ;;  %1134 = vperm.xlu1 %7816, %v8307_v47   ;;  %v10150_v56 = vmov 0  ;;  %s10203_s23 = smov 96  }
0x1092   : > { %v10151_v56 = vsel %vm8771_vm8, 4294967295, %v10150_v56 }
0x1099   : > { %1171 = vrot.lane.b32.xlu2 %v8307_v47, %s8018_s21  ;;  %s7925_s21 = scalar_lea.hbm %s10005_s8, 2 }
0x10e3   : > { %v1125_v32 = vpop.permute.xlu2 %1124 }
0x10e4   : > { %v1126_v33 = vsel %vm10146_vm1, %v1125_v32, 0.0  ;;  %vm10153_vm1 = vcmask 195584  }
0x10e5   : > { %v1132_v36 = vpack.c.bf16 %v1126_v33, %v1126_v33 }
0x10e7   : > { %v1149_v37 = vsel %vm10147_vm3, %v1132_v36, 0 }
0x10e8   : > { %1157 = vmatpush.bf16.msrb.mxu3 %v1149_v37 }
0x10eb   : > { %v1140_v46 = vpop.permute.xlu2 %1139 }
0x10ec   : > { %v1144_v50 = vsel %vm10152_vm5, %v1140_v46, %v1142_v42  ;;  %v8022_v46 = vmov 29  }
0x10ed   : > { %7819 = vset.pattern.permute.xlu1 %v8022_v46 }
0x10f3   : > { %v1172_v30 = vpop.permute.xlu2 %1171 }
0x10fb   : > { %v1122_v44 = vpop.permute.xlu1 %1121 }
0x10fc   : > { %v5452_v48 = vpack.c.bf16 %v1117_v26, %v1122_v44 }
0x10fe   : > { %5453 = vmatpush.bf16.msk.msrb.mxu3 %vm8771_vm8, %v5452_v48  ;;  %vm10161_vm8 = vcmp.ge.s32.totalorder %v8163_v2, 1 }
0x1101   : > { %5454 = vmatmul.msk.bf16.vlgmr.msrb.gmra.mxu3 %vm10153_vm1, %v1144_v50 }
0x1103   : > { %v1135_v22 = vpop.permute.xlu1 %1134 }
0x1184   : > { %v1160_v1 = vpop.f32.mrf.mxu3 }
0x1185   : > { %v1161_v45 = vadd.f32 %v1160_v1, %v1135_v22 }
0x1187   : > { %v1165_v23 = vsel %vm10060_vm11, %v1161_v45, 0.0  ;;  %vm10160_vm11 = vcmask 1043456  }
0x1188   : > { %v1166_v28 = vmul.f32 %v1165_v23, %v1165_v23 }
0x118a   : > { %1190 = vmatpush.msra.mxu0 %v1166_v28 }
0x118b   : > { %5455 = vmatmul.msk.f32.vlgmr.msra.gmra.mxu0 %vm10154_vm14, %v1172_v30  ;;  %vm10155_vm14 = vcmp.ge.s32.totalorder %v8163_v2, 2 }
0x118c   : > { %v1162_v31 = vpop.f32.mrf.mxu3 }
0x1208   : > { %v1192_v54 = vpop.f32.mrf.mxu0 }
0x1209   : > { %v1193_v55 = vadd.f32 %v1192_v54, %v1169_v35 }
0x120b   : > { %v1195_v58 = vmax.f32 %v1193_v55, 1e-09 }
0x120d   : > { %7837 = vrsqrt.f32 %v1195_v58  ;;  %vm1202_vm3 = vweird.f32 %v1195_v58 }
0x1213   : > { %v7838_v47 = vpop.eup %7837 }
0x1214   : > { %v1197_v59 = vmul.f32 %v7838_v47, %v1195_v58  ;;  %vm1203_vm5 = vweird.f32 %v7838_v47 }
0x1215   : > { %vm1204_vm1 = vmor %vm1202_vm3, %vm1203_vm5  ;;  %vm10156_vm5 = vcmask 1043456   ;;  %vm10157_vm3 = vcmask 195584  }
0x1216   : > { %v1198_v57 = vmul.f32 %v7838_v47, %v1197_v59 }
0x1218   : > { %v1199_v61 = vmul.f32 0.5, %v1198_v57 }
0x121a   : > { %v1200_v62 = vsub.f32 1.5, %v1199_v61 }
0x121c   : > { %v1201_v63 = vmul.f32 %v7838_v47, %v1200_v62 }
0x121e   : > { %v1205_v0 = vsel %vm1204_vm1, %v7838_v47, %v1201_v63  ;;  %vm10065_vm1 = vcmp.lt.s32.totalorder %v8163_v2, 32 }
0x121f   : > { %v1206_v9 = vmul.f32 %v1205_v0, %v1165_v23 }
0x1221   : > { %v1207_v10 = vpack.c.bf16 %v1206_v9, %v1206_v9  ;;  %v1368_v9 = vld [vmem:[%s9998_s1 + $0x20] sm:$0xff] }
0x1223   : > { %1216 = vmatmul.bf16.vlgmr.msra.gmra.mxu1 %v1207_v10 }
0x12a0   : > { %v1217_v11 = vpop.f32.mrf.mxu1 }
0x12a1   : > { %1221 = vrot.lane.b32.xlu2 %v1217_v11, %s7982_s22  ;;  %1224 = vrot.lane.b32.xlu1 %v1217_v11, %s8012_s25 }
0x12a8   : > { %v1219_v12 = vpop.f32.mrf.mxu1 }
0x12a9   : > { %1233 = vrot.lane.b32.xlu1 %v8757_v25, %s7985_s10  ;;  %1230 = vperm.xlu2 %7818, %v8791_v14   ;;  %v8839_v12 = vpack.c.bf16 %v1368_v9, %v1368_v9  ;;  %s8033_s10 = smov 80  }
0x12b1   : > { %1268 = vrot.lane.b32.xlu2 %v8757_v25, %s7988_s13  ;;  %s10219_s13 = smov 56  }
0x12fb   : > { %v1222_v26 = vpop.permute.xlu2 %1221 }
0x12fc   : > { %v5473_v40 = vpack.c.bf16 %v1222_v26, %v1217_v11  ;;  %v8023_v11 = vmov 30  }
0x12fd   : > { %7820 = vset.pattern.permute.xlu0 %v8023_v11 }
0x1303   : > { %v1231_v33 = vpop.permute.xlu2 %1230 }
0x130b   : > { %v1269_v28 = vpop.permute.xlu2 %1268 }
0x1313   : > { %v1225_v20 = vpop.permute.xlu1 %1224 }
0x1314   : > { %v1226_v21 = vsel %vm10155_vm14, %v1225_v20, 0.0  ;;  %vm10158_vm14 = vcmp.lt.s32.totalorder %v8163_v2, 127 }
0x1315   : > { %v1228_v60 = vpack.c.bf16 %v1226_v21, %v1226_v21 }
0x1317   : > { %v1239_v53 = vsel %vm10156_vm5, %v1228_v60, 0  ;;  %vm5508_vm5 = vmpackc.low %vm10158_vm14, %vm10065_vm1 }
0x1318   : > { %1247 = vmatpush.bf16.msrb.mxu0 %v1239_v53 }
0x131b   : > { %v1234_v32 = vpop.permute.xlu1 %1233 }
0x131c   : > { %5474 = vmatpush.bf16.msk.msrb.mxu0 %vm10130_vm2, %v5473_v40  ;;  %vm5476_vm2 = vmpackc.low %vm10065_vm1, %vm10161_vm8 }
0x131d   : > { %vm10165_vm8 = vmmov %vm10160_vm11 }
0x131f   : > { %5475 = vmatmul.msk.bf16.vlgmr.msrb.gmra.mxu0 %vm10157_vm3, %v1234_v32  ;;  %vm10159_vm3 = vmmov %vm10158_vm14  ;;  %vm10163_vm14 = vnez %v10112_v27 }
0x139c   : > { %v1250_v36 = vpop.f32.mrf.mxu0 }
0x139d   : > { %v1251_v37 = vadd.f32 %v1250_v36, %v1231_v33  ;;  %v8024_v36 = vmov 35  }
0x139f   : > { %v8805_v42 = vsel %vm10065_vm1, %v1251_v37, 0.0 }
0x13a0   : > { %1256 = vrot.lane.b32.xlu1 %v8805_v42, %s7982_s22  ;;  %1259 = vrot.lane.b32.xlu0 %v8805_v42, %s7986_s12 }
0x13a4   : > { %v1252_v44 = vpop.f32.mrf.mxu0 }
0x13a8   : > { %1405 = vrot.lane.b32.xlu0 %v8805_v42, %s7999_s26  ;;  %1265 = vperm.xlu1 %7819, %v8791_v14  }
0x13b0   : > { %1303 = vrot.lane.b32.xlu1 %v8757_v25, %s7990_s17  ;;  %s10179_s17 = smov 16  }
0x13b1   : > { %7821 = vset.pattern.permute.xlu1 %v8024_v36 }
0x1412   : > { %v1260_v48 = vpop.permute.xlu0 %1259  ;;  %v1257_v1 = vpop.permute.xlu1 %1256 }
0x1413   : > { %v1261_v50 = vsel %vm10159_vm3, %v1260_v48, 0.0  ;;  %v5509_v16 = vpack.c.bf16 %v1260_v48, %v1251_v37  ;;  %v5477_v23 = vpack.c.bf16 %v1251_v37, %v1257_v1 }
0x1414   : > { %v1263_v22 = vpack.c.bf16 %v1261_v50, %v1261_v50 }
0x1415   : > { %5510 = vmatmul.msk.bf16.vlgmr.msrb.gmra.mxu1 %vm5508_vm5, %v5509_v16  ;;  %vm10168_vm5 = vcmask 195584  }
0x1416   : > { %v1274_v45 = vsel %vm10160_vm11, %v1263_v22, 0  ;;  %vm10167_vm11 = vmmov %vm10165_vm8 }
0x1417   : > { %1282 = vmatpush.bf16.msra.mxu3 %v1274_v45  ;;  %v8025_v45 = vmov 31  }
0x1418   : > { %7822 = vset.pattern.permute.xlu2 %v8025_v45 }
0x141a   : > { %v1406_v30 = vpop.permute.xlu0 %1405  ;;  %v1266_v55 = vpop.permute.xlu1 %1265 }
0x141b   : > { %5478 = vmatpush.bf16.msk.msra.mxu3 %vm5476_vm2, %v5477_v23  ;;  %v5512_v31 = vpack.c.bf16 %v1406_v30, %v1406_v30  ;;  %vm10166_vm2 = vnez %v10088_v39 }
0x141e   : > { %5479 = vmatmul.msk.bf16.vlgmr.msra.gmra.mxu3 %vm10162_vm4, %v1269_v28  ;;  %vm10164_vm4 = vmmov %vm10159_vm3 }
0x141f   : > { %vm10169_vm3 = vmmov %vm10168_vm5 }
0x1422   : > { %v1304_v40 = vpop.permute.xlu1 %1303 }
0x1425   : > { %5513 = vmatmul.msk.bf16.gmra.mxu1 %vm10163_vm14, %v5512_v31  ;;  %vm10176_vm14 = vnez %v10082_v41 }
0x1492   : > { %v1419_v35 = vpop.f32.mrf.mxu1 }
0x149a   : > { %v1421_v54 = vpop.f32.mrf.mxu1 }
0x149b   : > { %v1428_v32 = vpack.c.bf16 %v1421_v54, %v1419_v35 }
0x14a1   : > { %v1285_v58 = vpop.f32.mrf.mxu3 }
0x14a2   : > { %v1286_v47 = vadd.f32 %v1285_v58, %v1266_v55  ;;  %v1424_v59 = vpop.f32.mrf.mxu1 }
0x14a3   : > { %v1429_v21 = vpack.c.bf16 %v1424_v59, %v1424_v59 }
0x14a4   : > { %v1289_v57 = vsel %vm10065_vm1, %v1286_v47, 0.0  ;;  %vm10174_vm1 = vnez %v10078_v34 }
0x14a5   : > { %v1290_v61 = vmax.f32 %v1289_v57, 0.0  ;;  %v1440_v53 = vsel %vm10167_vm11, %v1429_v21, 0  ;;  %vm10172_vm11 = vnez %v10074_v24 }
0x14a7   : > { %1291 = vrot.lane.b32.xlu0 %v1290_v61, %s7982_s22  ;;  %1294 = vrot.lane.b32.xlu2 %v1290_v61, %s7986_s12 }
0x14a9   : > { %v1287_v62 = vpop.f32.mrf.mxu3 }
0x14aa   : > { %v1426_v63 = vpop.f32.mrf.mxu1  ;;  %v8026_v62 = vmov 36  }
0x14af   : > { %1300 = vperm.xlu0 %7820, %v8791_v14   ;;  %1434 = vrot.lane.b32.xlu2 %v8839_v12, %s8003_s20  ;;  %s10194_s20 = smov 24  }
0x1501   : > { %v1295_v0 = vpop.permute.xlu2 %1294 }
0x1502   : > { %v1296_v10 = vsel %vm10164_vm4, %v1295_v0, 0.0  ;;  %vm10170_vm4 = vnez %v10070_v17  ;;  %v8037_v17 = vmov 41  }
0x1503   : > { %v1298_v13 = vpack.c.bf16 %v1296_v10, %v1296_v10 }
0x1505   : > { %v1309_v20 = vsel %vm10165_vm8, %v1298_v13, 0  ;;  %vm10171_vm8 = vnez %v10072_v19 }
0x1506   : > { %1317 = vmatpush.bf16.msra.mxu0 %v1309_v20 }
0x1509   : > { %v1435_v33 = vpop.permute.xlu2 %1434 }
0x1519   : > { %v1292_v60 = vpop.permute.xlu0 %1291 }
0x151a   : > { %v5481_v26 = vpack.c.bf16 %v1290_v61, %v1292_v60 }
0x151c   : > { %5482 = vmatpush.bf16.msk.msra.mxu0 %vm10166_vm2, %v5481_v26 }
0x151f   : > { %5483 = vmatmul.msk.bf16.vlgmr.msra.gmra.mxu0 %vm10168_vm5, %v1304_v40  ;;  %vm10173_vm5 = vnez %v10076_v29 }
0x1520   : > { %1448 = vmatpush.bf16.msrb.mxu0 %v1440_v53 }
0x1521   : > { %v1301_v37 = vpop.permute.xlu0 %1300 }
0x1524   : > { %1449 = vmatpush.bf16.msrb.mxu0 %v1428_v32 }
0x1528   : > { %5539 = vmatpush.bf16.msk.msra.mxu0 %vm10139_vm10, %v7981_v18 }
0x152c   : > { %5541 = vmatpush.bf16.msk.msra.mxu0 %vm10140_vm15, %v7981_v18 }
0x152f   : > { %5514 = vmatmul.msk.bf16.vlgmr.msrb.gmra.mxu0 %vm10169_vm3, %v1435_v33  ;;  %vm10175_vm3 = vnez %v10080_v38 }
0x1530   : > { %5543 = vmatpush.bf16.msk.msra.mxu0 %vm10141_vm7, %v7981_v18 }
0x1534   : > { %5545 = vmatpush.bf16.msk.msra.mxu0 %vm10142_vm9, %v7981_v18 }
0x1538   : > { %5547 = vmatpush.bf16.msk.msra.mxu0 %vm10143_vm12, %v7981_v18 }
0x153c   : > { %5549 = vmatpush.bf16.msk.msra.mxu0 %vm8502_vm13, %v7981_v18 }
0x1540   : > { %5551 = vmatpush.bf16.msk.msra.mxu0 %vm8511_vm0, %v7981_v18 }
0x1544   : > { %5553 = vmatpush.bf16.msk.msra.mxu0 %vm8520_vm6, %v7981_v18 }
0x1548   : > { %5590 = vmatpush.bf16.msk.msrb.mxu0 %vm10170_vm4, %v7981_v18 }
0x154c   : > { %5592 = vmatpush.bf16.msk.msrb.mxu0 %vm10171_vm8, %v7981_v18  ;;  %vm10177_vm8 = vnez %v10084_v43 }
0x1550   : > { %5594 = vmatpush.bf16.msk.msrb.mxu0 %vm10172_vm11, %v7981_v18 }
0x1554   : > { %5596 = vmatpush.bf16.msk.msrb.mxu0 %vm10173_vm5, %v7981_v18  ;;  %vm10178_vm5 = vcmp.lt.s32.totalorder %v8163_v2, 32 }
0x1558   : > { %5598 = vmatpush.bf16.msk.msrb.mxu0 %vm10174_vm1, %v7981_v18 }
0x155c   : > { %5600 = vmatpush.bf16.msk.msrb.mxu0 %vm10175_vm3, %v7981_v18 }
0x1560   : > { %5602 = vmatpush.bf16.msk.msrb.mxu0 %vm10176_vm14, %v7981_v18  ;;  %vm10182_vm14 = vcmp.lt.s32.totalorder %v8163_v2, 15 }
0x1564   : > { %5604 = vmatpush.bf16.msk.msrb.mxu0 %vm10177_vm8, %v7981_v18  ;;  %vm10181_vm8 = vcmask 1043456  }
0x159c   : > { %v1320_v44 = vpop.f32.mrf.mxu0 }
0x159d   : > { %v1321_v46 = vadd.f32 %v1320_v44, %v1301_v37 }
0x159f   : > { %v1324_v48 = vsel %vm10178_vm5, %v1321_v46, 0.0  ;;  %vm10180_vm5 = vcmp.lt.s32.totalorder %v8163_v2, 127 }
0x15a0   : > { %v8901_v50 = vadd.f32 %v1324_v48, %v8805_v42 }
0x15a2   : > { %1326 = vrot.lane.b32.xlu2 %v8901_v50, %s7982_s22  ;;  %1329 = vrot.lane.b32.xlu1 %v8901_v50, %s7986_s12 }
0x15a4   : > { %v1322_v16 = vpop.f32.mrf.mxu0 }
0x15aa   : > { %1431 = vperm.xlu1 %7821, %v8791_v14   ;;  %1338 = vrot.lane.b32.xlu2 %v8757_v25, %s7992_s18  ;;  %s10191_s18 = smov 48  }
0x15ac   : > { %v1451_v22 = vpop.f32.mrf.mxu0 }
0x15b2   : > { %1335 = vperm.xlu2 %7822, %v8791_v14  }
0x15b4   : > { %v1453_v1 = vpop.f32.mrf.mxu0 }
0x15ba   : > { %1379 = vrot.lane.b32.xlu2 %v8757_v25, %s10179_s17 }
0x15bb   : > { %7823 = vset.pattern.permute.xlu2 %v8026_v62 }
0x15c2   : > { %1486 = vperm.xlu2 %7823, %v8791_v14  }
0x15ca   : > { %1544 = vrot.lane.b32.xlu2 %v8839_v12, %s10194_s20 }
0x15fc   : > { %v1327_v28 = vpop.permute.xlu2 %1326 }
0x15fd   : > { %v5485_v54 = vpack.c.bf16 %v8901_v50, %v1327_v28 }
0x1604   : > { %v1339_v47 = vpop.permute.xlu2 %1338 }
0x160c   : > { %v1336_v4 = vpop.permute.xlu2 %1335 }
0x1614   : > { %v1330_v23 = vpop.permute.xlu1 %1329  ;;  %v1380_v20 = vpop.permute.xlu2 %1379 }
0x1615   : > { %v1331_v30 = vsel %vm10180_vm5, %v1330_v23, 0.0  ;;  %vm10183_vm5 = vcmask 195584  }
0x1616   : > { %v1333_v31 = vpack.c.bf16 %v1331_v30, %v1331_v30 }
0x1618   : > { %v1344_v35 = vsel %vm10181_vm8, %v1333_v31, 0 }
0x1619   : > { %1352 = vmatpush.bf16.msrb.mxu2 %v1344_v35 }
0x161c   : > { %v1432_v55 = vpop.permute.xlu1 %1431  ;;  %v1487_v16 = vpop.permute.xlu2 %1486 }
0x161d   : > { %v1452_v58 = vadd.f32 %v1451_v22, %v1432_v55  ;;  %5486 = vmatpush.bf16.msk.msrb.mxu2 %vm10166_vm2, %v5485_v54  ;;  %v8027_v55 = vmov 37  }
0x161e   : > { %7824 = vset.pattern.permute.xlu0 %v8027_v55 }
0x161f   : > { %v1455_v25 = vsel %vm10182_vm14, %v1452_v58, 0.0  ;;  %vm10193_vm14 = vmmov %vm10181_vm8  ;;  %vm10195_vm8 = vcmask 130048  }
0x1620   : > { %v1456_v59 = vmax.f32 %v1455_v25, 0.0  ;;  %5487 = vmatmul.msk.bf16.vlgmr.msrb.gmra.mxu2 %vm10183_vm5, %v1339_v47 }
0x1621   : > { %5516 = vmatpush.bf16.msk.msra.mxu2 %vm10139_vm10, %v7981_v18  ;;  %vm10189_vm10 = vcmp.lt.s32.totalorder %v8163_v2, 32 }
0x1622   : > { %1457 = vrot.lane.b32.xlu0 %v1456_v59, %s7986_s12  ;;  %1460 = vrot.lane.b32.xlu1 %v1456_v59, %s7999_s26 }
0x1625   : > { %5518 = vmatpush.bf16.msk.msra.mxu2 %vm10140_vm15, %v7981_v18  ;;  %vm10190_vm15 = vnez %v10112_v27 }
0x1629   : > { %5520 = vmatpush.bf16.msk.msra.mxu2 %vm10141_vm7, %v7981_v18  ;;  %vm10192_vm7 = vcmp.lt.s32.totalorder %v8163_v2, 127 }
0x162d   : > { %5522 = vmatpush.bf16.msk.msra.mxu2 %vm10142_vm9, %v7981_v18  ;;  %vm10184_vm9 = vnez %v10072_v19 }
0x1631   : > { %5524 = vmatpush.bf16.msk.msra.mxu2 %vm10143_vm12, %v7981_v18  ;;  %vm10188_vm12 = vnez %v10090_v52  ;;  %v1545_v52 = vpop.permute.xlu2 %1544 }
0x1635   : > { %5526 = vmatpush.bf16.msk.msra.mxu2 %vm8502_vm13, %v7981_v18  ;;  %vm10185_vm13 = vnez %v10076_v29 }
0x1639   : > { %5528 = vmatpush.bf16.msk.msra.mxu2 %vm8511_vm0, %v7981_v18  ;;  %vm10186_vm0 = vnez %v10082_v41 }
0x163d   : > { %5530 = vmatpush.bf16.msk.msra.mxu2 %vm8520_vm6, %v7981_v18  ;;  %vm10187_vm6 = vnez %v10084_v43 }
0x1641   : > { %5570 = vmatpush.bf16.msk.msrb.mxu2 %vm10170_vm4, %v7981_v18 }
0x1645   : > { %5572 = vmatpush.bf16.msk.msrb.mxu2 %vm10184_vm9, %v7981_v18 }
0x1649   : > { %5574 = vmatpush.bf16.msk.msrb.mxu2 %vm10172_vm11, %v7981_v18 }
0x164d   : > { %5576 = vmatpush.bf16.msk.msrb.mxu2 %vm10185_vm13, %v7981_v18 }
0x1651   : > { %5578 = vmatpush.bf16.msk.msrb.mxu2 %vm10174_vm1, %v7981_v18 }
0x1655   : > { %5580 = vmatpush.bf16.msk.msrb.mxu2 %vm10175_vm3, %v7981_v18 }
0x1659   : > { %5582 = vmatpush.bf16.msk.msrb.mxu2 %vm10186_vm0, %v7981_v18 }
0x165d   : > { %5584 = vmatpush.bf16.msk.msrb.mxu2 %vm10187_vm6, %v7981_v18 }
0x1694   : > { %v1458_v49 = vpop.permute.xlu0 %1457  ;;  %v1461_v5 = vpop.permute.xlu1 %1460 }
0x1695   : > { %v5532_v3 = vpack.c.bf16 %v1458_v49, %v1456_v59  ;;  %v5535_v8 = vpack.c.bf16 %v1461_v5, %v1461_v5 }
0x1697   : > { %5533 = vmatmul.msk.bf16.vlgmr.msra.gmra.mxu2 %vm10188_vm12, %v5532_v3 }
0x1698   : > { %5610 = vmatpush.bf16.msk.msra.mxu2 %vm10170_vm4, %v7981_v18 }
0x169c   : > { %5612 = vmatpush.bf16.msk.msra.mxu2 %vm10184_vm9, %v7981_v18 }
0x16a0   : > { %5614 = vmatpush.bf16.msk.msra.mxu2 %vm10172_vm11, %v7981_v18 }
0x16a3   : > { %v1355_v6 = vpop.f32.mrf.mxu2 }
0x16a4   : > { %v1356_v7 = vadd.f32 %v1355_v6, %v1336_v4  ;;  %5616 = vmatpush.bf16.msk.msra.mxu2 %vm10185_vm13, %v7981_v18 }
0x16a6   : > { %v1359_v15 = vsel %vm10189_vm10, %v1356_v7, 0.0  ;;  %vm10196_vm10 = vmmov %vm10193_vm14 }
0x16a7   : > { %v1360_v57 = vmax.f32 %v1359_v15, 0.0  ;;  %5536 = vmatmul.msk.bf16.gmra.mxu2 %vm10190_vm15, %v5535_v8  ;;  %v8028_v15 = vmov 33  }
0x16a8   : > { %5618 = vmatpush.bf16.msk.msra.mxu2 %vm10174_vm1, %v7981_v18  ;;  %7825 = vset.pattern.permute.xlu2 %v8028_v15 }
0x16a9   : > { %1361 = vrot.lane.b32.xlu1 %v1360_v57, %s7982_s22  ;;  %1364 = vrot.lane.b32.xlu0 %v1360_v57, %s7986_s12 }
0x16ab   : > { %v1357_v61 = vpop.f32.mrf.mxu2 }
0x16ac   : > { %5620 = vmatpush.bf16.msk.msra.mxu2 %vm10175_vm3, %v7981_v18 }
0x16b0   : > { %5622 = vmatpush.bf16.msk.msra.mxu2 %vm10186_vm0, %v7981_v18 }
0x16b1   : > { %1381 = vrot.lane.b32.xlu0 %v8839_v12, %s10179_s17  ;;  %1489 = vrot.lane.b32.xlu1 %v8839_v12, %s10191_s18  ;;  %s8039_s17 = smov 76  }
0x16b4   : > { %5624 = vmatpush.bf16.msk.msra.mxu2 %vm10187_vm6, %v7981_v18 }
0x171a   : > { %v1474_v63 = vpop.f32.mrf.mxu2 }
0x171b   : > { %v1365_v0 = vpop.permute.xlu0 %1364  ;;  %v1362_v11 = vpop.permute.xlu1 %1361 }
0x171c   : > { %v1366_v9 = vsel %vm10192_vm7, %v1365_v0, 0.0  ;;  %v5489_v21 = vpack.c.bf16 %v1360_v57, %v1362_v11  ;;  %vm10197_vm7 = vmmov %vm10183_vm5 }
0x171d   : > { %v1372_v10 = vpack.c.bf16 %v1366_v9, %v1366_v9 }
0x171f   : > { %v1388_v13 = vsel %vm10193_vm14, %v1372_v10, 0  ;;  %vm10198_vm14 = vcmp.lt.s32.totalorder %v8163_v2, 7 }
0x1720   : > { %1396 = vmatpush.bf16.msrb.mxu3 %v1388_v13 }
0x1722   : > { %v1476_v60 = vpop.f32.mrf.mxu2 }
0x1723   : > { %v1382_v26 = vpop.permute.xlu0 %1381  ;;  %v1483_v36 = vpack.c.bf16 %v1476_v60, %v1474_v63  ;;  %v1490_v44 = vpop.permute.xlu1 %1489 }
0x1724   : > { %5490 = vmatpush.bf16.msk.msrb.mxu3 %vm10166_vm2, %v5489_v21  ;;  %v1383_v53 = vsel %vm10195_vm8, %v1380_v20, %v1382_v26  ;;  %vm10199_vm8 = vmmov %vm10196_vm10  ;;  %v8029_v26 = vmov 34  }
0x1727   : > { %5491 = vmatmul.msk.bf16.vlgmr.msrb.gmra.mxu3 %vm10183_vm5, %v1383_v53 }
0x172a   : > { %v1479_v40 = vpop.f32.mrf.mxu2 }
0x172b   : > { %v1484_v32 = vpack.c.bf16 %v1479_v40, %v1479_v40 }
0x172d   : > { %v1495_v33 = vsel %vm10196_vm10, %v1484_v32, 0  ;;  %vm10205_vm10 = vmmov %vm10199_vm8 }
0x172e   : > { %1503 = vmatpush.bf16.msra.mxu3 %v1495_v33 }
0x1732   : > { %v1481_v37 = vpop.f32.mrf.mxu2  ;;  %1504 = vmatpush.bf16.msra.mxu3 %v1483_v36 }
0x1737   : > { %5537 = vmatmul.msk.bf16.vlgmr.msra.gmra.mxu3 %vm10197_vm7, %v1490_v44  ;;  %vm10206_vm7 = vcmp.ge.s32.totalorder %v8163_v2, 1 }
0x17aa   : > { %v9020_v46 = vpop.f32.mrf.mxu3 }
0x17b2   : > { %v1401_v48 = vpop.f32.mrf.mxu3 }
0x17ba   : > { %v1506_v22 = vpop.f32.mrf.mxu3 }
0x17bb   : > { %v1507_v1 = vadd.f32 %v1506_v22, %v1487_v16 }
0x17bd   : > { %v1510_v45 = vsel %vm10198_vm14, %v1507_v1, 0.0 }
0x17be   : > { %v1511_v23 = vmax.f32 %v1510_v45, 0.0 }
0x17c0   : > { %1515 = vrot.lane.b32.xlu1 %v1511_v23, %s7999_s26  ;;  %1512 = vrot.lane.b32.xlu0 %v1511_v23, %s7986_s12  ;;  %s10202_s26 = smov 120  }
0x17c2   : > { %v1508_v28 = vpop.f32.mrf.mxu3 }
0x17c8   : > { %1541 = vperm.xlu0 %7824, %v8791_v14  }
0x17d0   : > { %7826 = vset.pattern.permute.xlu0 %v8029_v26 }
0x1832   : > { %v1513_v30 = vpop.permute.xlu0 %1512  ;;  %v1516_v35 = vpop.permute.xlu1 %1515 }
0x1833   : > { %v5555_v31 = vpack.c.bf16 %v1513_v30, %v1511_v23  ;;  %v5558_v54 = vpack.c.bf16 %v1516_v35, %v1516_v35 }
0x1835   : > { %5556 = vmatmul.msk.bf16.vlgmr.msra.gmra.mxu0 %vm10188_vm12, %v5555_v31  ;;  %vm10200_vm12 = vmmov %vm10183_vm5  ;;  %vm10204_vm5 = vcmp.lt.s32.totalorder %v8163_v2, 127  ;;  %v8030_v31 = vmov 38  }
0x1836   : > { %7827 = vset.pattern.permute.xlu1 %v8030_v31 }
0x183a   : > { %v1542_v5 = vpop.permute.xlu0 %1541 }
0x1845   : > { %5559 = vmatmul.msk.bf16.gmra.mxu0 %vm10190_vm15, %v5558_v54  ;;  %vm10201_vm15 = vcmp.lt.s32.totalorder %v8163_v2, 3 }
0x1846   : > { %vm10207_vm14 = vmmov %vm10201_vm15 }
0x18b2   : > { %v1529_v58 = vpop.f32.mrf.mxu0 }
0x18ba   : > { %v1531_v47 = vpop.f32.mrf.mxu0 }
0x18bb   : > { %v1538_v3 = vpack.c.bf16 %v1531_v47, %v1529_v58 }
0x18c2   : > { %v1534_v25 = vpop.f32.mrf.mxu0 }
0x18c3   : > { %v1539_v59 = vpack.c.bf16 %v1534_v25, %v1534_v25  ;;  %v1656_v25 = vld [vmem:[%s9998_s1 + $0x28] sm:$0xff] }
0x18c5   : > { %v1550_v49 = vsel %vm10199_vm8, %v1539_v59, 0  ;;  %vm5561_vm8 = vmpackc.low %vm10207_vm14, %vm10206_vm7 }
0x18c6   : > { %1558 = vmatpush.bf16.msrb.mxu3 %v1550_v49  ;;  %vm10209_vm7 = vmmov %vm10200_vm12  ;;  %v9096_v49 = vpack.c.bf16 %v1656_v25, %v1656_v25 }
0x18ca   : > { %v1536_v4 = vpop.f32.mrf.mxu0  ;;  %1559 = vmatpush.bf16.msrb.mxu3 %v1538_v3 }
0x18cd   : > { %5560 = vmatmul.msk.bf16.vlgmr.msrb.gmra.mxu3 %vm10200_vm12, %v1545_v52 }
0x1950   : > { %v1561_v27 = vpop.f32.mrf.mxu3 }
0x1951   : > { %v1562_v6 = vadd.f32 %v1561_v27, %v1542_v5 }
0x1953   : > { %v1565_v7 = vsel %vm10201_vm15, %v1562_v6, 0.0  ;;  %vm10208_vm15 = vmmov %vm10207_vm14 }
0x1954   : > { %1566 = vrot.lane.b32.xlu2 %v1565_v7, %s7982_s22  ;;  %1569 = vrot.lane.b32.xlu1 %v1565_v7, %s7986_s12 }
0x1958   : > { %v1563_v8 = vpop.f32.mrf.mxu3 }
0x1959   : > { %v8032_v8 = vmov 39  }
0x195c   : > { %1578 = vrot.lane.b32.xlu1 %v8839_v12, %s10202_s26  ;;  %1575 = vperm.xlu2 %7825, %v8791_v14  }
0x1964   : > { %1613 = vrot.lane.b32.xlu2 %v8839_v12, %s10203_s23 }
0x1965   : > { %7828 = vset.pattern.permute.xlu2 %v8032_v8 }
0x19ae   : > { %v1567_v63 = vpop.permute.xlu2 %1566 }
0x19af   : > { %v5562_v9 = vpack.c.bf16 %v1562_v6, %v1567_v63 }
0x19b6   : > { %v1576_v12 = vpop.permute.xlu2 %1575 }
0x19be   : > { %v1614_v44 = vpop.permute.xlu2 %1613 }
0x19c6   : > { %v1570_v57 = vpop.permute.xlu1 %1569 }
0x19c7   : > { %v1571_v61 = vsel %vm10204_vm5, %v1570_v57, 0.0 }
0x19c8   : > { %v1573_v62 = vpack.c.bf16 %v1571_v61, %v1571_v61  ;;  %v8034_v61 = vmov 32  }
0x19ca   : > { %v1584_v0 = vsel %vm10205_vm10, %v1573_v62, 0 }
0x19cb   : > { %1592 = vmatpush.bf16.msra.mxu3 %v1584_v0 }
0x19ce   : > { %v1579_v10 = vpop.permute.xlu1 %1578 }
0x19cf   : > { %5563 = vmatpush.bf16.msk.msra.mxu3 %vm5561_vm8, %v5562_v9  ;;  %vm10211_vm8 = vmmov %vm10205_vm10 }
0x19d2   : > { %5564 = vmatmul.msk.bf16.vlgmr.msra.gmra.mxu3 %vm10200_vm12, %v1579_v10  ;;  %vm10212_vm12 = vnez %v10086_v51 }
0x1a55   : > { %v1595_v11 = vpop.f32.mrf.mxu3 }
0x1a56   : > { %v1596_v13 = vadd.f32 %v1595_v11, %v1576_v12 }
0x1a58   : > { %v1599_v20 = vsel %vm10208_vm15, %v1596_v13, 0.0  ;;  %vm10213_vm15 = vmmov %vm10209_vm7 }
0x1a59   : > { %v1600_v21 = vmax.f32 %v1599_v20, 0.0 }
0x1a5b   : > { %1601 = vrot.lane.b32.xlu1 %v1600_v21, %s7982_s22  ;;  %1604 = vrot.lane.b32.xlu0 %v1600_v21, %s7986_s12 }
0x1a5d   : > { %v1597_v60 = vpop.f32.mrf.mxu3 }
0x1a63   : > { %1610 = vperm.xlu0 %7826, %v8791_v14  }
0x1acd   : > { %v1605_v53 = vpop.permute.xlu0 %1604  ;;  %v1602_v33 = vpop.permute.xlu1 %1601 }
0x1ace   : > { %v1606_v40 = vsel %vm10204_vm5, %v1605_v53, 0.0  ;;  %v5566_v37 = vpack.c.bf16 %v1600_v21, %v1602_v33  ;;  %vm10214_vm5 = vcmp.lt.s32.totalorder %v8163_v2, 7 }
0x1acf   : > { %v1608_v32 = vpack.c.bf16 %v1606_v40, %v1606_v40 }
0x1ad1   : > { %v1619_v36 = vsel %vm10205_vm10, %v1608_v32, 0 }
0x1ad2   : > { %1627 = vmatpush.bf16.msra.mxu1 %v1619_v36  ;;  %v8035_v36 = vmov 40  }
0x1ad3   : > { %7829 = vset.pattern.permute.xlu0 %v8035_v36 }
0x1ad5   : > { %v1611_v48 = vpop.permute.xlu0 %1610 }
0x1ad6   : > { %5567 = vmatpush.bf16.msk.msra.mxu1 %vm10166_vm2, %v5566_v37  ;;  %vm10210_vm2 = vcmp.ge.s32.totalorder %v8163_v2, 2 }
0x1ad7   : > { %vm10215_vm10 = vmmov %vm10210_vm2 }
0x1ad9   : > { %5568 = vmatmul.msk.bf16.vlgmr.msra.gmra.mxu1 %vm10209_vm7, %v1614_v44  ;;  %vm10216_vm7 = vmmov %vm10211_vm8 }
0x1b56   : > { %v1630_v16 = vpop.f32.mrf.mxu1 }
0x1b57   : > { %v1631_v22 = vadd.f32 %v1630_v16, %v1611_v48 }
0x1b59   : > { %v1634_v1 = vsel %vm10207_vm14, %v1631_v22, 0.0  ;;  %vm10217_vm14 = vmmov %vm10213_vm15 }
0x1b5a   : > { %v1635_v45 = vadd.f32 %v1634_v1, %v1565_v7 }
0x1b5c   : > { %v1636_v23 = vpack.c.bf16 %v1635_v45, %v1635_v45 }
0x1b5e   : > { %v1632_v28 = vpop.f32.mrf.mxu1  ;;  %1645 = vmatmul.bf16.vlgmr.msrb.gmra.mxu2 %v1636_v23 }
0x1b5f   : > { %5653 = vmatpush.bf16.msk.msrb.mxu2 %vm10170_vm4, %v7981_v18 }
0x1b63   : > { %5655 = vmatpush.bf16.msk.msrb.mxu2 %vm10184_vm9, %v7981_v18 }
0x1b67   : > { %5657 = vmatpush.bf16.msk.msrb.mxu2 %vm10172_vm11, %v7981_v18 }
0x1b6b   : > { %5659 = vmatpush.bf16.msk.msrb.mxu2 %vm10185_vm13, %v7981_v18 }
0x1b6f   : > { %5661 = vmatpush.bf16.msk.msrb.mxu2 %vm10174_vm1, %v7981_v18 }
0x1b73   : > { %5663 = vmatpush.bf16.msk.msrb.mxu2 %vm10175_vm3, %v7981_v18 }
0x1b77   : > { %5665 = vmatpush.bf16.msk.msrb.mxu2 %vm10186_vm0, %v7981_v18 }
0x1b7b   : > { %5667 = vmatpush.bf16.msk.msrb.mxu2 %vm10187_vm6, %v7981_v18 }
0x1be1   : > { %v1646_v39 = vpop.f32.mrf.mxu2 }
0x1be2   : > { %1650 = vrot.lane.b32.xlu2 %v1646_v39, %s7982_s22  ;;  %1653 = vrot.lane.b32.xlu1 %v1646_v39, %s8012_s25 }
0x1be9   : > { %v1648_v30 = vpop.f32.mrf.mxu2 }
0x1bea   : > { %1661 = vperm.xlu1 %7827, %v8791_v14  }
0x1bf2   : > { %1712 = vrot.lane.b32.xlu1 %v9096_v49, %s8031_s19 }
0x1bf3   : > { %7831 = vset.pattern.permute.xlu1 %v8037_v17 }
0x1c3c   : > { %v1651_v58 = vpop.permute.xlu2 %1650 }
0x1c3d   : > { %v5586_v59 = vpack.c.bf16 %v1651_v58, %v1646_v39 }
0x1c54   : > { %v1654_v35 = vpop.permute.xlu1 %1653 }
0x1c55   : > { %v1655_v54 = vsel %vm10210_vm2, %v1654_v35, 0.0  ;;  %vm10218_vm2 = vcmp.lt.s32.totalorder %v8163_v2, 15 }
0x1c56   : > { %v1659_v55 = vpack.c.bf16 %v1655_v54, %v1655_v54 }
0x1c58   : > { %v1668_v47 = vsel %vm10211_vm8, %v1659_v55, 0  ;;  %vm10220_vm8 = vmmov %vm10215_vm10 }
0x1c59   : > { %1676 = vmatpush.bf16.msrb.mxu3 %v1668_v47 }
0x1c5c   : > { %v1662_v3 = vpop.permute.xlu1 %1661 }
0x1c5d   : > { %5587 = vmatpush.bf16.msk.msrb.mxu3 %vm10212_vm12, %v5586_v59 }
0x1c60   : > { %5588 = vmatmul.msk.bf16.vlgmr.msrb.gmra.mxu3 %vm10213_vm15, %v9096_v49  ;;  %vm10221_vm15 = vmmov %vm10216_vm7 }
0x1c64   : > { %v1713_v11 = vpop.permute.xlu1 %1712 }
0x1ce3   : > { %v1679_v4 = vpop.f32.mrf.mxu3 }
0x1ce4   : > { %v1680_v52 = vadd.f32 %v1679_v4, %v1662_v3 }
0x1ce6   : > { %v1683_v5 = vsel %vm10214_vm5, %v1680_v52, 0.0  ;;  %vm10222_vm5 = vmmov %vm10217_vm14 }
0x1ce7   : > { %v1684_v27 = vmax.f32 %v1683_v5, 0.0 }
0x1ce9   : > { %v1685_v6 = vpack.c.bf16 %v1684_v27, %v1684_v27 }
0x1ceb   : > { %v1681_v7 = vpop.f32.mrf.mxu3  ;;  %1694 = vmatmul.bf16.vlgmr.msrb.gmra.mxu0 %v1685_v6 }
0x1d68   : > { %v1695_v15 = vpop.f32.mrf.mxu0 }
0x1d69   : > { %1699 = vrot.lane.b32.xlu0 %v1695_v15, %s7982_s22  ;;  %1702 = vrot.lane.b32.xlu2 %v1695_v15, %s8012_s25 }
0x1d70   : > { %v1697_v57 = vpop.f32.mrf.mxu0 }
0x1d71   : > { %1708 = vperm.xlu2 %7828, %v8791_v14  }
0x1d79   : > { %1761 = vrot.lane.b32.xlu2 %v9096_v49, %s8033_s10 }
0x1d7a   : > { %7830 = vset.pattern.permute.xlu2 %v8034_v61 }
0x1d81   : > { %1374 = vperm.xlu2 %7830, %v8791_v14  }
0x1dc3   : > { %v1703_v62 = vpop.permute.xlu2 %1702 }
0x1dc4   : > { %v1704_v63 = vsel %vm10215_vm10, %v1703_v62, 0.0  ;;  %vm10227_vm10 = vcmask 130048  }
0x1dc5   : > { %v1706_v0 = vpack.c.bf16 %v1704_v63, %v1704_v63 }
0x1dc7   : > { %v1718_v9 = vsel %vm10216_vm7, %v1706_v0, 0 }
0x1dc8   : > { %1726 = vmatpush.bf16.msrb.mxu1 %v1718_v9  ;;  %v8040_v9 = vmov 51  }
0x1dcb   : > { %v1709_v13 = vpop.permute.xlu2 %1708 }
0x1dd3   : > { %v1762_v45 = vpop.permute.xlu2 %1761 }
0x1ddb   : > { %v1700_v10 = vpop.permute.xlu0 %1699  ;;  %v1375_v43 = vpop.permute.xlu2 %1374 }
0x1ddc   : > { %v5606_v12 = vpack.c.bf16 %v1700_v10, %v1695_v15  ;;  %v1400_v39 = vadd.f32 %v9020_v46, %v1375_v43  ;;  %v5732_v43 = vld [vmem:[%s10000_s3 + $0x78] sm:$0xf0] }
0x1dde   : > { %5607 = vmatpush.bf16.msk.msrb.mxu1 %vm10212_vm12, %v5606_v12 }
0x1de1   : > { %5608 = vmatmul.msk.bf16.vlgmr.msrb.gmra.mxu1 %vm10217_vm14, %v1713_v11 }
0x1e5e   : > { %v1729_v20 = vpop.f32.mrf.mxu1 }
0x1e5f   : > { %v1730_v21 = vadd.f32 %v1729_v20, %v1709_v13  ;;  %v8041_v13 = vmov 60  }
0x1e61   : > { %v1733_v60 = vsel %vm10218_vm2, %v1730_v21, 0.0 }
0x1e62   : > { %v1734_v26 = vmax.f32 %v1733_v60, 0.0 }
0x1e64   : > { %v1735_v53 = vpack.c.bf16 %v1734_v26, %v1734_v26 }
0x1e66   : > { %v1731_v40 = vpop.f32.mrf.mxu1  ;;  %1744 = vmatmul.bf16.vlgmr.msra.gmra.mxu2 %v1735_v53 }
0x1ee9   : > { %v1745_v32 = vpop.f32.mrf.mxu2 }
0x1eea   : > { %1749 = vrot.lane.b32.xlu1 %v1745_v32, %s7982_s22  ;;  %1752 = vrot.lane.b32.xlu0 %v1745_v32, %s8012_s25  ;;  %s8036_s25 = smov 86  }
0x1eeb   : > { %1818 = vrot.lane.b32.xlu2 %v8791_v14, %s8036_s25 }
0x1ef1   : > { %v1747_v33 = vpop.f32.mrf.mxu2 }
0x1ef2   : > { %1789 = vrot.lane.b32.xlu1 %v9096_v49, %s10219_s13  ;;  %1758 = vperm.xlu0 %7829, %v8791_v14   ;;  %s5225_s13 = scalar_lea.hbm %s10005_s8, %s8109_s9 }
0x1ef3   : > { %1876 = vrot.lane.b32.xlu2 %v9096_v49, %s10191_s18  ;;  %s10229_s18 = smov 32  }
0x1efa   : > { %1786 = vperm.xlu1 %7831, %v8791_v14  }
0x1efb   : > { %1901 = vrot.lane.b32.xlu2 %v8791_v14, %s8039_s17 }
0x1f02   : > { %7833 = vset.pattern.permute.xlu1 %v8040_v9 }
0x1f45   : > { %v1819_v3 = vpop.permute.xlu2 %1818 }
0x1f4d   : > { %v1877_v11 = vpop.permute.xlu2 %1876 }
0x1f55   : > { %v1902_v40 = vpop.permute.xlu2 %1901 }
0x1f5c   : > { %v1753_v37 = vpop.permute.xlu0 %1752  ;;  %v1750_v16 = vpop.permute.xlu1 %1749 }
0x1f5d   : > { %v1754_v44 = vsel %vm10220_vm8, %v1753_v37, 0.0  ;;  %v5626_v1 = vpack.c.bf16 %v1750_v16, %v1745_v32 }
0x1f5e   : > { %v1756_v48 = vpack.c.bf16 %v1754_v44, %v1754_v44 }
0x1f60   : > { %v1767_v22 = vsel %vm10221_vm15, %v1756_v48, 0  ;;  %vm10230_vm15 = vcmp.ge.s32.totalorder %v8163_v2, 1 }
0x1f61   : > { %1775 = vmatpush.bf16.msra.mxu3 %v1767_v22 }
0x1f64   : > { %v1759_v19 = vpop.permute.xlu0 %1758  ;;  %v1790_v23 = vpop.permute.xlu1 %1789 }
0x1f65   : > { %5627 = vmatpush.bf16.msk.msra.mxu3 %vm10212_vm12, %v5626_v1 }
0x1f68   : > { %5628 = vmatmul.msk.bf16.vlgmr.msra.gmra.mxu3 %vm10222_vm5, %v1762_v45 }
0x1f69   : > { %5632 = vmatpush.bf16.msk.msrb.mxu3 %vm10170_vm4, %v7981_v18  ;;  %vm10223_vm4 = vmmov %vm10216_vm7  ;;  %vm1894_vm7 = vcmp.lt.s32.totalorder %v8163_v2, 64 }
0x1f6a   : > { %vm10231_vm5 = vmmov %vm10223_vm4 }
0x1f6c   : > { %v1787_v30 = vpop.permute.xlu1 %1786 }
0x1f6d   : > { %5634 = vmatpush.bf16.msk.msrb.mxu3 %vm10184_vm9, %v7981_v18 }
0x1f71   : > { %5636 = vmatpush.bf16.msk.msrb.mxu3 %vm10172_vm11, %v7981_v18  ;;  %vm10224_vm11 = vcmask 64512  }
0x1f72   : > { %vm10226_vm9 = vmmov %vm10224_vm11 }
0x1f73   : > { %vm10228_vm14 = vmmov %vm10226_vm9 }
0x1f75   : > { %5638 = vmatpush.bf16.msk.msrb.mxu3 %vm10185_vm13, %v7981_v18 }
0x1f79   : > { %5640 = vmatpush.bf16.msk.msrb.mxu3 %vm10174_vm1, %v7981_v18  ;;  %vm1782_vm1 = vcmp.lt.s32.totalorder %v8163_v2, 31 }
0x1f7d   : > { %5642 = vmatpush.bf16.msk.msrb.mxu3 %vm10175_vm3, %v7981_v18  ;;  %vm10225_vm3 = vcmp.lt.s32.totalorder %v8163_v2, 32 }
0x1f7e   : > { %v1403_v31 = vsel %vm10225_vm3, %v1400_v39, 0.0 }
0x1f7f   : > { %v1404_v55 = vadd.f32 %v1403_v31, %v8901_v50  ;;  %v7286_v31 = vld [vmem:[%s10000_s3 + $0x64] sm:$0xf] }
0x1f81   : > { %5644 = vmatpush.bf16.msk.msrb.mxu3 %vm10186_vm0, %v7981_v18 }
0x1f85   : > { %5646 = vmatpush.bf16.msk.msrb.mxu3 %vm10187_vm6, %v7981_v18  ;;  %v8038_v18 = vmov 50  }
0x1f86   : > { %7832 = vset.pattern.permute.xlu0 %v8038_v18  ;;  %v7288_v18 = vld [vmem:[%s10000_s3 + $0x74] sm:$0xf] }
0x1f87   : > { %1815 = vperm.xlu0 %7832, %v8791_v14   ;;  %v5735_v39 = vor.u32 %v7288_v18, %v5732_v43  ;;  %v7352_v18 = vld [vmem:[%s10001_s4 + $0x1ec] sm:$0xf0]  ;;  %v7350_v43 = vld [vmem:[%s10001_s4 + $0x1e4] sm:$0xf] }
0x1f89   : > { %2102 = vmatpush.bf16.msra.mxu3 %v5735_v39 }
0x1f8f   : > { %7834 = vset.pattern.permute.xlu0 %v8041_v13  ;;  %v7277_v13 = vld [vmem:[%s10000_s3 + $0x14] sm:$0xf0] }
0x1f90   : > { %1898 = vperm.xlu0 %7834, %v8791_v14  }
0x1feb   : > { %v1778_v24 = vpop.f32.mrf.mxu3 }
0x1fec   : > { %v1779_v29 = vadd.f32 %v1778_v24, %v1759_v19 }
0x1fee   : > { %v1783_v34 = vsel %vm1782_vm1, %v1779_v29, 0.0 }
0x1fef   : > { %v1784_v38 = vpack.c.bf16 %v1783_v34, %v1783_v34 }
0x1ff1   : > { %v1795_v41 = vsel %vm10223_vm4, %v1784_v38, 0  ;;  %v5730_v38 = vld [vmem:[%s10000_s3 + $0x70] sm:$0xf]  ;;  %vm10233_vm4 = vcmask 195584  }
0x1ff2   : > { %1804 = vmatpush.bf16.msra.mxu1 %v1795_v41  ;;  %v7289_v41 = vld [vmem:[%s10000_s3 + $0x74] sm:$0xf0] }
0x1ff3   : > { %v1780_v28 = vpop.f32.mrf.mxu3 }
0x1ff4   : > { %v5731_v28 = vor.u32 %v7289_v41, %v5730_v38  ;;  %v7314_v38 = vld [vmem:[%s10001_s4 + $0xc4] sm:$0xf]  ;;  %v5836_v41 = vld [vmem:[%s10001_s4 + $0xd0] sm:$0xf0] }
0x1ff5   : > { %5629 = vmatmul.msk.bf16.vlgmr.msra.gmra.mxu1 %vm10224_vm11, %v1790_v23  ;;  %v8042_v23 = vmov 61   ;;  %v5839_v39 = vor.u32 %v7314_v38, %v5836_v41  ;;  %v7294_v38 = vld [vmem:[%s10001_s4 + $0x24] sm:$0xf]  ;;  %v5756_v41 = vld [vmem:[%s10001_s4 + $0x30] sm:$0xf0]  ;;  %vm5214_vm11 = vcmask 253952  }
0x1ff6   : > { %7835 = vset.pattern.permute.xlu2 %v8042_v23  ;;  %7836 = vset.pattern.permute.xlu0 %v8042_v23  ;;  %v5978_v23 = vld [vmem:[%s10001_s4 + $0x1e0] sm:$0xf] }
0x1ff9   : > { %v1816_v46 = vpop.permute.xlu0 %1815 }
0x2002   : > { %v1899_v32 = vpop.permute.xlu0 %1898 }
0x2072   : > { %v1806_v35 = vpop.f32.mrf.mxu1 }
0x2073   : > { %v1807_v54 = vadd.f32 %v1806_v35, %v1787_v30  ;;  %v7287_v30 = vld [vmem:[%s10000_s3 + $0x64] sm:$0xf0]  ;;  %v5724_v35 = vld [vmem:[%s10000_s3 + $0x68] sm:$0xf0] }
0x2075   : > { %v1810_v58 = vsel %vm1782_vm1, %v1807_v54, 0.0  ;;  %vm10232_vm1 = vnez %v10151_v56  ;;  %v5676_v56 = vld [vmem:[%s10000_s3 + $0x8] sm:$0xf0] }
0x2076   : > { %v1811_v47 = vmul.f32 %v1810_v58, %v1404_v55  ;;  %v5727_v55 = vor.u32 %v7286_v31, %v5724_v35  ;;  %v7285_v58 = vld [vmem:[%s10000_s3 + $0x54] sm:$0xf0]  ;;  %v5818_v35 = vld [vmem:[%s10001_s4 + $0xa0] sm:$0xf] }
0x2078   : > { %v1812_v25 = vadd.f32 %v1811_v47, %v8805_v42  ;;  %v7284_v47 = vld [vmem:[%s10000_s3 + $0x54] sm:$0xf]  ;;  %2103 = vmatpush.bf16.msra.mxu3 %v5727_v55  ;;  %v7310_v55 = vld [vmem:[%s10001_s4 + $0xa4] sm:$0xf] }
0x207a   : > { %v1808_v59 = vpop.f32.mrf.mxu1  ;;  %v1813_v4 = vmul.f32 %v1812_v25, %v1812_v25 }
0x207c   : > { %1837 = vmatpush.msra.mxu0 %v1813_v4  ;;  %v5706_v4 = vld [vmem:[%s10000_s3 + $0x40] sm:$0xf] }
0x207d   : > { %5630 = vmatmul.msk.f32.vlgmr.msra.gmra.mxu0 %vm10226_vm9, %v1819_v3 }
0x20fa   : > { %v1839_v52 = vpop.f32.mrf.mxu0 }
0x20fb   : > { %v1840_v5 = vadd.f32 %v1839_v52, %v1816_v46  ;;  %v7283_v46 = vld [vmem:[%s10000_s3 + $0x44] sm:$0xf0]  ;;  %v7282_v52 = vld [vmem:[%s10000_s3 + $0x44] sm:$0xf] }
0x20fd   : > { %v1842_v27 = vmax.f32 %v1840_v5, 1e-09  ;;  %v5708_v5 = vld [vmem:[%s10000_s3 + $0x48] sm:$0xf0] }
0x20ff   : > { %7839 = vrsqrt.f32 %v1842_v27  ;;  %vm1849_vm0 = vweird.f32 %v1842_v27 }
0x2105   : > { %v7840_v6 = vpop.eup %7839 }
0x2106   : > { %v1844_v7 = vmul.f32 %v7840_v6, %v1842_v27  ;;  %vm1850_vm13 = vweird.f32 %v7840_v6  ;;  %v5707_v27 = vor.u32 %v7283_v46, %v5706_v4 }
0x2107   : > { %vm1851_vm6 = vmor %vm1849_vm0, %vm1850_vm13 }
0x2108   : > { %v1845_v50 = vmul.f32 %v7840_v6, %v1844_v7  ;;  %v5698_v7 = vld [vmem:[%s10000_s3 + $0x30] sm:$0xf] }
0x210a   : > { %v1846_v8 = vmul.f32 0.5, %v1845_v50  ;;  %v7281_v50 = vld [vmem:[%s10000_s3 + $0x34] sm:$0xf0] }
0x210c   : > { %v1847_v15 = vsub.f32 1.5, %v1846_v8  ;;  %v7280_v8 = vld [vmem:[%s10000_s3 + $0x34] sm:$0xf] }
0x210e   : > { %v1848_v57 = vmul.f32 %v7840_v6, %v1847_v15  ;;  %v5700_v15 = vld [vmem:[%s10000_s3 + $0x38] sm:$0xf0] }
0x2110   : > { %v1852_v42 = vsel %vm1851_vm6, %v7840_v6, %v1848_v57  ;;  %v5711_v6 = vor.u32 %v7282_v52, %v5708_v5  ;;  %v5699_v57 = vor.u32 %v7281_v50, %v5698_v7  ;;  %v5802_v52 = vld [vmem:[%s10001_s4 + $0x80] sm:$0xf]  ;;  %v7308_v5 = vld [vmem:[%s10001_s4 + $0x8c] sm:$0xf0]  ;;  %v7342_v50 = vld [vmem:[%s10001_s4 + $0x1a4] sm:$0xf] }
0x2111   : > { %v1853_v61 = vmul.f32 %v1852_v42, %v1812_v25  ;;  %v5716_v25 = vld [vmem:[%s10000_s3 + $0x58] sm:$0xf0]  ;;  %v5703_v42 = vor.u32 %v7280_v8, %v5700_v15  ;;  %v7344_v7 = vld [vmem:[%s10001_s4 + $0x1ac] sm:$0xf0]  ;;  %v7306_v8 = vld [vmem:[%s10001_s4 + $0x84] sm:$0xf] }
0x2112   : > { %v5719_v3 = vor.u32 %v7284_v47, %v5716_v25  ;;  %v7348_v47 = vld [vmem:[%s10001_s4 + $0x1cc] sm:$0xf0]  ;;  %v5804_v15 = vld [vmem:[%s10001_s4 + $0x90] sm:$0xf0] }
0x2113   : > { %v1854_v62 = vpack.c.bf16 %v1853_v61, %v1853_v61  ;;  %v5690_v61 = vld [vmem:[%s10000_s3 + $0x20] sm:$0xf] }
0x2114   : > { %2104 = vmatpush.bf16.msra.mxu3 %v5719_v3  ;;  %v5964_v3 = vld [vmem:[%s10001_s4 + $0x1d0] sm:$0xf0] }
0x2115   : > { %1863 = vmatmul.bf16.vlgmr.msrb.gmra.mxu3 %v1854_v62  ;;  %v7279_v62 = vld [vmem:[%s10000_s3 + $0x24] sm:$0xf0] }
0x2116   : > { %v5691_v9 = vor.u32 %v7279_v62, %v5690_v61  ;;  %v5930_v62 = vld [vmem:[%s10001_s4 + $0x180] sm:$0xf] }
0x2118   : > { %2105 = vmatpush.bf16.msra.mxu3 %v5711_v6  ;;  %v5946_v6 = vld [vmem:[%s10001_s4 + $0x1a0] sm:$0xf] }
0x211c   : > { %2106 = vmatpush.bf16.msra.mxu3 %v5703_v42  ;;  %v5947_v42 = vor.u32 %v7344_v7, %v5946_v6  ;;  %v7324_v6 = vld [vmem:[%s10001_s4 + $0x10c] sm:$0xf0] }
0x2198   : > { %v1864_v63 = vpop.f32.mrf.mxu3 }
0x2199   : > { %1868 = vrot.lane.b32.xlu1 %v1864_v63, %s7982_s22 }
0x21a0   : > { %v1866_v0 = vpop.f32.mrf.mxu3 }
0x21a1   : > { %1873 = vperm.xlu1 %7833, %v8791_v14   ;;  %v5692_v0 = vld [vmem:[%s10000_s3 + $0x28] sm:$0xf0] }
0x220b   : > { %v1869_v10 = vpop.permute.xlu1 %1868 }
0x220c   : > { %v5648_v12 = vpack.c.bf16 %v1869_v10, %v1864_v63  ;;  %v7278_v63 = vld [vmem:[%s10000_s3 + $0x24] sm:$0xf] }
0x220e   : > { %5649 = vmatpush.bf16.msk.msrb.mxu0 %vm10212_vm12, %v5648_v12  ;;  %v5695_v12 = vor.u32 %v7278_v63, %v5692_v0  ;;  %v5803_v63 = vor.u32 %v7308_v5, %v5802_v52  ;;  %v7340_v0 = vld [vmem:[%s10001_s4 + $0x18c] sm:$0xf0] }
0x2210   : > { %2107 = vmatpush.bf16.msra.mxu3 %v5695_v12  ;;  %v5807_v12 = vor.u32 %v7306_v8, %v5804_v15  ;;  %v7322_v8 = vld [vmem:[%s10001_s4 + $0x104] sm:$0xf]  ;;  %v5868_v15 = vld [vmem:[%s10001_s4 + $0x110] sm:$0xf0] }
0x2211   : > { %5650 = vmatmul.msk.bf16.vlgmr.msrb.gmra.mxu0 %vm10227_vm10, %v1877_v11  ;;  %v5682_v11 = vld [vmem:[%s10000_s3 + $0x10] sm:$0xf] }
0x2212   : > { %2089 = vmatpush.bf16.msra.mxu0 %v5731_v28 }
0x2213   : > { %v1874_v20 = vpop.permute.xlu1 %1873 }
0x228e   : > { %v1890_v21 = vpop.f32.mrf.mxu0 }
0x228f   : > { %v1891_v60 = vadd.f32 %v1890_v21, %v1874_v20  ;;  %v7276_v21 = vld [vmem:[%s10000_s3 + $0x14] sm:$0xf] }
0x2291   : > { %v1895_v26 = vsel %vm1894_vm7, %v1891_v60, 0.0  ;;  %v5684_v60 = vld [vmem:[%s10000_s3 + $0x18] sm:$0xf0] }
0x2292   : > { %v1896_v53 = vmul.f32 %v1895_v26, %v1895_v26 }
0x2294   : > { %1920 = vmatpush.msrb.mxu1 %v1896_v53  ;;  %v5683_v53 = vor.u32 %v7277_v13, %v5682_v11  ;;  %v5786_v11 = vld [vmem:[%s10001_s4 + $0x60] sm:$0xf]  ;;  %v7304_v13 = vld [vmem:[%s10001_s4 + $0x6c] sm:$0xf0] }
0x2295   : > { %5651 = vmatmul.msk.f32.vlgmr.msrb.gmra.mxu1 %vm10228_vm14, %v1902_v40 }
0x2296   : > { %v1892_v51 = vpop.f32.mrf.mxu0 }
0x2312   : > { %v1922_v33 = vpop.f32.mrf.mxu1 }
0x2313   : > { %v1923_v36 = vadd.f32 %v1922_v33, %v1899_v32  ;;  %v5687_v32 = vor.u32 %v7276_v21, %v5684_v60  ;;  %v5788_v21 = vld [vmem:[%s10001_s4 + $0x70] sm:$0xf0]  ;;  %v5931_v60 = vor.u32 %v7340_v0, %v5930_v62  ;;  %v7353_v62 = vld [vmem:[%s10001_s4 + $0x1f4] sm:$0xf0]  ;;  %v5988_v0 = vld [vmem:[%s10001_s4 + $0x1f8] sm:$0xf0] }
0x2315   : > { %v1925_v37 = vmax.f32 %v1923_v36, 1e-09  ;;  %2108 = vmatpush.bf16.msra.mxu3 %v5687_v32  ;;  %v5674_v36 = vld [vmem:[%s10000_s3] sm:$0xf]  ;;  %v7334_v32 = vld [vmem:[%s10001_s4 + $0x164] sm:$0xf] }
0x2317   : > { %7841 = vrsqrt.f32 %v1925_v37  ;;  %vm1932_vm2 = vweird.f32 %v1925_v37 }
0x231d   : > { %v7842_v44 = vpop.eup %7841 }
0x231e   : > { %v1927_v48 = vmul.f32 %v7842_v44, %v1925_v37  ;;  %vm1933_vm12 = vweird.f32 %v7842_v44  ;;  %v7275_v37 = vld [vmem:[%s10000_s3 + $0x4] sm:$0xf0] }
0x231f   : > { %vm1934_vm8 = vmor %vm1932_vm2, %vm1933_vm12 }
0x2320   : > { %v1928_v16 = vmul.f32 %v7842_v44, %v1927_v48  ;;  %v5675_v48 = vor.u32 %v7275_v37, %v5674_v36  ;;  %v5770_v36 = vld [vmem:[%s10001_s4 + $0x40] sm:$0xf]  ;;  %v7300_v37 = vld [vmem:[%s10001_s4 + $0x4c] sm:$0xf0] }
0x2322   : > { %v1929_v22 = vmul.f32 0.5, %v1928_v16 }
0x2324   : > { %v1930_v1 = vsub.f32 1.5, %v1929_v22  ;;  %v5850_v22 = vld [vmem:[%s10001_s4 + $0xe0] sm:$0xf] }
0x2326   : > { %v1931_v45 = vmul.f32 %v7842_v44, %v1930_v1  ;;  %v7320_v1 = vld [vmem:[%s10001_s4 + $0xec] sm:$0xf0] }
0x2328   : > { %v1935_v17 = vsel %vm1934_vm8, %v7842_v44, %v1931_v45  ;;  %v7274_v44 = vld [vmem:[%s10000_s3 + $0x4] sm:$0xf] }
0x2329   : > { %v1936_v19 = vmul.f32 %v1935_v17, %v1895_v26  ;;  %v5679_v16 = vor.u32 %v7274_v44, %v5676_v56  ;;  %v7318_v45 = vld [vmem:[%s10001_s4 + $0xe4] sm:$0xf]  ;;  %v5851_v17 = vor.u32 %v7320_v1, %v5850_v22  ;;  %v5898_v22 = vld [vmem:[%s10001_s4 + $0x140] sm:$0xf]  ;;  %v5771_v1 = vor.u32 %v7300_v37, %v5770_v36  ;;  %v5828_v36 = vld [vmem:[%s10001_s4 + $0xb8] sm:$0xf0] }
0x232a   : > { %v7298_v44 = vld [vmem:[%s10001_s4 + $0x44] sm:$0xf] }
0x232b   : > { %v1937_v24 = vpack.c.bf16 %v1936_v19, %v1936_v19  ;;  %2109 = vmatpush.bf16.msra.mxu3 %v5679_v16  ;;  %v5852_v19 = vld [vmem:[%s10001_s4 + $0xf0] sm:$0xf0] }
0x232d   : > { %1946 = vmatmul.bf16.vlgmr.msrb.gmra.mxu2 %v1937_v24  ;;  %v5834_v24 = vld [vmem:[%s10001_s4 + $0xc0] sm:$0xf] }
0x23b0   : > { %v9180_v29 = vpop.f32.mrf.mxu2 }
0x23b1   : > { %1951 = vrot.lane.b32.xlu2 %v9180_v29, %s7986_s12  ;;  %1954 = vrot.lane.b32.xlu1 %v9180_v29, %s7982_s22  ;;  %s326_s22 = sand.u32 1, %s7967_s28  }
0x23b2   : > { %s327_s25 = scalar_lea.vmem [#allocation7], %s326_s22  ;;  %s5217_s20 = scalar_lea.sflag [#allocation4], %s326_s22 }
0x23b3   : > { %s5227_s17 = sshll.u32 %s327_s25, 4  ;;  %s5228_s17 = int_to_ptr.vmem [resolvable:$true] %s5227_s17 }
0x23b8   : > { %v1949_v34 = vpop.f32.mrf.mxu2 }
0x23b9   : > { %1963 = vrot.lane.b32.xlu1 %v9096_v49, %s10229_s18  ;;  %v5722_v49 = vld [vmem:[%s10000_s3 + $0x60] sm:$0xf]  ;;  %1960 = vperm.xlu2 %7835, %v8791_v14   ;;  %v5714_v14 = vld [vmem:[%s10000_s3 + $0x50] sm:$0xf]  ;;  %v5855_v34 = vor.u32 %v7318_v45, %v5852_v19  ;;  %v5900_v19 = vld [vmem:[%s10001_s4 + $0x150] sm:$0xf0] }
0x23ba   : > { %v5723_v54 = vor.u32 %v7287_v30, %v5722_v49  ;;  %v5715_v59 = vor.u32 %v7285_v58, %v5714_v14  ;;  %v5980_v49 = vld [vmem:[%s10001_s4 + $0x1f0] sm:$0xf0]  ;;  %v5979_v30 = vor.u32 %v7352_v18, %v5978_v23  ;;  %v5962_v58 = vld [vmem:[%s10001_s4 + $0x1c0] sm:$0xf]  ;;  %v7332_v45 = vld [vmem:[%s10001_s4 + $0x14c] sm:$0xf0] }
0x23bb   : > { %v5983_v31 = vor.u32 %v7350_v43, %v5980_v49  ;;  %v5820_v14 = vld [vmem:[%s10001_s4 + $0xb0] sm:$0xf0]  ;;  %v5963_v25 = vor.u32 %v7348_v47, %v5962_v58  ;;  %v5738_v43 = vld [vmem:[%s10001_s4] sm:$0xf]  ;;  %v7290_v58 = vld [vmem:[%s10001_s4 + $0x4] sm:$0xf] }
0x23bc   : > { %2090 = vmatpush.bf16.msra.mxu0 %v5723_v54  ;;  %v7312_v54 = vld [vmem:[%s10001_s4 + $0xac] sm:$0xf0]  ;;  %2524 = vmatpush.bf16.msra.mxu2 %v5979_v30  ;;  %v5882_v49 = vld [vmem:[%s10001_s4 + $0x120] sm:$0xf]  ;;  %v5740_v47 = vld [vmem:[%s10001_s4 + $0x10] sm:$0xf0] }
0x23bd   : > { %2550 = vmatpush.bf16.msrb.mxu3 %v5983_v31  ;;  %v5819_v4 = vor.u32 %v7312_v54, %v5818_v35  ;;  %v7328_v30 = vld [vmem:[%s10001_s4 + $0x12c] sm:$0xf0]  ;;  %v7326_v31 = vld [vmem:[%s10001_s4 + $0x124] sm:$0xf]  ;;  %v5884_v35 = vld [vmem:[%s10001_s4 + $0x130] sm:$0xf0] }
0x23be   : > { %v5883_v52 = vor.u32 %v7328_v30, %v5882_v49  ;;  %v5887_v5 = vor.u32 %v7326_v31, %v5884_v35  ;;  %v7305_v30 = vld [vmem:[%s10001_s4 + $0x74] sm:$0xf0]  ;;  %v7303_v31 = vld [vmem:[%s10001_s4 + $0x6c] sm:$0xf]  ;;  %s5229_s18 = sshll.u32 %s5225_s13, 4  ;;  %s5230_s18 = int_to_ptr.hbm [resolvable:$true] %s5229_s18 }
0x23bf   : > { %s7919_s26 = sshra.s32 %s5230_s18, 4  ;;  %s7920_s26 = int_to_ptr.hbm [resolvable:$true] %s7919_s26 }
0x23c0   : > { %2091 = vmatpush.bf16.msra.mxu0 %v5715_v59  ;;  %v7346_v59 = vld [vmem:[%s10001_s4 + $0x1c4] sm:$0xf]  ;;  %2525 = vmatpush.bf16.msra.mxu2 %v5963_v25  ;;  %s7921_s23 = scalar_lea.hbm %s7920_s26, 1  ;;  %p7926_p3 = scmp.lt.s32.totalorder %s7920_s26, %s10005_s8 }
0x23c1   : > { %v5967_v46 = vor.u32 %v7346_v59, %v5964_v3  ;;  %v5858_v59 = vld [vmem:[%s10001_s4 + $0xe8] sm:$0xf]  ;;  %v7321_v3 = vld [vmem:[%s10001_s4 + $0xf4] sm:$0xf0]  ;;  %p7922_p0 = scmp.ne.s32.totalorder %s7920_s26, %s7921_s23  ;;  %p7927_p4 = scmp.lt.s32.totalorder %s7925_s21, %s7921_s23 }
0x23c3   : > { %2551 = vmatpush.bf16.msrb.mxu3 %v5967_v46  ;;  %v5860_v46 = vld [vmem:[%s10001_s4 + $0xf8] sm:$0xf0]  ;;  %p7923_p1 = pnand %p7922_p0, %p8126_p5  ;;  %p7928_p7 = por %p7927_p4, %p7926_p3 }
0x23c4   : > { %2092 = vmatpush.bf16.msra.mxu0 %v5707_v27  ;;  %v5823_v27 = vor.u32 %v7310_v55, %v5820_v14  ;;  %2526 = vmatpush.bf16.msra.mxu2 %v5947_v42  ;;  %v5759_v55 = vor.u32 %v7294_v38, %v5756_v41  ;;  %v7292_v14 = vld [vmem:[%s10001_s4 + $0xc] sm:$0xf0]  ;;  %v5743_v42 = vor.u32 %v7290_v58, %v5740_v47  ;;  %v5954_v41 = vld [vmem:[%s10001_s4 + $0x1a8] sm:$0xf]  ;;  %v7341_v58 = vld [vmem:[%s10001_s4 + $0x194] sm:$0xf0] }
0x23c5   : > { %p7924_p2 = pneg %p7923_p1 }
0x23c7   : > { %p7929_p8 = pnand %p7928_p7, %p7924_p2 }
0x23c8   : > { %2093 = vmatpush.bf16.msra.mxu0 %v5699_v57  ;;  %v5948_v57 = vld [vmem:[%s10001_s4 + $0x1b0] sm:$0xf0]  ;;  %2527 = vmatpush.bf16.msra.mxu2 %v5931_v60 }
0x23c9   : > { %v5951_v61 = vor.u32 %v7342_v50, %v5948_v57  ;;  %v5739_v50 = vor.u32 %v7292_v14, %v5738_v43  ;;  %v5986_v57 = vld [vmem:[%s10001_s4 + $0x1e8] sm:$0xf]  ;;  %v5956_v43 = vld [vmem:[%s10001_s4 + $0x1b8] sm:$0xf0] }
0x23ca   : > { %v5987_v60 = vor.u32 %v7353_v62, %v5986_v57  ;;  %v5938_v14 = vld [vmem:[%s10001_s4 + $0x188] sm:$0xf]  ;;  %v5924_v57 = vld [vmem:[%s10001_s4 + $0x178] sm:$0xf0]  ;;  %v7297_v62 = vld [vmem:[%s10001_s4 + $0x34] sm:$0xf0] }
0x23cb   : > { %2552 = vmatpush.bf16.msrb.mxu3 %v5951_v61  ;;  %v5859_v61 = vor.u32 %v7321_v3, %v5858_v59  ;;  %v5939_v47 = vor.u32 %v7341_v58, %v5938_v14  ;;  %v5940_v59 = vld [vmem:[%s10001_s4 + $0x198] sm:$0xf0]  ;;  %v7534_v14 = vld [vmem:[#allocation2 + $0x59c] sm:$0xf0] }
0x23cc   : > { %2094 = vmatpush.bf16.msra.mxu0 %v5691_v9  ;;  %v7338_v9 = vld [vmem:[%s10001_s4 + $0x184] sm:$0xf]  ;;  %v7478_v58 = vld [vmem:[#allocation2 + $0x3dc] sm:$0xf0] }
0x23d0   : > { %2095 = vmatpush.bf16.msra.mxu0 %v5683_v53  ;;  %v5914_v53 = vld [vmem:[%s10001_s4 + $0x160] sm:$0xf] }
0x23d4   : > { %2096 = vmatpush.bf16.msra.mxu0 %v5675_v48  ;;  %v5772_v48 = vld [vmem:[%s10001_s4 + $0x50] sm:$0xf0] }
0x23d8   : > { %2537 = vmatpush.bf16.msrb.mxu0 %v5855_v34  ;;  %v7296_v34 = vld [vmem:[%s10001_s4 + $0x2c] sm:$0xf0] }
0x23dc   : > { %2538 = vmatpush.bf16.msrb.mxu0 %v5839_v39 }
0x23e0   : > { %2539 = vmatpush.bf16.msrb.mxu0 %v5823_v27  ;;  %v5866_v27 = vld [vmem:[%s10001_s4 + $0x100] sm:$0xf] }
0x23e4   : > { %2540 = vmatpush.bf16.msrb.mxu0 %v5807_v12  ;;  %v7317_v12 = vld [vmem:[%s10001_s4 + $0xd4] sm:$0xf0] }
0x240b   : > { %v1952_v40 = vpop.permute.xlu2 %1951 }
0x240c   : > { %v5669_v2 = vpack.c.bf16 %v9180_v29, %v1952_v40  ;;  %v7316_v29 = vld [vmem:[%s10001_s4 + $0xcc] sm:$0xf0]  ;;  %v5787_v40 = vor.u32 %v7304_v13, %v5786_v11  ;;  %v7315_v11 = vld [vmem:[%s10001_s4 + $0xcc] sm:$0xf]  ;;  %v5844_v13 = vld [vmem:[%s10001_s4 + $0xd8] sm:$0xf0] }
0x240d   : > { %v5835_v28 = vor.u32 %v7316_v29, %v5834_v24  ;;  %v5775_v24 = vor.u32 %v7298_v44, %v5772_v48  ;;  %v5754_v29 = vld [vmem:[%s10001_s4 + $0x20] sm:$0xf]  ;;  %v5970_v48 = vld [vmem:[%s10001_s4 + $0x1c8] sm:$0xf] }
0x240e   : > { %v5755_v39 = vor.u32 %v7296_v34, %v5754_v29  ;;  %v5812_v34 = vld [vmem:[%s10001_s4 + $0x98] sm:$0xf0] }
0x2413   : > { %v1961_v23 = vpop.permute.xlu2 %1960 }
0x2423   : > { %v1955_v10 = vpop.permute.xlu1 %1954 }
0x2424   : > { %v1956_v20 = vsel %vm10230_vm15, %v1955_v10, 0.0  ;;  %v5932_v10 = vld [vmem:[%s10001_s4 + $0x190] sm:$0xf0] }
0x2425   : > { %v1958_v26 = vpack.c.bf16 %v1956_v20, %v1956_v20  ;;  %v7302_v20 = vld [vmem:[%s10001_s4 + $0x64] sm:$0xf] }
0x2427   : > { %v1969_v51 = vsel %vm10231_vm5, %v1958_v26, 0  ;;  %v5935_v26 = vor.u32 %v7338_v9, %v5932_v10  ;;  %v5842_v10 = vld [vmem:[%s10001_s4 + $0xc8] sm:$0xf] }
0x2428   : > { %1977 = vmatpush.bf16.msra.mxu1 %v1969_v51  ;;  %v7336_v51 = vld [vmem:[%s10001_s4 + $0x16c] sm:$0xf0] }
0x2429   : > { %2553 = vmatpush.bf16.msrb.mxu3 %v5935_v26  ;;  %v5915_v56 = vor.u32 %v7336_v51, %v5914_v53  ;;  %v5847_v51 = vor.u32 %v7315_v11, %v5844_v13  ;;  %v7333_v11 = vld [vmem:[%s10001_s4 + $0x154] sm:$0xf0]  ;;  %v7331_v13 = vld [vmem:[%s10001_s4 + $0x14c] sm:$0xf] }
0x242b   : > { %v1964_v33 = vpop.permute.xlu1 %1963  ;;  %2528 = vmatpush.bf16.msra.mxu2 %v5915_v56  ;;  %v7349_v56 = vld [vmem:[%s10001_s4 + $0x1d4] sm:$0xf0] }
0x242c   : > { %5670 = vmatpush.bf16.msk.msra.mxu1 %vm10232_vm1, %v5669_v2  ;;  %v5916_v2 = vld [vmem:[%s10001_s4 + $0x170] sm:$0xf0] }
0x242d   : > { %v5919_v16 = vor.u32 %v7334_v32, %v5916_v2  ;;  %v5826_v32 = vld [vmem:[%s10001_s4 + $0xa8] sm:$0xf]  ;;  %v7313_v2 = vld [vmem:[%s10001_s4 + $0xb4] sm:$0xf0] }
0x242e   : > { %v5827_v37 = vor.u32 %v7313_v2, %v5826_v32  ;;  %v5748_v32 = vld [vmem:[%s10001_s4 + $0x18] sm:$0xf0]  ;;  %v5890_v2 = vld [vmem:[%s10001_s4 + $0x128] sm:$0xf] }
0x242f   : > { %5671 = vmatmul.msk.bf16.vlgmr.msra.gmra.mxu1 %vm10233_vm4, %v1964_v33  ;;  %v5791_v33 = vor.u32 %v7302_v20, %v5788_v21  ;;  %2554 = vmatpush.bf16.msrb.mxu3 %v5919_v16  ;;  %v5867_v20 = vor.u32 %v7324_v6, %v5866_v27  ;;  %v5871_v21 = vor.u32 %v7322_v8, %v5868_v15  ;;  %v7347_v16 = vld [vmem:[%s10001_s4 + $0x1cc] sm:$0xf]  ;;  %v5780_v27 = vld [vmem:[%s10001_s4 + $0x58] sm:$0xf0] }
0x2430   : > { %2511 = vmatpush.bf16.msrb.mxu1 %v5851_v17  ;;  %v7330_v17 = vld [vmem:[%s10001_s4 + $0x144] sm:$0xf]  ;;  %v7335_v8 = vld [vmem:[%s10001_s4 + $0x16c] sm:$0xf] }
0x2431   : > { %2541 = vmatpush.bf16.msrb.mxu0 %v5791_v33  ;;  %v5903_v18 = vor.u32 %v7330_v17, %v5900_v19  ;;  %v7311_v33 = vld [vmem:[%s10001_s4 + $0xac] sm:$0xf]  ;;  %v5810_v17 = vld [vmem:[%s10001_s4 + $0x88] sm:$0xf]  ;;  %v7309_v19 = vld [vmem:[%s10001_s4 + $0x94] sm:$0xf0] }
0x2432   : > { %v5831_v44 = vor.u32 %v7311_v33, %v5828_v36  ;;  %v5811_v29 = vor.u32 %v7309_v19, %v5810_v17  ;;  %v7329_v36 = vld [vmem:[%s10001_s4 + $0x134] sm:$0xf0]  ;;  %v5876_v17 = vld [vmem:[%s10001_s4 + $0x118] sm:$0xf0] }
0x2433   : > { %2555 = vmatpush.bf16.msrb.mxu3 %v5903_v18 }
0x2434   : > { %2512 = vmatpush.bf16.msrb.mxu1 %v5835_v28  ;;  %v5899_v28 = vor.u32 %v7332_v45, %v5898_v22  ;;  %v5971_v22 = vor.u32 %v7349_v56, %v5970_v48  ;;  %v5891_v48 = vor.u32 %v7329_v36, %v5890_v2  ;;  %v6602_v36 = vld [vmem:[#allocation2 + $0x4c0] sm:$0xf] }
0x2435   : > { %2542 = vmatpush.bf16.msrb.mxu0 %v5775_v24  ;;  %v7307_v24 = vld [vmem:[%s10001_s4 + $0x8c] sm:$0xf] }
0x2436   : > { %2529 = vmatpush.bf16.msra.mxu2 %v5899_v28  ;;  %v5815_v38 = vor.u32 %v7307_v24, %v5812_v34  ;;  %v7343_v28 = vld [vmem:[%s10001_s4 + $0x1ac] sm:$0xf]  ;;  %v2003_v24 = vld [vmem:[#allocation5] sm:$0x3] }
0x2437   : > { %2556 = vmatpush.bf16.msrb.mxu3 %v5887_v5  ;;  %v5959_v49 = vor.u32 %v7343_v28, %v5956_v43  ;;  %v6218_v34 = vld [vmem:[#allocation2 + $0x1c0] sm:$0xf] }
0x2438   : > { %2513 = vmatpush.bf16.msrb.mxu1 %v5819_v4  ;;  %v7319_v4 = vld [vmem:[%s10001_s4 + $0xec] sm:$0xf]  ;;  %v6730_v28 = vld [vmem:[#allocation2 + $0x5c0] sm:$0xf] }
0x2439   : > { %2543 = vmatpush.bf16.msrb.mxu0 %v5759_v55  ;;  %v5863_v9 = vor.u32 %v7319_v4, %v5860_v46  ;;  %v5778_v4 = vld [vmem:[%s10001_s4 + $0x48] sm:$0xf]  ;;  %v7301_v46 = vld [vmem:[%s10001_s4 + $0x54] sm:$0xf0]  ;;  %v7542_v43 = vld [vmem:[#allocation2 + $0x5dc] sm:$0xf0] }
0x243a   : > { %2530 = vmatpush.bf16.msra.mxu2 %v5883_v52  ;;  %v7299_v52 = vld [vmem:[%s10001_s4 + $0x4c] sm:$0xf]  ;;  %v5779_v5 = vor.u32 %v7301_v46, %v5778_v4  ;;  %v6154_v4 = vld [vmem:[#allocation2 + $0x140] sm:$0xf] }
0x243b   : > { %2557 = vmatpush.bf16.msrb.mxu3 %v5871_v21  ;;  %v5783_v6 = vor.u32 %v7299_v52, %v5780_v27  ;;  %v5908_v21 = vld [vmem:[%s10001_s4 + $0x158] sm:$0xf0]  ;;  %v6666_v27 = vld [vmem:[#allocation2 + $0x540] sm:$0xf] }
0x243c   : > { %2514 = vmatpush.bf16.msrb.mxu1 %v5803_v63  ;;  %v7351_v63 = vld [vmem:[%s10001_s4 + $0x1ec] sm:$0xf] }
0x243d   : > { %v5991_v26 = vor.u32 %v7351_v63, %v5988_v0  ;;  %2544 = vmatpush.bf16.msrb.mxu0 %v5743_v42  ;;  %v5927_v42 = vor.u32 %v7335_v8, %v5924_v57  ;;  %v7295_v63 = vld [vmem:[%s10001_s4 + $0x2c] sm:$0xf]  ;;  %v6442_v8 = vld [vmem:[#allocation2 + $0x380] sm:$0xf] }
0x243e   : > { %2531 = vmatpush.bf16.msra.mxu2 %v5867_v20 }
0x2440   : > { %2515 = vmatpush.bf16.msrb.mxu1 %v5787_v40  ;;  %v5843_v40 = vor.u32 %v7317_v12, %v5842_v10  ;;  %v5906_v12 = vld [vmem:[%s10001_s4 + $0x148] sm:$0xf] }
0x2441   : > { %v5907_v20 = vor.u32 %v7333_v11, %v5906_v12  ;;  %v6634_v12 = vld [vmem:[#allocation2 + $0x500] sm:$0xf] }
0x2442   : > { %2576 = vmatpush.bf16.msrb.mxu2 %v5987_v60  ;;  %v5746_v60 = vld [vmem:[%s10001_s4 + $0x8] sm:$0xf]  ;;  %v7518_v11 = vld [vmem:[#allocation2 + $0x51c] sm:$0xf0] }
0x2443   : > { %v6635_v2 = vor.u32 %v7518_v11, %v6634_v12  ;;  %v7422_v12 = vld [vmem:[#allocation2 + $0x21c] sm:$0xf0]  ;;  %v7474_v11 = vld [vmem:[#allocation2 + $0x3c4] sm:$0xf] }
0x2444   : > { %2516 = vmatpush.bf16.msrb.mxu1 %v5771_v1  ;;  %v5972_v1 = vld [vmem:[%s10001_s4 + $0x1d8] sm:$0xf0] }
0x2445   : > { %v5975_v45 = vor.u32 %v7347_v16, %v5972_v1  ;;  %v5874_v16 = vld [vmem:[%s10001_s4 + $0x108] sm:$0xf]  ;;  %v7323_v1 = vld [vmem:[%s10001_s4 + $0x10c] sm:$0xf] }
0x2446   : > { %2577 = vmatpush.bf16.msrb.mxu2 %v5971_v22  ;;  %v7325_v22 = vld [vmem:[%s10001_s4 + $0x114] sm:$0xf0]  ;;  %v5879_v19 = vor.u32 %v7323_v1, %v5876_v17  ;;  %v7582_v1 = vld [vmem:[#allocation2 + $0x71c] sm:$0xf0] }
0x2447   : > { %v6058_v17 = vld [vmem:[#allocation2 + $0x80] sm:$0xf] }
0x2448   : > { %2517 = vmatpush.bf16.msrb.mxu1 %v5755_v39  ;;  %v5794_v39 = vld [vmem:[%s10001_s4 + $0x68] sm:$0xf] }
0x2449   : > { %v5795_v35 = vor.u32 %v7305_v30, %v5794_v39  ;;  %v2086_v39 = vperm.slane %v2003_v24, 1  ;;  %v6186_v30 = vld [vmem:[#allocation2 + $0x180] sm:$0xf] }
0x244c   : > { %2518 = vmatpush.bf16.msrb.mxu1 %v5739_v50  ;;  %v7337_v50 = vld [vmem:[%s10001_s4 + $0x174] sm:$0xf0] }
0x2450   : > { %2563 = vmatpush.bf16.msra.mxu1 %v5859_v61  ;;  %v5762_v61 = vld [vmem:[%s10001_s4 + $0x28] sm:$0xf] }
0x2451   : > { %v5763_v0 = vor.u32 %v7297_v62, %v5762_v61  ;;  %v6954_v61 = vld [vmem:[#allocation2 + $0x780] sm:$0xf] }
0x2452   : > { %v7598_v62 = vld [vmem:[#allocation2 + $0x79c] sm:$0xf0] }
0x2454   : > { %2564 = vmatpush.bf16.msra.mxu1 %v5843_v40 }
0x2458   : > { %2565 = vmatpush.bf16.msra.mxu1 %v5827_v37  ;;  %v7327_v37 = vld [vmem:[%s10001_s4 + $0x12c] sm:$0xf] }
0x245c   : > { %2566 = vmatpush.bf16.msra.mxu1 %v5811_v29  ;;  %v2085_v29 = vperm.slane %v2003_v24, 0  ;;  %v7374_v24 = vld [vmem:[#allocation2 + $0x9c] sm:$0xf0] }
0x2460   : > { %2567 = vmatpush.bf16.msra.mxu1 %v5795_v35  ;;  %v6731_v35 = vor.u32 %v7542_v43, %v6730_v28  ;;  %v7446_v28 = vld [vmem:[#allocation2 + $0x2dc] sm:$0xf0] }
0x2461   : > { %v7574_v43 = vld [vmem:[#allocation2 + $0x6dc] sm:$0xf0] }
0x2464   : > { %2568 = vmatpush.bf16.msra.mxu1 %v5779_v5  ;;  %v7398_v5 = vld [vmem:[#allocation2 + $0x15c] sm:$0xf0] }
0x2468   : > { %2569 = vmatpush.bf16.msra.mxu1 %v5763_v0  ;;  %v6122_v0 = vld [vmem:[#allocation2 + $0x100] sm:$0xf] }
0x24ac   : > { %v1980_v54 = vpop.f32.mrf.mxu1 }
0x24ad   : > { %v1981_v25 = vadd.f32 %v1980_v54, %v1961_v23  ;;  %v7345_v23 = vld [vmem:[%s10001_s4 + $0x1b4] sm:$0xf0]  ;;  %v5796_v54 = vld [vmem:[%s10001_s4 + $0x78] sm:$0xf0] }
0x24ae   : > { %v5955_v18 = vor.u32 %v7345_v23, %v5954_v41  ;;  %v5799_v55 = vor.u32 %v7303_v31, %v5796_v54  ;;  %v7406_v31 = vld [vmem:[#allocation2 + $0x19c] sm:$0xf0] }
0x24af   : > { %v2002_v7 = vpack.c.bf16 %v1981_v25, %v1981_v25  ;;  %v7339_v25 = vld [vmem:[%s10001_s4 + $0x18c] sm:$0xf]  ;;  %v6474_v54 = vld [vmem:[#allocation2 + $0x3c0] sm:$0xf] }
0x24b0   : > { %2578 = vmatpush.bf16.msrb.mxu2 %v5955_v18  ;;  %v5943_v3 = vor.u32 %v7339_v25, %v5940_v59  ;;  %v7606_v25 = vld [vmem:[#allocation2 + $0x7dc] sm:$0xf0] }
0x24b1   : > { %2097 = vmatmul.bf16.vlgmr.msra.gmra.mxu0 %v2002_v7  ;;  %2110 = vmatmul.bf16.vlgmr.msra.gmra.mxu3 %v2002_v7  ;;  %v5922_v7 = vld [vmem:[%s10001_s4 + $0x168] sm:$0xf] }
0x24b2   : > { %2589 = vmatpush.bf16.msra.mxu0 %v5863_v9  ;;  %2602 = vmatpush.bf16.msra.mxu3 %v5991_v26  ;;  %v5923_v15 = vor.u32 %v7337_v50, %v5922_v7  ;;  %v5764_v9 = vld [vmem:[%s10001_s4 + $0x38] sm:$0xf0]  ;;  %v7293_v26 = vld [vmem:[%s10001_s4 + $0x14] sm:$0xf0]  ;;  %v6475_v50 = vor.u32 %v7478_v58, %v6474_v54  ;;  %v6538_v54 = vld [vmem:[#allocation2 + $0x440] sm:$0xf] }
0x24b3   : > { %v5767_v10 = vor.u32 %v7295_v63, %v5764_v9  ;;  %v5747_v40 = vor.u32 %v7293_v26, %v5746_v60  ;;  %v6155_v63 = vor.u32 %v7398_v5, %v6154_v4  ;;  %v7462_v60 = vld [vmem:[#allocation2 + $0x35c] sm:$0xf0] }
0x24b4   : > { %v1982_v53 = vpop.f32.mrf.mxu1  ;;  %2579 = vmatpush.bf16.msrb.mxu2 %v5939_v47  ;;  %v6986_v47 = vld [vmem:[#allocation2 + $0x7c0] sm:$0xf] }
0x24b5   : > { %v5911_v53 = vor.u32 %v7331_v13, %v5908_v21  ;;  %2570 = vmatpush.bf16.msra.mxu1 %v5747_v40  ;;  %v6955_v21 = vor.u32 %v7598_v62, %v6954_v61  ;;  %v6922_v26 = vld [vmem:[#allocation2 + $0x740] sm:$0xf] }
0x24b6   : > { %2590 = vmatpush.bf16.msra.mxu0 %v5847_v51  ;;  %2603 = vmatpush.bf16.msra.mxu3 %v5975_v45  ;;  %v7291_v51 = vld [vmem:[%s10001_s4 + $0xc] sm:$0xf]  ;;  %v5875_v45 = vor.u32 %v7325_v22, %v5874_v16  ;;  %v7454_v16 = vld [vmem:[#allocation2 + $0x31c] sm:$0xf0] }
0x24b7   : > { %v5751_v33 = vor.u32 %v7291_v51, %v5748_v32  ;;  %v6090_v32 = vld [vmem:[#allocation2 + $0xc0] sm:$0xf] }
0x24b8   : > { %2580 = vmatpush.bf16.msrb.mxu2 %v5923_v15  ;;  %v6987_v15 = vor.u32 %v7606_v25, %v6986_v47  ;;  %v6890_v22 = vld [vmem:[#allocation2 + $0x700] sm:$0xf] }
0x24b9   : > { %v6314_v58 = vld [vmem:[#allocation2 + $0x280] sm:$0xf] }
0x24ba   : > { %2591 = vmatpush.bf16.msra.mxu0 %v5831_v44  ;;  %2604 = vmatpush.bf16.msra.mxu3 %v5959_v49  ;;  %v5892_v44 = vld [vmem:[%s10001_s4 + $0x138] sm:$0xf0]  ;;  %v7438_v25 = vld [vmem:[#allocation2 + $0x29c] sm:$0xf0] }
0x24bb   : > { %v5895_v56 = vor.u32 %v7327_v37, %v5892_v44  ;;  %v7510_v37 = vld [vmem:[#allocation2 + $0x4dc] sm:$0xf0]  ;;  %v6315_v5 = vor.u32 %v7438_v25, %v6314_v58  ;;  %v6060_v58 = vld [vmem:[#allocation2 + $0xa0] sm:$0xf0] }
0x24bc   : > { %2581 = vmatpush.bf16.msrb.mxu2 %v5907_v20  ;;  %v6410_v20 = vld [vmem:[#allocation2 + $0x340] sm:$0xf] }
0x24bd   : > { %v6411_v44 = vor.u32 %v7462_v60, %v6410_v20  ;;  %v7394_v60 = vld [vmem:[#allocation2 + $0x144] sm:$0xf] }
0x24be   : > { %2592 = vmatpush.bf16.msra.mxu0 %v5815_v38  ;;  %2605 = vmatpush.bf16.msra.mxu3 %v5943_v3  ;;  %v7414_v38 = vld [vmem:[#allocation2 + $0x1dc] sm:$0xf0]  ;;  %v6187_v3 = vor.u32 %v7406_v31, %v6186_v30 }
0x24bf   : > { %v6219_v18 = vor.u32 %v7414_v38, %v6218_v34  ;;  %v7502_v34 = vld [vmem:[#allocation2 + $0x49c] sm:$0xf0] }
0x24c0   : > { %2582 = vmatpush.bf16.msrb.mxu2 %v5891_v48  ;;  %v6378_v48 = vld [vmem:[#allocation2 + $0x300] sm:$0xf] }
0x24c1   : > { %v6379_v38 = vor.u32 %v7454_v16, %v6378_v48  ;;  %v6026_v30 = vld [vmem:[#allocation2 + $0x40] sm:$0xf]  ;;  %v6124_v48 = vld [vmem:[#allocation2 + $0x120] sm:$0xf0] }
0x24c2   : > { %2593 = vmatpush.bf16.msra.mxu0 %v5799_v55  ;;  %2606 = vmatpush.bf16.msra.mxu3 %v5927_v42  ;;  %v6698_v55 = vld [vmem:[#allocation2 + $0x580] sm:$0xf] }
0x24c3   : > { %v6699_v46 = vor.u32 %v7534_v14, %v6698_v55  ;;  %v7470_v42 = vld [vmem:[#allocation2 + $0x39c] sm:$0xf0] }
0x24c4   : > { %2583 = vmatpush.bf16.msrb.mxu2 %v5875_v45  ;;  %v6443_v13 = vor.u32 %v7470_v42, %v6442_v8  ;;  %v7494_v55 = vld [vmem:[#allocation2 + $0x45c] sm:$0xf0] }
0x24c5   : > { %v6539_v4 = vor.u32 %v7494_v55, %v6538_v54  ;;  %v7430_v8 = vld [vmem:[#allocation2 + $0x25c] sm:$0xf0] }
0x24c6   : > { %2594 = vmatpush.bf16.msra.mxu0 %v5783_v6  ;;  %2607 = vmatpush.bf16.msra.mxu3 %v5911_v53  ;;  %v7526_v6 = vld [vmem:[#allocation2 + $0x55c] sm:$0xf0] }
0x24c7   : > { %v6667_v9 = vor.u32 %v7526_v6, %v6666_v27  ;;  %v7590_v53 = vld [vmem:[#allocation2 + $0x75c] sm:$0xf0]  ;;  %v7410_v6 = vld [vmem:[#allocation2 + $0x1c4] sm:$0xf] }
0x24c8   : > { %v6282_v27 = vld [vmem:[#allocation2 + $0x240] sm:$0xf] }
0x24c9   : > { %v7558_v42 = vld [vmem:[#allocation2 + $0x65c] sm:$0xf0] }
0x24ca   : > { %2595 = vmatpush.bf16.msra.mxu0 %v5767_v10  ;;  %2608 = vmatpush.bf16.msra.mxu3 %v5895_v56  ;;  %v7390_v10 = vld [vmem:[#allocation2 + $0x11c] sm:$0xf0]  ;;  %v6923_v56 = vor.u32 %v7590_v53, %v6922_v26  ;;  %v6156_v26 = vld [vmem:[#allocation2 + $0x160] sm:$0xf0] }
0x24cb   : > { %v6123_v51 = vor.u32 %v7390_v10, %v6122_v0  ;;  %v7402_v0 = vld [vmem:[#allocation2 + $0x184] sm:$0xf]  ;;  %v6250_v10 = vld [vmem:[#allocation2 + $0x200] sm:$0xf] }
0x24ce   : > { %2596 = vmatpush.bf16.msra.mxu0 %v5751_v33  ;;  %2609 = vmatpush.bf16.msra.mxu3 %v5879_v19  ;;  %v7382_v33 = vld [vmem:[#allocation2 + $0xdc] sm:$0xf0]  ;;  %v6603_v19 = vor.u32 %v7510_v37, %v6602_v36  ;;  %v6412_v36 = vld [vmem:[#allocation2 + $0x360] sm:$0xf0] }
0x24cf   : > { %v6091_v45 = vor.u32 %v7382_v33, %v6090_v32  ;;  %v6159_v32 = vor.u32 %v7394_v60, %v6156_v26  ;;  %v7458_v33 = vld [vmem:[#allocation2 + $0x344] sm:$0xf] }
0x24d0   : > { %v6415_v37 = vor.u32 %v7458_v33, %v6412_v36  ;;  %v6636_v60 = vld [vmem:[#allocation2 + $0x520] sm:$0xf0] }
0x24d1   : > { %v6604_v33 = vld [vmem:[#allocation2 + $0x4e0] sm:$0xf0] }
0x24d2   : > { %v7570_v36 = vld [vmem:[#allocation2 + $0x6c4] sm:$0xf] }
0x252e   : > { %v2098_v41 = vpop.f32.mrf.mxu0 }
0x252f   : > { %v2099_v23 = vadd.f32 %v2098_v41, %v2085_v29  ;;  %v6570_v29 = vld [vmem:[#allocation2 + $0x480] sm:$0xf] }
0x2530   : > { %v6346_v41 = vld [vmem:[#allocation2 + $0x2c0] sm:$0xf]  ;;  %v6571_v31 = vor.u32 %v7502_v34, %v6570_v29  ;;  %v7378_v34 = vld [vmem:[#allocation2 + $0xc4] sm:$0xf] }
0x2531   : > { %v9676_v49 = vpack.c.bf16 %v2099_v23, %v2099_v23  ;;  %v6891_v23 = vor.u32 %v7582_v1, %v6890_v22  ;;  %v6347_v14 = vor.u32 %v7446_v28, %v6346_v41  ;;  %v6380_v22 = vld [vmem:[#allocation2 + $0x320] sm:$0xf0]  ;;  %v7550_v29 = vld [vmem:[#allocation2 + $0x61c] sm:$0xf0] }
0x2532   : > { %v7442_v28 = vld [vmem:[#allocation2 + $0x2c4] sm:$0xf] }
0x2533   : > { %2519 = vmatmul.bf16.vlgmr.msrb.gmra.mxu1 %v9676_v49  ;;  %2545 = vmatmul.bf16.vlgmr.msrb.gmra.mxu0 %v9676_v49 }
0x2534   : > { %v2111_v59 = vpop.f32.mrf.mxu3  ;;  %4173 = vmatpush.bf16.msrb.mxu1 %v6219_v18  ;;  %4199 = vmatpush.bf16.msrb.mxu0 %v6731_v35  ;;  %v6858_v18 = vld [vmem:[#allocation2 + $0x6c0] sm:$0xf] }
0x2535   : > { %v2112_v52 = vadd.f32 %v2111_v59, %v2086_v39  ;;  %v6059_v39 = vor.u32 %v7374_v24, %v6058_v17  ;;  %v7366_v35 = vld [vmem:[#allocation2 + $0x5c] sm:$0xf0]  ;;  %v6859_v47 = vor.u32 %v7574_v43, %v6858_v18  ;;  %v6348_v18 = vld [vmem:[#allocation2 + $0x2e0] sm:$0xf0] }
0x2536   : > { %v2100_v7 = vpop.f32.mrf.mxu0  ;;  %v6826_v59 = vld [vmem:[#allocation2 + $0x680] sm:$0xf]  ;;  %v7538_v43 = vld [vmem:[#allocation2 + $0x5c4] sm:$0xf] }
0x2537   : > { %v9680_v57 = vpack.c.bf16 %v2112_v52, %v2112_v52  ;;  %v7358_v52 = vld [vmem:[#allocation2 + $0x1c] sm:$0xf0]  ;;  %v6220_v7 = vld [vmem:[#allocation2 + $0x1e0] sm:$0xf0] }
0x2538   : > { %4174 = vmatpush.bf16.msrb.mxu1 %v6187_v3  ;;  %4200 = vmatpush.bf16.msrb.mxu0 %v6699_v46  ;;  %v7566_v3 = vld [vmem:[#allocation2 + $0x69c] sm:$0xf0]  ;;  %v6223_v62 = vor.u32 %v7410_v6, %v6220_v7  ;;  %v7362_v6 = vld [vmem:[#allocation2 + $0x44] sm:$0xf] }
0x2539   : > { %2532 = vmatmul.bf16.vlgmr.msra.gmra.mxu2 %v9680_v57  ;;  %2558 = vmatmul.bf16.vlgmr.msrb.gmra.mxu3 %v9680_v57  ;;  %v5994_v46 = vld [vmem:[#allocation2] sm:$0xf]  ;;  %v6028_v7 = vld [vmem:[#allocation2 + $0x60] sm:$0xf0] }
0x253a   : > { %4186 = vmatpush.bf16.msra.mxu2 %v6475_v50  ;;  %4212 = vmatpush.bf16.msrb.mxu3 %v6987_v15  ;;  %v6827_v50 = vor.u32 %v7566_v3, %v6826_v59  ;;  %v6794_v15 = vld [vmem:[#allocation2 + $0x640] sm:$0xf]  ;;  %v5995_v61 = vor.u32 %v7358_v52, %v5994_v46  ;;  %v6316_v59 = vld [vmem:[#allocation2 + $0x2a0] sm:$0xf0] }
0x253b   : > { %v7486_v17 = vld [vmem:[#allocation2 + $0x41c] sm:$0xf0]  ;;  %v7530_v3 = vld [vmem:[#allocation2 + $0x584] sm:$0xf] }
0x253c   : > { %v2113_v40 = vpop.f32.mrf.mxu3  ;;  %4175 = vmatpush.bf16.msrb.mxu1 %v6155_v63  ;;  %4201 = vmatpush.bf16.msrb.mxu0 %v6667_v9  ;;  %v6283_v63 = vor.u32 %v7430_v8, %v6282_v27  ;;  %v6795_v9 = vor.u32 %v7558_v42, %v6794_v15  ;;  %v7594_v52 = vld [vmem:[#allocation2 + $0x784] sm:$0xf]  ;;  %v6031_v8 = vor.u32 %v7362_v6, %v6028_v7 }
0x253d   : > { %v7466_v40 = vld [vmem:[#allocation2 + $0x384] sm:$0xf] }
0x253e   : > { %4187 = vmatpush.bf16.msra.mxu2 %v6443_v13  ;;  %4213 = vmatpush.bf16.msrb.mxu3 %v6955_v21  ;;  %v6476_v13 = vld [vmem:[#allocation2 + $0x3e0] sm:$0xf0]  ;;  %v6251_v21 = vor.u32 %v7422_v12, %v6250_v10 }
0x253f   : > { %v6479_v53 = vor.u32 %v7474_v11, %v6476_v13  ;;  %v6284_v15 = vld [vmem:[#allocation2 + $0x260] sm:$0xf0] }
0x2540   : > { %4176 = vmatpush.bf16.msrb.mxu1 %v6123_v51  ;;  %4202 = vmatpush.bf16.msrb.mxu0 %v6635_v2  ;;  %v6444_v51 = vld [vmem:[#allocation2 + $0x3a0] sm:$0xf0] }
0x2541   : > { %v6447_v2 = vor.u32 %v7466_v40, %v6444_v51  ;;  %v7522_v42 = vld [vmem:[#allocation2 + $0x544] sm:$0xf] }
0x2542   : > { %4188 = vmatpush.bf16.msra.mxu2 %v6411_v44  ;;  %4214 = vmatpush.bf16.msrb.mxu3 %v6923_v56  ;;  %v7386_v44 = vld [vmem:[#allocation2 + $0x104] sm:$0xf] }
0x2543   : > { %2571 = vmatmul.bf16.vlgmr.msra.gmra.mxu1 %v9676_v49  ;;  %2597 = vmatmul.bf16.vlgmr.msra.gmra.mxu0 %v9676_v49  ;;  %v6027_v49 = vor.u32 %v7366_v35, %v6026_v30  ;;  %v7450_v56 = vld [vmem:[#allocation2 + $0x304] sm:$0xf]  ;;  %v6127_v16 = vor.u32 %v7386_v44, %v6124_v48 }
0x2544   : > { %4177 = vmatpush.bf16.msrb.mxu1 %v6091_v45  ;;  %4203 = vmatpush.bf16.msrb.mxu0 %v6603_v19  ;;  %v6383_v1 = vor.u32 %v7450_v56, %v6380_v22  ;;  %v6506_v45 = vld [vmem:[#allocation2 + $0x400] sm:$0xf]  ;;  %v6732_v30 = vld [vmem:[#allocation2 + $0x5e0] sm:$0xf0] }
0x2545   : > { %v6762_v19 = vld [vmem:[#allocation2 + $0x600] sm:$0xf]  ;;  %v6507_v24 = vor.u32 %v7486_v17, %v6506_v45  ;;  %v6988_v35 = vld [vmem:[#allocation2 + $0x7e0] sm:$0xf0]  ;;  %v6735_v54 = vor.u32 %v7538_v43, %v6732_v30 }
0x2546   : > { %4189 = vmatpush.bf16.msra.mxu2 %v6379_v38  ;;  %4215 = vmatpush.bf16.msrb.mxu3 %v6891_v23  ;;  %v6092_v38 = vld [vmem:[#allocation2 + $0xe0] sm:$0xf0]  ;;  %v6763_v41 = vor.u32 %v7550_v29, %v6762_v19 }
0x2547   : > { %v6095_v23 = vor.u32 %v7378_v34, %v6092_v38  ;;  %v7354_v10 = vld [vmem:[#allocation2 + $0x4] sm:$0xf] }
0x2548   : > { %4178 = vmatpush.bf16.msrb.mxu1 %v6059_v39  ;;  %4204 = vmatpush.bf16.msrb.mxu0 %v6571_v31  ;;  %v6351_v39 = vor.u32 %v7442_v28, %v6348_v18  ;;  %v7602_v31 = vld [vmem:[#allocation2 + $0x7c4] sm:$0xf] }
0x2549   : > { %2584 = vmatmul.bf16.vlgmr.msrb.gmra.mxu2 %v9680_v57  ;;  %2610 = vmatmul.bf16.vlgmr.msra.gmra.mxu3 %v9680_v57  ;;  %v6188_v57 = vld [vmem:[#allocation2 + $0x1a0] sm:$0xf0]  ;;  %v6991_v55 = vor.u32 %v7602_v31, %v6988_v35 }
0x254a   : > { %4190 = vmatpush.bf16.msra.mxu2 %v6347_v14  ;;  %4216 = vmatpush.bf16.msrb.mxu3 %v6859_v47  ;;  %v6191_v20 = vor.u32 %v7402_v0, %v6188_v57  ;;  %v7370_v14 = vld [vmem:[#allocation2 + $0x84] sm:$0xf] }
0x254b   : > { %v7434_v47 = vld [vmem:[#allocation2 + $0x284] sm:$0xf]  ;;  %v6063_v25 = vor.u32 %v7370_v14, %v6060_v58 }
0x254c   : > { %4179 = vmatpush.bf16.msrb.mxu1 %v6027_v49  ;;  %4205 = vmatpush.bf16.msrb.mxu0 %v6539_v4  ;;  %v6700_v49 = vld [vmem:[#allocation2 + $0x5a0] sm:$0xf0]  ;;  %v6319_v4 = vor.u32 %v7434_v47, %v6316_v59 }
0x254d   : > { %v6703_v46 = vor.u32 %v7530_v3, %v6700_v49  ;;  %v7586_v0 = vld [vmem:[#allocation2 + $0x744] sm:$0xf]  ;;  %v7415_v49 = vld [vmem:[#allocation2 + $0x1e4] sm:$0xf0] }
0x254e   : > { %4191 = vmatpush.bf16.msra.mxu2 %v6315_v5  ;;  %4217 = vmatpush.bf16.msrb.mxu3 %v6827_v50  ;;  %v6956_v5 = vld [vmem:[#allocation2 + $0x7a0] sm:$0xf0] }
0x254f   : > { %v6959_v27 = vor.u32 %v7594_v52, %v6956_v5  ;;  %v7426_v50 = vld [vmem:[#allocation2 + $0x244] sm:$0xf] }
0x2550   : > { %4180 = vmatpush.bf16.msrb.mxu1 %v5995_v61  ;;  %4206 = vmatpush.bf16.msrb.mxu0 %v6507_v24  ;;  %v6668_v61 = vld [vmem:[#allocation2 + $0x560] sm:$0xf0] }
0x2551   : > { %v6924_v57 = vld [vmem:[#allocation2 + $0x760] sm:$0xf0] }
0x2552   : > { %4192 = vmatpush.bf16.msra.mxu2 %v6283_v63  ;;  %4218 = vmatpush.bf16.msrb.mxu3 %v6795_v9  ;;  %v6671_v63 = vor.u32 %v7522_v42, %v6668_v61  ;;  %v6927_v9 = vor.u32 %v7586_v0, %v6924_v57  ;;  %v5996_v12 = vld [vmem:[#allocation2 + $0x20] sm:$0xf0]  ;;  %v7407_v61 = vld [vmem:[#allocation2 + $0x1a4] sm:$0xf0] }
0x2553   : > { %v7418_v11 = vld [vmem:[#allocation2 + $0x204] sm:$0xf]  ;;  %v5999_v13 = vor.u32 %v7354_v10, %v5996_v12  ;;  %v6162_v12 = vld [vmem:[#allocation2 + $0x148] sm:$0xf] }
0x2554   : > { %4225 = vmatpush.bf16.msra.mxu1 %v6223_v62  ;;  %4251 = vmatpush.bf16.msra.mxu0 %v6735_v54  ;;  %v6287_v62 = vor.u32 %v7426_v50, %v6284_v15  ;;  %v7578_v40 = vld [vmem:[#allocation2 + $0x704] sm:$0xf] }
0x2555   : > { %v6892_v51 = vld [vmem:[#allocation2 + $0x720] sm:$0xf0] }
0x2556   : > { %4193 = vmatpush.bf16.msra.mxu2 %v6251_v21  ;;  %4219 = vmatpush.bf16.msrb.mxu3 %v6763_v41  ;;  %v7514_v21 = vld [vmem:[#allocation2 + $0x504] sm:$0xf] }
0x2557   : > { %v6860_v44 = vld [vmem:[#allocation2 + $0x6e0] sm:$0xf0] }
0x2558   : > { %4226 = vmatpush.bf16.msra.mxu1 %v6191_v20  ;;  %4252 = vmatpush.bf16.msra.mxu0 %v6703_v46  ;;  %v6252_v20 = vld [vmem:[#allocation2 + $0x220] sm:$0xf0]  ;;  %v6863_v48 = vor.u32 %v7570_v36, %v6860_v44  ;;  %v7479_v46 = vld [vmem:[#allocation2 + $0x3e4] sm:$0xf0] }
0x2559   : > { %v6255_v26 = vor.u32 %v7418_v11, %v6252_v20  ;;  %v7498_v56 = vld [vmem:[#allocation2 + $0x484] sm:$0xf]  ;;  %v7399_v11 = vld [vmem:[#allocation2 + $0x164] sm:$0xf0] }
0x255a   : > { %4238 = vmatpush.bf16.msrb.mxu2 %v6479_v53  ;;  %4264 = vmatpush.bf16.msra.mxu3 %v6991_v55  ;;  %v6639_v53 = vor.u32 %v7514_v21, %v6636_v60  ;;  %v7562_v22 = vld [vmem:[#allocation2 + $0x684] sm:$0xf]  ;;  %v7463_v20 = vld [vmem:[#allocation2 + $0x364] sm:$0xf0] }
0x255b   : > { %v6828_v45 = vld [vmem:[#allocation2 + $0x6a0] sm:$0xf0]  ;;  %v7455_v36 = vld [vmem:[#allocation2 + $0x324] sm:$0xf0] }
0x255c   : > { %4227 = vmatpush.bf16.msra.mxu1 %v6159_v32  ;;  %4253 = vmatpush.bf16.msra.mxu0 %v6671_v63  ;;  %v6895_v32 = vor.u32 %v7578_v40, %v6892_v51  ;;  %v6831_v17 = vor.u32 %v7562_v22, %v6828_v45  ;;  %v7490_v19 = vld [vmem:[#allocation2 + $0x444] sm:$0xf]  ;;  %v7471_v63 = vld [vmem:[#allocation2 + $0x3a4] sm:$0xf0]  ;;  %v6163_v40 = vor.u32 %v7399_v11, %v6162_v12 }
0x255d   : > { %v6540_v24 = vld [vmem:[#allocation2 + $0x460] sm:$0xf0]  ;;  %v7383_v45 = vld [vmem:[#allocation2 + $0xe4] sm:$0xf0] }
0x255e   : > { %4239 = vmatpush.bf16.msrb.mxu2 %v6447_v2  ;;  %4265 = vmatpush.bf16.msra.mxu3 %v6959_v27  ;;  %v7506_v2 = vld [vmem:[#allocation2 + $0x4c4] sm:$0xf]  ;;  %v6543_v34 = vor.u32 %v7490_v19, %v6540_v24  ;;  %v6354_v24 = vld [vmem:[#allocation2 + $0x2c8] sm:$0xf] }
0x255f   : > { %v7554_v29 = vld [vmem:[#allocation2 + $0x644] sm:$0xf]  ;;  %v6002_v12 = vld [vmem:[#allocation2 + $0x8] sm:$0xf] }
0x2560   : > { %4228 = vmatpush.bf16.msra.mxu1 %v6127_v16  ;;  %4254 = vmatpush.bf16.msra.mxu0 %v6639_v53  ;;  %v6572_v16 = vld [vmem:[#allocation2 + $0x4a0] sm:$0xf0]  ;;  %v7359_v11 = vld [vmem:[#allocation2 + $0x24] sm:$0xf0] }
0x2561   : > { %v6796_v38 = vld [vmem:[#allocation2 + $0x660] sm:$0xf0] }
0x2562   : > { %4240 = vmatpush.bf16.msrb.mxu2 %v6415_v37  ;;  %4266 = vmatpush.bf16.msra.mxu3 %v6927_v9  ;;  %v6607_v37 = vor.u32 %v7506_v2, %v6604_v33  ;;  %v6799_v41 = vor.u32 %v7554_v29, %v6796_v38  ;;  %v6508_v28 = vld [vmem:[#allocation2 + $0x420] sm:$0xf0]  ;;  %v7391_v2 = vld [vmem:[#allocation2 + $0x124] sm:$0xf0] }
0x2563   : > { %v7546_v18 = vld [vmem:[#allocation2 + $0x604] sm:$0xf]  ;;  %v6386_v33 = vld [vmem:[#allocation2 + $0x308] sm:$0xf] }
0x2564   : > { %4229 = vmatpush.bf16.msra.mxu1 %v6095_v23  ;;  %4255 = vmatpush.bf16.msra.mxu0 %v6607_v37  ;;  %v7482_v23 = vld [vmem:[#allocation2 + $0x404] sm:$0xf]  ;;  %v7447_v29 = vld [vmem:[#allocation2 + $0x2e4] sm:$0xf0] }
0x2565   : > { %v6511_v43 = vor.u32 %v7482_v23, %v6508_v28  ;;  %v2181_v54 = vld [vmem:[#allocation5 + $0x2] sm:$0xf]  ;;  %v7543_v23 = vld [vmem:[#allocation2 + $0x5e4] sm:$0xf0] }
0x2566   : > { %4241 = vmatpush.bf16.msrb.mxu2 %v6383_v1  ;;  %4267 = vmatpush.bf16.msra.mxu3 %v6895_v32  ;;  %v6575_v1 = vor.u32 %v7498_v56, %v6572_v16  ;;  %v2503_v55 = vperm.slane %v2181_v54, 0  ;;  %v2504_v14 = vperm.slane %v2181_v54, 1  ;;  %v2506_v53 = vperm.slane %v2181_v54, 3  ;;  %v6130_v32 = vld [vmem:[#allocation2 + $0x108] sm:$0xf] }
0x2567   : > { %v6387_v56 = vor.u32 %v7455_v36, %v6386_v33  ;;  %v6994_v28 = vld [vmem:[#allocation2 + $0x7c8] sm:$0xf]  ;;  %v7475_v33 = vld [vmem:[#allocation2 + $0x3cc] sm:$0xf] }
0x2568   : > { %4230 = vmatpush.bf16.msra.mxu1 %v6063_v25  ;;  %4256 = vmatpush.bf16.msra.mxu0 %v6575_v1  ;;  %v6226_v25 = vld [vmem:[#allocation2 + $0x1c8] sm:$0xf]  ;;  %v6484_v36 = vld [vmem:[#allocation2 + $0x3e8] sm:$0xf0] }
0x2569   : > { %v6227_v7 = vor.u32 %v7415_v49, %v6226_v25  ;;  %v6098_v1 = vld [vmem:[#allocation2 + $0xc8] sm:$0xf] }
0x256a   : > { %4242 = vmatpush.bf16.msrb.mxu2 %v6351_v39  ;;  %4268 = vmatpush.bf16.msra.mxu3 %v6863_v48  ;;  %v6764_v39 = vld [vmem:[#allocation2 + $0x620] sm:$0xf0]  ;;  %v6131_v48 = vor.u32 %v7391_v2, %v6130_v32  ;;  %v6706_v25 = vld [vmem:[#allocation2 + $0x588] sm:$0xf]  ;;  %v7411_v32 = vld [vmem:[#allocation2 + $0x1cc] sm:$0xf] }
0x256b   : > { %v6767_v35 = vor.u32 %v7546_v18, %v6764_v39  ;;  %v7607_v18 = vld [vmem:[#allocation2 + $0x7e4] sm:$0xf0]  ;;  %v6228_v2 = vld [vmem:[#allocation2 + $0x1e8] sm:$0xf0] }
0x256c   : > { %4231 = vmatpush.bf16.msra.mxu1 %v6031_v8  ;;  %4257 = vmatpush.bf16.msra.mxu0 %v6543_v34  ;;  %v6194_v8 = vld [vmem:[#allocation2 + $0x188] sm:$0xf] }
0x256d   : > { %v6195_v9 = vor.u32 %v7407_v61, %v6194_v8  ;;  %v6738_v34 = vld [vmem:[#allocation2 + $0x5c8] sm:$0xf] }
0x256e   : > { %4243 = vmatpush.bf16.msrb.mxu2 %v6319_v4  ;;  %4269 = vmatpush.bf16.msra.mxu3 %v6831_v17  ;;  %v6482_v4 = vld [vmem:[#allocation2 + $0x3c8] sm:$0xf] }
0x256f   : > { %v6483_v50 = vor.u32 %v7479_v46, %v6482_v4  ;;  %v7599_v49 = vld [vmem:[#allocation2 + $0x7a4] sm:$0xf0] }
0x2570   : > { %4232 = vmatpush.bf16.msra.mxu1 %v5999_v13  ;;  %4258 = vmatpush.bf16.msra.mxu0 %v6511_v43  ;;  %v6418_v13 = vld [vmem:[#allocation2 + $0x348] sm:$0xf] }
0x2571   : > { %v6419_v51 = vor.u32 %v7463_v20, %v6418_v13  ;;  %v6290_v8 = vld [vmem:[#allocation2 + $0x248] sm:$0xf] }
0x2572   : > { %4244 = vmatpush.bf16.msrb.mxu2 %v6287_v62  ;;  %4270 = vmatpush.bf16.msra.mxu3 %v6799_v41  ;;  %v6450_v62 = vld [vmem:[#allocation2 + $0x388] sm:$0xf] }
0x2573   : > { %v6451_v10 = vor.u32 %v7471_v63, %v6450_v62  ;;  %v7431_v61 = vld [vmem:[#allocation2 + $0x264] sm:$0xf0] }
0x2574   : > { %v6674_v62 = vld [vmem:[#allocation2 + $0x548] sm:$0xf] }
0x2575   : > { %v7527_v63 = vld [vmem:[#allocation2 + $0x564] sm:$0xf0] }
0x2576   : > { %4245 = vmatpush.bf16.msrb.mxu2 %v6255_v26  ;;  %4271 = vmatpush.bf16.msra.mxu3 %v6767_v35  ;;  %v2505_v26 = vperm.slane %v2181_v54, 2  ;;  %v6066_v35 = vld [vmem:[#allocation2 + $0x88] sm:$0xf]  ;;  %v6675_v20 = vor.u32 %v7527_v63, %v6674_v62 }
0x2577   : > { %v7375_v54 = vld [vmem:[#allocation2 + $0xa4] sm:$0xf0] }
0x2578   : > { %v6067_v4 = vor.u32 %v7375_v54, %v6066_v35  ;;  %v6258_v13 = vld [vmem:[#allocation2 + $0x208] sm:$0xf] }
0x2579   : > { %v6834_v35 = vld [vmem:[#allocation2 + $0x688] sm:$0xf] }
0x257a   : > { %v7567_v54 = vld [vmem:[#allocation2 + $0x6a4] sm:$0xf0] }
0x257b   : > { %v6514_v62 = vld [vmem:[#allocation2 + $0x408] sm:$0xf] }
0x257c   : > { %v7487_v63 = vld [vmem:[#allocation2 + $0x424] sm:$0xf0] }
0x25b0   : > { %v2520_v30 = vpop.f32.mrf.mxu1  ;;  %v2546_v31 = vpop.f32.mrf.mxu0 }
0x25b1   : > { %v2521_v59 = vadd.f32 %v2520_v30, %v2503_v55  ;;  %v2547_v3 = vadd.f32 %v2546_v31, %v2504_v14  ;;  %v6099_v30 = vor.u32 %v7383_v45, %v6098_v1  ;;  %v6355_v31 = vor.u32 %v7447_v29, %v6354_v24  ;;  %v7403_v24 = vld [vmem:[#allocation2 + $0x18c] sm:$0xf] }
0x25b2   : > { %v6739_v55 = vor.u32 %v7543_v23, %v6738_v34  ;;  %v6995_v14 = vor.u32 %v7607_v18, %v6994_v28  ;;  %v6231_v1 = vor.u32 %v7411_v32, %v6228_v2  ;;  %v6487_v45 = vor.u32 %v7475_v33, %v6484_v36  ;;  %v6196_v29 = vld [vmem:[#allocation2 + $0x1a8] sm:$0xf0]  ;;  %v6578_v28 = vld [vmem:[#allocation2 + $0x488] sm:$0xf] }
0x25b3   : > { %v7467_v34 = vld [vmem:[#allocation2 + $0x38c] sm:$0xf]  ;;  %v7503_v18 = vld [vmem:[#allocation2 + $0x4a4] sm:$0xf0] }
0x25b4   : > { %v7371_v33 = vld [vmem:[#allocation2 + $0x8c] sm:$0xf] }
0x25b5   : > { %v6068_v36 = vld [vmem:[#allocation2 + $0xa8] sm:$0xf0] }
0x25b8   : > { %v2522_v58 = vpop.f32.mrf.mxu1  ;;  %v2548_v47 = vpop.f32.mrf.mxu0 }
0x25b9   : > { %v6322_v58 = vld [vmem:[#allocation2 + $0x288] sm:$0xf] }
0x25ba   : > { %v7439_v47 = vld [vmem:[#allocation2 + $0x2a4] sm:$0xf0] }
0x25bb   : > { %v6323_v46 = vor.u32 %v7439_v47, %v6322_v58  ;;  %v7459_v58 = vld [vmem:[#allocation2 + $0x34c] sm:$0xf] }
0x25bc   : > { %v2533_v52 = vpop.f32.mrf.mxu2  ;;  %v2559_v5 = vpop.f32.mrf.mxu3  ;;  %v6420_v47 = vld [vmem:[#allocation2 + $0x368] sm:$0xf0] }
0x25bd   : > { %v2534_v27 = vadd.f32 %v2533_v52, %v2521_v59  ;;  %v2560_v6 = vadd.f32 %v2559_v5, %v2547_v3  ;;  %v7535_v59 = vld [vmem:[#allocation2 + $0x5a4] sm:$0xf0] }
0x25be   : > { %v6962_v3 = vld [vmem:[#allocation2 + $0x788] sm:$0xf] }
0x25bf   : > { %v9688_v15 = vpack.c.bf16 %v2534_v27, %v2534_v27  ;;  %v9690_v42 = vpack.c.bf16 %v2560_v6, %v2560_v6  ;;  %v6034_v52 = vld [vmem:[#allocation2 + $0x48] sm:$0xf] }
0x25c0   : > { %v2572_v0 = vpop.f32.mrf.mxu1  ;;  %v2598_v57 = vpop.f32.mrf.mxu0  ;;  %v7367_v5 = vld [vmem:[#allocation2 + $0x64] sm:$0xf0] }
0x25c1   : > { %4181 = vmatmul.bf16.vlgmr.msrb.gmra.mxu1 %v9688_v15  ;;  %4194 = vmatmul.bf16.vlgmr.msra.gmra.mxu2 %v9690_v42  ;;  %v2573_v16 = vadd.f32 %v2572_v0, %v2505_v26  ;;  %v2599_v22 = vadd.f32 %v2598_v57, %v2506_v53  ;;  %v6930_v0 = vld [vmem:[#allocation2 + $0x748] sm:$0xf] }
0x25c2   : > { %4277 = vmatpush.bf16.msrb.mxu1 %v6227_v7  ;;  %4290 = vmatpush.bf16.msra.mxu2 %v6483_v50  ;;  %v6707_v7 = vor.u32 %v7535_v59, %v6706_v25  ;;  %v6963_v50 = vor.u32 %v7599_v49, %v6962_v3  ;;  %v7591_v57 = vld [vmem:[#allocation2 + $0x764] sm:$0xf0]  ;;  %v6579_v25 = vor.u32 %v7503_v18, %v6578_v28  ;;  %v7523_v28 = vld [vmem:[#allocation2 + $0x54c] sm:$0xf] }
0x25c3   : > { %v6642_v26 = vld [vmem:[#allocation2 + $0x508] sm:$0xf]  ;;  %v6835_v59 = vor.u32 %v7567_v54, %v6834_v35  ;;  %v6676_v18 = vld [vmem:[#allocation2 + $0x568] sm:$0xf0] }
0x25c4   : > { %v2535_v21 = vpop.f32.mrf.mxu2  ;;  %v2561_v60 = vpop.f32.mrf.mxu3  ;;  %v7519_v53 = vld [vmem:[#allocation2 + $0x524] sm:$0xf0] }
0x25c5   : > { %v6931_v21 = vor.u32 %v7591_v57, %v6930_v0  ;;  %v7423_v60 = vld [vmem:[#allocation2 + $0x224] sm:$0xf0] }
0x25c6   : > { %4278 = vmatpush.bf16.msrb.mxu1 %v6195_v9  ;;  %4291 = vmatpush.bf16.msra.mxu2 %v6451_v10  ;;  %v6035_v9 = vor.u32 %v7367_v5, %v6034_v52  ;;  %v6291_v10 = vor.u32 %v7431_v61, %v6290_v8  ;;  %v6546_v3 = vld [vmem:[#allocation2 + $0x448] sm:$0xf] }
0x25c7   : > { %v7495_v49 = vld [vmem:[#allocation2 + $0x464] sm:$0xf0] }
0x25c8   : > { %v2574_v37 = vpop.f32.mrf.mxu1  ;;  %v2600_v44 = vpop.f32.mrf.mxu0  ;;  %v6802_v52 = vld [vmem:[#allocation2 + $0x648] sm:$0xf]  ;;  %v6547_v8 = vor.u32 %v7495_v49, %v6546_v3  ;;  %v7515_v3 = vld [vmem:[#allocation2 + $0x50c] sm:$0xf] }
0x25c9   : > { %v6003_v37 = vor.u32 %v7359_v11, %v6002_v12  ;;  %v6259_v44 = vor.u32 %v7423_v60, %v6258_v13  ;;  %v7559_v5 = vld [vmem:[#allocation2 + $0x664] sm:$0xf0]  ;;  %v7379_v12 = vld [vmem:[#allocation2 + $0xcc] sm:$0xf] }
0x25ca   : > { %4279 = vmatpush.bf16.msrb.mxu1 %v6163_v40  ;;  %4292 = vmatpush.bf16.msra.mxu2 %v6419_v51  ;;  %v6898_v40 = vld [vmem:[#allocation2 + $0x708] sm:$0xf]  ;;  %v6803_v61 = vor.u32 %v7559_v5, %v6802_v52  ;;  %v6100_v11 = vld [vmem:[#allocation2 + $0xe8] sm:$0xf0]  ;;  %v6234_v52 = vld [vmem:[#allocation2 + $0x1d0] sm:$0xf] }
0x25cb   : > { %v7583_v51 = vld [vmem:[#allocation2 + $0x724] sm:$0xf0]  ;;  %v7443_v13 = vld [vmem:[#allocation2 + $0x2cc] sm:$0xf]  ;;  %v6103_v32 = vor.u32 %v7379_v12, %v6100_v11  ;;  %v7416_v5 = vld [vmem:[#allocation2 + $0x1ec] sm:$0xf0] }
0x25cc   : > { %v2585_v17 = vpop.f32.mrf.mxu2  ;;  %v2611_v19 = vpop.f32.mrf.mxu3  ;;  %v6770_v0 = vld [vmem:[#allocation2 + $0x608] sm:$0xf]  ;;  %v6740_v60 = vld [vmem:[#allocation2 + $0x5e8] sm:$0xf0]  ;;  %v6202_v12 = vld [vmem:[#allocation2 + $0x190] sm:$0xf] }
0x25cd   : > { %v2586_v38 = vadd.f32 %v2585_v17, %v2573_v16  ;;  %v2612_v41 = vadd.f32 %v2611_v19, %v2599_v22  ;;  %v6610_v16 = vld [vmem:[#allocation2 + $0x4c8] sm:$0xf]  ;;  %v6644_v49 = vld [vmem:[#allocation2 + $0x528] sm:$0xf0]  ;;  %v7408_v11 = vld [vmem:[#allocation2 + $0x1ac] sm:$0xf0] }
0x25ce   : > { %4280 = vmatpush.bf16.msrb.mxu1 %v6131_v48  ;;  %4293 = vmatpush.bf16.msra.mxu2 %v6387_v56  ;;  %v6643_v48 = vor.u32 %v7519_v53, %v6642_v26  ;;  %v6899_v56 = vor.u32 %v7583_v51, %v6898_v40  ;;  %v7511_v22 = vld [vmem:[#allocation2 + $0x4e4] sm:$0xf0]  ;;  %v7603_v26 = vld [vmem:[#allocation2 + $0x7cc] sm:$0xf]  ;;  %v6515_v40 = vor.u32 %v7487_v63, %v6514_v62 }
0x25cf   : > { %v9694_v43 = vpack.c.bf16 %v2586_v38, %v2586_v38  ;;  %v9696_v39 = vpack.c.bf16 %v2612_v41, %v2612_v41  ;;  %v6866_v17 = vld [vmem:[#allocation2 + $0x6c8] sm:$0xf]  ;;  %v6452_v38 = vld [vmem:[#allocation2 + $0x3a8] sm:$0xf0]  ;;  %v6611_v41 = vor.u32 %v7511_v22, %v6610_v16 }
0x25d0   : > { %v7575_v19 = vld [vmem:[#allocation2 + $0x6e4] sm:$0xf0]  ;;  %v6996_v53 = vld [vmem:[#allocation2 + $0x7e8] sm:$0xf0] }
0x25d1   : > { %4207 = vmatmul.bf16.vlgmr.msrb.gmra.mxu0 %v9694_v43  ;;  %4220 = vmatmul.bf16.vlgmr.msrb.gmra.mxu3 %v9696_v39  ;;  %v6867_v23 = vor.u32 %v7575_v19, %v6866_v17  ;;  %v7531_v16 = vld [vmem:[#allocation2 + $0x58c] sm:$0xf]  ;;  %v6071_v17 = vor.u32 %v7371_v33, %v6068_v36  ;;  %v6170_v33 = vld [vmem:[#allocation2 + $0x150] sm:$0xf] }
0x25d2   : > { %4233 = vmatmul.bf16.vlgmr.msra.gmra.mxu1 %v9688_v15  ;;  %4246 = vmatmul.bf16.vlgmr.msrb.gmra.mxu2 %v9690_v42  ;;  %v6708_v22 = vld [vmem:[#allocation2 + $0x5a8] sm:$0xf0]  ;;  %v7400_v36 = vld [vmem:[#allocation2 + $0x16c] sm:$0xf0] }
0x25d3   : > { %4281 = vmatpush.bf16.msrb.mxu1 %v6099_v30  ;;  %4294 = vmatpush.bf16.msra.mxu2 %v6355_v31  ;;  %v6199_v30 = vor.u32 %v7403_v24, %v6196_v29  ;;  %v6455_v31 = vor.u32 %v7467_v34, %v6452_v38  ;;  %v7363_v24 = vld [vmem:[#allocation2 + $0x4c] sm:$0xf]  ;;  %v6711_v34 = vor.u32 %v7531_v16, %v6708_v22 }
0x25d4   : > { %4303 = vmatpush.bf16.msrb.mxu0 %v6739_v55  ;;  %4316 = vmatpush.bf16.msrb.mxu3 %v6995_v14  ;;  %v2587_v27 = vpop.f32.mrf.mxu2  ;;  %v2613_v6 = vpop.f32.mrf.mxu3  ;;  %v7395_v55 = vld [vmem:[#allocation2 + $0x14c] sm:$0xf] }
0x25d5   : > { %v6164_v14 = vld [vmem:[#allocation2 + $0x168] sm:$0xf0] }
0x25d6   : > { %v7387_v27 = vld [vmem:[#allocation2 + $0x10c] sm:$0xf] }
0x25d7   : > { %4282 = vmatpush.bf16.msrb.mxu1 %v6067_v4  ;;  %4295 = vmatpush.bf16.msra.mxu2 %v6323_v46  ;;  %v6167_v4 = vor.u32 %v7395_v55, %v6164_v14  ;;  %v6423_v46 = vor.u32 %v7459_v58, %v6420_v47  ;;  %v6132_v6 = vld [vmem:[#allocation2 + $0x128] sm:$0xf0]  ;;  %v6679_v47 = vor.u32 %v7523_v28, %v6676_v18 }
0x25d8   : > { %4304 = vmatpush.bf16.msrb.mxu0 %v6707_v7  ;;  %4317 = vmatpush.bf16.msrb.mxu3 %v6963_v50  ;;  %v7451_v7 = vld [vmem:[#allocation2 + $0x30c] sm:$0xf]  ;;  %v6135_v57 = vor.u32 %v7387_v27, %v6132_v6  ;;  %v6490_v27 = vld [vmem:[#allocation2 + $0x3d0] sm:$0xf] }
0x25d9   : > { %v6388_v50 = vld [vmem:[#allocation2 + $0x328] sm:$0xf0]  ;;  %v7480_v6 = vld [vmem:[#allocation2 + $0x3ec] sm:$0xf0] }
0x25da   : > { %v6036_v29 = vld [vmem:[#allocation2 + $0x68] sm:$0xf0] }
0x25db   : > { %4283 = vmatpush.bf16.msrb.mxu1 %v6035_v9  ;;  %4296 = vmatpush.bf16.msra.mxu2 %v6291_v10  ;;  %v6391_v9 = vor.u32 %v7451_v7, %v6388_v50  ;;  %v7551_v10 = vld [vmem:[#allocation2 + $0x624] sm:$0xf0]  ;;  %v6039_v35 = vor.u32 %v7363_v24, %v6036_v29  ;;  %v7355_v55 = vld [vmem:[#allocation2 + $0xc] sm:$0xf]  ;;  %v6138_v24 = vld [vmem:[#allocation2 + $0x110] sm:$0xf] }
0x25dc   : > { %4305 = vmatpush.bf16.msrb.mxu0 %v6675_v20  ;;  %4318 = vmatpush.bf16.msrb.mxu3 %v6931_v21  ;;  %v6356_v20 = vld [vmem:[#allocation2 + $0x2e8] sm:$0xf0]  ;;  %v6771_v51 = vor.u32 %v7551_v10, %v6770_v0  ;;  %v6235_v0 = vor.u32 %v7416_v5, %v6234_v52  ;;  %v7392_v29 = vld [vmem:[#allocation2 + $0x12c] sm:$0xf0] }
0x25dd   : > { %v7539_v21 = vld [vmem:[#allocation2 + $0x5cc] sm:$0xf]  ;;  %v6359_v2 = vor.u32 %v7443_v13, %v6356_v20  ;;  %v6458_v13 = vld [vmem:[#allocation2 + $0x390] sm:$0xf] }
0x25de   : > { %v6004_v14 = vld [vmem:[#allocation2 + $0x28] sm:$0xf0]  ;;  %v7472_v20 = vld [vmem:[#allocation2 + $0x3ac] sm:$0xf0] }
0x25df   : > { %4284 = vmatpush.bf16.msrb.mxu1 %v6003_v37  ;;  %4297 = vmatpush.bf16.msra.mxu2 %v6259_v44  ;;  %v6743_v37 = vor.u32 %v7539_v21, %v6740_v60  ;;  %v6999_v44 = vor.u32 %v7603_v26, %v6996_v53  ;;  %v7419_v58 = vld [vmem:[#allocation2 + $0x20c] sm:$0xf]  ;;  %v6007_v7 = vor.u32 %v7355_v55, %v6004_v14  ;;  %v6106_v55 = vld [vmem:[#allocation2 + $0xd0] sm:$0xf] }
0x25e0   : > { %4306 = vmatpush.bf16.msrb.mxu0 %v6643_v48  ;;  %4319 = vmatpush.bf16.msrb.mxu3 %v6899_v56  ;;  %v7435_v48 = vld [vmem:[#allocation2 + $0x28c] sm:$0xf]  ;;  %v7384_v14 = vld [vmem:[#allocation2 + $0xec] sm:$0xf0] }
0x25e1   : > { %4259 = vmatmul.bf16.vlgmr.msra.gmra.mxu0 %v9694_v43  ;;  %4272 = vmatmul.bf16.vlgmr.msra.gmra.mxu3 %v9696_v39  ;;  %v6324_v56 = vld [vmem:[#allocation2 + $0x2a8] sm:$0xf0]  ;;  %v6107_v52 = vor.u32 %v7384_v14, %v6106_v55  ;;  %v7404_v55 = vld [vmem:[#allocation2 + $0x194] sm:$0xf] }
0x25e2   : > { %4285 = vmatmul.bf16.vlgmr.msrb.gmra.mxu1 %v9688_v15  ;;  %4298 = vmatmul.bf16.vlgmr.msra.gmra.mxu2 %v9690_v42  ;;  %v6327_v19 = vor.u32 %v7435_v48, %v6324_v56  ;;  %v7507_v62 = vld [vmem:[#allocation2 + $0x4cc] sm:$0xf]  ;;  %v6204_v14 = vld [vmem:[#allocation2 + $0x1b0] sm:$0xf0] }
0x25e3   : > { %4329 = vmatpush.bf16.msra.mxu1 %v6231_v1  ;;  %4342 = vmatpush.bf16.msrb.mxu2 %v6487_v45  ;;  %v7595_v1 = vld [vmem:[#allocation2 + $0x78c] sm:$0xf] }
0x25e4   : > { %4307 = vmatpush.bf16.msrb.mxu0 %v6611_v41  ;;  %4320 = vmatpush.bf16.msrb.mxu3 %v6867_v23  ;;  %v6964_v45 = vld [vmem:[#allocation2 + $0x7a8] sm:$0xf0] }
0x25e5   : > { %v6967_v38 = vor.u32 %v7595_v1, %v6964_v45  ;;  %v7427_v41 = vld [vmem:[#allocation2 + $0x24c] sm:$0xf]  ;;  %v6171_v1 = vor.u32 %v7400_v36, %v6170_v33  ;;  %v6010_v33 = vld [vmem:[#allocation2 + $0x10] sm:$0xf] }
0x25e6   : > { %v6292_v23 = vld [vmem:[#allocation2 + $0x268] sm:$0xf0]  ;;  %v7360_v36 = vld [vmem:[#allocation2 + $0x2c] sm:$0xf0] }
0x25e7   : > { %4330 = vmatpush.bf16.msra.mxu1 %v6199_v30  ;;  %4343 = vmatpush.bf16.msrb.mxu2 %v6455_v31  ;;  %v7587_v30 = vld [vmem:[#allocation2 + $0x74c] sm:$0xf]  ;;  %v6295_v54 = vor.u32 %v7427_v41, %v6292_v23 }
0x25e8   : > { %4308 = vmatpush.bf16.msrb.mxu0 %v6579_v25  ;;  %4321 = vmatpush.bf16.msrb.mxu3 %v6835_v59  ;;  %v6932_v31 = vld [vmem:[#allocation2 + $0x768] sm:$0xf0] }
0x25e9   : > { %v6935_v25 = vor.u32 %v7587_v30, %v6932_v31  ;;  %v6260_v59 = vld [vmem:[#allocation2 + $0x228] sm:$0xf0]  ;;  %v6139_v31 = vor.u32 %v7392_v29, %v6138_v24  ;;  %v7476_v24 = vld [vmem:[#allocation2 + $0x3d4] sm:$0xf] }
0x25ea   : > { %v6263_v50 = vor.u32 %v7419_v58, %v6260_v59  ;;  %v6612_v63 = vld [vmem:[#allocation2 + $0x4e8] sm:$0xf0]  ;;  %v6362_v58 = vld [vmem:[#allocation2 + $0x2d0] sm:$0xf]  ;;  %v6492_v29 = vld [vmem:[#allocation2 + $0x3f0] sm:$0xf0] }
0x25eb   : > { %4331 = vmatpush.bf16.msra.mxu1 %v6167_v4  ;;  %4344 = vmatpush.bf16.msrb.mxu2 %v6423_v46  ;;  %v7579_v4 = vld [vmem:[#allocation2 + $0x70c] sm:$0xf]  ;;  %v6615_v21 = vor.u32 %v7507_v62, %v6612_v63  ;;  %v7544_v59 = vld [vmem:[#allocation2 + $0x5ec] sm:$0xf0] }
0x25ec   : > { %4309 = vmatpush.bf16.msrb.mxu0 %v6547_v8  ;;  %4322 = vmatpush.bf16.msrb.mxu3 %v6803_v61  ;;  %v6900_v46 = vld [vmem:[#allocation2 + $0x728] sm:$0xf0]  ;;  %v6647_v8 = vor.u32 %v7515_v3, %v6644_v49  ;;  %v7002_v3 = vld [vmem:[#allocation2 + $0x7d0] sm:$0xf] }
0x25ed   : > { %v6903_v61 = vor.u32 %v7579_v4, %v6900_v46  ;;  %v6868_v10 = vld [vmem:[#allocation2 + $0x6e8] sm:$0xf0]  ;;  %v7608_v49 = vld [vmem:[#allocation2 + $0x7ec] sm:$0xf0] }
0x25ee   : > { %v7499_v26 = vld [vmem:[#allocation2 + $0x48c] sm:$0xf]  ;;  %v6714_v62 = vld [vmem:[#allocation2 + $0x590] sm:$0xf] }
0x25ef   : > { %4332 = vmatpush.bf16.msra.mxu1 %v6135_v57  ;;  %4345 = vmatpush.bf16.msrb.mxu2 %v6391_v9  ;;  %v6491_v57 = vor.u32 %v7480_v6, %v6490_v27  ;;  %v7571_v9 = vld [vmem:[#allocation2 + $0x6cc] sm:$0xf]  ;;  %v6074_v27 = vld [vmem:[#allocation2 + $0x90] sm:$0xf] }
0x25f0   : > { %4310 = vmatpush.bf16.msrb.mxu0 %v6515_v40  ;;  %4323 = vmatpush.bf16.msrb.mxu3 %v6771_v51  ;;  %v6871_v60 = vor.u32 %v7571_v9, %v6868_v10  ;;  %v6580_v53 = vld [vmem:[#allocation2 + $0x4a8] sm:$0xf0]  ;;  %v6203_v40 = vor.u32 %v7408_v11, %v6202_v12  ;;  %v6459_v51 = vor.u32 %v7472_v20, %v6458_v13  ;;  %v7376_v6 = vld [vmem:[#allocation2 + $0xac] sm:$0xf0] }
0x25f1   : > { %v6583_v48 = vor.u32 %v7499_v26, %v6580_v53  ;;  %v7491_v16 = vld [vmem:[#allocation2 + $0x44c] sm:$0xf]  ;;  %v7536_v63 = vld [vmem:[#allocation2 + $0x5ac] sm:$0xf0]  ;;  %v6075_v9 = vor.u32 %v7376_v6, %v6074_v27  ;;  %v7396_v27 = vld [vmem:[#allocation2 + $0x154] sm:$0xf] }
0x25f2   : > { %v6548_v22 = vld [vmem:[#allocation2 + $0x468] sm:$0xf0]  ;;  %v6042_v12 = vld [vmem:[#allocation2 + $0x50] sm:$0xf]  ;;  %v6715_v13 = vor.u32 %v7536_v63, %v6714_v62  ;;  %v6172_v6 = vld [vmem:[#allocation2 + $0x170] sm:$0xf0] }
0x25f3   : > { %4333 = vmatpush.bf16.msra.mxu1 %v6103_v32  ;;  %4346 = vmatpush.bf16.msrb.mxu2 %v6359_v2  ;;  %v7563_v32 = vld [vmem:[#allocation2 + $0x68c] sm:$0xf]  ;;  %v6551_v41 = vor.u32 %v7491_v16, %v6548_v22  ;;  %v7368_v11 = vld [vmem:[#allocation2 + $0x6c] sm:$0xf0] }
0x25f4   : > { %4355 = vmatpush.bf16.msra.mxu0 %v6743_v37  ;;  %4368 = vmatpush.bf16.msra.mxu3 %v6999_v44  ;;  %v6836_v2 = vld [vmem:[#allocation2 + $0x6a8] sm:$0xf0]  ;;  %v6426_v37 = vld [vmem:[#allocation2 + $0x350] sm:$0xf] }
0x25f5   : > { %4311 = vmatmul.bf16.vlgmr.msrb.gmra.mxu0 %v9694_v43  ;;  %4324 = vmatmul.bf16.vlgmr.msrb.gmra.mxu3 %v9696_v39  ;;  %v7464_v44 = vld [vmem:[#allocation2 + $0x36c] sm:$0xf0]  ;;  %v6839_v56 = vor.u32 %v7563_v32, %v6836_v2  ;;  %v7483_v28 = vld [vmem:[#allocation2 + $0x40c] sm:$0xf]  ;;  %v6043_v32 = vor.u32 %v7368_v11, %v6042_v12  ;;  %v7388_v12 = vld [vmem:[#allocation2 + $0x114] sm:$0xf] }
0x25f6   : > { %v6427_v45 = vor.u32 %v7464_v44, %v6426_v37  ;;  %v6516_v18 = vld [vmem:[#allocation2 + $0x428] sm:$0xf0]  ;;  %v6682_v26 = vld [vmem:[#allocation2 + $0x550] sm:$0xf]  ;;  %v6140_v11 = vld [vmem:[#allocation2 + $0x130] sm:$0xf0] }
0x25f7   : > { %4334 = vmatpush.bf16.msra.mxu1 %v6071_v17  ;;  %4347 = vmatpush.bf16.msrb.mxu2 %v6327_v19  ;;  %v7555_v17 = vld [vmem:[#allocation2 + $0x64c] sm:$0xf]  ;;  %v6519_v4 = vor.u32 %v7483_v28, %v6516_v18  ;;  %v7528_v53 = vld [vmem:[#allocation2 + $0x56c] sm:$0xf0] }
0x25f8   : > { %4356 = vmatpush.bf16.msra.mxu0 %v6711_v34  ;;  %4369 = vmatpush.bf16.msra.mxu3 %v6967_v38  ;;  %v6804_v19 = vld [vmem:[#allocation2 + $0x668] sm:$0xf0]  ;;  %v6394_v34 = vld [vmem:[#allocation2 + $0x310] sm:$0xf]  ;;  %v6683_v44 = vor.u32 %v7528_v53, %v6682_v26 }
0x25f9   : > { %v7456_v38 = vld [vmem:[#allocation2 + $0x32c] sm:$0xf0]  ;;  %v6807_v23 = vor.u32 %v7555_v17, %v6804_v19  ;;  %v7547_v30 = vld [vmem:[#allocation2 + $0x60c] sm:$0xf]  ;;  %v7412_v17 = vld [vmem:[#allocation2 + $0x1d4] sm:$0xf] }
0x25fa   : > { %v6266_v37 = vld [vmem:[#allocation2 + $0x210] sm:$0xf]  ;;  %v6236_v19 = vld [vmem:[#allocation2 + $0x1f0] sm:$0xf0] }
0x25fb   : > { %4335 = vmatpush.bf16.msra.mxu1 %v6039_v35  ;;  %4348 = vmatpush.bf16.msrb.mxu2 %v6295_v54  ;;  %v6395_v35 = vor.u32 %v7456_v38, %v6394_v34  ;;  %v6772_v54 = vld [vmem:[#allocation2 + $0x628] sm:$0xf0]  ;;  %v6650_v16 = vld [vmem:[#allocation2 + $0x510] sm:$0xf]  ;;  %v6011_v34 = vor.u32 %v7360_v36, %v6010_v33  ;;  %v7380_v33 = vld [vmem:[#allocation2 + $0xd4] sm:$0xf] }
0x25fc   : > { %4357 = vmatpush.bf16.msra.mxu0 %v6679_v47  ;;  %4370 = vmatpush.bf16.msra.mxu3 %v6935_v25  ;;  %v7448_v47 = vld [vmem:[#allocation2 + $0x2ec] sm:$0xf0]  ;;  %v6775_v46 = vor.u32 %v7547_v30, %v6772_v54  ;;  %v6239_v30 = vor.u32 %v7412_v17, %v6236_v19  ;;  %v6108_v36 = vld [vmem:[#allocation2 + $0xf0] sm:$0xf0] }
0x25fd   : > { %v6746_v25 = vld [vmem:[#allocation2 + $0x5d0] sm:$0xf]  ;;  %v6363_v5 = vor.u32 %v7448_v47, %v6362_v58  ;;  %v7468_v58 = vld [vmem:[#allocation2 + $0x394] sm:$0xf]  ;;  %v6111_v17 = vor.u32 %v7380_v33, %v6108_v36  ;;  %v6210_v33 = vld [vmem:[#allocation2 + $0x198] sm:$0xf] }
0x25fe   : > { %v7520_v22 = vld [vmem:[#allocation2 + $0x52c] sm:$0xf0]  ;;  %v6460_v47 = vld [vmem:[#allocation2 + $0x3b0] sm:$0xf0]  ;;  %v7409_v36 = vld [vmem:[#allocation2 + $0x1b4] sm:$0xf0] }
0x25ff   : > { %4336 = vmatpush.bf16.msra.mxu1 %v6007_v7  ;;  %4349 = vmatpush.bf16.msrb.mxu2 %v6263_v50  ;;  %v6747_v7 = vor.u32 %v7544_v59, %v6746_v25  ;;  %v7003_v50 = vor.u32 %v7608_v49, %v7002_v3  ;;  %v6618_v28 = vld [vmem:[#allocation2 + $0x4d0] sm:$0xf] }
0x2600   : > { %4358 = vmatpush.bf16.msra.mxu0 %v6647_v8  ;;  %4371 = vmatpush.bf16.msra.mxu3 %v6903_v61  ;;  %v6330_v8 = vld [vmem:[#allocation2 + $0x290] sm:$0xf] }
0x2601   : > { %v7440_v61 = vld [vmem:[#allocation2 + $0x2ac] sm:$0xf0] }
0x2602   : > { %4337 = vmatmul.bf16.vlgmr.msra.gmra.mxu1 %v9688_v15  ;;  %4350 = vmatmul.bf16.vlgmr.msrb.gmra.mxu2 %v9690_v42  ;;  %v6331_v10 = vor.u32 %v7440_v61, %v6330_v8  ;;  %v7512_v18 = vld [vmem:[#allocation2 + $0x4ec] sm:$0xf0] }
0x2603   : > { %4381 = vmatpush.bf16.msrb.mxu1 %v6235_v0  ;;  %4394 = vmatpush.bf16.msra.mxu2 %v6491_v57  ;;  %v6970_v0 = vld [vmem:[#allocation2 + $0x790] sm:$0xf]  ;;  %v6619_v25 = vor.u32 %v7512_v18, %v6618_v28  ;;  %v7532_v28 = vld [vmem:[#allocation2 + $0x594] sm:$0xf] }
0x2604   : > { %4359 = vmatpush.bf16.msra.mxu0 %v6615_v21  ;;  %4372 = vmatpush.bf16.msra.mxu3 %v6871_v60  ;;  %v7600_v57 = vld [vmem:[#allocation2 + $0x7ac] sm:$0xf0]  ;;  %v6716_v18 = vld [vmem:[#allocation2 + $0x5b0] sm:$0xf0] }
0x2605   : > { %v6971_v20 = vor.u32 %v7600_v57, %v6970_v0  ;;  %v6298_v21 = vld [vmem:[#allocation2 + $0x250] sm:$0xf]  ;;  %v6175_v0 = vor.u32 %v7396_v27, %v6172_v6  ;;  %v7356_v27 = vld [vmem:[#allocation2 + $0x14] sm:$0xf] }
0x2606   : > { %v7432_v60 = vld [vmem:[#allocation2 + $0x26c] sm:$0xf0]  ;;  %v6012_v6 = vld [vmem:[#allocation2 + $0x30] sm:$0xf0] }
0x2607   : > { %4382 = vmatpush.bf16.msrb.mxu1 %v6203_v40  ;;  %4395 = vmatpush.bf16.msra.mxu2 %v6459_v51  ;;  %v6938_v40 = vld [vmem:[#allocation2 + $0x750] sm:$0xf]  ;;  %v6299_v2 = vor.u32 %v7432_v60, %v6298_v21 }
0x2608   : > { %4360 = vmatpush.bf16.msra.mxu0 %v6583_v48  ;;  %4373 = vmatpush.bf16.msra.mxu3 %v6839_v56  ;;  %v7592_v51 = vld [vmem:[#allocation2 + $0x76c] sm:$0xf0] }
0x2609   : > { %v6939_v48 = vor.u32 %v7592_v51, %v6938_v40  ;;  %v7424_v56 = vld [vmem:[#allocation2 + $0x22c] sm:$0xf0]  ;;  %v6143_v51 = vor.u32 %v7388_v12, %v6140_v11  ;;  %v6498_v12 = vld [vmem:[#allocation2 + $0x3d8] sm:$0xf] }
0x260a   : > { %v6267_v38 = vor.u32 %v7424_v56, %v6266_v37  ;;  %v7576_v54 = vld [vmem:[#allocation2 + $0x6ec] sm:$0xf0]  ;;  %v7444_v37 = vld [vmem:[#allocation2 + $0x2d4] sm:$0xf]  ;;  %v7481_v11 = vld [vmem:[#allocation2 + $0x3f4] sm:$0xf0] }
0x260b   : > { %4383 = vmatpush.bf16.msrb.mxu1 %v6171_v1  ;;  %4396 = vmatpush.bf16.msra.mxu2 %v6427_v45  ;;  %v6906_v1 = vld [vmem:[#allocation2 + $0x710] sm:$0xf]  ;;  %v6748_v56 = vld [vmem:[#allocation2 + $0x5f0] sm:$0xf0] }
0x260c   : > { %4361 = vmatpush.bf16.msra.mxu0 %v6551_v41  ;;  %4374 = vmatpush.bf16.msra.mxu3 %v6807_v23  ;;  %v7584_v45 = vld [vmem:[#allocation2 + $0x72c] sm:$0xf0]  ;;  %v6651_v41 = vor.u32 %v7520_v22, %v6650_v16  ;;  %v7604_v16 = vld [vmem:[#allocation2 + $0x7d4] sm:$0xf] }
0x260d   : > { %v6907_v23 = vor.u32 %v7584_v45, %v6906_v1  ;;  %v6586_v3 = vld [vmem:[#allocation2 + $0x490] sm:$0xf]  ;;  %v7004_v22 = vld [vmem:[#allocation2 + $0x7f0] sm:$0xf0] }
0x260e   : > { %v7504_v49 = vld [vmem:[#allocation2 + $0x4ac] sm:$0xf0] }
0x260f   : > { %4384 = vmatpush.bf16.msrb.mxu1 %v6139_v31  ;;  %4397 = vmatpush.bf16.msra.mxu2 %v6395_v35  ;;  %v6495_v31 = vor.u32 %v7476_v24, %v6492_v29  ;;  %v6874_v35 = vld [vmem:[#allocation2 + $0x6d0] sm:$0xf]  ;;  %v6587_v8 = vor.u32 %v7504_v49, %v6586_v3  ;;  %v7372_v24 = vld [vmem:[#allocation2 + $0x94] sm:$0xf] }
0x2610   : > { %4362 = vmatpush.bf16.msra.mxu0 %v6519_v4  ;;  %4375 = vmatpush.bf16.msra.mxu3 %v6775_v46  ;;  %v6875_v59 = vor.u32 %v7576_v54, %v6874_v35  ;;  %v6207_v4 = vor.u32 %v7404_v55, %v6204_v14  ;;  %v6463_v46 = vor.u32 %v7468_v58, %v6460_v47  ;;  %v6554_v62 = vld [vmem:[#allocation2 + $0x450] sm:$0xf]  ;;  %v6076_v29 = vld [vmem:[#allocation2 + $0xb0] sm:$0xf0] }
0x2611   : > { %v7496_v63 = vld [vmem:[#allocation2 + $0x46c] sm:$0xf0]  ;;  %v6079_v35 = vor.u32 %v7372_v24, %v6076_v29  ;;  %v7364_v55 = vld [vmem:[#allocation2 + $0x54] sm:$0xf]  ;;  %v6719_v58 = vor.u32 %v7532_v28, %v6716_v18  ;;  %v6178_v24 = vld [vmem:[#allocation2 + $0x158] sm:$0xf] }
0x2612   : > { %v6555_v21 = vor.u32 %v7496_v63, %v6554_v62  ;;  %v6522_v26 = vld [vmem:[#allocation2 + $0x410] sm:$0xf]  ;;  %v6044_v14 = vld [vmem:[#allocation2 + $0x70] sm:$0xf0]  ;;  %v9716_v29 = vld [vmem:[#allocation5 + $0x6] sm:$0xff] }
0x2613   : > { %4385 = vmatpush.bf16.msrb.mxu1 %v6107_v52  ;;  %4398 = vmatpush.bf16.msra.mxu2 %v6363_v5  ;;  %v6842_v52 = vld [vmem:[#allocation2 + $0x690] sm:$0xf]  ;;  %v7524_v3 = vld [vmem:[#allocation2 + $0x554] sm:$0xf]  ;;  %v4157_v18 = vperm.slane %v9716_v29, 0 }
0x2614   : > { %4407 = vmatpush.bf16.msrb.mxu0 %v6747_v7  ;;  %4420 = vmatpush.bf16.msrb.mxu3 %v7003_v50  ;;  %v7568_v5 = vld [vmem:[#allocation2 + $0x6ac] sm:$0xf0]  ;;  %v7460_v7 = vld [vmem:[#allocation2 + $0x354] sm:$0xf] }
0x2615   : > { %4363 = vmatmul.bf16.vlgmr.msra.gmra.mxu0 %v9694_v43  ;;  %4376 = vmatmul.bf16.vlgmr.msra.gmra.mxu3 %v9696_v39  ;;  %v6428_v50 = vld [vmem:[#allocation2 + $0x370] sm:$0xf0]  ;;  %v6843_v61 = vor.u32 %v7568_v5, %v6842_v52  ;;  %v7488_v53 = vld [vmem:[#allocation2 + $0x42c] sm:$0xf0]  ;;  %v6047_v52 = vor.u32 %v7364_v55, %v6044_v14 }
0x2616   : > { %v6431_v57 = vor.u32 %v7460_v7, %v6428_v50  ;;  %v6778_v40 = vld [vmem:[#allocation2 + $0x610] sm:$0xf]  ;;  %v6523_v1 = vor.u32 %v7488_v53, %v6522_v26  ;;  %v6684_v49 = vld [vmem:[#allocation2 + $0x570] sm:$0xf0] }
0x2617   : > { %4386 = vmatpush.bf16.msrb.mxu1 %v6075_v9  ;;  %4399 = vmatpush.bf16.msra.mxu2 %v6331_v10  ;;  %v6810_v9 = vld [vmem:[#allocation2 + $0x650] sm:$0xf]  ;;  %v7420_v7 = vld [vmem:[#allocation2 + $0x214] sm:$0xf]  ;;  %v6687_v50 = vor.u32 %v7524_v3, %v6684_v49  ;;  %v7457_v3 = vld [vmem:[#allocation2 + $0x334] sm:$0xf0] }
0x2618   : > { %4408 = vmatpush.bf16.msrb.mxu0 %v6715_v13  ;;  %4421 = vmatpush.bf16.msrb.mxu3 %v6971_v20  ;;  %v7560_v10 = vld [vmem:[#allocation2 + $0x66c] sm:$0xf0]  ;;  %v7452_v13 = vld [vmem:[#allocation2 + $0x314] sm:$0xf] }
0x2619   : > { %v6396_v20 = vld [vmem:[#allocation2 + $0x330] sm:$0xf0]  ;;  %v6811_v60 = vor.u32 %v7560_v10, %v6810_v9  ;;  %v6242_v9 = vld [vmem:[#allocation2 + $0x1d8] sm:$0xf] }
0x261a   : > { %v7516_v62 = vld [vmem:[#allocation2 + $0x514] sm:$0xf]  ;;  %v7417_v10 = vld [vmem:[#allocation2 + $0x1f4] sm:$0xf0] }
0x261b   : > { %4387 = vmatpush.bf16.msrb.mxu1 %v6043_v32  ;;  %4400 = vmatpush.bf16.msra.mxu2 %v6299_v2  ;;  %v6399_v32 = vor.u32 %v7452_v13, %v6396_v20  ;;  %v7552_v2 = vld [vmem:[#allocation2 + $0x62c] sm:$0xf0]  ;;  %v6652_v63 = vld [vmem:[#allocation2 + $0x530] sm:$0xf0]  ;;  %v6015_v13 = vor.u32 %v7356_v27, %v6012_v6 }
0x261c   : > { %4409 = vmatpush.bf16.msrb.mxu0 %v6683_v44  ;;  %4422 = vmatpush.bf16.msrb.mxu3 %v6939_v48  ;;  %v6364_v44 = vld [vmem:[#allocation2 + $0x2f0] sm:$0xf0]  ;;  %v6779_v45 = vor.u32 %v7552_v2, %v6778_v40  ;;  %v6243_v40 = vor.u32 %v7417_v10, %v6242_v9  ;;  %v7545_v10 = vld [vmem:[#allocation2 + $0x5f4] sm:$0xf0] }
0x261d   : > { %v7540_v48 = vld [vmem:[#allocation2 + $0x5d4] sm:$0xf]  ;;  %v6367_v19 = vor.u32 %v7444_v37, %v6364_v44  ;;  %v6466_v37 = vld [vmem:[#allocation2 + $0x398] sm:$0xf] }
0x261e   : > { %v7508_v26 = vld [vmem:[#allocation2 + $0x4d4] sm:$0xf]  ;;  %v7473_v44 = vld [vmem:[#allocation2 + $0x3b4] sm:$0xf0] }
0x261f   : > { %4388 = vmatpush.bf16.msrb.mxu1 %v6011_v34  ;;  %4401 = vmatpush.bf16.msra.mxu2 %v6267_v38  ;;  %v6751_v34 = vor.u32 %v7540_v48, %v6748_v56  ;;  %v7007_v38 = vor.u32 %v7604_v16, %v7004_v22  ;;  %v6620_v53 = vld [vmem:[#allocation2 + $0x4f0] sm:$0xf0] }
0x2620   : > { %4410 = vmatpush.bf16.msrb.mxu0 %v6651_v41  ;;  %4423 = vmatpush.bf16.msrb.mxu3 %v6907_v23  ;;  %v7436_v41 = vld [vmem:[#allocation2 + $0x294] sm:$0xf]  ;;  %v6623_v48 = vor.u32 %v7508_v26, %v6620_v53  ;;  %v6082_v53 = vld [vmem:[#allocation2 + $0x98] sm:$0xf] }
0x2621   : > { %v6332_v23 = vld [vmem:[#allocation2 + $0x2b0] sm:$0xf0] }
0x2622   : > { %4389 = vmatmul.bf16.vlgmr.msrb.gmra.mxu1 %v9688_v15  ;;  %4402 = vmatmul.bf16.vlgmr.msra.gmra.mxu2 %v9690_v42  ;;  %v6335_v54 = vor.u32 %v7436_v41, %v6332_v23  ;;  %v6876_v2 = vld [vmem:[#allocation2 + $0x6f0] sm:$0xf0]  ;;  %v7465_v41 = vld [vmem:[#allocation2 + $0x374] sm:$0xf0] }
0x2623   : > { %4433 = vmatpush.bf16.msra.mxu1 %v6239_v30  ;;  %4446 = vmatpush.bf16.msrb.mxu2 %v6495_v31  ;;  %v7596_v30 = vld [vmem:[#allocation2 + $0x794] sm:$0xf] }
0x2624   : > { %4411 = vmatpush.bf16.msrb.mxu0 %v6619_v25  ;;  %4424 = vmatpush.bf16.msrb.mxu3 %v6875_v59  ;;  %v6972_v31 = vld [vmem:[#allocation2 + $0x7b0] sm:$0xf0] }
0x2625   : > { %v6975_v47 = vor.u32 %v7596_v30, %v6972_v31  ;;  %v7428_v25 = vld [vmem:[#allocation2 + $0x254] sm:$0xf] }
0x2626   : > { %v6300_v59 = vld [vmem:[#allocation2 + $0x270] sm:$0xf0] }
0x2627   : > { %4434 = vmatpush.bf16.msra.mxu1 %v6207_v4  ;;  %4447 = vmatpush.bf16.msrb.mxu2 %v6463_v46  ;;  %v7588_v4 = vld [vmem:[#allocation2 + $0x754] sm:$0xf]  ;;  %v6303_v5 = vor.u32 %v7428_v25, %v6300_v59  ;;  %v7393_v25 = vld [vmem:[#allocation2 + $0x134] sm:$0xf0] }
0x2628   : > { %4412 = vmatpush.bf16.msrb.mxu0 %v6587_v8  ;;  %4425 = vmatpush.bf16.msrb.mxu3 %v6843_v61  ;;  %v6940_v46 = vld [vmem:[#allocation2 + $0x770] sm:$0xf0]  ;;  %v6402_v59 = vld [vmem:[#allocation2 + $0x318] sm:$0xf] }
0x2629   : > { %v6943_v8 = vor.u32 %v7588_v4, %v6940_v46  ;;  %v6268_v61 = vld [vmem:[#allocation2 + $0x230] sm:$0xf0] }
0x262a   : > { %v6271_v20 = vor.u32 %v7420_v7, %v6268_v61  ;;  %v7500_v16 = vld [vmem:[#allocation2 + $0x494] sm:$0xf]  ;;  %v6403_v7 = vor.u32 %v7457_v3, %v6402_v59  ;;  %v7385_v61 = vld [vmem:[#allocation2 + $0xf4] sm:$0xf0] }
0x262b   : > { %4435 = vmatpush.bf16.msra.mxu1 %v6175_v0  ;;  %4448 = vmatpush.bf16.msrb.mxu2 %v6431_v57  ;;  %v7580_v0 = vld [vmem:[#allocation2 + $0x714] sm:$0xf]  ;;  %v7425_v59 = vld [vmem:[#allocation2 + $0x234] sm:$0xf0] }
0x262c   : > { %4413 = vmatpush.bf16.msrb.mxu0 %v6555_v21  ;;  %4426 = vmatpush.bf16.msrb.mxu3 %v6811_v60  ;;  %v6908_v57 = vld [vmem:[#allocation2 + $0x730] sm:$0xf0]  ;;  %v6655_v21 = vor.u32 %v7516_v62, %v6652_v63  ;;  %v6370_v63 = vld [vmem:[#allocation2 + $0x2d8] sm:$0xf] }
0x262d   : > { %v6911_v60 = vor.u32 %v7580_v0, %v6908_v57  ;;  %v6588_v22 = vld [vmem:[#allocation2 + $0x4b0] sm:$0xf0]  ;;  %v7449_v0 = vld [vmem:[#allocation2 + $0x2f4] sm:$0xf0] }
0x262e   : > { %v6591_v23 = vor.u32 %v7500_v16, %v6588_v22  ;;  %v7492_v31 = vld [vmem:[#allocation2 + $0x454] sm:$0xf]  ;;  %v6754_v57 = vld [vmem:[#allocation2 + $0x5d8] sm:$0xf]  ;;  %v6371_v26 = vor.u32 %v7449_v0, %v6370_v63 }
0x262f   : > { %4436 = vmatpush.bf16.msra.mxu1 %v6143_v51  ;;  %4449 = vmatpush.bf16.msrb.mxu2 %v6399_v32  ;;  %v6499_v51 = vor.u32 %v7481_v11, %v6498_v12  ;;  %v7572_v32 = vld [vmem:[#allocation2 + $0x6d4] sm:$0xf]  ;;  %v7010_v12 = vld [vmem:[#allocation2 + $0x7d8] sm:$0xf] }
0x2630   : > { %4414 = vmatpush.bf16.msrb.mxu0 %v6523_v1  ;;  %4427 = vmatpush.bf16.msrb.mxu3 %v6779_v45  ;;  %v6879_v56 = vor.u32 %v7572_v32, %v6876_v2  ;;  %v7564_v1 = vld [vmem:[#allocation2 + $0x694] sm:$0xf]  ;;  %v6211_v45 = vor.u32 %v7409_v36, %v6210_v33  ;;  %v7609_v11 = vld [vmem:[#allocation2 + $0x7f4] sm:$0xf0] }
0x2631   : > { %v7556_v14 = vld [vmem:[#allocation2 + $0x654] sm:$0xf]  ;;  %v7011_v32 = vor.u32 %v7609_v11, %v7010_v12  ;;  %v6338_v2 = vld [vmem:[#allocation2 + $0x298] sm:$0xf] }
0x2632   : > { %v7484_v46 = vld [vmem:[#allocation2 + $0x414] sm:$0xf]  ;;  %v7441_v33 = vld [vmem:[#allocation2 + $0x2b4] sm:$0xf0] }
0x2633   : > { %4437 = vmatpush.bf16.msra.mxu1 %v6111_v17  ;;  %4450 = vmatpush.bf16.msrb.mxu2 %v6367_v19  ;;  %v6467_v17 = vor.u32 %v7473_v44, %v6466_v37  ;;  %v6844_v19 = vld [vmem:[#allocation2 + $0x6b0] sm:$0xf0]  ;;  %v6722_v36 = vld [vmem:[#allocation2 + $0x598] sm:$0xf]  ;;  %v6339_v16 = vor.u32 %v7441_v33, %v6338_v2 }
0x2634   : > { %4459 = vmatpush.bf16.msra.mxu0 %v6751_v34  ;;  %4472 = vmatpush.bf16.msra.mxu3 %v7007_v38  ;;  %v7401_v34 = vld [vmem:[#allocation2 + $0x174] sm:$0xf0]  ;;  %v6847_v28 = vor.u32 %v7564_v1, %v6844_v19 }
0x2635   : > { %4415 = vmatmul.bf16.vlgmr.msrb.gmra.mxu0 %v9694_v43  ;;  %4428 = vmatmul.bf16.vlgmr.msrb.gmra.mxu3 %v9696_v39  ;;  %v6434_v38 = vld [vmem:[#allocation2 + $0x358] sm:$0xf] }
0x2636   : > { %v6435_v55 = vor.u32 %v7465_v41, %v6434_v38  ;;  %v7537_v37 = vld [vmem:[#allocation2 + $0x5b4] sm:$0xf0] }
0x2637   : > { %4438 = vmatpush.bf16.msra.mxu1 %v6079_v35  ;;  %4451 = vmatpush.bf16.msrb.mxu2 %v6335_v54  ;;  %v6556_v35 = vld [vmem:[#allocation2 + $0x470] sm:$0xf0]  ;;  %v6179_v54 = vor.u32 %v7401_v34, %v6178_v24  ;;  %v6978_v44 = vld [vmem:[#allocation2 + $0x798] sm:$0xf] }
0x2638   : > { %4460 = vmatpush.bf16.msra.mxu0 %v6719_v58  ;;  %4473 = vmatpush.bf16.msra.mxu3 %v6975_v47  ;;  %v6812_v58 = vld [vmem:[#allocation2 + $0x670] sm:$0xf0]  ;;  %v6146_v47 = vld [vmem:[#allocation2 + $0x118] sm:$0xf]  ;;  %v6559_v49 = vor.u32 %v7492_v31, %v6556_v35 }
0x2639   : > { %v6815_v4 = vor.u32 %v7556_v14, %v6812_v58  ;;  %v6147_v6 = vor.u32 %v7393_v25, %v6146_v47  ;;  %v6050_v22 = vld [vmem:[#allocation2 + $0x58] sm:$0xf] }
0x263a   : > { %v7369_v1 = vld [vmem:[#allocation2 + $0x74] sm:$0xf0] }
0x263b   : > { %4439 = vmatpush.bf16.msra.mxu1 %v6047_v52  ;;  %4452 = vmatpush.bf16.msrb.mxu2 %v6303_v5  ;;  %v6524_v52 = vld [vmem:[#allocation2 + $0x430] sm:$0xf0]  ;;  %v6306_v24 = vld [vmem:[#allocation2 + $0x258] sm:$0xf] }
0x263c   : > { %4461 = vmatpush.bf16.msra.mxu0 %v6687_v50  ;;  %4474 = vmatpush.bf16.msra.mxu3 %v6943_v8  ;;  %v7548_v5 = vld [vmem:[#allocation2 + $0x614] sm:$0xf]  ;;  %v6114_v8 = vld [vmem:[#allocation2 + $0xd8] sm:$0xf] }
0x263d   : > { %v6780_v50 = vld [vmem:[#allocation2 + $0x630] sm:$0xf0]  ;;  %v7433_v34 = vld [vmem:[#allocation2 + $0x274] sm:$0xf0] }
0x263e   : > { %v4182_v30 = vpop.f32.mrf.mxu1  ;;  %v6690_v38 = vld [vmem:[#allocation2 + $0x558] sm:$0xf]  ;;  %v6307_v31 = vor.u32 %v7433_v34, %v6306_v24 }
0x263f   : > { %4440 = vmatpush.bf16.msra.mxu1 %v6015_v13  ;;  %4453 = vmatpush.bf16.msrb.mxu2 %v6271_v20  ;;  %v4183_v27 = vadd.f32 %v4182_v30, %v4157_v18  ;;  %v6527_v13 = vor.u32 %v7484_v46, %v6524_v52  ;;  %v6783_v20 = vor.u32 %v7548_v5, %v6780_v50  ;;  %v7529_v41 = vld [vmem:[#allocation2 + $0x574] sm:$0xf0]  ;;  %v7413_v52 = vld [vmem:[#allocation2 + $0x1dc] sm:$0xf] }
0x2640   : > { %4462 = vmatpush.bf16.msra.mxu0 %v6655_v21  ;;  %4475 = vmatpush.bf16.msra.mxu3 %v6911_v60  ;;  %v6115_v60 = vor.u32 %v7385_v61, %v6114_v8  ;;  %v6051_v30 = vor.u32 %v7369_v1, %v6050_v22  ;;  %v7361_v14 = vld [vmem:[#allocation2 + $0x34] sm:$0xf0]  ;;  %v6691_v47 = vor.u32 %v7529_v41, %v6690_v38  ;;  %v6244_v5 = vld [vmem:[#allocation2 + $0x1f8] sm:$0xf0] }
0x2641   : > { %v6274_v58 = vld [vmem:[#allocation2 + $0x218] sm:$0xf]  ;;  %v6436_v22 = vld [vmem:[#allocation2 + $0x378] sm:$0xf0] }
0x2642   : > { %4441 = vmatmul.bf16.vlgmr.msra.gmra.mxu1 %v9688_v15  ;;  %4454 = vmatmul.bf16.vlgmr.msrb.gmra.mxu2 %v9690_v42  ;;  %v6658_v3 = vld [vmem:[#allocation2 + $0x518] sm:$0xf]  ;;  %v6275_v50 = vor.u32 %v7425_v59, %v6274_v58 }
0x2643   : > { %4485 = vmatpush.bf16.msrb.mxu1 %v6243_v40  ;;  %4498 = vmatpush.bf16.msra.mxu2 %v6499_v51  ;;  %v7377_v40 = vld [vmem:[#allocation2 + $0xb4] sm:$0xf0]  ;;  %v6755_v51 = vor.u32 %v7545_v10, %v6754_v57  ;;  %v6247_v57 = vor.u32 %v7413_v52, %v6244_v5  ;;  %v7381_v5 = vld [vmem:[#allocation2 + $0xdc] sm:$0xf] }
0x2644   : > { %4463 = vmatpush.bf16.msra.mxu0 %v6623_v48  ;;  %4476 = vmatpush.bf16.msra.mxu3 %v6879_v56  ;;  %v4195_v62 = vpop.f32.mrf.mxu2  ;;  %v7601_v48 = vld [vmem:[#allocation2 + $0x7b4] sm:$0xf0]  ;;  %v6083_v56 = vor.u32 %v7377_v40, %v6082_v53 }
0x2645   : > { %v4196_v9 = vadd.f32 %v4195_v62, %v4183_v27  ;;  %v7585_v46 = vld [vmem:[#allocation2 + $0x734] sm:$0xf0]  ;;  %v7477_v27 = vld [vmem:[#allocation2 + $0x3dc] sm:$0xf] }
0x2646   : > { %v4184_v21 = vpop.f32.mrf.mxu1  ;;  %v6626_v63 = vld [vmem:[#allocation2 + $0x4d8] sm:$0xf] }
0x2647   : > { %4486 = vmatpush.bf16.msrb.mxu1 %v6211_v45  ;;  %4499 = vmatpush.bf16.msra.mxu2 %v6467_v17  ;;  %v6723_v45 = vor.u32 %v7537_v37, %v6722_v36  ;;  %v6979_v17 = vor.u32 %v7601_v48, %v6978_v44  ;;  %v7513_v0 = vld [vmem:[#allocation2 + $0x4f4] sm:$0xf0]  ;;  %v6212_v21 = vld [vmem:[#allocation2 + $0x1b8] sm:$0xf0] }
0x2648   : > { %4464 = vmatpush.bf16.msra.mxu0 %v6591_v23  ;;  %4477 = vmatpush.bf16.msra.mxu3 %v6847_v28  ;;  %v6946_v23 = vld [vmem:[#allocation2 + $0x758] sm:$0xf]  ;;  %v6627_v40 = vor.u32 %v7513_v0, %v6626_v63  ;;  %v7397_v48 = vld [vmem:[#allocation2 + $0x15c] sm:$0xf] }
0x2649   : > { %v7593_v28 = vld [vmem:[#allocation2 + $0x774] sm:$0xf0]  ;;  %v7012_v63 = vld [vmem:[#allocation2 + $0x7f8] sm:$0xf0] }
0x264a   : > { %v6947_v25 = vor.u32 %v7593_v28, %v6946_v23  ;;  %v6882_v12 = vld [vmem:[#allocation2 + $0x6d8] sm:$0xf] }
0x264b   : > { %4487 = vmatpush.bf16.msrb.mxu1 %v6179_v54  ;;  %4500 = vmatpush.bf16.msra.mxu2 %v6435_v55  ;;  %v6018_v55 = vld [vmem:[#allocation2 + $0x18] sm:$0xf] }
0x264c   : > { %4465 = vmatpush.bf16.msra.mxu0 %v6559_v49  ;;  %4478 = vmatpush.bf16.msra.mxu3 %v6815_v4  ;;  %v4197_v19 = vpop.f32.mrf.mxu2  ;;  %v7521_v49 = vld [vmem:[#allocation2 + $0x534] sm:$0xf0] }
0x264d   : > { %v6914_v4 = vld [vmem:[#allocation2 + $0x718] sm:$0xf]  ;;  %v6659_v8 = vor.u32 %v7521_v49, %v6658_v3 }
0x264e   : > { %v4208_v18 = vpop.f32.mrf.mxu0  ;;  %v6915_v61 = vor.u32 %v7585_v46, %v6914_v4  ;;  %v7577_v11 = vld [vmem:[#allocation2 + $0x6f4] sm:$0xf0] }
0x264f   : > { %4488 = vmatpush.bf16.msrb.mxu1 %v6147_v6  ;;  %4501 = vmatpush.bf16.msra.mxu2 %v6403_v7  ;;  %v9723_v35 = vadd.f32 %v4208_v18, %v4196_v9  ;;  %v9725_v54 = vpop.f32.mrf.mxu1  ;;  %v6500_v6 = vld [vmem:[#allocation2 + $0x3f8] sm:$0xf0]  ;;  %v6019_v7 = vor.u32 %v7361_v14, %v6018_v55  ;;  %v7505_v2 = vld [vmem:[#allocation2 + $0x4b4] sm:$0xf0] }
0x2650   : > { %4466 = vmatpush.bf16.msra.mxu0 %v6527_v13  ;;  %4479 = vmatpush.bf16.msra.mxu3 %v6783_v20  ;;  %v6503_v9 = vor.u32 %v7477_v27, %v6500_v6  ;;  %v7405_v13 = vld [vmem:[#allocation2 + $0x19c] sm:$0xf]  ;;  %v6850_v37 = vld [vmem:[#allocation2 + $0x698] sm:$0xf] }
0x2651   : > { %v6215_v33 = vor.u32 %v7405_v13, %v6212_v21  ;;  %v7569_v44 = vld [vmem:[#allocation2 + $0x6b4] sm:$0xf0]  ;;  %v7389_v18 = vld [vmem:[#allocation2 + $0x11c] sm:$0xf] }
0x2652   : > { %v6562_v19 = vld [vmem:[#allocation2 + $0x458] sm:$0xf]  ;;  %v6404_v55 = vld [vmem:[#allocation2 + $0x338] sm:$0xf0] }
0x2653   : > { %4489 = vmatpush.bf16.msrb.mxu1 %v6115_v60  ;;  %4502 = vmatpush.bf16.msra.mxu2 %v6371_v26  ;;  %v7469_v60 = vld [vmem:[#allocation2 + $0x39c] sm:$0xf]  ;;  %v7497_v24 = vld [vmem:[#allocation2 + $0x474] sm:$0xf0] }
0x2654   : > { %4511 = vmatpush.bf16.msrb.mxu0 %v6755_v51  ;;  %4524 = vmatpush.bf16.msrb.mxu3 %v7011_v32  ;;  %v9727_v62 = vpop.f32.mrf.mxu3  ;;  %v6468_v26 = vld [vmem:[#allocation2 + $0x3b8] sm:$0xf0]  ;;  %v6883_v51 = vor.u32 %v7577_v11, %v6882_v12  ;;  %v6594_v32 = vld [vmem:[#allocation2 + $0x498] sm:$0xf]  ;;  %v6563_v58 = vor.u32 %v7497_v24, %v6562_v19 }
0x2655   : > { %4467 = vmatmul.bf16.vlgmr.msra.gmra.mxu0 %v9694_v43  ;;  %4480 = vmatmul.bf16.vlgmr.msra.gmra.mxu3 %v9696_v39  ;;  %v9729_v10 = vpop.f32.mrf.mxu2  ;;  %v6471_v36 = vor.u32 %v7469_v60, %v6468_v26  ;;  %v6595_v1 = vor.u32 %v7505_v2, %v6594_v32  ;;  %v6818_v23 = vld [vmem:[#allocation2 + $0x658] sm:$0xf]  ;;  %v6116_v27 = vld [vmem:[#allocation2 + $0xf8] sm:$0xf0] }
0x2656   : > { %v4210_v20 = vpop.f32.mrf.mxu0  ;;  %v7561_v28 = vld [vmem:[#allocation2 + $0x674] sm:$0xf0]  ;;  %v7445_v6 = vld [vmem:[#allocation2 + $0x2dc] sm:$0xf] }
0x2657   : > { %4490 = vmatpush.bf16.msrb.mxu1 %v6083_v56  ;;  %4503 = vmatpush.bf16.msra.mxu2 %v6339_v16  ;;  %v4236_v53 = vpop.f32.mrf.mxu1  ;;  %v6180_v56 = vld [vmem:[#allocation2 + $0x178] sm:$0xf0]  ;;  %v6530_v59 = vld [vmem:[#allocation2 + $0x418] sm:$0xf] }
0x2658   : > { %4512 = vmatpush.bf16.msrb.mxu0 %v6723_v45  ;;  %4525 = vmatpush.bf16.msrb.mxu3 %v6979_v17  ;;  %v7461_v16 = vld [vmem:[#allocation2 + $0x35c] sm:$0xf]  ;;  %v6851_v45 = vor.u32 %v7569_v44, %v6850_v37  ;;  %v6183_v34 = vor.u32 %v7397_v48, %v6180_v56  ;;  %v7489_v3 = vld [vmem:[#allocation2 + $0x434] sm:$0xf0] }
0x2659   : > { %v6439_v38 = vor.u32 %v7461_v16, %v6436_v22  ;;  %v6786_v49 = vld [vmem:[#allocation2 + $0x618] sm:$0xf]  ;;  %v6531_v0 = vor.u32 %v7489_v3, %v6530_v59  ;;  %v7373_v13 = vld [vmem:[#allocation2 + $0x9c] sm:$0xf] }
0x265a   : > { %v7553_v52 = vld [vmem:[#allocation2 + $0x634] sm:$0xf0]  ;;  %v6084_v20 = vld [vmem:[#allocation2 + $0xb8] sm:$0xf0] }
0x265b   : > { %4491 = vmatpush.bf16.msrb.mxu1 %v6051_v30  ;;  %4504 = vmatpush.bf16.msra.mxu2 %v6307_v31  ;;  %v6148_v30 = vld [vmem:[#allocation2 + $0x138] sm:$0xf0]  ;;  %v6087_v44 = vor.u32 %v7373_v13, %v6084_v20  ;;  %v7616_v13 = vld [vmem:[%s10003_s6 + $0x30] sm:$0xff] }
0x265c   : > { %4513 = vmatpush.bf16.msrb.mxu0 %v6691_v47  ;;  %4526 = vmatpush.bf16.msrb.mxu3 %v6947_v25  ;;  %v4223_v17 = vpop.f32.mrf.mxu3  ;;  %v7453_v31 = vld [vmem:[#allocation2 + $0x31c] sm:$0xf]  ;;  %v6819_v47 = vor.u32 %v7561_v28, %v6818_v23  ;;  %v6151_v4 = vor.u32 %v7389_v18, %v6148_v30  ;;  %v7624_v20 = vld [vmem:[%s10003_s6 + $0x70] sm:$0xff] }
0x265d   : > { %v4249_v41 = vpop.f32.mrf.mxu2  ;;  %v6407_v46 = vor.u32 %v7453_v31, %v6404_v55  ;;  %v7437_v53 = vld [vmem:[#allocation2 + $0x29c] sm:$0xf] }
0x265e   : > { %v9733_v14 = vpop.f32.mrf.mxu0  ;;  %v6724_v2 = vld [vmem:[#allocation2 + $0x5b8] sm:$0xf0] }
0x265f   : > { %4492 = vmatpush.bf16.msrb.mxu1 %v6019_v7  ;;  %4505 = vmatpush.bf16.msra.mxu2 %v6275_v50  ;;  %v9735_v25 = vpop.f32.mrf.mxu1  ;;  %v6372_v7 = vld [vmem:[#allocation2 + $0x2f8] sm:$0xf0] }
0x2660   : > { %4514 = vmatpush.bf16.msrb.mxu0 %v6659_v8  ;;  %4527 = vmatpush.bf16.msrb.mxu3 %v6915_v61  ;;  %v7541_v50 = vld [vmem:[#allocation2 + $0x5dc] sm:$0xf]  ;;  %v6375_v12 = vor.u32 %v7445_v6, %v6372_v7 }
0x2661   : > { %v6756_v8 = vld [vmem:[#allocation2 + $0x5f8] sm:$0xf0] }
0x2662   : > { %4493 = vmatmul.bf16.vlgmr.msrb.gmra.mxu1 %v9688_v15  ;;  %4506 = vmatmul.bf16.vlgmr.msra.gmra.mxu2 %v9690_v42  ;;  %v7605_v61 = vld [vmem:[#allocation2 + $0x7dc] sm:$0xf]  ;;  %v6759_v21 = vor.u32 %v7541_v50, %v6756_v8 }
0x2663   : > { %4537 = vmatpush.bf16.msra.mxu1 %v6247_v57  ;;  %4550 = vmatpush.bf16.msrb.mxu2 %v6503_v9  ;;  %v6787_v57 = vor.u32 %v7553_v52, %v6786_v49  ;;  %v6119_v9 = vor.u32 %v7381_v5, %v6116_v27  ;;  %v7015_v60 = vor.u32 %v7605_v61, %v7012_v63  ;;  %v7365_v56 = vld [vmem:[#allocation2 + $0x5c] sm:$0xf] }
0x2664   : > { %4515 = vmatpush.bf16.msrb.mxu0 %v6627_v40  ;;  %4528 = vmatpush.bf16.msrb.mxu3 %v6883_v51  ;;  %v9737_v11 = vpop.f32.mrf.mxu3  ;;  %v6340_v40 = vld [vmem:[#allocation2 + $0x2b8] sm:$0xf0] }
0x2665   : > { %v9739_v26 = vpop.f32.mrf.mxu2  ;;  %v7533_v51 = vld [vmem:[#allocation2 + $0x59c] sm:$0xf]  ;;  %v6343_v48 = vor.u32 %v7437_v53, %v6340_v40 }
0x2666   : > { %v4262_v32 = vpop.f32.mrf.mxu0  ;;  %v6052_v16 = vld [vmem:[#allocation2 + $0x78] sm:$0xf0]  ;;  %v6727_v22 = vor.u32 %v7533_v51, %v6724_v2 }
0x2667   : > { %4538 = vmatpush.bf16.msra.mxu1 %v6215_v33  ;;  %4551 = vmatpush.bf16.msrb.mxu2 %v6471_v36  ;;  %v7597_v33 = vld [vmem:[#allocation2 + $0x79c] sm:$0xf]  ;;  %v4288_v37 = vpop.f32.mrf.mxu1  ;;  %v6055_v41 = vor.u32 %v7365_v56, %v6052_v16 }
0x2668   : > { %4516 = vmatpush.bf16.msrb.mxu0 %v6595_v1  ;;  %4529 = vmatpush.bf16.msrb.mxu3 %v6851_v45  ;;  %v6980_v36 = vld [vmem:[#allocation2 + $0x7b8] sm:$0xf0]  ;;  %v7623_v37 = vld [vmem:[%s10003_s6 + $0x68] sm:$0xff] }
0x2669   : > { %v6983_v1 = vor.u32 %v7597_v33, %v6980_v36  ;;  %v7429_v45 = vld [vmem:[#allocation2 + $0x25c] sm:$0xf]  ;;  %v7615_v36 = vld [vmem:[%s10003_s6 + $0x28] sm:$0xff] }
0x266a   : > { %v6308_v17 = vld [vmem:[#allocation2 + $0x278] sm:$0xf0] }
0x266b   : > { %4539 = vmatpush.bf16.msra.mxu1 %v6183_v34  ;;  %4552 = vmatpush.bf16.msrb.mxu2 %v6439_v38  ;;  %v7525_v19 = vld [vmem:[#allocation2 + $0x55c] sm:$0xf]  ;;  %v6311_v23 = vor.u32 %v7429_v45, %v6308_v17  ;;  %v7622_v45 = vld [vmem:[%s10003_s6 + $0x60] sm:$0xff] }
0x266c   : > { %4517 = vmatpush.bf16.msrb.mxu0 %v6563_v58  ;;  %4530 = vmatpush.bf16.msrb.mxu3 %v6819_v47  ;;  %v6692_v24 = vld [vmem:[#allocation2 + $0x578] sm:$0xf0]  ;;  %v4275_v28 = vpop.f32.mrf.mxu3 }
0x266d   : > { %v7589_v34 = vld [vmem:[#allocation2 + $0x75c] sm:$0xf]  ;;  %v6695_v31 = vor.u32 %v7525_v19, %v6692_v24  ;;  %v4301_v58 = vpop.f32.mrf.mxu2 }
0x266e   : > { %v6948_v38 = vld [vmem:[#allocation2 + $0x778] sm:$0xf0] }
0x266f   : > { %4540 = vmatpush.bf16.msra.mxu1 %v6151_v4  ;;  %4553 = vmatpush.bf16.msrb.mxu2 %v6407_v46  ;;  %v7357_v18 = vld [vmem:[#allocation2 + $0x1c] sm:$0xf]  ;;  %v6951_v55 = vor.u32 %v7589_v34, %v6948_v38 }
0x2670   : > { %4518 = vmatpush.bf16.msrb.mxu0 %v6531_v0  ;;  %4531 = vmatpush.bf16.msrb.mxu3 %v6787_v57  ;;  %v6020_v30 = vld [vmem:[#allocation2 + $0x38] sm:$0xf0] }
0x2671   : > { %v7421_v47 = vld [vmem:[#allocation2 + $0x21c] sm:$0xf]  ;;  %v6023_v5 = vor.u32 %v7357_v18, %v6020_v30 }
0x2672   : > { %v6276_v59 = vld [vmem:[#allocation2 + $0x238] sm:$0xf0]  ;;  %v9743_v52 = vpop.f32.mrf.mxu0 }
0x2673   : > { %4541 = vmatpush.bf16.msra.mxu1 %v6119_v9  ;;  %4554 = vmatpush.bf16.msrb.mxu2 %v6375_v12  ;;  %v7517_v3 = vld [vmem:[#allocation2 + $0x51c] sm:$0xf]  ;;  %v6279_v27 = vor.u32 %v7421_v47, %v6276_v59  ;;  %v4158_v47 = vperm.slane %v9716_v29, 1  ;;  %v7612_v59 = vld [vmem:[%s10003_s6 + $0x10] sm:$0xff] }
0x2674   : > { %4563 = vmatpush.bf16.msra.mxu0 %v6759_v21  ;;  %4576 = vmatpush.bf16.msra.mxu3 %v7015_v60  ;;  %v6660_v49 = vld [vmem:[#allocation2 + $0x538] sm:$0xf0] }
0x2675   : > { %4519 = vmatmul.bf16.vlgmr.msrb.gmra.mxu0 %v9694_v43  ;;  %4532 = vmatmul.bf16.vlgmr.msrb.gmra.mxu3 %v9696_v39  ;;  %v7581_v4 = vld [vmem:[#allocation2 + $0x71c] sm:$0xf]  ;;  %v6663_v6 = vor.u32 %v7517_v3, %v6660_v49  ;;  %v7620_v3 = vld [vmem:[%s10003_s6 + $0x50] sm:$0xff] }
0x2676   : > { %v6916_v46 = vld [vmem:[#allocation2 + $0x738] sm:$0xf0]  ;;  %v7632_v49 = vld [vmem:[%s10003_s6 + $0xb0] sm:$0xff] }
0x2677   : > { %4542 = vmatpush.bf16.msra.mxu1 %v6087_v44  ;;  %4555 = vmatpush.bf16.msrb.mxu2 %v6343_v48  ;;  %v6919_v7 = vor.u32 %v7581_v4, %v6916_v46  ;;  %v7617_v50 = vld [vmem:[%s10003_s6 + $0x38] sm:$0xff]  ;;  %v7640_v4 = vld [vmem:[%s10003_s6 + $0xf0] sm:$0xff]  ;;  %v4235_v46 = vadd.f32 %v9725_v54, %v4158_v47 }
0x2678   : > { %4564 = vmatpush.bf16.msra.mxu0 %v6727_v22  ;;  %4577 = vmatpush.bf16.msra.mxu3 %v6983_v1  ;;  %v7625_v8 = vld [vmem:[%s10003_s6 + $0x78] sm:$0xff]  ;;  %v9757_v21 = vpop.f32.mrf.mxu3  ;;  %v7614_v1 = vld [vmem:[%s10003_s6 + $0x20] sm:$0xff] }
0x2679   : > { %v7509_v61 = vld [vmem:[#allocation2 + $0x4dc] sm:$0xf] }
0x267a   : > { %v6628_v63 = vld [vmem:[#allocation2 + $0x4f8] sm:$0xf0]  ;;  %v4314_v32 = vpop.f32.mrf.mxu0 }
0x267b   : > { %4543 = vmatpush.bf16.msra.mxu1 %v6055_v41  ;;  %4556 = vmatpush.bf16.msrb.mxu2 %v6311_v23  ;;  %v7573_v0 = vld [vmem:[#allocation2 + $0x6dc] sm:$0xf]  ;;  %v6631_v9 = vor.u32 %v7509_v61, %v6628_v63  ;;  %v4222_v61 = vadd.f32 %v9727_v62, %v9723_v35  ;;  %v7636_v32 = vld [vmem:[%s10003_s6 + $0xd0] sm:$0xff] }
0x267c   : > { %4565 = vmatpush.bf16.msra.mxu0 %v6695_v31  ;;  %4578 = vmatpush.bf16.msra.mxu3 %v6951_v55  ;;  %v6884_v57 = vld [vmem:[#allocation2 + $0x6f8] sm:$0xf0] }
0x267d   : > { %v6887_v12 = vor.u32 %v7573_v0, %v6884_v57  ;;  %v7501_v60 = vld [vmem:[#allocation2 + $0x49c] sm:$0xf]  ;;  %v7638_v0 = vld [vmem:[%s10003_s6 + $0xe0] sm:$0xff] }
0x267e   : > { %v6596_v53 = vld [vmem:[#allocation2 + $0x4b8] sm:$0xf0] }
0x267f   : > { %4544 = vmatpush.bf16.msra.mxu1 %v6023_v5  ;;  %4557 = vmatpush.bf16.msrb.mxu2 %v6279_v27  ;;  %v7565_v40 = vld [vmem:[#allocation2 + $0x69c] sm:$0xf]  ;;  %v6599_v2 = vor.u32 %v7501_v60, %v6596_v53  ;;  %v7611_v5 = vld [vmem:[%s10003_s6 + $0x8] sm:$0xff]  ;;  %v4159_v53 = vperm.slane %v9716_v29, 2 }
0x2680   : > { %4566 = vmatpush.bf16.msra.mxu0 %v6663_v6  ;;  %4579 = vmatpush.bf16.msra.mxu3 %v6919_v7  ;;  %v6852_v51 = vld [vmem:[#allocation2 + $0x6b8] sm:$0xf0]  ;;  %v4327_v17 = vpop.f32.mrf.mxu3  ;;  %v7619_v27 = vld [vmem:[%s10003_s6 + $0x48] sm:$0xff]  ;;  %v4248_v7 = vadd.f32 %v9729_v10, %v4235_v46  ;;  %v7618_v10 = vld [vmem:[%s10003_s6 + $0x40] sm:$0xff] }
0x2681   : > { %v6855_v33 = vor.u32 %v7565_v40, %v6852_v51  ;;  %v7493_v44 = vld [vmem:[#allocation2 + $0x45c] sm:$0xf]  ;;  %v4160_v40 = vperm.slane %v9716_v29, 3  ;;  %v7628_v51 = vld [vmem:[%s10003_s6 + $0x90] sm:$0xff]  ;;  %v7634_v17 = vld [vmem:[%s10003_s6 + $0xc0] sm:$0xff] }
0x2682   : > { %4545 = vmatmul.bf16.vlgmr.msra.gmra.mxu1 %v9688_v15  ;;  %4558 = vmatmul.bf16.vlgmr.msrb.gmra.mxu2 %v9690_v42  ;;  %v6564_v48 = vld [vmem:[#allocation2 + $0x478] sm:$0xf0]  ;;  %v9767_v42 = vpop.f32.mrf.mxu1  ;;  %v4261_v54 = vadd.f32 %v9733_v14, %v4248_v7  ;;  %v7630_v14 = vld [vmem:[%s10003_s6 + $0xa0] sm:$0xff] }
0x2683   : > { %5110 = vmatpush.bf16.msrb.mxu1 %v7617_v50  ;;  %5123 = vmatpush.bf16.msra.mxu2 %v7625_v8  ;;  %v7557_v15 = vld [vmem:[#allocation2 + $0x65c] sm:$0xf]  ;;  %v6567_v16 = vor.u32 %v7493_v44, %v6564_v48  ;;  %v7610_v8 = vld [vmem:[%s10003_s6] sm:$0xff]  ;;  %v7627_v48 = vld [vmem:[%s10003_s6 + $0x88] sm:$0xff] }
0x2684   : > { %4567 = vmatpush.bf16.msra.mxu0 %v6631_v9  ;;  %4580 = vmatpush.bf16.msra.mxu3 %v6887_v12  ;;  %v6820_v56 = vld [vmem:[#allocation2 + $0x678] sm:$0xf0]  ;;  %v4274_v63 = vadd.f32 %v9737_v11, %v4261_v54  ;;  %v4717_v9 = vpack.c.bf16 %v4222_v61, %v4222_v61  ;;  %v7664_v54 = vld [vmem:[%s10003_s6 + $0x1b0] sm:$0xff] }
0x2685   : > { %v6823_v22 = vor.u32 %v7557_v15, %v6820_v56  ;;  %v7485_v19 = vld [vmem:[#allocation2 + $0x41c] sm:$0xf]  ;;  %v9781_v30 = vpop.f32.mrf.mxu2  ;;  %v7635_v15 = vld [vmem:[%s10003_s6 + $0xc8] sm:$0xff] }
0x2686   : > { %v6532_v24 = vld [vmem:[#allocation2 + $0x438] sm:$0xf0]  ;;  %v4718_v35 = vpack.c.bf16 %v4274_v63, %v4274_v63  ;;  %v7662_v63 = vld [vmem:[%s10003_s6 + $0x1a0] sm:$0xff] }
0x2687   : > { %5111 = vmatpush.bf16.msrb.mxu1 %v7616_v13  ;;  %5124 = vmatpush.bf16.msra.mxu2 %v7624_v20  ;;  %v7549_v34 = vld [vmem:[#allocation2 + $0x61c] sm:$0xf]  ;;  %v6535_v41 = vor.u32 %v7485_v19, %v6532_v24  ;;  %v7648_v13 = vld [vmem:[%s10003_s6 + $0x130] sm:$0xff] }
0x2688   : > { %4568 = vmatpush.bf16.msra.mxu0 %v6599_v2  ;;  %4581 = vmatpush.bf16.msra.mxu3 %v6855_v33  ;;  %v6788_v38 = vld [vmem:[#allocation2 + $0x638] sm:$0xf0]  ;;  %v7647_v2 = vld [vmem:[%s10003_s6 + $0x128] sm:$0xff]  ;;  %v7656_v33 = vld [vmem:[%s10003_s6 + $0x170] sm:$0xff] }
0x2689   : > { %v6791_v23 = vor.u32 %v7549_v34, %v6788_v38  ;;  %v7613_v28 = vld [vmem:[%s10003_s6 + $0x18] sm:$0xff]  ;;  %v7654_v38 = vld [vmem:[%s10003_s6 + $0x160] sm:$0xff] }
0x268a   : > { %v7621_v18 = vld [vmem:[%s10003_s6 + $0x58] sm:$0xff]  ;;  %v4340_v58 = vpop.f32.mrf.mxu1 }
0x268b   : > { %5112 = vmatpush.bf16.msrb.mxu1 %v7615_v36  ;;  %5125 = vmatpush.bf16.msra.mxu2 %v7623_v37  ;;  %v7633_v31 = vld [vmem:[%s10003_s6 + $0xb8] sm:$0xff]  ;;  %v4287_v36 = vadd.f32 %v9735_v25, %v4159_v53  ;;  %v4339_v37 = vadd.f32 %v9767_v42, %v4160_v40  ;;  %v7646_v25 = vld [vmem:[%s10003_s6 + $0x120] sm:$0xff]  ;;  %v7655_v42 = vld [vmem:[%s10003_s6 + $0x168] sm:$0xff] }
0x268c   : > { %4569 = vmatpush.bf16.msra.mxu0 %v6567_v16  ;;  %4582 = vmatpush.bf16.msra.mxu3 %v6823_v22  ;;  %v7641_v55 = vld [vmem:[%s10003_s6 + $0xf8] sm:$0xff]  ;;  %v7652_v58 = vld [vmem:[%s10003_s6 + $0x150] sm:$0xff]  ;;  %v7658_v53 = vld [vmem:[%s10003_s6 + $0x180] sm:$0xff] }
0x268d   : > { %v4353_v6 = vpop.f32.mrf.mxu2  ;;  %v7649_v57 = vld [vmem:[%s10003_s6 + $0x138] sm:$0xff]  ;;  %v4300_v16 = vadd.f32 %v9739_v26, %v4287_v36  ;;  %v4352_v22 = vadd.f32 %v9781_v30, %v4339_v37  ;;  %v7626_v26 = vld [vmem:[%s10003_s6 + $0x80] sm:$0xff]  ;;  %v4161_v30 = vperm.slane %v9716_v29, 4  ;;  %v7671_v37 = vld [vmem:[%s10003_s6 + $0x1e8] sm:$0xff] }
0x268e   : > { %v7629_v62 = vld [vmem:[%s10003_s6 + $0x98] sm:$0xff]  ;;  %v7650_v6 = vld [vmem:[%s10003_s6 + $0x140] sm:$0xff] }
0x268f   : > { %5113 = vmatpush.bf16.msrb.mxu1 %v7614_v1  ;;  %5126 = vmatpush.bf16.msra.mxu2 %v7622_v45  ;;  %v7637_v11 = vld [vmem:[%s10003_s6 + $0xd8] sm:$0xff]  ;;  %v4313_v1 = vadd.f32 %v9743_v52, %v4300_v16 }
0x2690   : > { %4570 = vmatpush.bf16.msra.mxu0 %v6535_v41  ;;  %4583 = vmatpush.bf16.msra.mxu3 %v6791_v23  ;;  %v7657_v20 = vld [vmem:[%s10003_s6 + $0x178] sm:$0xff] }
0x2691   : > { %v4326_v19 = vadd.f32 %v9757_v21, %v4313_v1  ;;  %v7645_v52 = vld [vmem:[%s10003_s6 + $0x118] sm:$0xff]  ;;  %v7644_v21 = vld [vmem:[%s10003_s6 + $0x110] sm:$0xff]  ;;  %v7667_v1 = vld [vmem:[%s10003_s6 + $0x1c8] sm:$0xff] }
0x2692   : > { %v4364_v50 = vpop.f32.mrf.mxu0  ;;  %v7665_v7 = vld [vmem:[%s10003_s6 + $0x1b8] sm:$0xff] }
0x2693   : > { %5114 = vmatpush.bf16.msrb.mxu1 %v7613_v28  ;;  %5127 = vmatpush.bf16.msra.mxu2 %v7621_v18  ;;  %v4365_v45 = vadd.f32 %v4364_v50, %v4352_v22  ;;  %v4719_v23 = vpack.c.bf16 %v4326_v19, %v4326_v19  ;;  %v7653_v18 = vld [vmem:[%s10003_s6 + $0x158] sm:$0xff]  ;;  %v4163_v22 = vperm.slane %v9716_v29, 6 }
0x2694   : > { %5136 = vmatpush.bf16.msrb.mxu0 %v7633_v31  ;;  %5149 = vmatpush.bf16.msrb.mxu3 %v7641_v55  ;;  %v7643_v55 = vld [vmem:[%s10003_s6 + $0x108] sm:$0xff]  ;;  %v7669_v16 = vld [vmem:[%s10003_s6 + $0x1d8] sm:$0xff] }
0x2695   : > { %4571 = vmatmul.bf16.vlgmr.msra.gmra.mxu0 %v9694_v43  ;;  %4584 = vmatmul.bf16.vlgmr.msra.gmra.mxu3 %v9696_v39  ;;  %v7631_v43 = vld [vmem:[%s10003_s6 + $0xa8] sm:$0xff] }
0x2696   : > { %v7639_v39 = vld [vmem:[%s10003_s6 + $0xe8] sm:$0xff] }
0x2697   : > { %5115 = vmatpush.bf16.msrb.mxu1 %v7612_v59  ;;  %5128 = vmatpush.bf16.msra.mxu2 %v7620_v3  ;;  %v7642_v3 = vld [vmem:[%s10003_s6 + $0x100] sm:$0xff] }
0x2698   : > { %5137 = vmatpush.bf16.msrb.mxu0 %v7632_v49  ;;  %5150 = vmatpush.bf16.msrb.mxu3 %v7640_v4  ;;  %v4377_v12 = vpop.f32.mrf.mxu3  ;;  %v7651_v49 = vld [vmem:[%s10003_s6 + $0x148] sm:$0xff] }
0x2699   : > { %v4378_v24 = vadd.f32 %v4377_v12, %v4365_v45 }
0x269a   : > { %v4366_v60 = vpop.f32.mrf.mxu0 }
0x269b   : > { %5116 = vmatpush.bf16.msrb.mxu1 %v7611_v5  ;;  %5129 = vmatpush.bf16.msra.mxu2 %v7619_v27  ;;  %v4720_v28 = vpack.c.bf16 %v4378_v24, %v4378_v24  ;;  %v7666_v24 = vld [vmem:[%s10003_s6 + $0x1c0] sm:$0xff] }
0x269c   : > { %5138 = vmatpush.bf16.msrb.mxu0 %v7631_v43  ;;  %5151 = vmatpush.bf16.msrb.mxu3 %v7639_v39 }
0x269f   : > { %5117 = vmatpush.bf16.msrb.mxu1 %v7610_v8  ;;  %5130 = vmatpush.bf16.msra.mxu2 %v7618_v10  ;;  %v4390_v44 = vpop.f32.mrf.mxu1  ;;  %v7663_v10 = vld [vmem:[%s10003_s6 + $0x1a8] sm:$0xff] }
0x26a0   : > { %5139 = vmatpush.bf16.msrb.mxu0 %v7630_v14  ;;  %5152 = vmatpush.bf16.msrb.mxu3 %v7638_v0  ;;  %v4379_v56 = vpop.f32.mrf.mxu3  ;;  %v4391_v59 = vadd.f32 %v4390_v44, %v4161_v30  ;;  %v7661_v0 = vld [vmem:[%s10003_s6 + $0x198] sm:$0xff] }
0x26a2   : > { %5118 = vmatmul.bf16.vlgmr.msrb.gmra.mxu1 %v4717_v9  ;;  %5131 = vmatmul.bf16.vlgmr.msra.gmra.mxu2 %v4718_v35  ;;  %v7660_v35 = vld [vmem:[%s10003_s6 + $0x190] sm:$0xff] }
0x26a3   : > { %5162 = vmatpush.bf16.msra.mxu1 %v7649_v57  ;;  %5175 = vmatpush.bf16.msrb.mxu2 %v7657_v20  ;;  %v4162_v57 = vperm.slane %v9716_v29, 5 }
0x26a4   : > { %5140 = vmatpush.bf16.msrb.mxu0 %v7629_v62  ;;  %5153 = vmatpush.bf16.msrb.mxu3 %v7637_v11  ;;  %v7659_v11 = vld [vmem:[%s10003_s6 + $0x188] sm:$0xff] }
0x26a5   : > { %v4403_v34 = vpop.f32.mrf.mxu2 }
0x26a6   : > { %v4404_v4 = vadd.f32 %v4403_v34, %v4391_v59 }
0x26a7   : > { %5163 = vmatpush.bf16.msra.mxu1 %v7648_v13  ;;  %5176 = vmatpush.bf16.msrb.mxu2 %v7656_v33  ;;  %v4392_v41 = vpop.f32.mrf.mxu1  ;;  %v7672_v33 = vld [vmem:[%s10003_s6 + $0x1f0] sm:$0xff] }
0x26a8   : > { %5141 = vmatpush.bf16.msrb.mxu0 %v7628_v51  ;;  %5154 = vmatpush.bf16.msrb.mxu3 %v7636_v32  ;;  %v7673_v51 = vld [vmem:[%s10003_s6 + $0x1f8] sm:$0xff] }
0x26ab   : > { %5164 = vmatpush.bf16.msra.mxu1 %v7647_v2  ;;  %5177 = vmatpush.bf16.msrb.mxu2 %v7655_v42  ;;  %v7668_v42 = vld [vmem:[%s10003_s6 + $0x1d0] sm:$0xff] }
0x26ac   : > { %5142 = vmatpush.bf16.msrb.mxu0 %v7627_v48  ;;  %5155 = vmatpush.bf16.msrb.mxu3 %v7635_v15  ;;  %v7670_v15 = vld [vmem:[%s10003_s6 + $0x1e0] sm:$0xff] }
0x26ad   : > { %v4405_v31 = vpop.f32.mrf.mxu2 }
0x26af   : > { %5165 = vmatpush.bf16.msra.mxu1 %v7646_v25  ;;  %5178 = vmatpush.bf16.msrb.mxu2 %v7654_v38 }
0x26b0   : > { %5143 = vmatpush.bf16.msrb.mxu0 %v7626_v26  ;;  %5156 = vmatpush.bf16.msrb.mxu3 %v7634_v17 }
0x26b2   : > { %v4416_v47 = vpop.f32.mrf.mxu0 }
0x26b3   : > { %5166 = vmatpush.bf16.msra.mxu1 %v7645_v52  ;;  %5144 = vmatmul.bf16.vlgmr.msrb.gmra.mxu0 %v4719_v23  ;;  %v4417_v46 = vadd.f32 %v4416_v47, %v4404_v4 }
0x26b4   : > { %5157 = vmatmul.bf16.vlgmr.msrb.gmra.mxu3 %v4720_v28  ;;  %5179 = vmatpush.bf16.msrb.mxu2 %v7653_v18  ;;  %v7844_v18 = vld [vmem:[#allocation5 + $0x6] sm:$0xff] }
0x26b5   : > { %5188 = vmatpush.bf16.msra.mxu0 %v7665_v7  ;;  %5201 = vmatpush.bf16.msra.mxu3 %v7673_v51  ;;  %v4164_v30 = vperm.slane %v7844_v18, 7 }
0x26b7   : > { %5167 = vmatpush.bf16.msra.mxu1 %v7644_v21 }
0x26b8   : > { %5180 = vmatpush.bf16.msrb.mxu2 %v7652_v58  ;;  %v4429_v5 = vpop.f32.mrf.mxu3 }
0x26b9   : > { %v4430_v27 = vadd.f32 %v4429_v5, %v4417_v46  ;;  %5189 = vmatpush.bf16.msra.mxu0 %v7664_v54  ;;  %5202 = vmatpush.bf16.msra.mxu3 %v7672_v33 }
0x26ba   : > { %v4418_v43 = vpop.f32.mrf.mxu0 }
0x26bb   : > { %5168 = vmatpush.bf16.msra.mxu1 %v7643_v55  ;;  %v4721_v39 = vpack.c.bf16 %v4430_v27, %v4430_v27 }
0x26bc   : > { %5181 = vmatpush.bf16.msrb.mxu2 %v7651_v49 }
0x26bd   : > { %5190 = vmatpush.bf16.msra.mxu0 %v7663_v10  ;;  %5203 = vmatpush.bf16.msra.mxu3 %v7671_v37 }
0x26bf   : > { %5169 = vmatpush.bf16.msra.mxu1 %v7642_v3  ;;  %v4442_v50 = vpop.f32.mrf.mxu1 }
0x26c0   : > { %5182 = vmatpush.bf16.msrb.mxu2 %v7650_v6  ;;  %v4431_v8 = vpop.f32.mrf.mxu3  ;;  %v4443_v12 = vadd.f32 %v4442_v50, %v4162_v57  ;;  %v4725_v6 = vld [vmem:[#allocation5 + $0xe] sm:$0x1] }
0x26c1   : > { %5191 = vmatpush.bf16.msra.mxu0 %v7662_v63  ;;  %5204 = vmatpush.bf16.msra.mxu3 %v7670_v15 }
0x26c2   : > { %5170 = vmatmul.bf16.vlgmr.msra.gmra.mxu1 %v4721_v39 }
0x26c5   : > { %v4455_v61 = vpop.f32.mrf.mxu2  ;;  %5192 = vmatpush.bf16.msra.mxu0 %v7661_v0  ;;  %5205 = vmatpush.bf16.msra.mxu3 %v7669_v16 }
0x26c6   : > { %v4456_v13 = vadd.f32 %v4455_v61, %v4443_v12 }
0x26c7   : > { %v4444_v14 = vpop.f32.mrf.mxu1 }
0x26c9   : > { %5193 = vmatpush.bf16.msra.mxu0 %v7660_v35  ;;  %5206 = vmatpush.bf16.msra.mxu3 %v7668_v42 }
0x26cd   : > { %v4457_v9 = vpop.f32.mrf.mxu2  ;;  %5194 = vmatpush.bf16.msra.mxu0 %v7659_v11  ;;  %5207 = vmatpush.bf16.msra.mxu3 %v7667_v1 }
0x26d1   : > { %5195 = vmatpush.bf16.msra.mxu0 %v7658_v53  ;;  %5208 = vmatpush.bf16.msra.mxu3 %v7666_v24 }
0x26d2   : > { %v4468_v62 = vpop.f32.mrf.mxu0 }
0x26d3   : > { %v4469_v20 = vadd.f32 %v4468_v62, %v4456_v13 }
0x26d8   : > { %v4481_v60 = vpop.f32.mrf.mxu3 }
0x26d9   : > { %v4482_v40 = vadd.f32 %v4481_v60, %v4469_v20 }
0x26da   : > { %v4470_v32 = vpop.f32.mrf.mxu0 }
0x26db   : > { %v4722_v2 = vpack.c.bf16 %v4482_v40, %v4482_v40 }
0x26dd   : > { %5183 = vmatmul.bf16.vlgmr.msrb.gmra.mxu2 %v4722_v2 }
0x26df   : > { %v4494_v36 = vpop.f32.mrf.mxu1 }
0x26e0   : > { %v4483_v44 = vpop.f32.mrf.mxu3  ;;  %v4495_v26 = vadd.f32 %v4494_v36, %v4163_v22 }
0x26e5   : > { %v4507_v48 = vpop.f32.mrf.mxu2 }
0x26e6   : > { %v4508_v17 = vadd.f32 %v4507_v48, %v4495_v26 }
0x26e7   : > { %v4496_v56 = vpop.f32.mrf.mxu1 }
0x26ed   : > { %v4509_v25 = vpop.f32.mrf.mxu2 }
0x26f2   : > { %v4520_v45 = vpop.f32.mrf.mxu0 }
0x26f3   : > { %v4521_v19 = vadd.f32 %v4520_v45, %v4508_v17 }
0x26f8   : > { %v4533_v29 = vpop.f32.mrf.mxu3 }
0x26f9   : > { %v4534_v34 = vadd.f32 %v4533_v29, %v4521_v19 }
0x26fa   : > { %v4522_v52 = vpop.f32.mrf.mxu0 }
0x26fb   : > { %v4723_v38 = vpack.c.bf16 %v4534_v34, %v4534_v34 }
0x26fd   : > { %5196 = vmatmul.bf16.vlgmr.msra.gmra.mxu0 %v4723_v38 }
0x26ff   : > { %v4546_v41 = vpop.f32.mrf.mxu1 }
0x2700   : > { %v4535_v23 = vpop.f32.mrf.mxu3  ;;  %v4547_v58 = vadd.f32 %v4546_v41, %v4164_v30 }
0x2705   : > { %v4559_v28 = vpop.f32.mrf.mxu2 }
0x2706   : > { %v4560_v47 = vadd.f32 %v4559_v28, %v4547_v58 }
0x2707   : > { %v4548_v21 = vpop.f32.mrf.mxu1 }
0x270d   : > { %v4561_v31 = vpop.f32.mrf.mxu2 }
0x2712   : > { %v4572_v55 = vpop.f32.mrf.mxu0 }
0x2713   : > { %v4573_v59 = vadd.f32 %v4572_v55, %v4560_v47 }
0x2718   : > { %v4585_v3 = vpop.f32.mrf.mxu3 }
0x2719   : > { %v4586_v49 = vadd.f32 %v4585_v3, %v4573_v59 }
0x271a   : > { %v4574_v4 = vpop.f32.mrf.mxu0 }
0x271b   : > { %v4724_v46 = vpack.c.bf16 %v4586_v49, %v4586_v49 }
0x271d   : > { %5209 = vmatmul.bf16.vlgmr.msra.gmra.mxu3 %v4724_v46 }
0x271f   : > { %v5119_v5 = vpop.f32.mrf.mxu1 }
0x2720   : > { %v4587_v27 = vpop.f32.mrf.mxu3  ;;  %v5120_v7 = vadd.f32 %v5119_v5, %v4725_v6 }
0x2725   : > { %v5132_v43 = vpop.f32.mrf.mxu2 }
0x2726   : > { %v5133_v39 = vadd.f32 %v5132_v43, %v5120_v7 }
0x2727   : > { %v5121_v54 = vpop.f32.mrf.mxu1 }
0x272d   : > { %v5134_v50 = vpop.f32.mrf.mxu2 }
0x2730   : > { %v5145_v8 = vpop.f32.mrf.mxu0 }
0x2731   : > { %v5146_v10 = vadd.f32 %v5145_v8, %v5133_v39 }
0x2737   : > { %v5158_v61 = vpop.f32.mrf.mxu3 }
0x2738   : > { %v5159_v63 = vadd.f32 %v5158_v61, %v5146_v10  ;;  %v5147_v14 = vpop.f32.mrf.mxu0 }
0x273f   : > { %v5160_v0 = vpop.f32.mrf.mxu3  ;;  %v5171_v57 = vpop.f32.mrf.mxu1 }
0x2740   : > { %v5172_v9 = vadd.f32 %v5171_v57, %v5159_v63 }
0x2747   : > { %v5173_v35 = vpop.f32.mrf.mxu1 }
0x2760   : > { %v5184_v62 = vpop.f32.mrf.mxu2 }
0x2761   : > { %v5185_v20 = vadd.f32 %v5184_v62, %v5172_v9 }
0x2768   : > { %v5186_v11 = vpop.f32.mrf.mxu2 }
0x277a   : > { %v5197_v12 = vpop.f32.mrf.mxu0 }
0x277b   : > { %v5198_v60 = vadd.f32 %v5197_v12, %v5185_v20 }
0x2782   : > { %v5199_v13 = vpop.f32.mrf.mxu0 }
0x27a0   : > { %v5210_v53 = vpop.f32.mrf.mxu3 }
0x27a1   : > { %v5211_v40 = vadd.f32 %v5210_v53, %v5198_v60 }
0x27a3   : > { %5215 = vst.msk [vmem:[%s327_s25] sm:$0x1] %vm5214_vm11, %v5211_v40 }
0x27a4   : > { %7932 = shalt.err (!%p7929_p8)
}
0x27a5   : > { %7682 = dma.vmem_to_hbm [thread:$0]  (%p8126_p5), %s5228_s17, 16, %s5230_s18, %s5217_s20  }
0x27a8   : > { %v5212_v51 = vpop.f32.mrf.mxu3 }
0x27a9 PF: > { %p7699_p9 = scmp.ge.s32.totalorder %s7975_s30, 2  ;;  %s5241_s22 = sand.u32 1, %s7963_s27  }
0x27aa   : > { %s5242_s10 = scalar_lea.sflag [#allocation4], %s5241_s22 }
0x27ab   : > { %p7692_p10 = pnand %p7699_p9, %p8130_p6 }
0x27ad   : > { %p7693_p11 = pneg %p7692_p10 }
0x27af   : > { %7958 = dma.done.wait (%p7693_p11), %s5242_s10, 16  }
0x27b0   : > { %7960 = vsyncadd (%p7693_p11), %s5242_s10, 4294967280  ;;  %p20_p12 = scmp.ge.s32.totalorder %s8113_s11, 4   ;;  %s10234_s27 = smov %s7967_s28 }
0x27b1   : > { %s10235_s28 = smov %s7971_s29  ;;  %s10236_s29 = smov %s8124_s14 }
0x27b2   : > { %s10237_s30 = smov %s8113_s11  ;;  %22 = sbr.rel (!%p20_p12) target bundleno = 5 (0x5), region = 96 }
0x27b7   :  { %5247 = vsyncpa [#allocation3], 1 }
0x27b8   :  { %5249 = vsyncpa [#allocation3 + $0x1], 1 }
0x27b9   :  { %5250 = vsyncpa [#allocation6], 1 }
0x27ba   :  { %5251 = vsyncpa [#allocation4], 1 }
0x27bb   :  { %5253 = vsyncpa [#allocation4 + $0x1], 1 }

</bundles_post_ra>
